<compile_context>
chip_gen: v7x
topology: tpu7x:2x2x1
jax: 0.10.0
libtpu: 0.0.40
codegen_flags: <defaults>
</compile_context>

<pallas_src>
import functools

import jax
import jax.numpy as jnp
from jax.experimental import pallas as pl
from jax.experimental.pallas import tpu as pltpu


def _round_up(x, m):
    return (x + m - 1) // m * m


# ---------------------------------------------------------------------------
# Fused forward kernel (whole-array VMEM blocks; all shapes here are small).
# ---------------------------------------------------------------------------

def fused_gcn_forward_kernel(
    x_ref,            # [N_pad, F_PAD]   bf16  node features (zero padded)
    adj_ref,          # [N_pad, N_pad]   bf16  D^-1/2 (A+I) D^-1/2 (zero padded)
    mask_ref,         # [B_pad, N_pad]   bf16  graph-membership one-hot (mean pool)
    maskT_ref,        # [N_pad, BL_pad]  bf16  transposed one-hot (max pool)
    inv_cnt_ref,      # [B_pad, 1]       f32   1 / nodes-per-graph (precomputed, exact)
    w_in_ref, b_in_ref,          # combined lin2|lin1:  [F_PAD, D_PAD] bf16, [1, D_PAD] f32
    w_c1_ref, b_c1_ref,          # GCNConv1:            [D_PAD, D_PAD] bf16, [1, D_PAD] f32
    w_c2_ref, b_c2_ref,          # GCNConv2:            [D_PAD, D2_PAD] bf16, [1, D2_PAD] f32
    w_c3_ref, b_c3_ref,          # GCNConv3:            [D2_PAD, D3_PAD] bf16, [1, D3_PAD] f32
    w_fc1_mean_ref, w_fc1_max_ref, b_fc1_ref,   # fc1(+BN folded), split halves
    w_fc2_ref, b_fc2_ref,        # fc2:                 [1024, OUT_PAD] bf16, [1, OUT_PAD] f32
    out_ref,          # [B_pad, OUT_PAD] f32   softmax probabilities (padded lanes 0)
    mx_ref,           # scratch [B_pad, D3_PAD] bf16   per-graph max-pool rows
    *, output_dim,
):
    f32, bf16 = jnp.float32, jnp.bfloat16
    adj = adj_ref[...]

    # Input projection: one padded matmul whose output is already cat([x2, x1]).
    h = jnp.dot(x_ref[...], w_in_ref[...], preferred_element_type=f32)
    h = jnp.maximum(h + b_in_ref[...], 0.0).astype(bf16)        # h stays bf16-resident

    # GCN layers 1 & 2 (padded in/out widths equal, 128): transform then aggregate.
    for w_ref, b_ref in ((w_c1_ref, b_c1_ref), (w_c2_ref, b_c2_ref)):
        xw = jnp.dot(h, w_ref[...], preferred_element_type=f32).astype(bf16)
        agg = jnp.dot(adj, xw, preferred_element_type=f32)
        h = jnp.maximum(agg + b_ref[...], 0.0).astype(bf16)

    # GCN layer 3 (128 -> 256 lanes): aggregate FIRST so the dominant O(N^2)
    # matmul stays 128 lanes wide (same result by associativity, ~half the MXU work).
    ah = jnp.dot(adj, h, preferred_element_type=f32).astype(bf16)
    h = jnp.dot(ah, w_c3_ref[...], preferred_element_type=f32)
    h = jnp.maximum(h + b_c3_ref[...], 0.0).astype(bf16)        # [N_pad, D3_PAD]

    # Global mean pool on the MXU; exact precomputed 1/count scaling.
    mean = jnp.dot(mask_ref[...], h, preferred_element_type=f32) * inv_cnt_ref[...]
    mean = mean.astype(bf16)

    # Global max pool: per-graph masked max, no [B, N, D] broadcast cube.
    # h >= 0 after ReLU, so (h * onehot_column).max(axis=0) is exactly the masked
    # max for non-empty graphs and 0 for empty / padded graphs.
    b_pad = out_ref.shape[0]
    for g in range(b_pad):                                       # static unroll (B is small)
        mcol = maskT_ref[:, g:g + 1]                             # [N_pad, 1] static view
        mx_ref[g:g + 1, :] = jnp.max(h * mcol, axis=0, keepdims=True)

    # Head: fc1 (+folded BN, split mean/max halves) -> relu -> dropout(identity) -> fc2.
    # TODO(synk): training-mode dropout (p=0.2) omitted; eval-mode dropout is identity.
    h1 = jnp.dot(mean, w_fc1_mean_ref[...], preferred_element_type=f32)
    h1 = h1 + jnp.dot(mx_ref[...], w_fc1_max_ref[...], preferred_element_type=f32)
    h1 = jnp.maximum(h1 + b_fc1_ref[...], 0.0).astype(bf16)
    logits = jnp.dot(h1, w_fc2_ref[...], preferred_element_type=f32) + b_fc2_ref[...]

    # Mask padded logit lanes, then exact softmax (no approx reciprocal on outputs).
    col = jax.lax.broadcasted_iota(jnp.int32, logits.shape, 1)
    logits = jnp.where(col < output_dim, logits, jnp.float32(-1e30))
    m = jnp.max(logits, axis=1, keepdims=True)
    e = jnp.exp(logits - m)
    out_ref[...] = e / jnp.sum(e, axis=1, keepdims=True)


# ---------------------------------------------------------------------------
# Glue: normalized adjacency and parameter init / padding.
# ---------------------------------------------------------------------------

def normalized_adjacency(edge_index, num_nodes):
    # TODO(synk): for large graphs build this sparsely (segment-sum) and row-tile the
    # aggregation inside the kernel; the dense scatter here is O(N^2) HBM / FLOPs.
    src, dst = edge_index[0], edge_index[1]
    adj = jnp.zeros((num_nodes, num_nodes), jnp.float32)
    adj = adj.at[dst, src].add(1.0)                 # duplicate edges accumulate (PyG semantics)
    diag = jnp.arange(num_nodes)
    adj = adj.at[diag, diag].add(1.0)               # add self loops
    deg = jnp.sum(adj, axis=1)
    dinv = jax.lax.rsqrt(jnp.maximum(deg, 1e-12))
    return adj * dinv[:, None] * dinv[None, :]


def init_linear(key, fan_in, fan_out):
    kw, kb = jax.random.split(key)
    scale = 1.0 / jnp.sqrt(jnp.float32(fan_in))
    w = jax.random.normal(kw, (fan_in, fan_out), jnp.float32) * scale
    b = jax.random.normal(kb, (1, fan_out), jnp.float32) * 0.01
    return w, b


def _pad2(a, rows, cols, dtype):
    out = jnp.zeros((rows, cols), jnp.float32)
    out = out.at[:a.shape[0], :a.shape[1]].set(a)
    return out.astype(dtype)


# ---------------------------------------------------------------------------
# Model
# ---------------------------------------------------------------------------

class GCNModelPallas:
    def __init__(self, key, num_features=149, output_dim=2, aa_num=21,
                 hidden_dim=32):
        assert num_features > 100
        self.num_features = num_features
        self.aa_num = aa_num
        self.hidden_dim = hidden_dim
        self.output_dim = output_dim

        d = hidden_dim + aa_num            # 53
        d2, d3 = 2 * d, 4 * d              # 106, 212
        self.d, self.d2, self.d3 = d, d2, d3

        # lane-dense padded feature widths (multiples of 128)
        self.F_PAD = _round_up(num_features, 128)
        self.D_PAD = _round_up(d, 128)
        self.D2_PAD = _round_up(d2, 128)
        self.D3_PAD = _round_up(d3, 128)
        self.OUT_PAD = _round_up(output_dim, 128)

        keys = jax.random.split(key, 8)
        w_lin1, b_lin1 = init_linear(keys[0], num_features - aa_num, hidden_dim)
        w_lin2, b_lin2 = init_linear(keys[1], aa_num, aa_num)
        w_c1, b_c1 = init_linear(keys[2], d, d)
        w_c2, b_c2 = init_linear(keys[3], d, d2)
        w_c3, b_c3 = init_linear(keys[4], d2, d3)
        w_fc1, b_fc1 = init_linear(keys[5], 2 * d3, 1024)
        w_fc2, b_fc2 = init_linear(keys[6], 1024, output_dim)

        kbn = jax.random.split(keys[7], 4)
        bn_gamma = 1.0 + 0.1 * jax.random.normal(kbn[0], (1, 1024), jnp.float32)
        bn_beta = 0.1 * jax.random.normal(kbn[1], (1, 1024), jnp.float32)
        bn_mean = 0.1 * jax.random.normal(kbn[2], (1, 1024), jnp.float32)
        bn_var = jnp.abs(1.0 + 0.1 * jax.random.normal(kbn[3], (1, 1024), jnp.float32))

        bf16, f32 = jnp.bfloat16, jnp.float32

        # Combined input projection: x @ w_in == cat([relu-input of lin2, lin1]).
        w_in = jnp.zeros((self.F_PAD, self.D_PAD), f32)
        w_in = w_in.at[:aa_num, :aa_num].set(w_lin2)                   # x[:, :21] -> cols [0,21)
        w_in = w_in.at[aa_num:num_features, aa_num:d].set(w_lin1)      # x[:, 21:] -> cols [21,53)
        b_in = jnp.zeros((1, self.D_PAD), f32)
        b_in = b_in.at[:, :aa_num].set(b_lin2)
        b_in = b_in.at[:, aa_num:d].set(b_lin1)
        self.w_in, self.b_in = w_in.astype(bf16), b_in

        self.w_c1 = _pad2(w_c1, self.D_PAD, self.D_PAD, bf16)
        self.b_c1 = _pad2(b_c1, 1, self.D_PAD, f32)
        self.w_c2 = _pad2(w_c2, self.D_PAD, self.D2_PAD, bf16)
        self.b_c2 = _pad2(b_c2, 1, self.D2_PAD, f32)
        self.w_c3 = _pad2(w_c3, self.D2_PAD, self.D3_PAD, bf16)
        self.b_c3 = _pad2(b_c3, 1, self.D3_PAD, f32)

        # Fold eval-mode BatchNorm1d into fc1 (identical numerics), then split the
        # weight into its mean-pool half and max-pool half (no in-kernel concat).
        s = bn_gamma * jax.lax.rsqrt(bn_var + 1e-5)            # [1, 1024]
        w_fc1_f = w_fc1 * s                                    # [2*d3, 1024]
        b_fc1_f = (b_fc1 - bn_mean) * s + bn_beta              # [1, 1024]
        self.w_fc1_mean = _pad2(w_fc1_f[:d3, :], self.D3_PAD, 1024, bf16)
        self.w_fc1_max = _pad2(w_fc1_f[d3:, :], self.D3_PAD, 1024, bf16)
        self.b_fc1 = b_fc1_f

        self.w_fc2 = _pad2(w_fc2, 1024, self.OUT_PAD, bf16)
        self.b_fc2 = _pad2(b_fc2, 1, self.OUT_PAD, f32)

    @staticmethod
    def _pick_vmem_limit(required_bytes):
        # ~3/4 of physical VMEM: ≈48 MiB on v7x (64 MiB), ≈96 MiB on v5e/v6e (128 MiB).
        try:
            phys = int(getattr(pltpu.get_tpu_info(), "vmem_capacity_bytes",
                               128 * 1024 * 1024))
        except Exception:
            phys = 128 * 1024 * 1024
        cap = (phys * 3) // 4
        return int(min(max(int(required_bytes), 16 * 1024 * 1024), cap))

    @functools.partial(jax.jit, static_argnums=(0, 4))
    def forward(self, x, edge_index, batch, num_graphs):
        n = x.shape[0]
        n_pad = _round_up(max(n, 1), 128)          # lane-dense node dim (adj / mask lanes)
        b_pad = _round_up(max(num_graphs, 1), 16)  # sublane-friendly graph dim
        bl_pad = _round_up(b_pad, 128)             # lane-dense width of maskT
        f32, bf16 = jnp.float32, jnp.bfloat16

        adj = normalized_adjacency(edge_index, n)
        adj_pad = jnp.zeros((n_pad, n_pad), f32).at[:n, :n].set(adj).astype(bf16)
        x_pad = (jnp.zeros((n_pad, self.F_PAD), f32)
                 .at[:n, :self.num_features].set(x).astype(bf16))

        batch_pad = jnp.full((n_pad,), -1, jnp.int32).at[:n].set(batch.astype(jnp.int32))
        mask_f32 = (batch_pad[None, :] ==
                    jnp.arange(b_pad, dtype=jnp.int32)[:, None]).astype(f32)
        counts = jnp.sum(mask_f32, axis=1, keepdims=True)             # [b_pad, 1]
        inv_cnt = 1.0 / jnp.maximum(counts, 1.0)                      # exact f32
        mask = mask_f32.astype(bf16)                                  # mean pool operand
        maskT = (jnp.zeros((n_pad, bl_pad), bf16)
                 .at[:, :b_pad].set(mask_f32.T.astype(bf16)))         # max pool operand

        kernel = functools.partial(fused_gcn_forward_kernel,
                                   output_dim=self.output_dim)
        args = (x_pad, adj_pad, mask, maskT, inv_cnt,
                self.w_in, self.b_in,
                self.w_c1, self.b_c1,
                self.w_c2, self.b_c2,
                self.w_c3, self.b_c3,
                self.w_fc1_mean, self.w_fc1_max, self.b_fc1,
                self.w_fc2, self.b_fc2)

        # VMEM budget sized from actual operands (adj bf16 = 2*N_pad^2 dominates at large N).
        operand_bytes = sum(int(a.size) * a.dtype.itemsize for a in args)
        act_bytes = n_pad * self.D3_PAD * (2 + 4) * 2    # bf16 h + f32 temps, 2x headroom
        required = 2 * operand_bytes + act_bytes + (1 << 20)
        vmem_limit = self._pick_vmem_limit(required)

        # TODO(synk): once 2*n_pad^2 bytes approaches the VMEM cap, split into per-layer
        # pallas_calls with a ("parallel", "arbitrary") node-row grid so the adjacency is
        # tiled / double-buffered and work is sharded across v7x's two TensorCores.
        out_pad = pl.pallas_call(
            kernel,
            out_shape=jax.ShapeDtypeStruct((b_pad, self.OUT_PAD), jnp.float32),
            in_specs=[pl.BlockSpec(memory_space=pltpu.MemorySpace.VMEM)] * len(args),
            out_specs=pl.BlockSpec(memory_space=pltpu.MemorySpace.VMEM),
            scratch_shapes=[pltpu.VMEM((b_pad, self.D3_PAD), bf16)],
            compiler_params=pltpu.CompilerParams(vmem_limit_bytes=vmem_limit),
        )(*args)

        return out_pad[:num_graphs, :self.output_dim]


# ---------------------------------------------------------------------------
# Example
# ---------------------------------------------------------------------------

if __name__ == "__main__":
    key = jax.random.PRNGKey(0)
    k_model, k_x = jax.random.split(key)

    N = 16                    # total nodes
    NUM_GRAPHS = 2            # batch of 2 graphs (8 nodes each)
    NUM_FEATURES = 149        # > 100 -> split branch; 149 - 21 = 128 into lin1

    model = GCNModelPallas(k_model, num_features=NUM_FEATURES, output_dim=2,
                           aa_num=21, hidden_dim=32)

    x = jax.random.normal(k_x, (N, NUM_FEATURES), jnp.float32)

    # ring graph inside each of the two 8-node graphs, edges in both directions
    def ring_edges(offset, n):
        idx = jnp.arange(n) + offset
        nxt = (jnp.arange(n) + 1) % n + offset
        src = jnp.concatenate([idx, nxt])
        dst = jnp.concatenate([nxt, idx])
        return jnp.stack([src, dst])

    edge_index = jnp.concatenate([ring_edges(0, 8), ring_edges(8, 8)], axis=1)
    batch = jnp.concatenate([jnp.zeros(8, jnp.int32), jnp.ones(8, jnp.int32)])

    out = model.forward(x, edge_index, batch, NUM_GRAPHS)
    out = jax.block_until_ready(out)

    assert out.shape == (NUM_GRAPHS, 2)
    assert bool(jnp.all(jnp.isfinite(out)))
    assert bool(jnp.all(out >= 0.0))
    # exact softmax division -> rows sum to 1 up to f32 rounding
    assert bool(jnp.allclose(jnp.sum(out, axis=1), 1.0, atol=1e-3))
    print("KERNEL_OK")
</pallas_src>

<mosaic_0001>
module attributes {stable_mosaic.version = 11 : i64} {
  func.func private @main(%arg0: i32) attributes {dimension_semantics = [#tpu.dimension_semantics<core_parallel>], iteration_bounds = array<i64: 2>, tpu.core_type = #tpu.core_type<sc_scalar_subcore>, window_params = []} {
    return
  }
}

module attributes {stable_mosaic.version = 11 : i64} {
  func.func private @main(%arg0: i32) attributes {dimension_semantics = [#tpu.dimension_semantics<core_parallel>], iteration_bounds = array<i64: 2>, tpu.core_type = #tpu.core_type<sc_scalar_subcore>, window_params = []} {
    return
  }
}

module attributes {stable_mosaic.version = 11 : i64} {
  func.func @fused_gcn_forward_kernel(%arg0: memref<128x256xbf16, #tpu.memory_space<vmem>>, %arg1: memref<128x128xbf16, #tpu.memory_space<vmem>>, %arg2: memref<16x128xbf16, #tpu.memory_space<vmem>>, %arg3: memref<128x128xbf16, #tpu.memory_space<vmem>>, %arg4: memref<16x1xf32, #tpu.memory_space<vmem>>, %arg5: memref<256x128xbf16, #tpu.memory_space<vmem>>, %arg6: memref<1x128xf32, #tpu.memory_space<vmem>>, %arg7: memref<128x128xbf16, #tpu.memory_space<vmem>>, %arg8: memref<1x128xf32, #tpu.memory_space<vmem>>, %arg9: memref<128x128xbf16, #tpu.memory_space<vmem>>, %arg10: memref<1x128xf32, #tpu.memory_space<vmem>>, %arg11: memref<128x256xbf16, #tpu.memory_space<vmem>>, %arg12: memref<1x256xf32, #tpu.memory_space<vmem>>, %arg13: memref<256x1024xbf16, #tpu.memory_space<vmem>>, %arg14: memref<256x1024xbf16, #tpu.memory_space<vmem>>, %arg15: memref<1x1024xf32, #tpu.memory_space<vmem>>, %arg16: memref<1024x128xbf16, #tpu.memory_space<vmem>>, %arg17: memref<1x128xf32, #tpu.memory_space<vmem>>, %arg18: memref<16x128xf32, #tpu.memory_space<vmem>>, %arg19: memref<16x256xbf16, #tpu.memory_space<vmem>>) attributes {dimension_semantics = [], scalar_prefetch = 0 : i64, scratch_operands = 1 : i64, tpu.core_type = #tpu.core_type<tc>} {
    %c0 = arith.constant 0 : index
    %c0_0 = arith.constant 0 : index
    %0 = vector.load %arg1[%c0, %c0_0] : memref<128x128xbf16, #tpu.memory_space<vmem>>, vector<128x128xbf16>
    %c0_1 = arith.constant 0 : index
    %c0_2 = arith.constant 0 : index
    %1 = vector.load %arg0[%c0_1, %c0_2] : memref<128x256xbf16, #tpu.memory_space<vmem>>, vector<128x256xbf16>
    %c0_3 = arith.constant 0 : index
    %c0_4 = arith.constant 0 : index
    %2 = vector.load %arg5[%c0_3, %c0_4] : memref<256x128xbf16, #tpu.memory_space<vmem>>, vector<256x128xbf16>
    %cst = arith.constant dense<0.000000e+00> : vector<128x128xf32>
    %3 = tpu.matmul %1, %2, %cst {dimension_numbers = #tpu.dot_dimension_numbers<[1], [0], [0], [1], [0, 0, 1, 1], [], []>} : vector<128x256xbf16>, vector<256x128xbf16>, vector<128x128xf32> -> vector<128x128xf32>
    %c0_5 = arith.constant 0 : index
    %c0_6 = arith.constant 0 : index
    %4 = vector.load %arg6[%c0_5, %c0_6] : memref<1x128xf32, #tpu.memory_space<vmem>>, vector<1x128xf32>
    %5 = vector.broadcast %4 : vector<1x128xf32> to vector<128x128xf32>
    %6 = arith.addf %3, %5 : vector<128x128xf32>
    %cst_7 = arith.constant 0.000000e+00 : f32
    %7 = vector.broadcast %cst_7 : f32 to vector<128x128xf32>
    %8 = arith.maximumf %6, %7 : vector<128x128xf32>
    %9 = arith.truncf %8 : vector<128x128xf32> to vector<128x128xbf16>
    %c0_8 = arith.constant 0 : index
    %c0_9 = arith.constant 0 : index
    %10 = vector.load %arg7[%c0_8, %c0_9] : memref<128x128xbf16, #tpu.memory_space<vmem>>, vector<128x128xbf16>
    %cst_10 = arith.constant dense<0.000000e+00> : vector<128x128xf32>
    %11 = tpu.matmul %9, %10, %cst_10 {dimension_numbers = #tpu.dot_dimension_numbers<[1], [0], [0], [1], [0, 0, 1, 1], [], []>} : vector<128x128xbf16>, vector<128x128xbf16>, vector<128x128xf32> -> vector<128x128xf32>
    %12 = arith.truncf %11 : vector<128x128xf32> to vector<128x128xbf16>
    %cst_11 = arith.constant dense<0.000000e+00> : vector<128x128xf32>
    %13 = tpu.matmul %0, %12, %cst_11 {dimension_numbers = #tpu.dot_dimension_numbers<[1], [0], [0], [1], [0, 0, 1, 1], [], []>} : vector<128x128xbf16>, vector<128x128xbf16>, vector<128x128xf32> -> vector<128x128xf32>
    %c0_12 = arith.constant 0 : index
    %c0_13 = arith.constant 0 : index
    %14 = vector.load %arg8[%c0_12, %c0_13] : memref<1x128xf32, #tpu.memory_space<vmem>>, vector<1x128xf32>
    %15 = vector.broadcast %14 : vector<1x128xf32> to vector<128x128xf32>
    %16 = arith.addf %13, %15 : vector<128x128xf32>
    %cst_14 = arith.constant 0.000000e+00 : f32
    %17 = vector.broadcast %cst_14 : f32 to vector<128x128xf32>
    %18 = arith.maximumf %16, %17 : vector<128x128xf32>
    %19 = arith.truncf %18 : vector<128x128xf32> to vector<128x128xbf16>
    %c0_15 = arith.constant 0 : index
    %c0_16 = arith.constant 0 : index
    %20 = vector.load %arg9[%c0_15, %c0_16] : memref<128x128xbf16, #tpu.memory_space<vmem>>, vector<128x128xbf16>
    %cst_17 = arith.constant dense<0.000000e+00> : vector<128x128xf32>
    %21 = tpu.matmul %19, %20, %cst_17 {dimension_numbers = #tpu.dot_dimension_numbers<[1], [0], [0], [1], [0, 0, 1, 1], [], []>} : vector<128x128xbf16>, vector<128x128xbf16>, vector<128x128xf32> -> vector<128x128xf32>
    %22 = arith.truncf %21 : vector<128x128xf32> to vector<128x128xbf16>
    %cst_18 = arith.constant dense<0.000000e+00> : vector<128x128xf32>
    %23 = tpu.matmul %0, %22, %cst_18 {dimension_numbers = #tpu.dot_dimension_numbers<[1], [0], [0], [1], [0, 0, 1, 1], [], []>} : vector<128x128xbf16>, vector<128x128xbf16>, vector<128x128xf32> -> vector<128x128xf32>
    %c0_19 = arith.constant 0 : index
    %c0_20 = arith.constant 0 : index
    %24 = vector.load %arg10[%c0_19, %c0_20] : memref<1x128xf32, #tpu.memory_space<vmem>>, vector<1x128xf32>
    %25 = vector.broadcast %24 : vector<1x128xf32> to vector<128x128xf32>
    %26 = arith.addf %23, %25 : vector<128x128xf32>
    %cst_21 = arith.constant 0.000000e+00 : f32
    %27 = vector.broadcast %cst_21 : f32 to vector<128x128xf32>
    %28 = arith.maximumf %26, %27 : vector<128x128xf32>
    %29 = arith.truncf %28 : vector<128x128xf32> to vector<128x128xbf16>
    %cst_22 = arith.constant dense<0.000000e+00> : vector<128x128xf32>
    %30 = tpu.matmul %0, %29, %cst_22 {dimension_numbers = #tpu.dot_dimension_numbers<[1], [0], [0], [1], [0, 0, 1, 1], [], []>} : vector<128x128xbf16>, vector<128x128xbf16>, vector<128x128xf32> -> vector<128x128xf32>
    %31 = arith.truncf %30 : vector<128x128xf32> to vector<128x128xbf16>
    %c0_23 = arith.constant 0 : index
    %c0_24 = arith.constant 0 : index
    %32 = vector.load %arg11[%c0_23, %c0_24] : memref<128x256xbf16, #tpu.memory_space<vmem>>, vector<128x256xbf16>
    %cst_25 = arith.constant dense<0.000000e+00> : vector<128x256xf32>
    %33 = tpu.matmul %31, %32, %cst_25 {dimension_numbers = #tpu.dot_dimension_numbers<[1], [0], [0], [1], [0, 0, 1, 1], [], []>} : vector<128x128xbf16>, vector<128x256xbf16>, vector<128x256xf32> -> vector<128x256xf32>
    %c0_26 = arith.constant 0 : index
    %c0_27 = arith.constant 0 : index
    %34 = vector.load %arg12[%c0_26, %c0_27] : memref<1x256xf32, #tpu.memory_space<vmem>>, vector<1x256xf32>
    %35 = vector.broadcast %34 : vector<1x256xf32> to vector<128x256xf32>
    %36 = arith.addf %33, %35 : vector<128x256xf32>
    %cst_28 = arith.constant 0.000000e+00 : f32
    %37 = vector.broadcast %cst_28 : f32 to vector<128x256xf32>
    %38 = arith.maximumf %36, %37 : vector<128x256xf32>
    %39 = arith.truncf %38 : vector<128x256xf32> to vector<128x256xbf16>
    %c0_29 = arith.constant 0 : index
    %c0_30 = arith.constant 0 : index
    %40 = vector.load %arg2[%c0_29, %c0_30] : memref<16x128xbf16, #tpu.memory_space<vmem>>, vector<16x128xbf16>
    %cst_31 = arith.constant dense<0.000000e+00> : vector<16x256xf32>
    %41 = tpu.matmul %40, %39, %cst_31 {dimension_numbers = #tpu.dot_dimension_numbers<[1], [0], [0], [1], [0, 0, 1, 1], [], []>} : vector<16x128xbf16>, vector<128x256xbf16>, vector<16x256xf32> -> vector<16x256xf32>
    %c0_32 = arith.constant 0 : index
    %c0_33 = arith.constant 0 : index
    %42 = vector.load %arg4[%c0_32, %c0_33] : memref<16x1xf32, #tpu.memory_space<vmem>>, vector<16x1xf32>
    %43 = vector.broadcast %42 : vector<16x1xf32> to vector<16x256xf32>
    %44 = arith.mulf %41, %43 : vector<16x256xf32>
    %45 = arith.truncf %44 : vector<16x256xf32> to vector<16x256xbf16>
    %c0_34 = arith.constant 0 : index
    %c0_35 = arith.constant 0 : index
    %46 = vector.load %arg3[%c0_34, %c0_35] : memref<128x128xbf16, #tpu.memory_space<vmem>>, vector<128x1xbf16>
    %47 = vector.broadcast %46 : vector<128x1xbf16> to vector<128x256xbf16>
    %48 = arith.mulf %39, %47 : vector<128x256xbf16>
    %cst_36 = arith.constant dense<0xFF80> : vector<256xbf16>
    %49 = vector.multi_reduction <maximumf>, %48, %cst_36 [0] : vector<128x256xbf16> to vector<256xbf16>
    %50 = vector.shape_cast %49 : vector<256xbf16> to vector<1x256xbf16>
    %c0_37 = arith.constant 0 : index
    %c0_38 = arith.constant 0 : index
    %51 = vector.load %arg19[%c0_37, %c0_38] : memref<16x256xbf16, #tpu.memory_space<vmem>>, vector<1x256xbf16>
    tpu.vector_store %arg19[%c0_37, %c0_38], %50 {strides = array<i32>} : memref<16x256xbf16, #tpu.memory_space<vmem>>, vector<1x256xbf16>,
    %c0_39 = arith.constant 0 : index
    %c1 = arith.constant 1 : index
    %52 = vector.load %arg3[%c0_39, %c1] : memref<128x128xbf16, #tpu.memory_space<vmem>>, vector<128x1xbf16>
    %53 = vector.broadcast %52 : vector<128x1xbf16> to vector<128x256xbf16>
    %54 = arith.mulf %39, %53 : vector<128x256xbf16>
    %cst_40 = arith.constant dense<0xFF80> : vector<256xbf16>
    %55 = vector.multi_reduction <maximumf>, %54, %cst_40 [0] : vector<128x256xbf16> to vector<256xbf16>
    %56 = vector.shape_cast %55 : vector<256xbf16> to vector<1x256xbf16>
    %c1_41 = arith.constant 1 : index
    %c0_42 = arith.constant 0 : index
    %57 = vector.load %arg19[%c1_41, %c0_42] : memref<16x256xbf16, #tpu.memory_space<vmem>>, vector<1x256xbf16>
    tpu.vector_store %arg19[%c1_41, %c0_42], %56 {strides = array<i32>} : memref<16x256xbf16, #tpu.memory_space<vmem>>, vector<1x256xbf16>,
    %c0_43 = arith.constant 0 : index
    %c2 = arith.constant 2 : index
    %58 = vector.load %arg3[%c0_43, %c2] : memref<128x128xbf16, #tpu.memory_space<vmem>>, vector<128x1xbf16>
    %59 = vector.broadcast %58 : vector<128x1xbf16> to vector<128x256xbf16>
    %60 = arith.mulf %39, %59 : vector<128x256xbf16>
    %cst_44 = arith.constant dense<0xFF80> : vector<256xbf16>
    %61 = vector.multi_reduction <maximumf>, %60, %cst_44 [0] : vector<128x256xbf16> to vector<256xbf16>
    %62 = vector.shape_cast %61 : vector<256xbf16> to vector<1x256xbf16>
    %c2_45 = arith.constant 2 : index
    %c0_46 = arith.constant 0 : index
    %63 = vector.load %arg19[%c2_45, %c0_46] : memref<16x256xbf16, #tpu.memory_space<vmem>>, vector<1x256xbf16>
    tpu.vector_store %arg19[%c2_45, %c0_46], %62 {strides = array<i32>} : memref<16x256xbf16, #tpu.memory_space<vmem>>, vector<1x256xbf16>,
    %c0_47 = arith.constant 0 : index
    %c3 = arith.constant 3 : index
    %64 = vector.load %arg3[%c0_47, %c3] : memref<128x128xbf16, #tpu.memory_space<vmem>>, vector<128x1xbf16>
    %65 = vector.broadcast %64 : vector<128x1xbf16> to vector<128x256xbf16>
    %66 = arith.mulf %39, %65 : vector<128x256xbf16>
    %cst_48 = arith.constant dense<0xFF80> : vector<256xbf16>
    %67 = vector.multi_reduction <maximumf>, %66, %cst_48 [0] : vector<128x256xbf16> to vector<256xbf16>
    %68 = vector.shape_cast %67 : vector<256xbf16> to vector<1x256xbf16>
    %c3_49 = arith.constant 3 : index
    %c0_50 = arith.constant 0 : index
    %69 = vector.load %arg19[%c3_49, %c0_50] : memref<16x256xbf16, #tpu.memory_space<vmem>>, vector<1x256xbf16>
    tpu.vector_store %arg19[%c3_49, %c0_50], %68 {strides = array<i32>} : memref<16x256xbf16, #tpu.memory_space<vmem>>, vector<1x256xbf16>,
    %c0_51 = arith.constant 0 : index
    %c4 = arith.constant 4 : index
    %70 = vector.load %arg3[%c0_51, %c4] : memref<128x128xbf16, #tpu.memory_space<vmem>>, vector<128x1xbf16>
    %71 = vector.broadcast %70 : vector<128x1xbf16> to vector<128x256xbf16>
    %72 = arith.mulf %39, %71 : vector<128x256xbf16>
    %cst_52 = arith.constant dense<0xFF80> : vector<256xbf16>
    %73 = vector.multi_reduction <maximumf>, %72, %cst_52 [0] : vector<128x256xbf16> to vector<256xbf16>
    %74 = vector.shape_cast %73 : vector<256xbf16> to vector<1x256xbf16>
    %c4_53 = arith.constant 4 : index
    %c0_54 = arith.constant 0 : index
    %75 = vector.load %arg19[%c4_53, %c0_54] : memref<16x256xbf16, #tpu.memory_space<vmem>>, vector<1x256xbf16>
    tpu.vector_store %arg19[%c4_53, %c0_54], %74 {strides = array<i32>} : memref<16x256xbf16, #tpu.memory_space<vmem>>, vector<1x256xbf16>,
    %c0_55 = arith.constant 0 : index
    %c5 = arith.constant 5 : index
    %76 = vector.load %arg3[%c0_55, %c5] : memref<128x128xbf16, #tpu.memory_space<vmem>>, vector<128x1xbf16>
    %77 = vector.broadcast %76 : vector<128x1xbf16> to vector<128x256xbf16>
    %78 = arith.mulf %39, %77 : vector<128x256xbf16>
    %cst_56 = arith.constant dense<0xFF80> : vector<256xbf16>
    %79 = vector.multi_reduction <maximumf>, %78, %cst_56 [0] : vector<128x256xbf16> to vector<256xbf16>
    %80 = vector.shape_cast %79 : vector<256xbf16> to vector<1x256xbf16>
    %c5_57 = arith.constant 5 : index
    %c0_58 = arith.constant 0 : index
    %81 = vector.load %arg19[%c5_57, %c0_58] : memref<16x256xbf16, #tpu.memory_space<vmem>>, vector<1x256xbf16>
    tpu.vector_store %arg19[%c5_57, %c0_58], %80 {strides = array<i32>} : memref<16x256xbf16, #tpu.memory_space<vmem>>, vector<1x256xbf16>,
    %c0_59 = arith.constant 0 : index
    %c6 = arith.constant 6 : index
    %82 = vector.load %arg3[%c0_59, %c6] : memref<128x128xbf16, #tpu.memory_space<vmem>>, vector<128x1xbf16>
    %83 = vector.broadcast %82 : vector<128x1xbf16> to vector<128x256xbf16>
    %84 = arith.mulf %39, %83 : vector<128x256xbf16>
    %cst_60 = arith.constant dense<0xFF80> : vector<256xbf16>
    %85 = vector.multi_reduction <maximumf>, %84, %cst_60 [0] : vector<128x256xbf16> to vector<256xbf16>
    %86 = vector.shape_cast %85 : vector<256xbf16> to vector<1x256xbf16>
    %c6_61 = arith.constant 6 : index
    %c0_62 = arith.constant 0 : index
    %87 = vector.load %arg19[%c6_61, %c0_62] : memref<16x256xbf16, #tpu.memory_space<vmem>>, vector<1x256xbf16>
    tpu.vector_store %arg19[%c6_61, %c0_62], %86 {strides = array<i32>} : memref<16x256xbf16, #tpu.memory_space<vmem>>, vector<1x256xbf16>,
    %c0_63 = arith.constant 0 : index
    %c7 = arith.constant 7 : index
    %88 = vector.load %arg3[%c0_63, %c7] : memref<128x128xbf16, #tpu.memory_space<vmem>>, vector<128x1xbf16>
    %89 = vector.broadcast %88 : vector<128x1xbf16> to vector<128x256xbf16>
    %90 = arith.mulf %39, %89 : vector<128x256xbf16>
    %cst_64 = arith.constant dense<0xFF80> : vector<256xbf16>
    %91 = vector.multi_reduction <maximumf>, %90, %cst_64 [0] : vector<128x256xbf16> to vector<256xbf16>
    %92 = vector.shape_cast %91 : vector<256xbf16> to vector<1x256xbf16>
    %c7_65 = arith.constant 7 : index
    %c0_66 = arith.constant 0 : index
    %93 = vector.load %arg19[%c7_65, %c0_66] : memref<16x256xbf16, #tpu.memory_space<vmem>>, vector<1x256xbf16>
    tpu.vector_store %arg19[%c7_65, %c0_66], %92 {strides = array<i32>} : memref<16x256xbf16, #tpu.memory_space<vmem>>, vector<1x256xbf16>,
    %c0_67 = arith.constant 0 : index
    %c8 = arith.constant 8 : index
    %94 = vector.load %arg3[%c0_67, %c8] : memref<128x128xbf16, #tpu.memory_space<vmem>>, vector<128x1xbf16>
    %95 = vector.broadcast %94 : vector<128x1xbf16> to vector<128x256xbf16>
    %96 = arith.mulf %39, %95 : vector<128x256xbf16>
    %cst_68 = arith.constant dense<0xFF80> : vector<256xbf16>
    %97 = vector.multi_reduction <maximumf>, %96, %cst_68 [0] : vector<128x256xbf16> to vector<256xbf16>
    %98 = vector.shape_cast %97 : vector<256xbf16> to vector<1x256xbf16>
    %c8_69 = arith.constant 8 : index
    %c0_70 = arith.constant 0 : index
    %99 = vector.load %arg19[%c8_69, %c0_70] : memref<16x256xbf16, #tpu.memory_space<vmem>>, vector<1x256xbf16>
    tpu.vector_store %arg19[%c8_69, %c0_70], %98 {strides = array<i32>} : memref<16x256xbf16, #tpu.memory_space<vmem>>, vector<1x256xbf16>,
    %c0_71 = arith.constant 0 : index
    %c9 = arith.constant 9 : index
    %100 = vector.load %arg3[%c0_71, %c9] : memref<128x128xbf16, #tpu.memory_space<vmem>>, vector<128x1xbf16>
    %101 = vector.broadcast %100 : vector<128x1xbf16> to vector<128x256xbf16>
    %102 = arith.mulf %39, %101 : vector<128x256xbf16>
    %cst_72 = arith.constant dense<0xFF80> : vector<256xbf16>
    %103 = vector.multi_reduction <maximumf>, %102, %cst_72 [0] : vector<128x256xbf16> to vector<256xbf16>
    %104 = vector.shape_cast %103 : vector<256xbf16> to vector<1x256xbf16>
    %c9_73 = arith.constant 9 : index
    %c0_74 = arith.constant 0 : index
    %105 = vector.load %arg19[%c9_73, %c0_74] : memref<16x256xbf16, #tpu.memory_space<vmem>>, vector<1x256xbf16>
    tpu.vector_store %arg19[%c9_73, %c0_74], %104 {strides = array<i32>} : memref<16x256xbf16, #tpu.memory_space<vmem>>, vector<1x256xbf16>,
    %c0_75 = arith.constant 0 : index
    %c10 = arith.constant 10 : index
    %106 = vector.load %arg3[%c0_75, %c10] : memref<128x128xbf16, #tpu.memory_space<vmem>>, vector<128x1xbf16>
    %107 = vector.broadcast %106 : vector<128x1xbf16> to vector<128x256xbf16>
    %108 = arith.mulf %39, %107 : vector<128x256xbf16>
    %cst_76 = arith.constant dense<0xFF80> : vector<256xbf16>
    %109 = vector.multi_reduction <maximumf>, %108, %cst_76 [0] : vector<128x256xbf16> to vector<256xbf16>
    %110 = vector.shape_cast %109 : vector<256xbf16> to vector<1x256xbf16>
    %c10_77 = arith.constant 10 : index
    %c0_78 = arith.constant 0 : index
    %111 = vector.load %arg19[%c10_77, %c0_78] : memref<16x256xbf16, #tpu.memory_space<vmem>>, vector<1x256xbf16>
    tpu.vector_store %arg19[%c10_77, %c0_78], %110 {strides = array<i32>} : memref<16x256xbf16, #tpu.memory_space<vmem>>, vector<1x256xbf16>,
    %c0_79 = arith.constant 0 : index
    %c11 = arith.constant 11 : index
    %112 = vector.load %arg3[%c0_79, %c11] : memref<128x128xbf16, #tpu.memory_space<vmem>>, vector<128x1xbf16>
    %113 = vector.broadcast %112 : vector<128x1xbf16> to vector<128x256xbf16>
    %114 = arith.mulf %39, %113 : vector<128x256xbf16>
    %cst_80 = arith.constant dense<0xFF80> : vector<256xbf16>
    %115 = vector.multi_reduction <maximumf>, %114, %cst_80 [0] : vector<128x256xbf16> to vector<256xbf16>
    %116 = vector.shape_cast %115 : vector<256xbf16> to vector<1x256xbf16>
    %c11_81 = arith.constant 11 : index
    %c0_82 = arith.constant 0 : index
    %117 = vector.load %arg19[%c11_81, %c0_82] : memref<16x256xbf16, #tpu.memory_space<vmem>>, vector<1x256xbf16>
    tpu.vector_store %arg19[%c11_81, %c0_82], %116 {strides = array<i32>} : memref<16x256xbf16, #tpu.memory_space<vmem>>, vector<1x256xbf16>,
    %c0_83 = arith.constant 0 : index
    %c12 = arith.constant 12 : index
    %118 = vector.load %arg3[%c0_83, %c12] : memref<128x128xbf16, #tpu.memory_space<vmem>>, vector<128x1xbf16>
    %119 = vector.broadcast %118 : vector<128x1xbf16> to vector<128x256xbf16>
    %120 = arith.mulf %39, %119 : vector<128x256xbf16>
    %cst_84 = arith.constant dense<0xFF80> : vector<256xbf16>
    %121 = vector.multi_reduction <maximumf>, %120, %cst_84 [0] : vector<128x256xbf16> to vector<256xbf16>
    %122 = vector.shape_cast %121 : vector<256xbf16> to vector<1x256xbf16>
    %c12_85 = arith.constant 12 : index
    %c0_86 = arith.constant 0 : index
    %123 = vector.load %arg19[%c12_85, %c0_86] : memref<16x256xbf16, #tpu.memory_space<vmem>>, vector<1x256xbf16>
    tpu.vector_store %arg19[%c12_85, %c0_86], %122 {strides = array<i32>} : memref<16x256xbf16, #tpu.memory_space<vmem>>, vector<1x256xbf16>,
    %c0_87 = arith.constant 0 : index
    %c13 = arith.constant 13 : index
    %124 = vector.load %arg3[%c0_87, %c13] : memref<128x128xbf16, #tpu.memory_space<vmem>>, vector<128x1xbf16>
    %125 = vector.broadcast %124 : vector<128x1xbf16> to vector<128x256xbf16>
    %126 = arith.mulf %39, %125 : vector<128x256xbf16>
    %cst_88 = arith.constant dense<0xFF80> : vector<256xbf16>
    %127 = vector.multi_reduction <maximumf>, %126, %cst_88 [0] : vector<128x256xbf16> to vector<256xbf16>
    %128 = vector.shape_cast %127 : vector<256xbf16> to vector<1x256xbf16>
    %c13_89 = arith.constant 13 : index
    %c0_90 = arith.constant 0 : index
    %129 = vector.load %arg19[%c13_89, %c0_90] : memref<16x256xbf16, #tpu.memory_space<vmem>>, vector<1x256xbf16>
    tpu.vector_store %arg19[%c13_89, %c0_90], %128 {strides = array<i32>} : memref<16x256xbf16, #tpu.memory_space<vmem>>, vector<1x256xbf16>,
    %c0_91 = arith.constant 0 : index
    %c14 = arith.constant 14 : index
    %130 = vector.load %arg3[%c0_91, %c14] : memref<128x128xbf16, #tpu.memory_space<vmem>>, vector<128x1xbf16>
    %131 = vector.broadcast %130 : vector<128x1xbf16> to vector<128x256xbf16>
    %132 = arith.mulf %39, %131 : vector<128x256xbf16>
    %cst_92 = arith.constant dense<0xFF80> : vector<256xbf16>
    %133 = vector.multi_reduction <maximumf>, %132, %cst_92 [0] : vector<128x256xbf16> to vector<256xbf16>
    %134 = vector.shape_cast %133 : vector<256xbf16> to vector<1x256xbf16>
    %c14_93 = arith.constant 14 : index
    %c0_94 = arith.constant 0 : index
    %135 = vector.load %arg19[%c14_93, %c0_94] : memref<16x256xbf16, #tpu.memory_space<vmem>>, vector<1x256xbf16>
    tpu.vector_store %arg19[%c14_93, %c0_94], %134 {strides = array<i32>} : memref<16x256xbf16, #tpu.memory_space<vmem>>, vector<1x256xbf16>,
    %c0_95 = arith.constant 0 : index
    %c15 = arith.constant 15 : index
    %136 = vector.load %arg3[%c0_95, %c15] : memref<128x128xbf16, #tpu.memory_space<vmem>>, vector<128x1xbf16>
    %137 = vector.broadcast %136 : vector<128x1xbf16> to vector<128x256xbf16>
    %138 = arith.mulf %39, %137 : vector<128x256xbf16>
    %cst_96 = arith.constant dense<0xFF80> : vector<256xbf16>
    %139 = vector.multi_reduction <maximumf>, %138, %cst_96 [0] : vector<128x256xbf16> to vector<256xbf16>
    %140 = vector.shape_cast %139 : vector<256xbf16> to vector<1x256xbf16>
    %c15_97 = arith.constant 15 : index
    %c0_98 = arith.constant 0 : index
    %141 = vector.load %arg19[%c15_97, %c0_98] : memref<16x256xbf16, #tpu.memory_space<vmem>>, vector<1x256xbf16>
    tpu.vector_store %arg19[%c15_97, %c0_98], %140 {strides = array<i32>} : memref<16x256xbf16, #tpu.memory_space<vmem>>, vector<1x256xbf16>,
    %c0_99 = arith.constant 0 : index
    %c0_100 = arith.constant 0 : index
    %142 = vector.load %arg13[%c0_99, %c0_100] : memref<256x1024xbf16, #tpu.memory_space<vmem>>, vector<256x1024xbf16>
    %cst_101 = arith.constant dense<0.000000e+00> : vector<16x1024xf32>
    %143 = tpu.matmul %45, %142, %cst_101 {dimension_numbers = #tpu.dot_dimension_numbers<[1], [0], [0], [1], [0, 0, 1, 1], [], []>} : vector<16x256xbf16>, vector<256x1024xbf16>, vector<16x1024xf32> -> vector<16x1024xf32>
    %c0_102 = arith.constant 0 : index
    %c0_103 = arith.constant 0 : index
    %144 = vector.load %arg19[%c0_102, %c0_103] : memref<16x256xbf16, #tpu.memory_space<vmem>>, vector<16x256xbf16>
    %c0_104 = arith.constant 0 : index
    %c0_105 = arith.constant 0 : index
    %145 = vector.load %arg14[%c0_104, %c0_105] : memref<256x1024xbf16, #tpu.memory_space<vmem>>, vector<256x1024xbf16>
    %cst_106 = arith.constant dense<0.000000e+00> : vector<16x1024xf32>
    %146 = tpu.matmul %144, %145, %cst_106 {dimension_numbers = #tpu.dot_dimension_numbers<[1], [0], [0], [1], [0, 0, 1, 1], [], []>} : vector<16x256xbf16>, vector<256x1024xbf16>, vector<16x1024xf32> -> vector<16x1024xf32>
    %147 = arith.addf %143, %146 : vector<16x1024xf32>
    %c0_107 = arith.constant 0 : index
    %c0_108 = arith.constant 0 : index
    %148 = vector.load %arg15[%c0_107, %c0_108] : memref<1x1024xf32, #tpu.memory_space<vmem>>, vector<1x1024xf32>
    %149 = vector.broadcast %148 : vector<1x1024xf32> to vector<16x1024xf32>
    %150 = arith.addf %147, %149 : vector<16x1024xf32>
    %cst_109 = arith.constant 0.000000e+00 : f32
    %151 = vector.broadcast %cst_109 : f32 to vector<16x1024xf32>
    %152 = arith.maximumf %150, %151 : vector<16x1024xf32>
    %153 = arith.truncf %152 : vector<16x1024xf32> to vector<16x1024xbf16>
    %c0_110 = arith.constant 0 : index
    %c0_111 = arith.constant 0 : index
    %154 = vector.load %arg16[%c0_110, %c0_111] : memref<1024x128xbf16, #tpu.memory_space<vmem>>, vector<1024x128xbf16>
    %cst_112 = arith.constant dense<0.000000e+00> : vector<16x128xf32>
    %155 = tpu.matmul %153, %154, %cst_112 {dimension_numbers = #tpu.dot_dimension_numbers<[1], [0], [0], [1], [0, 0, 1, 1], [], []>} : vector<16x1024xbf16>, vector<1024x128xbf16>, vector<16x128xf32> -> vector<16x128xf32>
    %c0_113 = arith.constant 0 : index
    %c0_114 = arith.constant 0 : index
    %156 = vector.load %arg17[%c0_113, %c0_114] : memref<1x128xf32, #tpu.memory_space<vmem>>, vector<1x128xf32>
    %157 = vector.broadcast %156 : vector<1x128xf32> to vector<16x128xf32>
    %158 = arith.addf %155, %157 : vector<16x128xf32>
    %159 = tpu.iota {dimensions = array<i32: 1>} : vector<16x128xi32>
    %c2_i32 = arith.constant 2 : i32
    %160 = vector.broadcast %c2_i32 : i32 to vector<16x128xi32>
    %161 = arith.cmpi slt, %159, %160 : vector<16x128xi32>
    %cst_115 = arith.constant -1.000000e+30 : f32
    %162 = vector.broadcast %cst_115 : f32 to vector<16x128xf32>
    %163 = arith.select %161, %158, %162 : vector<16x128xi1>, vector<16x128xf32>
    %cst_116 = arith.constant dense<0xFF800000> : vector<16xf32>
    %164 = vector.multi_reduction <maximumf>, %163, %cst_116 [1] : vector<16x128xf32> to vector<16xf32>
    %165 = vector.shape_cast %164 : vector<16xf32> to vector<16x1xf32>
    %166 = vector.broadcast %165 : vector<16x1xf32> to vector<16x128xf32>
    %167 = arith.subf %163, %166 : vector<16x128xf32>
    %168 = math.exp %167 : vector<16x128xf32>
    %cst_117 = arith.constant dense<0.000000e+00> : vector<16xf32>
    %169 = vector.multi_reduction <add>, %168, %cst_117 [1] : vector<16x128xf32> to vector<16xf32>
    %170 = vector.shape_cast %169 : vector<16xf32> to vector<16x1xf32>
    %171 = vector.broadcast %170 : vector<16x1xf32> to vector<16x128xf32>
    %172 = arith.divf %168, %171 : vector<16x128xf32>
    %c0_118 = arith.constant 0 : index
    %c0_119 = arith.constant 0 : index
    %173 = vector.load %arg18[%c0_118, %c0_119] : memref<16x128xf32, #tpu.memory_space<vmem>>, vector<16x128xf32>
    tpu.vector_store %arg18[%c0_118, %c0_119], %172 {strides = array<i32>} : memref<16x128xf32, #tpu.memory_space<vmem>>, vector<16x128xf32>,
    return
  }
}

</mosaic_0001>

<bundles_post_ra>
// kernel: forward.1
= control target key start
LH: loop header
LB: loop body
LE: loop exit
PB: predicated region body
PF: predicated region fallthrough
CT: control target
= control target key end

     0   :  { %vm6222_vm0 = vcmask 1047559   ;;  %vm6223_vm1 = vsmask.f32 7424  ;;  %vm1819_vm2 = vcmask 1040384   ;;  %vm1820_vm3 = vsmask.f32 256  ;;  %s15261_s5 = inlined_call_operand.vmem [shape: bf16[256,128], index: 5, kind: input, shape index: {}]   ;;  %s15262_s0 = inlined_call_operand.vmem [shape: bf16[128,256], index: 0, kind: input, shape index: {}]   ;;  %s15263_s7 = inlined_call_operand.vmem [shape: bf16[128,128], index: 7, kind: input, shape index: {}]   ;;  %s15264_s6 = inlined_call_operand.vmem [shape: f32[1,128], index: 6, kind: input, shape index: {}]   ;;  %s15265_s3 = inlined_call_operand.vmem [shape: bf16[128,128], index: 3, kind: input, shape index: {}]   ;;  %s15266_s1 = inlined_call_operand.vmem [shape: bf16[128,128], index: 1, kind: input, shape index: {}]   ;;  %s15267_s9 = inlined_call_operand.vmem [shape: bf16[128,128], index: 9, kind: input, shape index: {}]   ;;  %s15268_s8 = inlined_call_operand.vmem [shape: f32[1,128], index: 8, kind: input, shape index: {}]   ;;  %s15269_s4 = inlined_call_operand.vmem [shape: f32[16,1], index: 4, kind: input, shape index: {}]   ;;  %s15270_s11 = inlined_call_operand.vmem [shape: bf16[128,256], index: 11, kind: input, shape index: {}]   ;;  %s15271_s10 = inlined_call_operand.vmem [shape: f32[1,128], index: 10, kind: input, shape index: {}]   ;;  %s15272_s14 = inlined_call_operand.vmem [shape: bf16[256,1024], index: 14, kind: input, shape index: {}]   ;;  %s15273_s2 = inlined_call_operand.vmem [shape: bf16[16,128], index: 2, kind: input, shape index: {}]   ;;  %s15274_s12 = inlined_call_operand.vmem [shape: f32[1,256], index: 12, kind: input, shape index: {}]   ;;  %s15275_s13 = inlined_call_operand.vmem [shape: bf16[256,1024], index: 13, kind: input, shape index: {}]   ;;  %s15276_s16 = inlined_call_operand.vmem [shape: bf16[1024,128], index: 16, kind: input, shape index: {}]   ;;  %s15277_s15 = inlined_call_operand.vmem [shape: f32[1,1024], index: 15, kind: input, shape index: {}]   ;;  %s15278_s17 = inlined_call_operand.vmem [shape: f32[1,128], index: 17, kind: input, shape index: {}]   ;;  %s15279_s18 = inlined_call_operand.vmem [shape: f32[16,128], index: 18, kind: output, shape index: {}]  }
   0x1   :  { %15557 = sst [smem:[#allocation196_spill]] %s15261_s5  ;;  %v10635_v42 = vld [vmem:[%s15264_s6] ss:$0 sm:$0xff]  ;;  %vm2448_vm4 = vcmask 1041409   ;;  %vm2449_vm5 = vsmask.f32 1280  ;;  %vm13809_vm7 = vmand %vm6222_vm0, %vm6223_vm1 }
   0x2   :  { %15558 = sst [smem:[#allocation197_spill]] %s15262_s0  ;;  %s15560_s29 = sld [smem:[#allocation196_spill]]  ;;  %vm6537_vm6 = vsmask.f32 7966  ;;  %vm2134_vm8 = vsmask.f32 7938  ;;  %vm13827_vm9 = vmand %vm1819_vm2, %vm1820_vm3 }
   0x3   :  { %15559 = sst [smem:[#allocation198_spill]] %s15263_s7  ;;  %s15561_s23 = sld [smem:[#allocation197_spill]]  ;;  %vm2763_vm10 = vsmask.f32 7942  ;;  %vm13861_vm11 = vmand %vm2448_vm4, %vm2449_vm5  ;;  %vm3077_vm14 = vcmask 1042434  }
   0x4   :  { %s15562_s7 = sld [smem:[#allocation198_spill]]  ;;  %vm13876_vm12 = vmand %vm6222_vm0, %vm6537_vm6  ;;  %vm3078_vm15 = vsmask.f32 2304  ;;  %vm3706_vm0 = vcmask 1043459   ;;  %vm3707_vm1 = vsmask.f32 3328 }
   0x5   :  { %vm13897_vm13 = vmand %vm1819_vm2, %vm2134_vm8  ;;  %vm3392_vm3 = vsmask.f32 7946  ;;  %vm4021_vm5 = vsmask.f32 7950  ;;  %vm4336_vm8 = vsmask.f32 4352 }
   0x6   :  { %vm13927_vm2 = vmand %vm2448_vm4, %vm2763_vm10 }
   0x7   :  { %vm13966_vm4 = vmand %vm3077_vm14, %vm3078_vm15 }
   0x8   :  { %v10232_v0 = vld [vmem:[%s15560_s29 + $0x40] sm:$0xff]   ;;  %v10234_v2 = vld [vmem:[%s15560_s29 + $0x48] sm:$0xff]   ;;  %v10236_v4 = vld [vmem:[%s15560_s29 + $0x50] sm:$0xff]  }
   0x9   :  { %v10233_v1 = vld [vmem:[%s15560_s29] sm:$0xff]   ;;  %9746 = vmatprep.subr.bf16.mxu0 %v10232_v0  ;;  %v10235_v3 = vld [vmem:[%s15560_s29 + $0x8] sm:$0xff]   ;;  %v10237_v5 = vld [vmem:[%s15560_s29 + $0x10] sm:$0xff]  }
   0xa   :  { %9747 = vmatpush3.bf16.msra.mxu0 %v10233_v1  ;;  %v10238_v6 = vld [vmem:[%s15560_s29 + $0x58] sm:$0xff]   ;;  %v10240_v8 = vld [vmem:[%s15560_s29 + $0x60] sm:$0xff]   ;;  %v10242_v10 = vld [vmem:[%s15560_s29 + $0x68] sm:$0xff]  }
   0xb   :  { %9748 = vmatprep.subr.bf16.mxu0 %v10234_v2  ;;  %v10239_v7 = vld [vmem:[%s15560_s29 + $0x18] sm:$0xff]   ;;  %v10241_v9 = vld [vmem:[%s15560_s29 + $0x20] sm:$0xff]   ;;  %v10243_v12 = vld [vmem:[%s15560_s29 + $0x28] sm:$0xff]  }
   0xc   :  { %v10250_v11 = vld [vmem:[%s15561_s23 + $0x4] ss:$8 sps:$4 sm:$0xff]   ;;  %v10244_v13 = vld [vmem:[%s15560_s29 + $0x70] sm:$0xff]   ;;  %v10246_v15 = vld [vmem:[%s15560_s29 + $0x78] sm:$0xff]  }
   0xd   :  { %339 = vmatprep.mubr.bf16.mxu0 %v10250_v11  ;;  %v10245_v14 = vld [vmem:[%s15560_s29 + $0x30] sm:$0xff]   ;;  %v10247_v16 = vld [vmem:[%s15560_s29 + $0x38] sm:$0xff]   ;;  %v10272_v17 = vld [vmem:[%s15562_s7] sm:$0xff]  }
   0xe   :  { %9749 = vmatpush3.bf16.msra.mxu0 %v10235_v3  ;;  %v10248_v18 = vld [vmem:[%s15561_s23] ss:$8 sps:$4 sm:$0xff]   ;;  %v10251_v20 = vld [vmem:[%s15561_s23 + $0x14] ss:$8 sps:$4 sm:$0xff]   ;;  %9978 = vmatprep.subr.bf16.mxu1 %v10272_v17  ;;  %v10253_v22 = vld [vmem:[%s15561_s23 + $0x10] ss:$8 sps:$4 sm:$0xff]  }
   0xf   :  { %9750 = vmatprep.subr.bf16.mxu0 %v10236_v4  ;;  %v10273_v19 = vld [vmem:[%s15562_s7 + $0x8] sm:$0xff]   ;;  %v10274_v21 = vld [vmem:[%s15562_s7 + $0x10] sm:$0xff]   ;;  %9979 = vmatpush3.bf16.msra.mxu1 %v10272_v17  ;;  %v10275_v35 = vld [vmem:[%s15562_s7 + $0x18] sm:$0xff]  }
  0x10   :  { %9980 = vmatprep.subr.bf16.mxu1 %v10273_v19  ;;  %v10254_v23 = vld [vmem:[%s15561_s23 + $0x24] ss:$8 sps:$4 sm:$0xff]   ;;  %v10256_v24 = vld [vmem:[%s15561_s23 + $0x20] ss:$8 sps:$4 sm:$0xff]   ;;  %v10257_v25 = vld [vmem:[%s15561_s23 + $0x34] ss:$8 sps:$4 sm:$0xff]  }
  0x11   :  { %v10259_v26 = vld [vmem:[%s15561_s23 + $0x30] ss:$8 sps:$4 sm:$0xff]   ;;  %v10260_v27 = vld [vmem:[%s15561_s23 + $0x44] ss:$8 sps:$4 sm:$0xff]   ;;  %v10262_v28 = vld [vmem:[%s15561_s23 + $0x40] ss:$8 sps:$4 sm:$0xff]  }
  0x12   :  { %9751 = vmatpush3.bf16.msra.mxu0 %v10237_v5  ;;  %v10263_v29 = vld [vmem:[%s15561_s23 + $0x54] ss:$8 sps:$4 sm:$0xff]   ;;  %v10265_v30 = vld [vmem:[%s15561_s23 + $0x50] ss:$8 sps:$4 sm:$0xff]   ;;  %v10266_v31 = vld [vmem:[%s15561_s23 + $0x64] ss:$8 sps:$4 sm:$0xff]  }
  0x13   :  { %9752 = vmatprep.subr.bf16.mxu0 %v10238_v6  ;;  %9981 = vmatpush3.bf16.msra.mxu1 %v10273_v19  ;;  %v10268_v32 = vld [vmem:[%s15561_s23 + $0x60] ss:$8 sps:$4 sm:$0xff]   ;;  %v10269_v33 = vld [vmem:[%s15561_s23 + $0x74] ss:$8 sps:$4 sm:$0xff]   ;;  %v10271_v34 = vld [vmem:[%s15561_s23 + $0x70] ss:$8 sps:$4 sm:$0xff]  }
  0x14   :  { %9982 = vmatprep.subr.bf16.mxu1 %v10274_v21  ;;  %v10276_v36 = vld [vmem:[%s15562_s7 + $0x20] sm:$0xff]   ;;  %v10277_v37 = vld [vmem:[%s15562_s7 + $0x28] sm:$0xff]   ;;  %v10278_v38 = vld [vmem:[%s15562_s7 + $0x30] sm:$0xff]  }
  0x15   :  { %v10279_v39 = vld [vmem:[%s15562_s7 + $0x38] sm:$0xff]   ;;  %vm13980_vm6 = vmand %vm3706_vm0, %vm3707_vm1  ;;  %vm4965_vm1 = vsmask.f32 5376 }
  0x16   :  { %9753 = vmatpush3.bf16.msra.mxu0 %v10239_v7  ;;  %vm14012_vm10 = vmand %vm3077_vm14, %vm3392_vm3  ;;  %vm4650_vm14 = vsmask.f32 7954 }
  0x17   :  { %9754 = vmatprep.subr.bf16.mxu0 %v10240_v8  ;;  %9983 = vmatpush3.bf16.msra.mxu1 %v10274_v21 }
  0x18   :  { %9984 = vmatprep.subr.bf16.mxu1 %v10275_v35 }
  0x1a   :  { %9755 = vmatpush3.bf16.msra.mxu0 %v10241_v9 }
  0x1b   :  { %9756 = vmatprep.subr.bf16.mxu0 %v10242_v10  ;;  %9985 = vmatpush3.bf16.msra.mxu1 %v10275_v35 }
  0x1c   :  { %9986 = vmatprep.subr.bf16.mxu1 %v10276_v36 }
  0x1e   :  { %9757 = vmatpush3.bf16.msra.mxu0 %v10243_v12 }
  0x1f   :  { %9758 = vmatprep.subr.bf16.mxu0 %v10244_v13  ;;  %9987 = vmatpush3.bf16.msra.mxu1 %v10276_v36 }
  0x20   :  { %9988 = vmatprep.subr.bf16.mxu1 %v10277_v37 }
  0x22   :  { %9759 = vmatpush3.bf16.msra.mxu0 %v10245_v14 }
  0x23   :  { %9760 = vmatprep.subr.bf16.mxu0 %v10246_v15  ;;  %9989 = vmatpush3.bf16.msra.mxu1 %v10277_v37 }
  0x24   :  { %9990 = vmatprep.subr.bf16.mxu1 %v10278_v38 }
  0x26   :  { %9761 = vmatpush3.bf16.msra.mxu0 %v10247_v16 }
  0x27   :  { %9991 = vmatpush3.bf16.msra.mxu1 %v10278_v38 }
  0x28   :  { %9992 = vmatprep.subr.bf16.mxu1 %v10279_v39 }
  0x29   :  { %340 = vmatmul.mubr.bf16.vlgmr.msra.gmra.mrb[0].mxu0 %v10248_v18 }
  0x2a   :  { %347 = vmatprep.mubr.bf16.mxu0 %v10251_v20 }
  0x2b   :  { %9993 = vmatpush3.bf16.msra.mxu1 %v10279_v39 }
  0x31   :  { %348 = vmatmul.mubr.bf16.gmra.mrb[4].mxu0 %v10253_v22 }
  0x32   :  { %355 = vmatprep.mubr.bf16.mxu0 %v10254_v23 }
  0x39   :  { %356 = vmatmul.mubr.bf16.gmra.mrb[8].mxu0 %v10256_v24 }
  0x3a   :  { %363 = vmatprep.mubr.bf16.mxu0 %v10257_v25 }
  0x41   :  { %364 = vmatmul.mubr.bf16.gmra.mrb[12].mxu0 %v10259_v26 }
  0x42   :  { %371 = vmatprep.mubr.bf16.mxu0 %v10260_v27 }
  0x49   :  { %372 = vmatmul.mubr.bf16.gmra.mrb[16].mxu0 %v10262_v28 }
  0x4a   :  { %379 = vmatprep.mubr.bf16.mxu0 %v10263_v29 }
  0x51   :  { %380 = vmatmul.mubr.bf16.gmra.mrb[20].mxu0 %v10265_v30 }
  0x52   :  { %387 = vmatprep.mubr.bf16.mxu0 %v10266_v31 }
  0x59   :  { %388 = vmatmul.mubr.bf16.gmra.mrb[24].mxu0 %v10268_v32 }
  0x5a   :  { %395 = vmatprep.mubr.bf16.mxu0 %v10269_v33 }
  0x61   :  { %396 = vmatmul.mubr.bf16.gmra.mrb[28].mxu0 %v10271_v34 }
  0xfc   :  { %v9762_v40 = vpop.f32.mrb[0].mxu0 }
  0xfd   :  { %v9763_v41 = vpop.f32.mrb[1].mxu0 }
  0xfe   :  { %v9764_v43 = vadd.f32 %v9763_v41, %v9762_v40  ;;  %v9765_v44 = vpop.f32.mrb[2].mxu0 }
  0xff   :  { %v9766_v45 = vpop.f32.mrb[3].mxu0 }
 0x100   :  { %v9767_v46 = vadd.f32 %v9766_v45, %v9765_v44  ;;  %v342_v47 = vadd.f32 %v9764_v43, %v10635_v42 }
 0x102   :  { %v345_v48 = vadd.f32 %v9767_v46, %v10635_v42  ;;  %v404_v50 = vmax.f32 %v342_v47, 0.0 }
 0x104   :  { %v9768_v49 = vpop.f32.mrb[4].mxu0  ;;  %v405_v51 = vmax.f32 %v345_v48, 0.0 }
 0x105   :  { %v9769_v52 = vpop.f32.mrb[5].mxu0 }
 0x106   :  { %v9770_v53 = vadd.f32 %v9769_v52, %v9768_v49  ;;  %v9771_v54 = vpop.f32.mrb[6].mxu0  ;;  %v420_v55 = vpack.c.bf16 %v405_v51, %v404_v50 }
 0x107   :  { %v9772_v56 = vpop.f32.mrb[7].mxu0 }
 0x108   :  { %v350_v57 = vadd.f32 %v9770_v53, %v10635_v42  ;;  %v9773_v58 = vadd.f32 %v9772_v56, %v9771_v54  ;;  %9994 = vmatprep.mubr.bf16.mxu1 %v420_v55 }
 0x10a   :  { %v353_v59 = vadd.f32 %v9773_v58, %v10635_v42  ;;  %v406_v60 = vmax.f32 %v350_v57, 0.0 }
 0x10c   :  { %v407_v61 = vmax.f32 %v353_v59, 0.0  ;;  %v9774_v62 = vpop.f32.mrb[8].mxu0 }
 0x10d   :  { %v9775_v63 = vpop.f32.mrb[9].mxu0 }
 0x10e   :  { %v9776_v0 = vadd.f32 %v9775_v63, %v9774_v62  ;;  %v9777_v1 = vpop.f32.mrb[10].mxu0  ;;  %v421_v2 = vpack.c.bf16 %v407_v61, %v406_v60 }
 0x10f   :  { %v9778_v3 = vpop.f32.mrb[11].mxu0 }
 0x110   :  { %v358_v4 = vadd.f32 %v9776_v0, %v10635_v42  ;;  %v9779_v5 = vadd.f32 %v9778_v3, %v9777_v1  ;;  %9995 = vmatmul.mubr.bf16.vlgmr.msra.gmra.mrb[0].mxu1 %v421_v2  ;;  %v15287_v2 = vmov 0   ;;  %v1513_v3 = vld [vmem:[%s15265_s3] sm:$0xf] }
 0x111   :  { %10172 = vset.pattern.permute.xlu1 %v15287_v2  ;;  %10171 = vset.pattern.permute.xlu0 %v15287_v2 }
 0x112   :  { %v361_v6 = vadd.f32 %v9779_v5, %v10635_v42  ;;  %v408_v7 = vmax.f32 %v358_v4, 0.0  ;;  %1531 = vperm.xlu1 %10172, %v1513_v3   ;;  %v1514_v4 = vld [vmem:[%s15265_s3 + $0x4] sm:$0xf]  ;;  %v1518_v5 = vld [vmem:[%s15265_s3 + $0x14] sm:$0xf] }
 0x113   :  { %v4032_v3 = vld [vmem:[%s15265_s3 + $0xc] sm:$0xf] }
 0x114   :  { %v409_v8 = vmax.f32 %v361_v6, 0.0  ;;  %v9780_v9 = vpop.f32.mrb[12].mxu0  ;;  %v1520_v6 = vld [vmem:[%s15265_s3 + $0x1c] sm:$0xf] }
 0x115   :  { %v9781_v10 = vpop.f32.mrb[13].mxu0 }
 0x116   :  { %v9782_v11 = vadd.f32 %v9781_v10, %v9780_v9  ;;  %v9783_v12 = vpop.f32.mrb[14].mxu0  ;;  %v422_v13 = vpack.c.bf16 %v409_v8, %v408_v7  ;;  %1543 = vperm.xlu1 %10172, %v1514_v4   ;;  %v10673_v7 = vld [vmem:[%s15266_s1] sm:$0xff]   ;;  %v1524_v9 = vld [vmem:[%s15265_s3 + $0x2c] sm:$0xf]  ;;  %v1526_v10 = vld [vmem:[%s15265_s3 + $0x34] sm:$0xf] }
 0x117   :  { %v9784_v14 = vpop.f32.mrb[15].mxu0  ;;  %v1522_v8 = vld [vmem:[%s15265_s3 + $0x24] sm:$0xf] }
 0x118   :  { %v366_v15 = vadd.f32 %v9782_v11, %v10635_v42  ;;  %v9785_v16 = vadd.f32 %v9784_v14, %v9783_v12  ;;  %9998 = vmatprep.mubr.bf16.mxu1 %v422_v13  ;;  %v1528_v11 = vld [vmem:[%s15265_s3 + $0x3c] sm:$0xf]  ;;  %v15293_v12 = vmov 1   ;;  %v1829_v13 = vld [vmem:[%s15265_s3 + $0x4] sm:$0xf] }
 0x119   :  { %v1830_v14 = vld [vmem:[%s15265_s3 + $0x8] sm:$0xf] }
 0x11a   :  { %v369_v17 = vadd.f32 %v9785_v16, %v10635_v42  ;;  %v410_v18 = vmax.f32 %v366_v15, 0.0  ;;  %v1832_v15 = vld [vmem:[%s15265_s3 + $0x10] sm:$0xf]  ;;  %v1834_v16 = vld [vmem:[%s15265_s3 + $0x18] sm:$0xf] }
 0x11c   :  { %v411_v19 = vmax.f32 %v369_v17, 0.0  ;;  %v9786_v20 = vpop.f32.mrb[16].mxu0  ;;  %v1836_v17 = vld [vmem:[%s15265_s3 + $0x20] sm:$0xf] }
 0x11d   :  { %v9787_v21 = vpop.f32.mrb[17].mxu0 }
 0x11e   :  { %v9788_v22 = vadd.f32 %v9787_v21, %v9786_v20  ;;  %v9789_v23 = vpop.f32.mrb[18].mxu0  ;;  %v423_v24 = vpack.c.bf16 %v411_v19, %v410_v18  ;;  %v1838_v18 = vld [vmem:[%s15265_s3 + $0x28] sm:$0xf]  ;;  %v10288_v19 = vld [vmem:[%s15267_s9] sm:$0xff]   ;;  %v1840_v21 = vld [vmem:[%s15265_s3 + $0x30] sm:$0xf] }
 0x11f   :  { %v9790_v25 = vpop.f32.mrb[19].mxu0  ;;  %10042 = vmatprep.subr.bf16.mxu0 %v10288_v19  ;;  %v10289_v20 = vld [vmem:[%s15267_s9 + $0x8] sm:$0xff]  }
 0x120   :  { %v374_v26 = vadd.f32 %v9788_v22, %v10635_v42  ;;  %v9791_v27 = vadd.f32 %v9790_v25, %v9789_v23  ;;  %9999 = vmatmul.mubr.bf16.gmra.mrb[4].mxu1 %v423_v24  ;;  %10043 = vmatpush3.bf16.msra.mxu0 %v10288_v19  ;;  %v1842_v22 = vld [vmem:[%s15265_s3 + $0x38] sm:$0xf]  ;;  %v10290_v23 = vld [vmem:[%s15267_s9 + $0x10] sm:$0xff]   ;;  %v2143_v24 = vld [vmem:[%s15265_s3 + $0x4] sm:$0xf]  ;;  %v15292_v25 = vmov 2  }
 0x121   :  { %10044 = vmatprep.subr.bf16.mxu0 %v10289_v20  ;;  %v15286_v19 = vmov 10  }
 0x122   :  { %v377_v28 = vadd.f32 %v9791_v27, %v10635_v42  ;;  %v412_v29 = vmax.f32 %v374_v26, 0.0  ;;  %v2144_v26 = vld [vmem:[%s15265_s3 + $0x8] sm:$0xf]  ;;  %v10291_v27 = vld [vmem:[%s15267_s9 + $0x18] sm:$0xff]  }
 0x124   :  { %v413_v30 = vmax.f32 %v377_v28, 0.0  ;;  %v9792_v31 = vpop.f32.mrb[20].mxu0  ;;  %10045 = vmatpush3.bf16.msra.mxu0 %v10289_v20  ;;  %v2146_v28 = vld [vmem:[%s15265_s3 + $0x10] sm:$0xf]  ;;  %v4660_v20 = vld [vmem:[%s15265_s3 + $0x8] sm:$0xf] }
 0x125   :  { %v9793_v32 = vpop.f32.mrb[21].mxu0  ;;  %10046 = vmatprep.subr.bf16.mxu0 %v10290_v23 }
 0x126   :  { %v9794_v33 = vadd.f32 %v9793_v32, %v9792_v31  ;;  %v9795_v34 = vpop.f32.mrb[22].mxu0  ;;  %v424_v35 = vpack.c.bf16 %v413_v30, %v412_v29  ;;  %v2148_v29 = vld [vmem:[%s15265_s3 + $0x18] sm:$0xf]  ;;  %v10292_v30 = vld [vmem:[%s15267_s9 + $0x20] sm:$0xff]  }
 0x127   :  { %v9796_v36 = vpop.f32.mrb[23].mxu0  ;;  %v2771_v31 = vld [vmem:[%s15265_s3] sm:$0xf] }
 0x128   :  { %v382_v37 = vadd.f32 %v9794_v33, %v10635_v42  ;;  %v9797_v38 = vadd.f32 %v9796_v36, %v9795_v34  ;;  %10002 = vmatprep.mubr.bf16.mxu1 %v424_v35  ;;  %10047 = vmatpush3.bf16.msra.mxu0 %v10290_v23  ;;  %v15291_v33 = vmov 4   ;;  %v10293_v34 = vld [vmem:[%s15267_s9 + $0x28] sm:$0xff]   ;;  %v10283_v23 = vld [vmem:[%s15266_s1 + $0x18] sm:$0xff]  }
 0x129   :  { %10048 = vmatprep.subr.bf16.mxu0 %v10291_v27 }
 0x12a   :  { %v385_v39 = vadd.f32 %v9797_v38, %v10635_v42  ;;  %v414_v40 = vmax.f32 %v382_v37, 0.0  ;;  %v2773_v37 = vld [vmem:[%s15265_s3 + $0x8] sm:$0xf] }
 0x12c   :  { %v415_v41 = vmax.f32 %v385_v39, 0.0  ;;  %v9798_v43 = vpop.f32.mrb[24].mxu0  ;;  %10049 = vmatpush3.bf16.msra.mxu0 %v10291_v27  ;;  %v4664_v27 = vld [vmem:[%s15265_s3 + $0x18] sm:$0xf] }
 0x12d   :  { %v9799_v44 = vpop.f32.mrb[25].mxu0  ;;  %10050 = vmatprep.subr.bf16.mxu0 %v10292_v30 }
 0x12e   :  { %v9800_v45 = vadd.f32 %v9799_v44, %v9798_v43  ;;  %v9801_v46 = vpop.f32.mrb[26].mxu0  ;;  %v425_v47 = vpack.c.bf16 %v415_v41, %v414_v40  ;;  %v2774_v41 = vld [vmem:[%s15265_s3 + $0xc] sm:$0xf]  ;;  %v10294_v43 = vld [vmem:[%s15267_s9 + $0x30] sm:$0xff]  }
 0x12f   :  { %v9802_v48 = vpop.f32.mrb[27].mxu0  ;;  %v2776_v44 = vld [vmem:[%s15265_s3 + $0x14] sm:$0xf] }
 0x130   :  { %v390_v49 = vadd.f32 %v9800_v45, %v10635_v42  ;;  %v9803_v50 = vadd.f32 %v9802_v48, %v9801_v46  ;;  %10003 = vmatmul.mubr.bf16.gmra.mrb[8].mxu1 %v425_v47  ;;  %10051 = vmatpush3.bf16.msra.mxu0 %v10292_v30  ;;  %v2778_v45 = vld [vmem:[%s15265_s3 + $0x1c] sm:$0xf] }
 0x131   :  { %10052 = vmatprep.subr.bf16.mxu0 %v10293_v34 }
 0x132   :  { %v393_v51 = vadd.f32 %v9803_v50, %v10635_v42  ;;  %v416_v52 = vmax.f32 %v390_v49, 0.0 }
 0x134   :  { %v417_v53 = vmax.f32 %v393_v51, 0.0  ;;  %v9804_v54 = vpop.f32.mrb[28].mxu0  ;;  %10053 = vmatpush3.bf16.msra.mxu0 %v10293_v34  ;;  %v3401_v51 = vld [vmem:[%s15265_s3 + $0x4] sm:$0xf]  ;;  %v5289_v34 = vld [vmem:[%s15265_s3 + $0x8] sm:$0xf] }
 0x135   :  { %v9805_v55 = vpop.f32.mrb[29].mxu0  ;;  %10054 = vmatprep.subr.bf16.mxu0 %v10294_v43 }
 0x136   :  { %v9806_v56 = vadd.f32 %v9805_v55, %v9804_v54  ;;  %v9807_v57 = vpop.f32.mrb[30].mxu0  ;;  %v426_v58 = vpack.c.bf16 %v417_v53, %v416_v52  ;;  %v15290_v53 = vmov 6   ;;  %v3402_v54 = vld [vmem:[%s15265_s3 + $0x8] sm:$0xf]  ;;  %v3404_v55 = vld [vmem:[%s15265_s3 + $0x10] sm:$0xf] }
 0x137   :  { %v9808_v59 = vpop.f32.mrb[31].mxu0 }
 0x138   :  { %v398_v60 = vadd.f32 %v9806_v56, %v10635_v42  ;;  %v9809_v61 = vadd.f32 %v9808_v59, %v9807_v57  ;;  %10006 = vmatprep.mubr.bf16.mxu1 %v426_v58  ;;  %10055 = vmatpush3.bf16.msra.mxu0 %v10294_v43  ;;  %v3406_v56 = vld [vmem:[%s15265_s3 + $0x18] sm:$0xf]  ;;  %v5917_v43 = vld [vmem:[%s15265_s3 + $0x4] sm:$0xf] }
 0x13a   :  { %v401_v62 = vadd.f32 %v9809_v61, %v10635_v42  ;;  %v418_v63 = vmax.f32 %v398_v60, 0.0  ;;  %v1516_v42 = vld [vmem:[%s15265_s3 + $0xc] sm:$0xf] }
 0x13b   :  { %1567 = vperm.xlu1 %10172, %v1516_v42  }
 0x13c   :  { %v419_v0 = vmax.f32 %v401_v62, 0.0 }
 0x13e   :  { %v427_v1 = vpack.c.bf16 %v419_v0, %v418_v63  ;;  %v4029_v63 = vld [vmem:[%s15265_s3] sm:$0xf]  ;;  %v15289_v0 = vmov 8  }
 0x13f   :  { %1591 = vperm.xlu1 %10172, %v1518_v5   ;;  %v4034_v5 = vld [vmem:[%s15265_s3 + $0x14] sm:$0xf] }
 0x140   :  { %10007 = vmatmul.mubr.bf16.gmra.mrb[12].mxu1 %v427_v1  ;;  %v4031_v1 = vld [vmem:[%s15265_s3 + $0x8] sm:$0xf] }
 0x141   :  { %10026 = vmatprep.mubr.bf16.mxu1 %v10673_v7 }
 0x143   :  { %1615 = vperm.xlu1 %10172, %v1520_v6  }
 0x147   :  { %1639 = vperm.xlu1 %10172, %v1522_v8  }
 0x14b   :  { %1663 = vperm.xlu1 %10172, %v1524_v9  }
 0x14f   :  { %1687 = vperm.xlu1 %10172, %v1526_v10  }
 0x153   :  { %1711 = vperm.xlu1 %10172, %v1528_v11  }
 0x157   :  { %10174 = vset.pattern.permute.xlu1 %v15293_v12 }
 0x158   :  { %1858 = vperm.xlu1 %10174, %v1829_v13  }
 0x15c   :  { %1870 = vperm.xlu1 %10174, %v1830_v14   ;;  %v4036_v14 = vld [vmem:[%s15265_s3 + $0x1c] sm:$0xf] }
 0x160   :  { %1894 = vperm.xlu1 %10174, %v1832_v15  }
 0x164   :  { %1918 = vperm.xlu1 %10174, %v1834_v16   ;;  %v4659_v16 = vld [vmem:[%s15265_s3 + $0x4] sm:$0xf] }
 0x168   :  { %1942 = vperm.xlu1 %10174, %v1836_v17   ;;  %v10281_v17 = vld [vmem:[%s15266_s1 + $0x8] sm:$0xff]  }
 0x16c   :  { %1966 = vperm.xlu1 %10174, %v1838_v18   ;;  %v10282_v18 = vld [vmem:[%s15266_s1 + $0x10] sm:$0xff]  }
 0x170   :  { %1990 = vperm.xlu1 %10174, %v1840_v21  }
 0x174   :  { %2014 = vperm.xlu1 %10174, %v1842_v22   ;;  %v4662_v22 = vld [vmem:[%s15265_s3 + $0x10] sm:$0xf] }
 0x178   :  { %10176 = vset.pattern.permute.xlu1 %v15292_v25 }
 0x179   :  { %2172 = vperm.xlu1 %10176, %v2143_v24   ;;  %v10284_v24 = vld [vmem:[%s15266_s1 + $0x20] sm:$0xff]  }
 0x17d   :  { %2184 = vperm.xlu1 %10176, %v2144_v26  }
 0x181   :  { %2208 = vperm.xlu1 %10176, %v2146_v28   ;;  %v10285_v28 = vld [vmem:[%s15266_s1 + $0x28] sm:$0xff]  }
 0x185   :  { %2232 = vperm.xlu1 %10176, %v2148_v29   ;;  %v5287_v29 = vld [vmem:[%s15265_s3] sm:$0xf] }
 0x189   :  { %10177 = vset.pattern.permute.xlu1 %v15291_v33 }
 0x18a   :  { %2789 = vperm.xlu1 %10177, %v2771_v31   ;;  %v10286_v31 = vld [vmem:[%s15266_s1 + $0x30] sm:$0xff]  }
 0x18e   :  { %2813 = vperm.xlu1 %10177, %v2773_v37   ;;  %v5290_v37 = vld [vmem:[%s15265_s3 + $0xc] sm:$0xf] }
 0x191   :  { %v10786_v4 = vpop.permute.xlu1 %1531 }
 0x192   :  { %2825 = vperm.xlu1 %10177, %v2774_v41  }
 0x195   :  { %v10791_v9 = vpop.permute.xlu1 %1543 }
 0x196   :  { %2849 = vperm.xlu1 %10177, %v2776_v44   ;;  %v15284_v44 = vmov 14  }
 0x19a   :  { %2873 = vperm.xlu1 %10177, %v2778_v45  }
 0x19e   :  { %10178 = vset.pattern.permute.xlu1 %v15290_v53 }
 0x19f   :  { %3430 = vperm.xlu1 %10178, %v3401_v51   ;;  %v2150_v51 = vld [vmem:[%s15265_s3 + $0x20] sm:$0xf] }
 0x1a3   :  { %3442 = vperm.xlu1 %10178, %v3402_v54  }
 0x1a7   :  { %3466 = vperm.xlu1 %10178, %v3404_v55   ;;  %v2153_v55 = vld [vmem:[%s15265_s3 + $0x2c] sm:$0xf] }
 0x1ab   :  { %3490 = vperm.xlu1 %10178, %v3406_v56  }
 0x1af   :  { %10179 = vset.pattern.permute.xlu1 %v15289_v0 }
 0x1b0   :  { %4047 = vperm.xlu1 %10179, %v4029_v63  }
 0x1b4   :  { %4071 = vperm.xlu1 %10179, %v4031_v1   ;;  %v3411_v1 = vld [vmem:[%s15265_s3 + $0x2c] sm:$0xf] }
 0x1b8   :  { %4083 = vperm.xlu1 %10179, %v4032_v3  }
 0x1ba   :  { %v10796_v15 = vpop.permute.xlu1 %1567 }
 0x1bc   :  { %4107 = vperm.xlu1 %10179, %v4034_v5   ;;  %v10295_v5 = vld [vmem:[%s15267_s9 + $0x38] sm:$0xff]  }
 0x1bd   :  { %10056 = vmatprep.subr.bf16.mxu0 %v10295_v5 }
 0x1be   :  { %v10811_v21 = vpop.permute.xlu1 %1591  ;;  %10057 = vmatpush3.bf16.msra.mxu0 %v10295_v5  ;;  %v2785_v5 = vld [vmem:[%s15265_s3 + $0x38] sm:$0xf] }
 0x1c0   :  { %4131 = vperm.xlu1 %10179, %v4036_v14   ;;  %v15283_v14 = vlaneseq }
 0x1c2   :  { %v10822_v26 = vpop.permute.xlu1 %1615 }
 0x1c4   :  { %10180 = vset.pattern.permute.xlu1 %v15286_v19 }
 0x1c5   :  { %4688 = vperm.xlu1 %10180, %v4659_v16   ;;  %v10409_v16 = vmov 839922192  }
 0x1c6   :  { %v10833_v30 = vpop.permute.xlu1 %1639 }
 0x1c9   :  { %4700 = vperm.xlu1 %10180, %v4660_v20   ;;  %v4668_v20 = vld [vmem:[%s15265_s3 + $0x28] sm:$0xf] }
 0x1cd   :  { %4724 = vperm.xlu1 %10180, %v4662_v22   ;;  %v10945_v22 = vshrl.u32 %v15283_v14, 7 }
 0x1cf   :  { %15570 = vst [vmem:[#allocation10_spill] sm:$0xff] %v10945_v22 }
 0x1d1   :  { %4748 = vperm.xlu1 %10180, %v4664_v27   ;;  %v4669_v27 = vld [vmem:[%s15265_s3 + $0x2c] sm:$0xf] }
 0x1e3   :  { %v9996_v32 = vpop.f32.mrb[0].mxu1 }
 0x1e4   :  { %v526_v35 = vpop.f32.mrb[1].mxu1 }
 0x1e5   :  { %v9997_v36 = vpop.f32.mrb[2].mxu1 }
 0x1e6   :  { %v590_v38 = vpack.c.bf16 %v9997_v36, %v9996_v32  ;;  %v529_v39 = vpop.f32.mrb[3].mxu1  ;;  %v15285_v32 = vmov 12   ;;  %v10287_v36 = vld [vmem:[%s15266_s1 + $0x38] sm:$0xff]  }
 0x1e7   :  { %v589_v40 = vpack.c.bf16 %v529_v39, %v526_v35  ;;  %10181 = vset.pattern.permute.xlu1 %v15285_v32  ;;  %v10842_v35 = vpop.permute.xlu1 %1663 }
 0x1e8   :  { %5305 = vperm.xlu1 %10181, %v5287_v29  }
 0x1e9   :  { %10010 = vmatprep.subr.bf16.mxu1 %v589_v40 }
 0x1ea   :  { %10011 = vmatpush3.bf16.msra.mxu1 %v589_v40  ;;  %v5294_v40 = vld [vmem:[%s15265_s3 + $0x1c] sm:$0xf] }
 0x1eb   :  { %10012 = vmatprep.subr.bf16.mxu1 %v590_v38  ;;  %v10853_v39 = vpop.permute.xlu1 %1687 }
 0x1ec   :  { %5329 = vperm.xlu1 %10181, %v5289_v34   ;;  %v5296_v34 = vld [vmem:[%s15265_s3 + $0x24] sm:$0xf] }
 0x1ee   :  { %10013 = vmatpush3.bf16.msra.mxu1 %v590_v38  ;;  %v5292_v38 = vld [vmem:[%s15265_s3 + $0x14] sm:$0xf] }
 0x1ef   :  { %v10859_v41 = vpop.permute.xlu1 %1711 }
 0x1f0   :  { %5341 = vperm.xlu1 %10181, %v5290_v37  }
 0x1f3   :  { %v10000_v46 = vpop.f32.mrb[4].mxu1  ;;  %v10865_v45 = vpop.permute.xlu1 %1858 }
 0x1f4   :  { %v542_v47 = vpop.f32.mrb[5].mxu1  ;;  %5365 = vperm.xlu1 %10181, %v5292_v38  }
 0x1f5   :  { %v10001_v48 = vpop.f32.mrb[6].mxu1 }
 0x1f6   :  { %v592_v49 = vpack.c.bf16 %v10001_v48, %v10000_v46  ;;  %v545_v50 = vpop.f32.mrb[7].mxu1  ;;  %v5918_v46 = vld [vmem:[%s15265_s3 + $0x8] sm:$0xf] }
 0x1f7   :  { %v591_v52 = vpack.c.bf16 %v545_v50, %v542_v47  ;;  %v5920_v47 = vld [vmem:[%s15265_s3 + $0x10] sm:$0xf]  ;;  %v10873_v48 = vpop.permute.xlu1 %1870 }
 0x1f8   :  { %5389 = vperm.xlu1 %10181, %v5294_v40   ;;  %v5297_v40 = vld [vmem:[%s15265_s3 + $0x28] sm:$0xf] }
 0x1f9   :  { %10014 = vmatprep.subr.bf16.mxu1 %v591_v52 }
 0x1fa   :  { %10015 = vmatpush3.bf16.msra.mxu1 %v591_v52  ;;  %v2152_v52 = vld [vmem:[%s15265_s3 + $0x28] sm:$0xf] }
 0x1fb   :  { %10016 = vmatprep.subr.bf16.mxu1 %v592_v49  ;;  %v10878_v50 = vpop.permute.xlu1 %1894 }
 0x1fc   :  { %10182 = vset.pattern.permute.xlu1 %v15284_v44 }
 0x1fd   :  { %5946 = vperm.xlu1 %10182, %v5917_v43  }
 0x1fe   :  { %10017 = vmatpush3.bf16.msra.mxu1 %v592_v49  ;;  %v5922_v49 = vld [vmem:[%s15265_s3 + $0x18] sm:$0xf] }
 0x1ff   :  { %v10887_v54 = vpop.permute.xlu1 %1918 }
 0x201   :  { %5958 = vperm.xlu1 %10182, %v5918_v46   ;;  %v5924_v46 = vld [vmem:[%s15265_s3 + $0x20] sm:$0xf] }
 0x203   :  { %v10004_v57 = vpop.f32.mrb[8].mxu1  ;;  %v10892_v56 = vpop.permute.xlu1 %1942 }
 0x204   :  { %v558_v58 = vpop.f32.mrb[9].mxu1 }
 0x205   :  { %v10005_v59 = vpop.f32.mrb[10].mxu1  ;;  %5982 = vperm.xlu1 %10182, %v5920_v47  }
 0x206   :  { %v594_v60 = vpack.c.bf16 %v10005_v59, %v10004_v57  ;;  %v561_v61 = vpop.f32.mrb[11].mxu1  ;;  %v2780_v57 = vld [vmem:[%s15265_s3 + $0x24] sm:$0xf]  ;;  %v2781_v59 = vld [vmem:[%s15265_s3 + $0x28] sm:$0xf] }
 0x207   :  { %v593_v62 = vpack.c.bf16 %v561_v61, %v558_v58  ;;  %v10898_v58 = vpop.permute.xlu1 %1966 }
 0x209   :  { %10018 = vmatprep.subr.bf16.mxu1 %v593_v62  ;;  %6006 = vperm.xlu1 %10182, %v5922_v49   ;;  %v5926_v49 = vld [vmem:[%s15265_s3 + $0x28] sm:$0xf] }
 0x20a   :  { %10019 = vmatpush3.bf16.msra.mxu1 %v593_v62  ;;  %v3410_v62 = vld [vmem:[%s15265_s3 + $0x28] sm:$0xf] }
 0x20b   :  { %10020 = vmatprep.subr.bf16.mxu1 %v594_v60  ;;  %v10906_v61 = vpop.permute.xlu1 %1990 }
 0x20c   :  { %15563 = vst [vmem:[#allocation3_spill] sm:$0xff] %v10906_v61 }
 0x20d   :  { %10183 = vset.pattern.permute.xlu1 %v15292_v25 }
 0x20e   :  { %10021 = vmatpush3.bf16.msra.mxu1 %v594_v60  ;;  %2256 = vperm.xlu1 %10183, %v2150_v51   ;;  %v3408_v60 = vld [vmem:[%s15265_s3 + $0x20] sm:$0xf] }
 0x20f   :  { %v10912_v63 = vpop.permute.xlu1 %2014 }
 0x210   :  { %15564 = vst [vmem:[#allocation4_spill] sm:$0xff] %v10912_v63 }
 0x212   :  { %2280 = vperm.xlu1 %10183, %v2152_v52   ;;  %v5927_v52 = vld [vmem:[%s15265_s3 + $0x2c] sm:$0xf] }
 0x213   :  { %v10008_v42 = vpop.f32.mrb[12].mxu1  ;;  %v10917_v3 = vpop.permute.xlu1 %2172 }
 0x214   :  { %v574_v6 = vpop.f32.mrb[13].mxu1  ;;  %15565 = vst [vmem:[#allocation5_spill] sm:$0xff] %v10917_v3 }
 0x215   :  { %v10009_v8 = vpop.f32.mrb[14].mxu1 }
 0x216   :  { %v596_v10 = vpack.c.bf16 %v10009_v8, %v10008_v42  ;;  %v577_v11 = vpop.f32.mrb[15].mxu1  ;;  %2292 = vperm.xlu1 %10183, %v2153_v55   ;;  %v4038_v42 = vld [vmem:[%s15265_s3 + $0x24] sm:$0xf]  ;;  %v4039_v8 = vld [vmem:[%s15265_s3 + $0x28] sm:$0xf] }
 0x217   :  { %v595_v13 = vpack.c.bf16 %v577_v11, %v574_v6  ;;  %v10926_v6 = vpop.permute.xlu1 %2184 }
 0x218   :  { %15566 = vst [vmem:[#allocation6_spill] sm:$0xff] %v10926_v6 }
 0x219   :  { %10022 = vmatprep.subr.bf16.mxu1 %v595_v13 }
 0x21a   :  { %10023 = vmatpush3.bf16.msra.mxu1 %v595_v13  ;;  %10184 = vset.pattern.permute.xlu1 %v15291_v33  ;;  %v4666_v13 = vld [vmem:[%s15265_s3 + $0x20] sm:$0xf] }
 0x21b   :  { %10024 = vmatprep.subr.bf16.mxu1 %v596_v10  ;;  %2897 = vperm.xlu1 %10184, %v2780_v57   ;;  %v2155_v57 = vld [vmem:[%s15265_s3 + $0x34] sm:$0xf] }
 0x21e   :  { %10025 = vmatpush3.bf16.msra.mxu1 %v596_v10  ;;  %v10931_v10 = vpop.permute.xlu1 %2208 }
 0x21f   :  { %2909 = vperm.xlu1 %10184, %v2781_v59   ;;  %15567 = vst [vmem:[#allocation7_spill] sm:$0xff] %v10931_v10 }
 0x221   :  { %10027 = vmatmul.mubr.bf16.vlgmr.msra.gmra.mrb[16].mxu1 %v10281_v17  ;;  %v1535_v17 = vunpack.c.l.s4 %v10409_v16 }
 0x222   :  { %10030 = vmatprep.mubr.bf16.mxu1 %v10282_v18  ;;  %v10934_v11 = vpop.permute.xlu1 %2232 }
 0x223   :  { %10185 = vset.pattern.permute.xlu1 %v15290_v53  ;;  %15568 = vst [vmem:[#allocation8_spill] sm:$0xff] %v10934_v11 }
 0x224   :  { %3514 = vperm.xlu1 %10185, %v3408_v60   ;;  %v2156_v60 = vld [vmem:[%s15265_s3 + $0x38] sm:$0xf] }
 0x226   :  { %v10939_v18 = vpop.permute.xlu1 %2789 }
 0x227   :  { %15569 = vst [vmem:[#allocation9_spill] sm:$0xff] %v10939_v18 }
 0x228   :  { %3538 = vperm.xlu1 %10185, %v3410_v62  }
 0x229   :  { %10031 = vmatmul.mubr.bf16.gmra.mrb[20].mxu1 %v10283_v23  ;;  %v1536_v23 = vunpack.c.0.s8 %v1535_v17  ;;  %v2786_v17 = vld [vmem:[%s15265_s3 + $0x3c] sm:$0xf] }
 0x22a   :  { %10034 = vmatprep.mubr.bf16.mxu1 %v10284_v24  ;;  %v2814_v24 = vpop.permute.xlu1 %2813 }
 0x22c   :  { %3550 = vperm.xlu1 %10185, %v3411_v1   ;;  %v2783_v1 = vld [vmem:[%s15265_s3 + $0x30] sm:$0xf] }
 0x22e   :  { %v2826_v29 = vpop.permute.xlu1 %2825 }
 0x230   :  { %10186 = vset.pattern.permute.xlu1 %v15289_v0 }
 0x231   :  { %10035 = vmatmul.mubr.bf16.gmra.mrb[24].mxu1 %v10285_v28  ;;  %4155 = vperm.xlu1 %10186, %v4038_v42   ;;  %v10951_v28 = vsub.s32 %v1536_v23, %v10945_v22 }
 0x232   :  { %10038 = vmatprep.mubr.bf16.mxu1 %v10286_v31  ;;  %v10959_v37 = vpop.permute.xlu1 %2849 }
 0x233   :  { %v2822_v31 = vrot.slane %v2814_v24, %v10951_v28  ;;  %15571 = vst [vmem:[#allocation11_spill] sm:$0xff] %v10959_v37  ;;  %v3413_v24 = vld [vmem:[%s15265_s3 + $0x34] sm:$0xf] }
 0x235   :  { %4167 = vperm.xlu1 %10186, %v4039_v8  }
 0x236   :  { %v10966_v43 = vpop.permute.xlu1 %2873 }
 0x237   :  { %15573 = vst [vmem:[#allocation13_spill] sm:$0xff] %v10966_v43 }
 0x239   :  { %10039 = vmatmul.mubr.bf16.gmra.mrb[28].mxu1 %v10287_v36  ;;  %10187 = vset.pattern.permute.xlu1 %v15286_v19  ;;  %v2834_v36 = vrot.slane %v2826_v29, %v10951_v28  ;;  %v3414_v29 = vld [vmem:[%s15265_s3 + $0x38] sm:$0xf] }
 0x23a   :  { %10090 = vmatprep.mubr.bf16.mxu1 %v10673_v7  ;;  %4772 = vperm.xlu1 %10187, %v4666_v13   ;;  %v10972_v47 = vpop.permute.xlu1 %3430 }
 0x23b   :  { %v10961_v38 = vcombine.low %v2822_v31, %v2834_v36  ;;  %15574 = vst [vmem:[#allocation14_spill] sm:$0xff] %v10972_v47  ;;  %v4041_v36 = vld [vmem:[%s15265_s3 + $0x30] sm:$0xf] }
 0x23d   :  { %15572 = vst [vmem:[#allocation12_spill] sm:$0xff] %v10961_v38 }
 0x23e   :  { %4796 = vperm.xlu1 %10187, %v4668_v20   ;;  %v10977_v51 = vpop.permute.xlu1 %3442 }
 0x23f   :  { %15575 = vst [vmem:[#allocation15_spill] sm:$0xff] %v10977_v51  ;;  %v5293_v51 = vld [vmem:[%s15265_s3 + $0x18] sm:$0xf] }
 0x242   :  { %4808 = vperm.xlu1 %10187, %v4669_v27   ;;  %v10982_v55 = vpop.permute.xlu1 %3466 }
 0x243   :  { %15576 = vst [vmem:[#allocation16_spill] sm:$0xff] %v10982_v55 }
 0x246   :  { %10188 = vset.pattern.permute.xlu1 %v15285_v32  ;;  %v10988_v59 = vpop.permute.xlu1 %3490 }
 0x247   :  { %5413 = vperm.xlu1 %10188, %v5296_v34   ;;  %15577 = vst [vmem:[#allocation17_spill] sm:$0xff] %v10988_v59 }
 0x24a   :  { %v10993_v62 = vpop.permute.xlu1 %4047 }
 0x24b   :  { %5425 = vperm.xlu1 %10188, %v5297_v40   ;;  %15578 = vst [vmem:[#allocation18_spill] sm:$0xff] %v10993_v62 }
 0x24e   :  { %v4072_v42 = vpop.permute.xlu1 %4071 }
 0x24f   :  { %10189 = vset.pattern.permute.xlu1 %v15284_v44  ;;  %v4080_v8 = vrot.slane %v4072_v42, %v10951_v28  ;;  %v4672_v42 = vld [vmem:[%s15265_s3 + $0x38] sm:$0xf] }
 0x250   :  { %6030 = vperm.xlu1 %10189, %v5924_v46   ;;  %v4043_v46 = vld [vmem:[%s15265_s3 + $0x38] sm:$0xf] }
 0x252   :  { %v4084_v13 = vpop.permute.xlu1 %4083 }
 0x253   :  { %v4092_v16 = vrot.slane %v4084_v13, %v10951_v28 }
 0x254   :  { %6054 = vperm.xlu1 %10189, %v5926_v49  }
 0x255   :  { %v11007_v20 = vcombine.low %v4080_v8, %v4092_v16  ;;  %v5299_v16 = vld [vmem:[%s15265_s3 + $0x30] sm:$0xf] }
 0x256   :  { %v11009_v23 = vpop.permute.xlu1 %4107 }
 0x257   :  { %15579 = vst [vmem:[#allocation19_spill] sm:$0xff] %v11007_v20  ;;  %15580 = vst [vmem:[#allocation20_spill] sm:$0xff] %v11009_v23 }
 0x258   :  { %6066 = vperm.xlu1 %10189, %v5927_v52   ;;  %v4044_v52 = vld [vmem:[%s15265_s3 + $0x3c] sm:$0xf] }
 0x25a   :  { %v11014_v27 = vpop.permute.xlu1 %4131 }
 0x25b   :  { %15581 = vst [vmem:[#allocation21_spill] sm:$0xff] %v11014_v27 }
 0x25c   :  { %10190 = vset.pattern.permute.xlu1 %v15292_v25 }
 0x25d   :  { %2316 = vperm.xlu1 %10190, %v2155_v57  }
 0x25e   :  { %v11020_v31 = vpop.permute.xlu1 %4688 }
 0x25f   :  { %15582 = vst [vmem:[#allocation22_spill] sm:$0xff] %v11020_v31  ;;  %v15670_v31 = vmov 0  }
 0x261   :  { %2328 = vperm.xlu1 %10190, %v2156_v60   ;;  %v4671_v60 = vld [vmem:[%s15265_s3 + $0x34] sm:$0xf] }
 0x262   :  { %v11022_v34 = vpop.permute.xlu1 %4700 }
 0x263   :  { %15583 = vst [vmem:[#allocation23_spill] sm:$0xff] %v11022_v34  ;;  %v11598_v34 = vld [vmem:[%s15266_s1 + $0x38] sm:$0xff]  }
 0x265   :  { %10192 = vset.pattern.permute.xlu1 %v15291_v33 }
 0x266   :  { %2933 = vperm.xlu1 %10192, %v2783_v1   ;;  %v11028_v40 = vpop.permute.xlu1 %4724 }
 0x267   :  { %15584 = vst [vmem:[#allocation24_spill] sm:$0xff] %v11028_v40 }
 0x26a   :  { %2957 = vperm.xlu1 %10192, %v2785_v5   ;;  %v11033_v49 = vpop.permute.xlu1 %4748 }
 0x26b   :  { %15585 = vst [vmem:[#allocation25_spill] sm:$0xff] %v11033_v49 }
 0x26e   :  { %2969 = vperm.xlu1 %10192, %v2786_v17   ;;  %v11038_v57 = vpop.permute.xlu1 %5305 }
 0x26f   :  { %15586 = vst [vmem:[#allocation26_spill] sm:$0xff] %v11038_v57 }
 0x272   :  { %10194 = vset.pattern.permute.xlu1 %v15290_v53  ;;  %v5330_v1 = vpop.permute.xlu1 %5329 }
 0x273   :  { %3574 = vperm.xlu1 %10194, %v3413_v24   ;;  %v5338_v5 = vrot.slane %v5330_v1, %v10951_v28 }
 0x276   :  { %v5342_v8 = vpop.permute.xlu1 %5341 }
 0x277   :  { %3586 = vperm.xlu1 %10194, %v3414_v29   ;;  %v5350_v13 = vrot.slane %v5342_v8, %v10951_v28  ;;  %v5301_v29 = vld [vmem:[%s15265_s3 + $0x38] sm:$0xf] }
 0x279   :  { %v11052_v17 = vcombine.low %v5338_v5, %v5350_v13  ;;  %v2457_v13 = vld [vmem:[%s15265_s3] sm:$0xf] }
 0x27a   :  { %v11055_v24 = vpop.permute.xlu1 %5365 }
 0x27b   :  { %10196 = vset.pattern.permute.xlu1 %v15289_v0  ;;  %15587 = vst [vmem:[#allocation27_spill] sm:$0xff] %v11052_v17  ;;  %15588 = vst [vmem:[#allocation28_spill] sm:$0xff] %v11055_v24 }
 0x27c   :  { %4191 = vperm.xlu1 %10196, %v4041_v36  }
 0x27e   :  { %v11060_v36 = vpop.permute.xlu1 %5389 }
 0x27f   :  { %15589 = vst [vmem:[#allocation29_spill] sm:$0xff] %v11060_v36 }
 0x280   :  { %4215 = vperm.xlu1 %10196, %v4043_v46   ;;  %v5302_v46 = vld [vmem:[%s15265_s3 + $0x3c] sm:$0xf] }
 0x284   :  { %4227 = vperm.xlu1 %10196, %v4044_v52   ;;  %v11065_v52 = vpop.permute.xlu1 %5946 }
 0x285   :  { %15590 = vst [vmem:[#allocation30_spill] sm:$0xff] %v11065_v52 }
 0x288   :  { %10198 = vset.pattern.permute.xlu1 %v15286_v19  ;;  %v11070_v1 = vpop.permute.xlu1 %5958 }
 0x289   :  { %4832 = vperm.xlu1 %10198, %v4671_v60   ;;  %v5929_v60 = vld [vmem:[%s15265_s3 + $0x34] sm:$0xf]  ;;  %15591 = vst [vmem:[#allocation31_spill] sm:$0xff] %v11070_v1 }
 0x28c   :  { %v11076_v5 = vpop.permute.xlu1 %5982 }
 0x28d   :  { %4844 = vperm.xlu1 %10198, %v4672_v42   ;;  %v5930_v42 = vld [vmem:[%s15265_s3 + $0x38] sm:$0xf]  ;;  %15592 = vst [vmem:[#allocation32_spill] sm:$0xff] %v11076_v5 }
 0x290   :  { %v11078_v8 = vpop.permute.xlu1 %6006 }
 0x291   :  { %10200 = vset.pattern.permute.xlu1 %v15285_v32  ;;  %15593 = vst [vmem:[#allocation33_spill] sm:$0xff] %v11078_v8 }
 0x292   :  { %5449 = vperm.xlu1 %10200, %v5299_v16   ;;  %v15295_v16 = vmov 3  }
 0x296   :  { %5473 = vperm.xlu1 %10200, %v5301_v29   ;;  %v11084_v29 = vpop.permute.xlu1 %2256 }
 0x297   :  { %15594 = vst [vmem:[#allocation34_spill] sm:$0xff] %v11084_v29 }
 0x29a   :  { %5485 = vperm.xlu1 %10200, %v5302_v46   ;;  %v2459_v46 = vld [vmem:[%s15265_s3 + $0x8] sm:$0xf]  ;;  %v2281_v32 = vpop.permute.xlu1 %2280 }
 0x29b   :  { %v2289_v25 = vrot.slane %v2281_v32, %v10951_v28 }
 0x29e   :  { %10202 = vset.pattern.permute.xlu1 %v15284_v44 }
 0x29f   :  { %6090 = vperm.xlu1 %10202, %v5929_v60   ;;  %v11092_v60 = vld [vmem:[%s15268_s8] ss:$0 sm:$0xff] }
 0x2a3   :  { %6102 = vperm.xlu1 %10202, %v5930_v42  }
 0x2a7   :  { %10203 = vset.pattern.permute.xlu1 %v15295_v16  ;;  %v2462_v16 = vld [vmem:[%s15265_s3 + $0x14] sm:$0xf] }
 0x2a8   :  { %2475 = vperm.xlu1 %10203, %v2457_v13   ;;  %v2460_v13 = vld [vmem:[%s15265_s3 + $0xc] sm:$0xf] }
 0x2ac   :  { %2499 = vperm.xlu1 %10203, %v2459_v46  }
 0x2b0   :  { %2511 = vperm.xlu1 %10203, %v2460_v13  }
 0x2b4   :  { %2535 = vperm.xlu1 %10203, %v2462_v16  }
 0x2f4   :  { %v10028_v42 = vpop.f32.mrb[16].mxu1 }
 0x2f5   :  { %v695_v14 = vadd.f32 %v10028_v42, %v11092_v60  ;;  %v686_v44 = vpop.f32.mrb[17].mxu1  ;;  %v2293_v42 = vpop.permute.xlu1 %2292 }
 0x2f6   :  { %v687_v19 = vadd.f32 %v11092_v60, %v686_v44  ;;  %v10029_v2 = vpop.f32.mrb[18].mxu1  ;;  %v2301_v44 = vrot.slane %v2293_v42, %v10951_v28 }
 0x2f7   :  { %v698_v0 = vadd.f32 %v10029_v2, %v11092_v60  ;;  %v689_v53 = vpop.f32.mrb[19].mxu1  ;;  %v751_v46 = vmax.f32 %v695_v14, 0.0 }
 0x2f8   :  { %v690_v33 = vadd.f32 %v11092_v60, %v689_v53  ;;  %v749_v17 = vmax.f32 %v687_v19, 0.0  ;;  %v11106_v29 = vcombine.low %v2289_v25, %v2301_v44  ;;  %v3087_v44 = vld [vmem:[%s15265_s3 + $0x4] sm:$0xf] }
 0x2f9   :  { %v752_v12 = vmax.f32 %v698_v0, 0.0  ;;  %v11109_v14 = vpop.permute.xlu1 %2897  ;;  %v2464_v0 = vld [vmem:[%s15265_s3 + $0x1c] sm:$0xf] }
 0x2fa   :  { %v750_v20 = vmax.f32 %v690_v33, 0.0  ;;  %15595 = vst [vmem:[#allocation35_spill] sm:$0xff] %v11106_v29  ;;  %15596 = vst [vmem:[#allocation36_spill] sm:$0xff] %v11109_v14  ;;  %2559 = vperm.xlu1 %10203, %v2464_v0   ;;  %v15304_v29 = vmov 5  }
 0x2fb   :  { %v766_v38 = vpack.c.bf16 %v752_v12, %v751_v46 }
 0x2fc   :  { %v765_v22 = vpack.c.bf16 %v750_v20, %v749_v17  ;;  %v10032_v2 = vpop.f32.mrb[20].mxu1 }
 0x2fd   :  { %v711_v53 = vadd.f32 %v10032_v2, %v11092_v60  ;;  %v702_v32 = vpop.f32.mrb[21].mxu1  ;;  %v11117_v13 = vpop.permute.xlu1 %2909 }
 0x2fe   :  { %v703_v19 = vadd.f32 %v11092_v60, %v702_v32  ;;  %v10033_v33 = vpop.f32.mrb[22].mxu1  ;;  %10058 = vmatprep.mubr.bf16.mxu0 %v765_v22  ;;  %15597 = vst [vmem:[#allocation37_spill] sm:$0xff] %v11117_v13  ;;  %10205 = vset.pattern.permute.xlu1 %v15304_v29 }
 0x2ff   :  { %v714_v12 = vadd.f32 %v10033_v33, %v11092_v60  ;;  %v705_v20 = vpop.f32.mrb[23].mxu1  ;;  %10059 = vmatmul.mubr.bf16.vlgmr.msra.gmra.mrb[32].mxu0 %v766_v38  ;;  %v755_v17 = vmax.f32 %v711_v53, 0.0  ;;  %3116 = vperm.xlu1 %10205, %v3087_v44  }
 0x300   :  { %v706_v25 = vadd.f32 %v11092_v60, %v705_v20  ;;  %v753_v46 = vmax.f32 %v703_v19, 0.0 }
 0x301   :  { %v756_v16 = vmax.f32 %v714_v12, 0.0  ;;  %v11124_v53 = vpop.permute.xlu1 %3514  ;;  %v3088_v12 = vld [vmem:[%s15265_s3 + $0x8] sm:$0xf] }
 0x302   :  { %v754_v42 = vmax.f32 %v706_v25, 0.0  ;;  %15598 = vst [vmem:[#allocation38_spill] sm:$0xff] %v11124_v53 }
 0x303   :  { %v768_v2 = vpack.c.bf16 %v756_v16, %v755_v17  ;;  %3128 = vperm.xlu1 %10205, %v3088_v12  }
 0x304   :  { %v767_v32 = vpack.c.bf16 %v754_v42, %v753_v46  ;;  %v10036_v22 = vpop.f32.mrb[24].mxu1 }
 0x305   :  { %v727_v38 = vadd.f32 %v10036_v22, %v11092_v60  ;;  %v718_v33 = vpop.f32.mrb[25].mxu1  ;;  %v3539_v42 = vpop.permute.xlu1 %3538 }
 0x306   :  { %v719_v0 = vadd.f32 %v11092_v60, %v718_v33  ;;  %v10037_v19 = vpop.f32.mrb[26].mxu1  ;;  %10062 = vmatprep.mubr.bf16.mxu0 %v767_v32  ;;  %v3090_v32 = vld [vmem:[%s15265_s3 + $0x10] sm:$0xf]  ;;  %v3547_v13 = vrot.slane %v3539_v42, %v10951_v28 }
 0x307   :  { %v730_v20 = vadd.f32 %v10037_v19, %v11092_v60  ;;  %v721_v25 = vpop.f32.mrb[27].mxu1  ;;  %10063 = vmatmul.mubr.bf16.gmra.mrb[36].mxu0 %v768_v2  ;;  %v759_v16 = vmax.f32 %v727_v38, 0.0  ;;  %3152 = vperm.xlu1 %10205, %v3090_v32  }
 0x308   :  { %v722_v17 = vadd.f32 %v11092_v60, %v721_v25  ;;  %v757_v44 = vmax.f32 %v719_v0, 0.0 }
 0x309   :  { %v760_v46 = vmax.f32 %v730_v20, 0.0  ;;  %v3551_v25 = vpop.permute.xlu1 %3550  ;;  %v3092_v20 = vld [vmem:[%s15265_s3 + $0x18] sm:$0xf] }
 0x30a   :  { %v758_v22 = vmax.f32 %v722_v17, 0.0  ;;  %v3559_v0 = vrot.slane %v3551_v25, %v10951_v28  ;;  %v3715_v25 = vld [vmem:[%s15265_s3] sm:$0xf] }
 0x30b   :  { %v770_v33 = vpack.c.bf16 %v760_v46, %v759_v16  ;;  %3176 = vperm.xlu1 %10205, %v3092_v20  }
 0x30c   :  { %v769_v29 = vpack.c.bf16 %v758_v22, %v757_v44  ;;  %v10040_v53 = vpop.f32.mrb[28].mxu1 }
 0x30d   :  { %v743_v19 = vadd.f32 %v10040_v53, %v11092_v60  ;;  %v734_v2 = vpop.f32.mrb[29].mxu1  ;;  %v11144_v53 = vcombine.low %v3547_v13, %v3559_v0  ;;  %v11146_v22 = vpop.permute.xlu1 %4155 }
 0x30e   :  { %v735_v38 = vadd.f32 %v11092_v60, %v734_v2  ;;  %v10041_v12 = vpop.f32.mrb[30].mxu1  ;;  %10066 = vmatprep.mubr.bf16.mxu0 %v769_v29  ;;  %15600 = vst [vmem:[#allocation40_spill] sm:$0xff] %v11146_v22 }
 0x30f   :  { %v746_v17 = vadd.f32 %v10041_v12, %v11092_v60  ;;  %v737_v16 = vpop.f32.mrb[31].mxu1  ;;  %10067 = vmatmul.mubr.bf16.gmra.mrb[40].mxu0 %v770_v33  ;;  %15599 = vst [vmem:[#allocation39_spill] sm:$0xff] %v11144_v53  ;;  %v763_v42 = vmax.f32 %v743_v19, 0.0  ;;  %v15313_v12 = vmov 7   ;;  %v3718_v19 = vld [vmem:[%s15265_s3 + $0xc] sm:$0xf] }
 0x310   :  { %v738_v46 = vadd.f32 %v11092_v60, %v737_v16  ;;  %v761_v29 = vmax.f32 %v735_v38, 0.0  ;;  %10206 = vset.pattern.permute.xlu1 %v15313_v12  ;;  %v3717_v60 = vld [vmem:[%s15265_s3 + $0x8] sm:$0xf] }
 0x311   :  { %v764_v44 = vmax.f32 %v746_v17, 0.0  ;;  %v11152_v33 = vpop.permute.xlu1 %4167  ;;  %3733 = vperm.xlu1 %10206, %v3715_v25   ;;  %v4348_v25 = vld [vmem:[%s15265_s3 + $0x10] sm:$0xf] }
 0x312   :  { %v762_v32 = vmax.f32 %v738_v46, 0.0  ;;  %15601 = vst [vmem:[#allocation41_spill] sm:$0xff] %v11152_v33  ;;  %v15654_v33 = vmov 6  }
 0x313   :  { %v772_v2 = vpack.c.bf16 %v764_v44, %v763_v42  ;;  %v4345_v42 = vld [vmem:[%s15265_s3 + $0x4] sm:$0xf] }
 0x314   :  { %v771_v14 = vpack.c.bf16 %v762_v32, %v761_v29  ;;  %v15311_v29 = vmov 9   ;;  %v4346_v32 = vld [vmem:[%s15265_s3 + $0x8] sm:$0xf] }
 0x315   :  { %v11158_v13 = vpop.permute.xlu1 %4772  ;;  %3757 = vperm.xlu1 %10206, %v3717_v60  }
 0x316   :  { %10070 = vmatprep.mubr.bf16.mxu0 %v771_v14  ;;  %15602 = vst [vmem:[#allocation42_spill] sm:$0xff] %v11158_v13  ;;  %v3720_v14 = vld [vmem:[%s15265_s3 + $0x14] sm:$0xf] }
 0x317   :  { %10071 = vmatmul.mubr.bf16.gmra.mrb[44].mxu0 %v772_v2 }
 0x318   :  { %10122 = vmatprep.mubr.bf16.mxu0 %v10673_v7  ;;  %v3722_v7 = vld [vmem:[%s15265_s3 + $0x1c] sm:$0xf] }
 0x319   :  { %v4797_v38 = vpop.permute.xlu1 %4796  ;;  %3769 = vperm.xlu1 %10206, %v3718_v19  }
 0x31a   :  { %v4805_v0 = vrot.slane %v4797_v38, %v10951_v28  ;;  %v4350_v38 = vld [vmem:[%s15265_s3 + $0x18] sm:$0xf] }
 0x31d   :  { %v4809_v20 = vpop.permute.xlu1 %4808  ;;  %3793 = vperm.xlu1 %10206, %v3720_v14  }
 0x31e   :  { %v4817_v17 = vrot.slane %v4809_v20, %v10951_v28 }
 0x320   :  { %v11171_v16 = vcombine.low %v4805_v0, %v4817_v17 }
 0x321   :  { %v11173_v46 = vpop.permute.xlu1 %5413  ;;  %3817 = vperm.xlu1 %10206, %v3722_v7   ;;  %v4973_v7 = vld [vmem:[%s15265_s3] sm:$0xf] }
 0x322   :  { %15603 = vst [vmem:[#allocation43_spill] sm:$0xff] %v11171_v16  ;;  %15604 = vst [vmem:[#allocation44_spill] sm:$0xff] %v11173_v46  ;;  %v15316_v16 = vmov 13  }
 0x325   :  { %v11178_v44 = vpop.permute.xlu1 %5425  ;;  %10207 = vset.pattern.permute.xlu1 %v15311_v29 }
 0x326   :  { %15605 = vst [vmem:[#allocation45_spill] sm:$0xff] %v11178_v44  ;;  %4374 = vperm.xlu1 %10207, %v4345_v42   ;;  %v15309_v42 = vmov 11  }
 0x329   :  { %v11184_v2 = vpop.permute.xlu1 %6030 }
 0x32a   :  { %15606 = vst [vmem:[#allocation46_spill] sm:$0xff] %v11184_v2  ;;  %4386 = vperm.xlu1 %10207, %v4346_v32  }
 0x32d   :  { %v6055_v60 = vpop.permute.xlu1 %6054 }
 0x32e   :  { %4410 = vperm.xlu1 %10207, %v4348_v25   ;;  %v6063_v19 = vrot.slane %v6055_v60, %v10951_v28  ;;  %v4975_v25 = vld [vmem:[%s15265_s3 + $0x8] sm:$0xf] }
 0x331   :  { %v6067_v14 = vpop.permute.xlu1 %6066 }
 0x332   :  { %v6075_v0 = vrot.slane %v6067_v14, %v10951_v28  ;;  %4434 = vperm.xlu1 %10207, %v4350_v38   ;;  %v4978_v14 = vld [vmem:[%s15265_s3 + $0x14] sm:$0xf] }
 0x334   :  { %v11194_v20 = vcombine.low %v6063_v19, %v6075_v0  ;;  %v4976_v19 = vld [vmem:[%s15265_s3 + $0xc] sm:$0xf] }
 0x335   :  { %v11196_v17 = vpop.permute.xlu1 %2316 }
 0x336   :  { %15607 = vst [vmem:[#allocation47_spill] sm:$0xff] %v11194_v20  ;;  %15608 = vst [vmem:[#allocation48_spill] sm:$0xff] %v11196_v17  ;;  %10208 = vset.pattern.permute.xlu1 %v15309_v42  ;;  %v1843_v17 = vld [vmem:[%s15265_s3 + $0x3c] sm:$0xf] }
 0x337   :  { %4991 = vperm.xlu1 %10208, %v4973_v7  }
 0x339   :  { %v11202_v32 = vpop.permute.xlu1 %2328 }
 0x33a   :  { %15609 = vst [vmem:[#allocation49_spill] sm:$0xff] %v11202_v32  ;;  %v1839_v32 = vld [vmem:[%s15265_s3 + $0x2c] sm:$0xf] }
 0x33b   :  { %5015 = vperm.xlu1 %10208, %v4975_v25   ;;  %v4980_v25 = vld [vmem:[%s15265_s3 + $0x1c] sm:$0xf] }
 0x33d   :  { %v11207_v60 = vpop.permute.xlu1 %2933 }
 0x33e   :  { %15610 = vst [vmem:[#allocation50_spill] sm:$0xff] %v11207_v60  ;;  %v15630_v60 = vmov 7  }
 0x33f   :  { %5027 = vperm.xlu1 %10208, %v4976_v19   ;;  %v5603_v19 = vld [vmem:[%s15265_s3 + $0x4] sm:$0xf] }
 0x341   :  { %v2958_v38 = vpop.permute.xlu1 %2957 }
 0x342   :  { %v2966_v0 = vrot.slane %v2958_v38, %v10951_v28 }
 0x343   :  { %5051 = vperm.xlu1 %10208, %v4978_v14   ;;  %v5604_v14 = vld [vmem:[%s15265_s3 + $0x8] sm:$0xf] }
 0x345   :  { %v2970_v7 = vpop.permute.xlu1 %2969 }
 0x346   :  { %v2978_v42 = vrot.slane %v2970_v7, %v10951_v28 }
 0x347   :  { %5075 = vperm.xlu1 %10208, %v4980_v25  }
 0x348   :  { %v11220_v29 = vcombine.low %v2966_v0, %v2978_v42  ;;  %v5606_v0 = vld [vmem:[%s15265_s3 + $0x10] sm:$0xf] }
 0x349   :  { %v11222_v12 = vpop.permute.xlu1 %3574 }
 0x34a   :  { %15611 = vst [vmem:[#allocation51_spill] sm:$0xff] %v11220_v29  ;;  %15612 = vst [vmem:[#allocation52_spill] sm:$0xff] %v11222_v12 }
 0x34b   :  { %10209 = vset.pattern.permute.xlu1 %v15316_v16 }
 0x34c   :  { %5632 = vperm.xlu1 %10209, %v5603_v19   ;;  %v5608_v19 = vld [vmem:[%s15265_s3 + $0x18] sm:$0xf] }
 0x34d   :  { %v11228_v38 = vpop.permute.xlu1 %3586 }
 0x34e   :  { %15613 = vst [vmem:[#allocation53_spill] sm:$0xff] %v11228_v38  ;;  %v15628_v38 = vmov 1  }
 0x350   :  { %5644 = vperm.xlu1 %10209, %v5604_v14   ;;  %v15321_v14 = vmov 15  }
 0x351   :  { %v11233_v42 = vpop.permute.xlu1 %4191 }
 0x352   :  { %15614 = vst [vmem:[#allocation54_spill] sm:$0xff] %v11233_v42  ;;  %v3094_v42 = vld [vmem:[%s15265_s3 + $0x20] sm:$0xf] }
 0x354   :  { %5668 = vperm.xlu1 %10209, %v5606_v0   ;;  %v6231_v0 = vld [vmem:[%s15265_s3] sm:$0xf] }
 0x355   :  { %v4216_v7 = vpop.permute.xlu1 %4215 }
 0x356   :  { %v4224_v25 = vrot.slane %v4216_v7, %v10951_v28  ;;  %v1495_v7 = vld [vmem:[%s15269_s4] sm:$0xff] }
 0x357   :  { %1499 = vperm.xlu0 %10171, %v1495_v7   ;;  %v1515_v7 = vld [vmem:[%s15265_s3 + $0x8] sm:$0xf] }
 0x358   :  { %5692 = vperm.xlu1 %10209, %v5608_v19  }
 0x359   :  { %v4228_v16 = vpop.permute.xlu1 %4227 }
 0x35a   :  { %v4236_v29 = vrot.slane %v4228_v16, %v10951_v28  ;;  %v6233_v16 = vld [vmem:[%s15265_s3 + $0x8] sm:$0xf] }
 0x35c   :  { %v11243_v53 = vcombine.low %v4224_v25, %v4236_v29  ;;  %10210 = vset.pattern.permute.xlu1 %v15321_v14  ;;  %v1496_v29 = vld [vmem:[%s15269_s4 + $0x8] sm:$0xff] }
 0x35d   :  { %v11246_v20 = vpop.permute.xlu1 %4832  ;;  %6249 = vperm.xlu1 %10210, %v6231_v0   ;;  %1504 = vperm.xlu0 %10171, %v1496_v29   ;;  %v6234_v0 = vld [vmem:[%s15265_s3 + $0xc] sm:$0xf]  ;;  %v1517_v29 = vld [vmem:[%s15265_s3 + $0x10] sm:$0xf] }
 0x35e   :  { %15615 = vst [vmem:[#allocation55_spill] sm:$0xff] %v11243_v53  ;;  %15616 = vst [vmem:[#allocation56_spill] sm:$0xff] %v11246_v20 }
 0x361   :  { %v11254_v19 = vpop.permute.xlu1 %4844  ;;  %6273 = vperm.xlu1 %10210, %v6233_v16   ;;  %1555 = vperm.xlu0 %10171, %v1515_v7   ;;  %v6236_v16 = vld [vmem:[%s15265_s3 + $0x14] sm:$0xf]  ;;  %v1519_v7 = vld [vmem:[%s15265_s3 + $0x18] sm:$0xf] }
 0x362   :  { %15617 = vst [vmem:[#allocation57_spill] sm:$0xff] %v11254_v19  ;;  %v15622_v19 = vmov 3  }
 0x365   :  { %v11262_v25 = vpop.permute.xlu1 %5449  ;;  %6285 = vperm.xlu1 %10210, %v6234_v0   ;;  %1579 = vperm.xlu0 %10171, %v1517_v29   ;;  %v6238_v0 = vld [vmem:[%s15265_s3 + $0x1c] sm:$0xf]  ;;  %v1521_v29 = vld [vmem:[%s15265_s3 + $0x20] sm:$0xf] }
 0x366   :  { %15618 = vst [vmem:[#allocation58_spill] sm:$0xff] %v11262_v25 }
 0x369   :  { %v11270_v14 = vpop.permute.xlu1 %5473  ;;  %6309 = vperm.xlu1 %10210, %v6236_v16   ;;  %1603 = vperm.xlu0 %10171, %v1519_v7   ;;  %v2466_v16 = vld [vmem:[%s15265_s3 + $0x24] sm:$0xf]  ;;  %v1523_v7 = vld [vmem:[%s15265_s3 + $0x28] sm:$0xf] }
 0x36a   :  { %15619 = vst [vmem:[#allocation59_spill] sm:$0xff] %v11270_v14  ;;  %v15642_v14 = vmov 13  }
 0x36d   :  { %v11278_v53 = vpop.permute.xlu1 %5485  ;;  %6333 = vperm.xlu1 %10210, %v6238_v0   ;;  %v2467_v0 = vld [vmem:[%s15265_s3 + $0x28] sm:$0xf]  ;;  %1627 = vperm.xlu0 %10171, %v1521_v29   ;;  %v1525_v29 = vld [vmem:[%s15265_s3 + $0x30] sm:$0xf] }
 0x36e   :  { %15620 = vst [vmem:[#allocation60_spill] sm:$0xff] %v11278_v53  ;;  %v15640_v53 = vmov 2  }
 0x371   :  { %v11286_v25 = vpop.permute.xlu1 %6090  ;;  %10211 = vset.pattern.permute.xlu1 %v15622_v19  ;;  %1651 = vperm.xlu0 %10171, %v1523_v7   ;;  %v1527_v7 = vld [vmem:[%s15265_s3 + $0x38] sm:$0xf] }
 0x372   :  { %15621 = vst [vmem:[#allocation61_spill] sm:$0xff] %v11286_v25  ;;  %2583 = vperm.xlu1 %10211, %v2466_v16   ;;  %v15625_v16 = vmov 5  }
 0x375   :  { %v11298_v20 = vpop.permute.xlu1 %6102  ;;  %1675 = vperm.xlu0 %10171, %v1525_v29   ;;  %v1828_v29 = vld [vmem:[%s15265_s3] sm:$0xf] }
 0x376   :  { %15623 = vst [vmem:[#allocation62_spill] sm:$0xff] %v11298_v20  ;;  %2595 = vperm.xlu1 %10211, %v2467_v0   ;;  %v3096_v0 = vld [vmem:[%s15265_s3 + $0x28] sm:$0xf] }
 0x379   :  { %v11303_v25 = vpop.permute.xlu1 %2475  ;;  %1699 = vperm.xlu0 %10171, %v1527_v7   ;;  %v1831_v7 = vld [vmem:[%s15265_s3 + $0xc] sm:$0xf] }
 0x37a   :  { %15624 = vst [vmem:[#allocation63_spill] sm:$0xff] %v11303_v25  ;;  %10212 = vset.pattern.permute.xlu1 %v15625_v16 }
 0x37b   :  { %3200 = vperm.xlu1 %10212, %v3094_v42   ;;  %v3097_v42 = vld [vmem:[%s15265_s3 + $0x2c] sm:$0xf] }
 0x37d   :  { %v11312_v20 = vpop.permute.xlu1 %2499  ;;  %10173 = vset.pattern.permute.xlu0 %v15628_v38 }
 0x37e   :  { %15626 = vst [vmem:[#allocation64_spill] sm:$0xff] %v11312_v20  ;;  %1846 = vperm.xlu0 %10173, %v1828_v29   ;;  %v1833_v29 = vld [vmem:[%s15265_s3 + $0x14] sm:$0xf]  ;;  %v1835_v20 = vld [vmem:[%s15265_s3 + $0x1c] sm:$0xf] }
 0x37f   :  { %3224 = vperm.xlu1 %10212, %v3096_v0   ;;  %v3724_v0 = vld [vmem:[%s15265_s3 + $0x24] sm:$0xf] }
 0x381   :  { %v11320_v25 = vpop.permute.xlu1 %2511 }
 0x382   :  { %15627 = vst [vmem:[#allocation65_spill] sm:$0xff] %v11320_v25  ;;  %1882 = vperm.xlu0 %10173, %v1831_v7   ;;  %v3725_v25 = vld [vmem:[%s15265_s3 + $0x28] sm:$0xf]  ;;  %v15633_v7 = vmov 9  }
 0x383   :  { %3236 = vperm.xlu1 %10212, %v3097_v42  }
 0x385   :  { %v11329_v12 = vpop.permute.xlu1 %2535 }
 0x386   :  { %15629 = vst [vmem:[#allocation66_spill] sm:$0xff] %v11329_v12  ;;  %1906 = vperm.xlu0 %10173, %v1833_v29   ;;  %v4354_v29 = vld [vmem:[%s15265_s3 + $0x28] sm:$0xf] }
 0x387   :  { %10213 = vset.pattern.permute.xlu1 %v15630_v60 }
 0x388   :  { %3841 = vperm.xlu1 %10213, %v3724_v0   ;;  %v4352_v0 = vld [vmem:[%s15265_s3 + $0x20] sm:$0xf] }
 0x389   :  { %v11338_v42 = vpop.permute.xlu1 %2559 }
 0x38a   :  { %15631 = vst [vmem:[#allocation67_spill] sm:$0xff] %v11338_v42  ;;  %1930 = vperm.xlu0 %10173, %v1835_v20   ;;  %v4355_v20 = vld [vmem:[%s15265_s3 + $0x2c] sm:$0xf] }
 0x38c   :  { %3853 = vperm.xlu1 %10213, %v3725_v25   ;;  %v1837_v25 = vld [vmem:[%s15265_s3 + $0x24] sm:$0xf] }
 0x38d   :  { %v11346_v12 = vpop.permute.xlu1 %3116 }
 0x38e   :  { %15632 = vst [vmem:[#allocation68_spill] sm:$0xff] %v11346_v12  ;;  %1954 = vperm.xlu0 %10173, %v1837_v25   ;;  %v4982_v25 = vld [vmem:[%s15265_s3 + $0x24] sm:$0xf] }
 0x390   :  { %10214 = vset.pattern.permute.xlu1 %v15633_v7 }
 0x391   :  { %v11355_v42 = vpop.permute.xlu1 %3128  ;;  %4458 = vperm.xlu1 %10214, %v4352_v0  }
 0x392   :  { %15634 = vst [vmem:[#allocation69_spill] sm:$0xff] %v11355_v42  ;;  %1978 = vperm.xlu0 %10173, %v1839_v32   ;;  %v1841_v42 = vld [vmem:[%s15265_s3 + $0x34] sm:$0xf]  ;;  %v4983_v32 = vld [vmem:[%s15265_s3 + $0x28] sm:$0xf] }
 0x395   :  { %v11363_v12 = vpop.permute.xlu1 %3152  ;;  %4482 = vperm.xlu1 %10214, %v4354_v29  }
 0x396   :  { %15635 = vst [vmem:[#allocation70_spill] sm:$0xff] %v11363_v12  ;;  %2002 = vperm.xlu0 %10173, %v1841_v42   ;;  %v15638_v12 = vmov 11   ;;  %v2145_v42 = vld [vmem:[%s15265_s3 + $0xc] sm:$0xf] }
 0x399   :  { %v11371_v0 = vpop.permute.xlu1 %3176  ;;  %4494 = vperm.xlu1 %10214, %v4355_v20  }
 0x39a   :  { %15636 = vst [vmem:[#allocation71_spill] sm:$0xff] %v11371_v0  ;;  %v2142_v0 = vld [vmem:[%s15265_s3] sm:$0xf]  ;;  %10175 = vset.pattern.permute.xlu0 %v15640_v53  ;;  %v2147_v53 = vld [vmem:[%s15265_s3 + $0x14] sm:$0xf] }
 0x39b   :  { %2160 = vperm.xlu0 %10175, %v2142_v0  }
 0x39d   :  { %v11379_v29 = vpop.permute.xlu1 %3733  ;;  %10215 = vset.pattern.permute.xlu1 %v15638_v12 }
 0x39e   :  { %15637 = vst [vmem:[#allocation72_spill] sm:$0xff] %v11379_v29  ;;  %5099 = vperm.xlu1 %10215, %v4982_v25   ;;  %v5610_v25 = vld [vmem:[%s15265_s3 + $0x20] sm:$0xf] }
 0x39f   :  { %2196 = vperm.xlu0 %10175, %v2145_v42  }
 0x3a1   :  { %v11388_v20 = vpop.permute.xlu1 %3757 }
 0x3a2   :  { %15639 = vst [vmem:[#allocation73_spill] sm:$0xff] %v11388_v20  ;;  %5111 = vperm.xlu1 %10215, %v4983_v32   ;;  %v5612_v32 = vld [vmem:[%s15265_s3 + $0x28] sm:$0xf] }
 0x3a3   :  { %2220 = vperm.xlu0 %10175, %v2147_v53   ;;  %v6240_v53 = vld [vmem:[%s15265_s3 + $0x24] sm:$0xf] }
 0x3a5   :  { %v11394_v29 = vpop.permute.xlu1 %3769 }
 0x3a6   :  { %15641 = vst [vmem:[#allocation74_spill] sm:$0xff] %v11394_v29  ;;  %10216 = vset.pattern.permute.xlu1 %v15642_v14  ;;  %v2149_v29 = vld [vmem:[%s15265_s3 + $0x1c] sm:$0xf] }
 0x3a7   :  { %5716 = vperm.xlu1 %10216, %v5610_v25   ;;  %v5613_v25 = vld [vmem:[%s15265_s3 + $0x2c] sm:$0xf]  ;;  %2244 = vperm.xlu0 %10175, %v2149_v29  }
 0x3a9   :  { %v11403_v0 = vpop.permute.xlu1 %3793 }
 0x3aa   :  { %15643 = vst [vmem:[#allocation75_spill] sm:$0xff] %v11403_v0  ;;  %v2151_v0 = vld [vmem:[%s15265_s3 + $0x24] sm:$0xf] }
 0x3ab   :  { %5740 = vperm.xlu1 %10216, %v5612_v32   ;;  %2268 = vperm.xlu0 %10175, %v2151_v0   ;;  %v15646_v32 = vmov 15  }
 0x3ad   :  { %v11411_v42 = vpop.permute.xlu1 %3817 }
 0x3ae   :  { %15644 = vst [vmem:[#allocation76_spill] sm:$0xff] %v11411_v42  ;;  %v2154_v42 = vld [vmem:[%s15265_s3 + $0x30] sm:$0xf] }
 0x3af   :  { %5752 = vperm.xlu1 %10216, %v5613_v25   ;;  %v6241_v25 = vld [vmem:[%s15265_s3 + $0x28] sm:$0xf]  ;;  %2304 = vperm.xlu0 %10175, %v2154_v42   ;;  %v2772_v42 = vld [vmem:[%s15265_s3 + $0x4] sm:$0xf] }
 0x3b1   :  { %v11419_v20 = vpop.permute.xlu1 %4374 }
 0x3b2   :  { %15645 = vst [vmem:[#allocation77_spill] sm:$0xff] %v11419_v20  ;;  %v2157_v20 = vld [vmem:[%s15265_s3 + $0x3c] sm:$0xf] }
 0x3b3   :  { %10217 = vset.pattern.permute.xlu1 %v15646_v32  ;;  %2340 = vperm.xlu0 %10175, %v2157_v20   ;;  %v2775_v20 = vld [vmem:[%s15265_s3 + $0x10] sm:$0xf] }
 0x3b4   :  { %6357 = vperm.xlu1 %10217, %v6240_v53  }
 0x3b5   :  { %v11428_v29 = vpop.permute.xlu1 %4386 }
 0x3b6   :  { %15647 = vst [vmem:[#allocation78_spill] sm:$0xff] %v11428_v29  ;;  %v15650_v29 = vmov 4  }
 0x3b7   :  { %10191 = vset.pattern.permute.xlu0 %v15650_v29  ;;  %v2779_v29 = vld [vmem:[%s15265_s3 + $0x20] sm:$0xf] }
 0x3b8   :  { %6369 = vperm.xlu1 %10217, %v6241_v25   ;;  %2801 = vperm.xlu0 %10191, %v2772_v42  }
 0x3b9   :  { %v11436_v0 = vpop.permute.xlu1 %4410 }
 0x3ba   :  { %15648 = vst [vmem:[#allocation79_spill] sm:$0xff] %v11436_v0 }
 0x3bc   :  { %10218 = vset.pattern.permute.xlu1 %v15628_v38  ;;  %2837 = vperm.xlu0 %10191, %v2775_v20   ;;  %v2782_v20 = vld [vmem:[%s15265_s3 + $0x2c] sm:$0xf] }
 0x3bd   :  { %v11442_v53 = vpop.permute.xlu1 %4434  ;;  %2026 = vperm.xlu1 %10218, %v1843_v17  }
 0x3be   :  { %15649 = vst [vmem:[#allocation80_spill] sm:$0xff] %v11442_v53  ;;  %v2777_v53 = vld [vmem:[%s15265_s3 + $0x18] sm:$0xf] }
 0x3c0   :  { %2861 = vperm.xlu0 %10191, %v2777_v53  }
 0x3c1   :  { %v11448_v25 = vpop.permute.xlu1 %4991  ;;  %10219 = vset.pattern.permute.xlu1 %v15622_v19 }
 0x3c2   :  { %15651 = vst [vmem:[#allocation81_spill] sm:$0xff] %v11448_v25 }
 0x3c4   :  { %2885 = vperm.xlu0 %10191, %v2779_v29  }
 0x3c5   :  { %v11454_v38 = vpop.permute.xlu1 %5015 }
 0x3c6   :  { %15652 = vst [vmem:[#allocation82_spill] sm:$0xff] %v11454_v38 }
 0x3c8   :  { %2921 = vperm.xlu0 %10191, %v2782_v20   ;;  %v3400_v20 = vld [vmem:[%s15265_s3] sm:$0xf] }
 0x3c9   :  { %v11459_v17 = vpop.permute.xlu1 %5027 }
 0x3ca   :  { %15653 = vst [vmem:[#allocation83_spill] sm:$0xff] %v11459_v17  ;;  %v2784_v17 = vld [vmem:[%s15265_s3 + $0x34] sm:$0xf] }
 0x3cc   :  { %2945 = vperm.xlu0 %10191, %v2784_v17  }
 0x3cd   :  { %v11464_v42 = vpop.permute.xlu1 %5051 }
 0x3d0   :  { %10193 = vset.pattern.permute.xlu0 %v15654_v33  ;;  %v3405_v33 = vld [vmem:[%s15265_s3 + $0x14] sm:$0xf] }
 0x3d1   :  { %v11469_v53 = vpop.permute.xlu1 %5075  ;;  %3418 = vperm.xlu0 %10193, %v3400_v20  }
 0x3d2   :  { %v10060_v25 = vpop.f32.mrb[32].mxu0 }
 0x3d3   :  { %v871_v0 = vpop.f32.mrb[33].mxu0 }
 0x3d4   :  { %v10061_v38 = vpop.f32.mrb[34].mxu0 }
 0x3d5   :  { %v935_v2 = vpack.c.bf16 %v10061_v38, %v10060_v25  ;;  %v874_v44 = vpop.f32.mrb[35].mxu0  ;;  %v11474_v29 = vpop.permute.xlu1 %5632 }
 0x3d6   :  { %v934_v46 = vpack.c.bf16 %v874_v44, %v871_v0  ;;  %v11490_v20 = vpop.permute.xlu0 %1499 }
 0x3d7   :  { %15655 = vst [vmem:[#allocation84_spill] sm:$0xff] %v11490_v20 }
 0x3d8   :  { %10074 = vmatprep.subr.bf16.mxu1 %v934_v46 }
 0x3d9   :  { %10075 = vmatpush3.bf16.msra.mxu1 %v934_v46  ;;  %v11480_v44 = vpop.permute.xlu1 %5644  ;;  %v3403_v46 = vld [vmem:[%s15265_s3 + $0xc] sm:$0xf] }
 0x3da   :  { %v10064_v13 = vpop.f32.mrb[36].mxu0  ;;  %10076 = vmatprep.subr.bf16.mxu1 %v935_v2  ;;  %3454 = vperm.xlu0 %10193, %v3403_v46   ;;  %v3407_v46 = vld [vmem:[%s15265_s3 + $0x1c] sm:$0xf] }
 0x3db   :  { %v887_v25 = vpop.f32.mrb[37].mxu0 }
 0x3dc   :  { %v10065_v38 = vpop.f32.mrb[38].mxu0  ;;  %v11497_v1 = vpop.permute.xlu0 %1504 }
 0x3dd   :  { %v937_v22 = vpack.c.bf16 %v10065_v38, %v10064_v13  ;;  %v890_v8 = vpop.f32.mrb[39].mxu0  ;;  %10077 = vmatpush3.bf16.msra.mxu1 %v935_v2  ;;  %v11485_v17 = vpop.permute.xlu1 %5668  ;;  %15656 = vst [vmem:[#allocation85_spill] sm:$0xff] %v11497_v1 }
 0x3de   :  { %v936_v0 = vpack.c.bf16 %v890_v8, %v887_v25  ;;  %3478 = vperm.xlu0 %10193, %v3405_v33  }
 0x3e0   :  { %10078 = vmatprep.subr.bf16.mxu1 %v936_v0 }
 0x3e1   :  { %10079 = vmatpush3.bf16.msra.mxu1 %v936_v0  ;;  %v11492_v38 = vpop.permute.xlu1 %5692 }
 0x3e2   :  { %v10068_v5 = vpop.f32.mrb[40].mxu0  ;;  %10080 = vmatprep.subr.bf16.mxu1 %v937_v22  ;;  %3502 = vperm.xlu0 %10193, %v3407_v46  }
 0x3e3   :  { %v903_v13 = vpop.f32.mrb[41].mxu0 }
 0x3e4   :  { %v10069_v2 = vpop.f32.mrb[42].mxu0 }
 0x3e5   :  { %v939_v8 = vpack.c.bf16 %v10069_v2, %v10068_v5  ;;  %v906_v25 = vpop.f32.mrb[43].mxu0  ;;  %10081 = vmatpush3.bf16.msra.mxu1 %v937_v22  ;;  %v11499_v52 = vpop.permute.xlu1 %6249  ;;  %v3409_v5 = vld [vmem:[%s15265_s3 + $0x24] sm:$0xf] }
 0x3e6   :  { %v938_v0 = vpack.c.bf16 %v906_v25, %v903_v13  ;;  %15657 = vst [vmem:[#allocation86_spill] sm:$0xff] %v11499_v52  ;;  %v11504_v13 = vpop.permute.xlu0 %1555  ;;  %3526 = vperm.xlu0 %10193, %v3409_v5  }
 0x3e7   :  { %15658 = vst [vmem:[#allocation87_spill] sm:$0xff] %v11504_v13 }
 0x3e8   :  { %10082 = vmatprep.subr.bf16.mxu1 %v938_v0 }
 0x3e9   :  { %10083 = vmatpush3.bf16.msra.mxu1 %v938_v0  ;;  %v6274_v20 = vpop.permute.xlu1 %6273  ;;  %v3412_v0 = vld [vmem:[%s15265_s3 + $0x30] sm:$0xf] }
 0x3ea   :  { %v10072_v36 = vpop.f32.mrb[44].mxu0  ;;  %10084 = vmatprep.subr.bf16.mxu1 %v939_v8  ;;  %v6282_v46 = vrot.slane %v6274_v20, %v10951_v28  ;;  %3562 = vperm.xlu0 %10193, %v3412_v0   ;;  %v11510_v24 = vpop.permute.xlu0 %1579  ;;  %v4033_v0 = vld [vmem:[%s15265_s3 + $0x10] sm:$0xf] }
 0x3eb   :  { %v919_v22 = vpop.f32.mrb[45].mxu0  ;;  %15659 = vst [vmem:[#allocation88_spill] sm:$0xff] %v11510_v24  ;;  %v4042_v24 = vld [vmem:[%s15265_s3 + $0x34] sm:$0xf] }
 0x3ec   :  { %v10073_v33 = vpop.f32.mrb[46].mxu0 }
 0x3ed   :  { %v941_v2 = vpack.c.bf16 %v10073_v33, %v10072_v36  ;;  %v922_v25 = vpop.f32.mrb[47].mxu0  ;;  %10085 = vmatpush3.bf16.msra.mxu1 %v939_v8  ;;  %v6286_v52 = vpop.permute.xlu1 %6285  ;;  %v3415_v8 = vld [vmem:[%s15265_s3 + $0x3c] sm:$0xf]  ;;  %v11534_v33 = vld [vmem:[%s15266_s1 + $0x10] sm:$0xff]  }
 0x3ee   :  { %v940_v1 = vpack.c.bf16 %v922_v25, %v919_v22  ;;  %v6294_v36 = vrot.slane %v6286_v52, %v10951_v28  ;;  %3598 = vperm.xlu0 %10193, %v3415_v8   ;;  %v11523_v20 = vpop.permute.xlu0 %1603  ;;  %v11528_v52 = vld [vmem:[%s15266_s1 + $0x8] sm:$0xff]   ;;  %v4035_v8 = vld [vmem:[%s15265_s3 + $0x18] sm:$0xf] }
 0x3ef   :  { %15662 = vst [vmem:[#allocation91_spill] sm:$0xff] %v11523_v20  ;;  %v11577_v20 = vld [vmem:[%s15266_s1 + $0x28] sm:$0xff]  }
 0x3f0   :  { %10086 = vmatprep.subr.bf16.mxu1 %v940_v1  ;;  %v11516_v5 = vcombine.low %v6282_v46, %v6294_v36 }
 0x3f1   :  { %10087 = vmatpush3.bf16.msra.mxu1 %v940_v1  ;;  %v11518_v22 = vpop.permute.xlu1 %6309  ;;  %v4030_v1 = vld [vmem:[%s15265_s3 + $0x4] sm:$0xf] }
 0x3f2   :  { %10088 = vmatprep.subr.bf16.mxu1 %v941_v2  ;;  %15660 = vst [vmem:[#allocation89_spill] sm:$0xff] %v11516_v5  ;;  %15661 = vst [vmem:[#allocation90_spill] sm:$0xff] %v11518_v22  ;;  %v11545_v36 = vpop.permute.xlu0 %1627 }
 0x3f3   :  { %15665 = vst [vmem:[#allocation93_spill] sm:$0xff] %v11545_v36  ;;  %v4040_v36 = vld [vmem:[%s15265_s3 + $0x2c] sm:$0xf] }
 0x3f5   :  { %10089 = vmatpush3.bf16.msra.mxu1 %v941_v2  ;;  %v15663_v2 = vmov 8   ;;  %v11538_v25 = vpop.permute.xlu1 %6333 }
 0x3f6   :  { %10195 = vset.pattern.permute.xlu0 %v15663_v2  ;;  %15664 = vst [vmem:[#allocation92_spill] sm:$0xff] %v11538_v25  ;;  %v11553_v2 = vld [vmem:[%s15266_s1 + $0x18] sm:$0xff]   ;;  %v4037_v25 = vld [vmem:[%s15265_s3 + $0x20] sm:$0xf] }
 0x3f7   :  { %4059 = vperm.xlu0 %10195, %v4030_v1   ;;  %v11559_v1 = vld [vmem:[%s15266_s1 + $0x20] sm:$0xff]  }
 0x3f8   :  { %10091 = vmatmul.mubr.bf16.vlgmr.msra.gmra.mrb[32].mxu1 %v11528_v52 }
 0x3f9   :  { %10094 = vmatprep.mubr.bf16.mxu1 %v11534_v33  ;;  %v11543_v46 = vpop.permute.xlu1 %2583 }
 0x3fb   :  { %4095 = vperm.xlu0 %10195, %v4033_v0   ;;  %v11564_v0 = vpop.permute.xlu0 %1651 }
 0x3fc   :  { %15666 = vst [vmem:[#allocation94_spill] sm:$0xff] %v11564_v0 }
 0x3fd   :  { %v11562_v5 = vpop.permute.xlu1 %2595 }
 0x3ff   :  { %4119 = vperm.xlu0 %10195, %v4035_v8   ;;  %v11583_v8 = vld [vmem:[%s15266_s1 + $0x30] sm:$0xff]   ;;  %v11586_v0 = vpop.permute.xlu0 %1675 }
 0x400   :  { %10095 = vmatmul.mubr.bf16.gmra.mrb[36].mxu1 %v11553_v2  ;;  %15667 = vst [vmem:[#allocation95_spill] sm:$0xff] %v11586_v0  ;;  %v4658_v0 = vld [vmem:[%s15265_s3] sm:$0xf] }
 0x401   :  { %10098 = vmatprep.mubr.bf16.mxu1 %v11559_v1  ;;  %v11569_v22 = vpop.permute.xlu1 %3200 }
 0x403   :  { %4143 = vperm.xlu0 %10195, %v4037_v25   ;;  %v11593_v40 = vpop.permute.xlu0 %1699 }
 0x404   :  { %15668 = vst [vmem:[#allocation96_spill] sm:$0xff] %v11593_v40 }
 0x405   :  { %v3225_v25 = vpop.permute.xlu1 %3224 }
 0x406   :  { %v3233_v13 = vrot.slane %v3225_v25, %v10951_v28 }
 0x407   :  { %4179 = vperm.xlu0 %10195, %v4040_v36   ;;  %v11613_v40 = vpop.permute.xlu0 %1846 }
 0x408   :  { %10099 = vmatmul.mubr.bf16.gmra.mrb[40].mxu1 %v11577_v20  ;;  %15672 = vst [vmem:[#allocation98_spill] sm:$0xff] %v11613_v40 }
 0x409   :  { %10102 = vmatprep.mubr.bf16.mxu1 %v11583_v8  ;;  %v3237_v57 = vpop.permute.xlu1 %3236 }
 0x40a   :  { %v3245_v49 = vrot.slane %v3237_v57, %v10951_v28  ;;  %v15671_v57 = vmov 10  }
 0x40b   :  { %4203 = vperm.xlu0 %10195, %v4042_v24   ;;  %v4661_v24 = vld [vmem:[%s15265_s3 + $0xc] sm:$0xf] }
 0x40c   :  { %v11601_v36 = vcombine.low %v3233_v13, %v3245_v49  ;;  %v4663_v49 = vld [vmem:[%s15265_s3 + $0x14] sm:$0xf] }
 0x40d   :  { %v11606_v25 = vpop.permute.xlu1 %3841 }
 0x40e   :  { %15669 = vst [vmem:[#allocation97_spill] sm:$0xff] %v11601_v36  ;;  %v11622_v36 = vpop.permute.xlu0 %1882 }
 0x40f   :  { %10197 = vset.pattern.permute.xlu0 %v15671_v57  ;;  %15673 = vst [vmem:[#allocation99_spill] sm:$0xff] %v11622_v36 }
 0x410   :  { %10103 = vmatmul.mubr.bf16.gmra.mrb[44].mxu1 %v11598_v34  ;;  %4676 = vperm.xlu0 %10197, %v4658_v0   ;;  %v4665_v0 = vld [vmem:[%s15265_s3 + $0x1c] sm:$0xf] }
 0x411   :  { %1315 = vmatprep.mubr.bf16.mxu1 %v15670_v31  ;;  %v11615_v27 = vpop.permute.xlu1 %3853 }
 0x412   :  { %v11631_v23 = vpop.permute.xlu0 %1906 }
 0x413   :  { %15674 = vst [vmem:[#allocation100_spill] sm:$0xff] %v11631_v23 }
 0x414   :  { %4712 = vperm.xlu0 %10197, %v4661_v24   ;;  %v4667_v24 = vld [vmem:[%s15265_s3 + $0x24] sm:$0xf] }
 0x415   :  { %v11620_v13 = vpop.permute.xlu1 %4458 }
 0x418   :  { %4736 = vperm.xlu0 %10197, %v4663_v49   ;;  %v4670_v49 = vld [vmem:[%s15265_s3 + $0x30] sm:$0xf] }
 0x419   :  { %v4483_v57 = vpop.permute.xlu1 %4482 }
 0x41a   :  { %v4491_v40 = vrot.slane %v4483_v57, %v10951_v28  ;;  %v4673_v57 = vld [vmem:[%s15265_s3 + $0x3c] sm:$0xf] }
 0x41c   :  { %4760 = vperm.xlu0 %10197, %v4665_v0   ;;  %v11641_v0 = vpop.permute.xlu0 %1930 }
 0x41d   :  { %v4495_v62 = vpop.permute.xlu1 %4494  ;;  %15676 = vst [vmem:[#allocation102_spill] sm:$0xff] %v11641_v0 }
 0x41e   :  { %v4503_v59 = vrot.slane %v4495_v62, %v10951_v28 }
 0x420   :  { %4784 = vperm.xlu0 %10197, %v4667_v24   ;;  %v11634_v36 = vcombine.low %v4491_v40, %v4503_v59  ;;  %v11648_v62 = vpop.permute.xlu0 %1954  ;;  %v5288_v40 = vld [vmem:[%s15265_s3 + $0x4] sm:$0xf]  ;;  %v15678_v24 = vmov 12  }
 0x421   :  { %v11639_v55 = vpop.permute.xlu1 %5099  ;;  %15677 = vst [vmem:[#allocation103_spill] sm:$0xff] %v11648_v62 }
 0x422   :  { %15675 = vst [vmem:[#allocation101_spill] sm:$0xff] %v11634_v36 }
 0x424   :  { %4820 = vperm.xlu0 %10197, %v4670_v49   ;;  %v5291_v49 = vld [vmem:[%s15265_s3 + $0x10] sm:$0xf]  ;;  %v11659_v0 = vpop.permute.xlu0 %1978 }
 0x425   :  { %v11646_v23 = vpop.permute.xlu1 %5111  ;;  %15679 = vst [vmem:[#allocation104_spill] sm:$0xff] %v11659_v0 }
 0x428   :  { %4856 = vperm.xlu0 %10197, %v4673_v57  }
 0x429   :  { %v11650_v59 = vpop.permute.xlu1 %5716 }
 0x42c   :  { %10199 = vset.pattern.permute.xlu0 %v15678_v24  ;;  %v5295_v24 = vld [vmem:[%s15265_s3 + $0x20] sm:$0xf] }
 0x42d   :  { %5317 = vperm.xlu0 %10199, %v5288_v40   ;;  %v5741_v36 = vpop.permute.xlu1 %5740  ;;  %v11668_v40 = vpop.permute.xlu0 %2002 }
 0x42e   :  { %v5749_v57 = vrot.slane %v5741_v36, %v10951_v28  ;;  %15681 = vst [vmem:[#allocation106_spill] sm:$0xff] %v11668_v40  ;;  %v5298_v36 = vld [vmem:[%s15265_s3 + $0x2c] sm:$0xf] }
 0x431   :  { %5353 = vperm.xlu0 %10199, %v5291_v49   ;;  %v5753_v62 = vpop.permute.xlu1 %5752  ;;  %v11676_v49 = vpop.permute.xlu0 %2160 }
 0x432   :  { %v5761_v47 = vrot.slane %v5753_v62, %v10951_v28  ;;  %15682 = vst [vmem:[#allocation107_spill] sm:$0xff] %v11676_v49  ;;  %v5916_v62 = vld [vmem:[%s15265_s3] sm:$0xf] }
 0x434   :  { %v11666_v43 = vcombine.low %v5749_v57, %v5761_v47  ;;  %v5300_v47 = vld [vmem:[%s15265_s3 + $0x34] sm:$0xf]  ;;  %v15684_v57 = vmov 14  }
 0x435   :  { %5377 = vperm.xlu0 %10199, %v5293_v51   ;;  %v11681_v51 = vpop.permute.xlu0 %2196 }
 0x436   :  { %15680 = vst [vmem:[#allocation105_spill] sm:$0xff] %v11666_v43  ;;  %15683 = vst [vmem:[#allocation108_spill] sm:$0xff] %v11681_v51  ;;  %v5923_v51 = vld [vmem:[%s15265_s3 + $0x1c] sm:$0xf] }
 0x439   :  { %5401 = vperm.xlu0 %10199, %v5295_v24   ;;  %v11687_v24 = vpop.permute.xlu0 %2220 }
 0x43a   :  { %15685 = vst [vmem:[#allocation109_spill] sm:$0xff] %v11687_v24 }
 0x43d   :  { %5437 = vperm.xlu0 %10199, %v5298_v36   ;;  %v5919_v36 = vld [vmem:[%s15265_s3 + $0xc] sm:$0xf]  ;;  %v11695_v43 = vpop.permute.xlu0 %2244 }
 0x43e   :  { %15686 = vst [vmem:[#allocation110_spill] sm:$0xff] %v11695_v43 }
 0x441   :  { %5461 = vperm.xlu0 %10199, %v5300_v47   ;;  %v5921_v47 = vld [vmem:[%s15265_s3 + $0x14] sm:$0xf] }
 0x445   :  { %10201 = vset.pattern.permute.xlu0 %v15684_v57 }
 0x446   :  { %5934 = vperm.xlu0 %10201, %v5916_v62   ;;  %v11700_v62 = vpop.permute.xlu0 %2268 }
 0x447   :  { %15687 = vst [vmem:[#allocation111_spill] sm:$0xff] %v11700_v62 }
 0x44a   :  { %5970 = vperm.xlu0 %10201, %v5919_v36   ;;  %v11702_v57 = vpop.permute.xlu0 %2304 }
 0x44b   :  { %15688 = vst [vmem:[#allocation112_spill] sm:$0xff] %v11702_v57  ;;  %v3716_v57 = vld [vmem:[%s15265_s3 + $0x4] sm:$0xf] }
 0x44e   :  { %5994 = vperm.xlu0 %10201, %v5921_v47   ;;  %v11704_v24 = vpop.permute.xlu0 %2340 }
 0x44f   :  { %15689 = vst [vmem:[#allocation113_spill] sm:$0xff] %v11704_v24 }
 0x452   :  { %6018 = vperm.xlu0 %10201, %v5923_v51   ;;  %v11706_v49 = vpop.permute.xlu0 %2801  ;;  %v5925_v51 = vld [vmem:[%s15265_s3 + $0x24] sm:$0xf] }
 0x453   :  { %15690 = vst [vmem:[#allocation114_spill] sm:$0xff] %v11706_v49  ;;  %v5928_v49 = vld [vmem:[%s15265_s3 + $0x30] sm:$0xf] }
 0x456   :  { %v11708_v36 = vpop.permute.xlu0 %2837  ;;  %6042 = vperm.xlu0 %10201, %v5925_v51   ;;  %v10298_v51 = vld [vmem:[%s15270_s11 + $0x4] ss:$8 sps:$4 sm:$0xff]  }
 0x457   :  { %15691 = vst [vmem:[#allocation115_spill] sm:$0xff] %v11708_v36  ;;  %1283 = vmatprep.subr.bf16.mxu1 %v10298_v51  ;;  %v2461_v51 = vld [vmem:[%s15265_s3 + $0x10] sm:$0xf] }
 0x45a   :  { %v11710_v40 = vpop.permute.xlu0 %2861  ;;  %6078 = vperm.xlu0 %10201, %v5928_v49  }
 0x45b   :  { %15692 = vst [vmem:[#allocation116_spill] sm:$0xff] %v11710_v40 }
 0x45e   :  { %v11712_v0 = vpop.permute.xlu0 %2885 }
 0x45f   :  { %15693 = vst [vmem:[#allocation117_spill] sm:$0xff] %v11712_v0  ;;  %v10304_v0 = vld [vmem:[%s15270_s11 + $0x24] ss:$8 sps:$4 sm:$0xff]  }
 0x462   :  { %v11714_v47 = vpop.permute.xlu0 %2921 }
 0x463   :  { %15694 = vst [vmem:[#allocation118_spill] sm:$0xff] %v11714_v47  ;;  %v5931_v47 = vld [vmem:[%s15265_s3 + $0x3c] sm:$0xf] }
 0x464   :  { %6114 = vperm.xlu0 %10201, %v5931_v47   ;;  %v10299_v47 = vld [vmem:[%s15270_s11 + $0x10] ss:$8 sps:$4 sm:$0xff]  }
 0x466   :  { %v11716_v43 = vpop.permute.xlu0 %2945 }
 0x467   :  { %15695 = vst [vmem:[#allocation119_spill] sm:$0xff] %v11716_v43  ;;  %v2458_v43 = vld [vmem:[%s15265_s3 + $0x4] sm:$0xf] }
 0x468   :  { %10204 = vset.pattern.permute.xlu0 %v15622_v19  ;;  %v10302_v19 = vld [vmem:[%s15270_s11 + $0x20] ss:$8 sps:$4 sm:$0xff]  }
 0x469   :  { %2487 = vperm.xlu0 %10204, %v2458_v43   ;;  %v10307_v43 = vld [vmem:[%s15270_s11 + $0x34] ss:$8 sps:$4 sm:$0xff]  }
 0x46a   :  { %v11718_v37 = vpop.permute.xlu0 %3418 }
 0x46b   :  { %15696 = vst [vmem:[#allocation120_spill] sm:$0xff] %v11718_v37  ;;  %v10296_v37 = vld [vmem:[%s15270_s11] ss:$8 sps:$4 sm:$0xff]  }
 0x46c   :  { %1284 = vmatpush1.bf16.msra.mxu1 %v10296_v37 }
 0x46d   :  { %2523 = vperm.xlu0 %10204, %v2461_v51   ;;  %v10310_v51 = vld [vmem:[%s15270_s11 + $0x44] ss:$8 sps:$4 sm:$0xff]  }
 0x46e   :  { %v11726_v36 = vpop.permute.xlu0 %3454 }
 0x46f   :  { %15697 = vst [vmem:[#allocation121_spill] sm:$0xff] %v11726_v36  ;;  %v10301_v36 = vld [vmem:[%s15270_s11 + $0x14] ss:$8 sps:$4 sm:$0xff]  }
 0x470   :  { %1285 = vmatprep.subr.bf16.mxu1 %v10301_v36  ;;  %v2463_v36 = vld [vmem:[%s15265_s3 + $0x18] sm:$0xf] }
 0x471   :  { %1286 = vmatpush1.bf16.msra.mxu1 %v10299_v47  ;;  %v10305_v47 = vld [vmem:[%s15270_s11 + $0x30] ss:$8 sps:$4 sm:$0xff]   ;;  %2547 = vperm.xlu0 %10204, %v2463_v36   ;;  %v2468_v36 = vld [vmem:[%s15265_s3 + $0x2c] sm:$0xf] }
 0x472   :  { %v11740_v49 = vpop.permute.xlu0 %3478  ;;  %1287 = vmatprep.subr.bf16.mxu1 %v10304_v0  ;;  %v2465_v0 = vld [vmem:[%s15265_s3 + $0x20] sm:$0xf] }
 0x473   :  { %15698 = vst [vmem:[#allocation122_spill] sm:$0xff] %v11740_v49 }
 0x475   :  { %1288 = vmatpush1.bf16.msra.mxu1 %v10302_v19  ;;  %v10308_v19 = vld [vmem:[%s15270_s11 + $0x40] ss:$8 sps:$4 sm:$0xff]   ;;  %2571 = vperm.xlu0 %10204, %v2465_v0   ;;  %v2469_v0 = vld [vmem:[%s15265_s3 + $0x30] sm:$0xf] }
 0x476   :  { %v11758_v37 = vpop.permute.xlu0 %3502  ;;  %1289 = vmatprep.subr.bf16.mxu1 %v10307_v43  ;;  %v10313_v43 = vld [vmem:[%s15270_s11 + $0x54] ss:$8 sps:$4 sm:$0xff]  }
 0x477   :  { %15699 = vst [vmem:[#allocation123_spill] sm:$0xff] %v11758_v37 }
 0x479   :  { %1290 = vmatpush1.bf16.msra.mxu1 %v10305_v47  ;;  %2607 = vperm.xlu0 %10204, %v2468_v36   ;;  %v2472_v36 = vld [vmem:[%s15265_s3 + $0x3c] sm:$0xf] }
 0x47a   :  { %v11775_v37 = vpop.permute.xlu0 %3526  ;;  %1291 = vmatprep.subr.bf16.mxu1 %v10310_v51  ;;  %v10316_v51 = vld [vmem:[%s15270_s11 + $0x64] ss:$8 sps:$4 sm:$0xff]  }
 0x47b   :  { %15700 = vst [vmem:[#allocation124_spill] sm:$0xff] %v11775_v37  ;;  %v10311_v37 = vld [vmem:[%s15270_s11 + $0x50] ss:$8 sps:$4 sm:$0xff]  }
 0x47d   :  { %1292 = vmatpush1.bf16.msra.mxu1 %v10308_v19  ;;  %v10314_v19 = vld [vmem:[%s15270_s11 + $0x60] ss:$8 sps:$4 sm:$0xff]   ;;  %2619 = vperm.xlu0 %10204, %v2469_v0   ;;  %v3091_v0 = vld [vmem:[%s15265_s3 + $0x14] sm:$0xf] }
 0x47e   :  { %v11789_v47 = vpop.permute.xlu0 %3562  ;;  %1293 = vmatprep.subr.bf16.mxu1 %v10313_v43 }
 0x47f   :  { %15701 = vst [vmem:[#allocation125_spill] sm:$0xff] %v11789_v47  ;;  %v3086_v47 = vld [vmem:[%s15265_s3] sm:$0xf] }
 0x481   :  { %1294 = vmatpush1.bf16.msra.mxu1 %v10311_v37  ;;  %2655 = vperm.xlu0 %10204, %v2472_v36   ;;  %v3089_v37 = vld [vmem:[%s15265_s3 + $0xc] sm:$0xf] }
 0x482   :  { %1295 = vmatprep.subr.bf16.mxu1 %v10316_v51  ;;  %v11803_v43 = vpop.permute.xlu0 %3598 }
 0x483   :  { %15702 = vst [vmem:[#allocation126_spill] sm:$0xff] %v11803_v43 }
 0x485   :  { %1296 = vmatpush1.bf16.msra.mxu1 %v10314_v19  ;;  %10220 = vset.pattern.permute.xlu0 %v15625_v16  ;;  %v3093_v19 = vld [vmem:[%s15265_s3 + $0x1c] sm:$0xf] }
 0x486   :  { %v11808_v49 = vpop.permute.xlu0 %4059  ;;  %3104 = vperm.xlu0 %10220, %v3086_v47   ;;  %v3095_v47 = vld [vmem:[%s15265_s3 + $0x24] sm:$0xf] }
 0x487   :  { %15703 = vst [vmem:[#allocation127_spill] sm:$0xff] %v11808_v49 }
 0x48a   :  { %3140 = vperm.xlu0 %10220, %v3089_v37   ;;  %v11814_v51 = vpop.permute.xlu0 %4095  ;;  %v11830_v37 = vld [vmem:[%s15271_s10] ss:$0 sm:$0xff] }
 0x48b   :  { %15704 = vst [vmem:[#allocation128_spill] sm:$0xff] %v11814_v51 }
 0x48e   :  { %3164 = vperm.xlu0 %10220, %v3091_v0   ;;  %v11822_v36 = vpop.permute.xlu0 %4119  ;;  %v3099_v0 = vld [vmem:[%s15265_s3 + $0x34] sm:$0xf] }
 0x48f   :  { %15705 = vst [vmem:[#allocation129_spill] sm:$0xff] %v11822_v36 }
 0x492   :  { %3188 = vperm.xlu0 %10220, %v3093_v19   ;;  %v11832_v51 = vpop.permute.xlu0 %4143 }
 0x493   :  { %15706 = vst [vmem:[#allocation130_spill] sm:$0xff] %v11832_v51 }
 0x496   :  { %3212 = vperm.xlu0 %10220, %v3095_v47   ;;  %v11844_v62 = vpop.permute.xlu0 %4179 }
 0x497   :  { %15707 = vst [vmem:[#allocation131_spill] sm:$0xff] %v11844_v62 }
 0x49a   :  { %3260 = vperm.xlu0 %10220, %v3099_v0  }
 0x49e   :  { %10222 = vset.pattern.permute.xlu0 %v15630_v60 }
 0x49f   :  { %3745 = vperm.xlu0 %10222, %v3716_v57  }
 0x4cb   :  { %v10092_v49 = vpop.f32.mrb[32].mxu1 }
 0x4cc   :  { %v992_v36 = vadd.f32 %v10092_v49, %v11830_v37  ;;  %v983_v19 = vpop.f32.mrb[33].mxu1 }
 0x4cd   :  { %v984_v43 = vadd.f32 %v11830_v37, %v983_v19  ;;  %v10093_v40 = vpop.f32.mrb[34].mxu1 }
 0x4ce   :  { %v995_v47 = vadd.f32 %v10093_v40, %v11830_v37  ;;  %v986_v24 = vpop.f32.mrb[35].mxu1  ;;  %v1048_v18 = vmax.f32 %v992_v36, 0.0  ;;  %v3719_v40 = vld [vmem:[%s15265_s3 + $0x10] sm:$0xf]  ;;  %v11852_v36 = vpop.permute.xlu0 %4203 }
 0x4cf   :  { %v987_v51 = vadd.f32 %v11830_v37, %v986_v24  ;;  %v1046_v49 = vmax.f32 %v984_v43, 0.0  ;;  %15708 = vst [vmem:[#allocation132_spill] sm:$0xff] %v11852_v36  ;;  %3781 = vperm.xlu0 %10222, %v3719_v40  }
 0x4d0   :  { %v1049_v11 = vmax.f32 %v995_v47, 0.0 }
 0x4d1   :  { %v1047_v0 = vmax.f32 %v987_v51, 0.0 }
 0x4d2   :  { %v1063_v19 = vpack.c.bf16 %v1049_v11, %v1048_v18  ;;  %v3721_v11 = vld [vmem:[%s15265_s3 + $0x18] sm:$0xf]  ;;  %v11862_v40 = vpop.permute.xlu0 %4676 }
 0x4d3   :  { %v1062_v10 = vpack.c.bf16 %v1047_v0, %v1046_v49  ;;  %v10096_v6 = vpop.f32.mrb[36].mxu1  ;;  %3805 = vperm.xlu0 %10222, %v3721_v11   ;;  %15709 = vst [vmem:[#allocation133_spill] sm:$0xff] %v11862_v40 }
 0x4d4   :  { %v1008_v3 = vadd.f32 %v10096_v6, %v11830_v37  ;;  %v999_v63 = vpop.f32.mrb[37].mxu1 }
 0x4d5   :  { %v1000_v24 = vadd.f32 %v11830_v37, %v999_v63  ;;  %v10097_v62 = vpop.f32.mrb[38].mxu1  ;;  %10106 = vmatprep.subr.bf16.mxu0 %v1062_v10 }
 0x4d6   :  { %v1011_v43 = vadd.f32 %v10097_v62, %v11830_v37  ;;  %v1002_v57 = vpop.f32.mrb[39].mxu1  ;;  %10107 = vmatpush3.bf16.msra.mxu0 %v1062_v10  ;;  %v1052_v6 = vmax.f32 %v1008_v3, 0.0  ;;  %v3723_v62 = vld [vmem:[%s15265_s3 + $0x20] sm:$0xf] }
 0x4d7   :  { %v1003_v18 = vadd.f32 %v11830_v37, %v1002_v57  ;;  %10108 = vmatprep.subr.bf16.mxu0 %v1063_v19  ;;  %v1050_v47 = vmax.f32 %v1000_v24, 0.0  ;;  %3829 = vperm.xlu0 %10222, %v3723_v62   ;;  %v3727_v62 = vld [vmem:[%s15265_s3 + $0x30] sm:$0xf] }
 0x4d8   :  { %v1053_v51 = vmax.f32 %v1011_v43, 0.0 }
 0x4d9   :  { %v1051_v63 = vmax.f32 %v1003_v18, 0.0 }
 0x4da   :  { %v1065_v49 = vpack.c.bf16 %v1053_v51, %v1052_v6  ;;  %10109 = vmatpush3.bf16.msra.mxu0 %v1063_v19  ;;  %v3726_v19 = vld [vmem:[%s15265_s3 + $0x2c] sm:$0xf] }
 0x4db   :  { %v1064_v0 = vpack.c.bf16 %v1051_v63, %v1050_v47  ;;  %v10100_v10 = vpop.f32.mrb[40].mxu1  ;;  %v11871_v63 = vpop.permute.xlu0 %4712  ;;  %3865 = vperm.xlu0 %10222, %v3726_v19  }
 0x4dc   :  { %v1024_v36 = vadd.f32 %v10100_v10, %v11830_v37  ;;  %v1015_v61 = vpop.f32.mrb[41].mxu1  ;;  %15710 = vst [vmem:[#allocation134_spill] sm:$0xff] %v11871_v63 }
 0x4dd   :  { %v1016_v57 = vadd.f32 %v11830_v37, %v1015_v61  ;;  %v10101_v3 = vpop.f32.mrb[42].mxu1  ;;  %10110 = vmatprep.subr.bf16.mxu0 %v1064_v0 }
 0x4de   :  { %v1027_v24 = vadd.f32 %v10101_v3, %v11830_v37  ;;  %v1018_v43 = vpop.f32.mrb[43].mxu1  ;;  %10111 = vmatpush3.bf16.msra.mxu0 %v1064_v0  ;;  %v1056_v18 = vmax.f32 %v1024_v36, 0.0 }
 0x4df   :  { %v1019_v11 = vadd.f32 %v11830_v37, %v1018_v43  ;;  %10112 = vmatprep.subr.bf16.mxu0 %v1065_v49  ;;  %v1054_v51 = vmax.f32 %v1016_v57, 0.0  ;;  %3877 = vperm.xlu0 %10222, %v3727_v62  }
 0x4e0   :  { %v1057_v6 = vmax.f32 %v1027_v24, 0.0 }
 0x4e1   :  { %v1055_v47 = vmax.f32 %v1019_v11, 0.0  ;;  %v11883_v11 = vpop.permute.xlu0 %4736 }
 0x4e2   :  { %v1067_v61 = vpack.c.bf16 %v1057_v6, %v1056_v18  ;;  %10113 = vmatpush3.bf16.msra.mxu0 %v1065_v49  ;;  %v3730_v49 = vld [vmem:[%s15265_s3 + $0x3c] sm:$0xf]  ;;  %15711 = vst [vmem:[#allocation135_spill] sm:$0xff] %v11883_v11  ;;  %v6755_v11 = vld [vmem:[%s15272_s14 + $0x280] sm:$0xff] }
 0x4e3   :  { %v1066_v0 = vpack.c.bf16 %v1055_v47, %v1054_v51  ;;  %v10104_v10 = vpop.f32.mrb[44].mxu1  ;;  %3913 = vperm.xlu0 %10222, %v3730_v49  }
 0x4e4   :  { %v1040_v3 = vadd.f32 %v10104_v10, %v11830_v37  ;;  %v1031_v40 = vpop.f32.mrb[45].mxu1 }
 0x4e5   :  { %v1032_v43 = vadd.f32 %v11830_v37, %v1031_v40  ;;  %v10105_v36 = vpop.f32.mrb[46].mxu1  ;;  %10114 = vmatprep.subr.bf16.mxu0 %v1066_v0  ;;  %v11888_v10 = vpop.permute.xlu0 %4760 }
 0x4e6   :  { %v1043_v57 = vadd.f32 %v10105_v36, %v11830_v37  ;;  %v1034_v24 = vpop.f32.mrb[47].mxu1  ;;  %10115 = vmatpush3.bf16.msra.mxu0 %v1066_v0  ;;  %v1060_v18 = vmax.f32 %v1040_v3, 0.0  ;;  %v4344_v0 = vld [vmem:[%s15265_s3] sm:$0xf]  ;;  %15712 = vst [vmem:[#allocation136_spill] sm:$0xff] %v11888_v10 }
 0x4e7   :  { %v1035_v19 = vadd.f32 %v11830_v37, %v1034_v24  ;;  %10116 = vmatprep.subr.bf16.mxu0 %v1067_v61  ;;  %v1058_v51 = vmax.f32 %v1032_v43, 0.0  ;;  %10224 = vset.pattern.permute.xlu0 %v15633_v7  ;;  %v4347_v37 = vld [vmem:[%s15265_s3 + $0xc] sm:$0xf]  ;;  %v4349_v3 = vld [vmem:[%s15265_s3 + $0x14] sm:$0xf]  ;;  %v6751_v10 = vld [vmem:[%s15272_s14 + $0x260] sm:$0xff] }
 0x4e8   :  { %v1061_v6 = vmax.f32 %v1043_v57, 0.0  ;;  %4362 = vperm.xlu0 %10224, %v4344_v0   ;;  %v4351_v43 = vld [vmem:[%s15265_s3 + $0x1c] sm:$0xf]  ;;  %v4353_v57 = vld [vmem:[%s15265_s3 + $0x24] sm:$0xf] }
 0x4e9   :  { %v1059_v40 = vmax.f32 %v1035_v19, 0.0  ;;  %v4974_v24 = vld [vmem:[%s15265_s3 + $0x4] sm:$0xf]  ;;  %v4979_v19 = vld [vmem:[%s15265_s3 + $0x18] sm:$0xf] }
 0x4ea   :  { %v1069_v47 = vpack.c.bf16 %v1061_v6, %v1060_v18  ;;  %10117 = vmatpush3.bf16.msra.mxu0 %v1067_v61  ;;  %v11894_v61 = vpop.permute.xlu0 %4784  ;;  %v4984_v18 = vld [vmem:[%s15265_s3 + $0x2c] sm:$0xf] }
 0x4eb   :  { %v1068_v62 = vpack.c.bf16 %v1059_v40, %v1058_v51  ;;  %15713 = vst [vmem:[#allocation137_spill] sm:$0xff] %v11894_v61  ;;  %v6747_v61 = vld [vmem:[%s15272_s14 + $0x240] sm:$0xff] }
 0x4ec   :  { %4398 = vperm.xlu0 %10224, %v4347_v37  }
 0x4ed   :  { %10118 = vmatprep.subr.bf16.mxu0 %v1068_v62 }
 0x4ee   :  { %10119 = vmatpush3.bf16.msra.mxu0 %v1068_v62  ;;  %v11904_v36 = vpop.permute.xlu0 %4820 }
 0x4ef   :  { %10120 = vmatprep.subr.bf16.mxu0 %v1069_v47  ;;  %15714 = vst [vmem:[#allocation138_spill] sm:$0xff] %v11904_v36  ;;  %v15825_v36 = vld [vmem:[#allocation74_spill] sm:$0xff] }
 0x4f0   :  { %4422 = vperm.xlu0 %10224, %v4349_v3  }
 0x4f2   :  { %10121 = vmatpush3.bf16.msra.mxu0 %v1069_v47 }
 0x4f4   :  { %4446 = vperm.xlu0 %10224, %v4351_v43   ;;  %v4985_v43 = vld [vmem:[%s15265_s3 + $0x30] sm:$0xf] }
 0x4f5   :  { %10123 = vmatmul.mubr.bf16.vlgmr.msra.gmra.mrb[48].mxu0 %v11528_v52  ;;  %v11911_v52 = vpop.permute.xlu0 %4856 }
 0x4f6   :  { %10126 = vmatprep.mubr.bf16.mxu0 %v11534_v33  ;;  %15715 = vst [vmem:[#allocation139_spill] sm:$0xff] %v11911_v52  ;;  %v4357_v33 = vld [vmem:[%s15265_s3 + $0x34] sm:$0xf] }
 0x4f8   :  { %4470 = vperm.xlu0 %10224, %v4353_v57   ;;  %v10319_v57 = vld [vmem:[%s15270_s11 + $0x74] ss:$8 sps:$4 sm:$0xff]  }
 0x4f9   :  { %v11920_v49 = vpop.permute.xlu0 %5317  ;;  %1297 = vmatprep.subr.bf16.mxu1 %v10319_v57 }
 0x4fa   :  { %15716 = vst [vmem:[#allocation140_spill] sm:$0xff] %v11920_v49  ;;  %v3778_v49 = vrot.slane %v15825_v36, %v10951_v28 }
 0x4fc   :  { %4518 = vperm.xlu0 %10224, %v4357_v33  }
 0x4fd   :  { %10127 = vmatmul.mubr.bf16.gmra.mrb[52].mxu0 %v11553_v2  ;;  %v4977_v2 = vld [vmem:[%s15265_s3 + $0x10] sm:$0xf] }
 0x4fe   :  { %10130 = vmatprep.mubr.bf16.mxu0 %v11559_v1  ;;  %v11927_v1 = vpop.permute.xlu0 %5353 }
 0x4ff   :  { %15717 = vst [vmem:[#allocation141_spill] sm:$0xff] %v11927_v1  ;;  %v15817_v1 = vld [vmem:[#allocation53_spill] sm:$0xff] }
 0x500   :  { %10226 = vset.pattern.permute.xlu0 %v15638_v12 }
 0x501   :  { %5003 = vperm.xlu0 %10226, %v4974_v24   ;;  %v10317_v24 = vld [vmem:[%s15270_s11 + $0x70] ss:$8 sps:$4 sm:$0xff]  }
 0x502   :  { %1298 = vmatpush1.bf16.msra.mxu1 %v10317_v24  ;;  %v5607_v24 = vld [vmem:[%s15265_s3 + $0x14] sm:$0xf] }
 0x505   :  { %10131 = vmatmul.mubr.bf16.gmra.mrb[56].mxu0 %v11577_v20  ;;  %5039 = vperm.xlu0 %10226, %v4977_v2   ;;  %v4981_v20 = vld [vmem:[%s15265_s3 + $0x20] sm:$0xf]  ;;  %v4988_v2 = vld [vmem:[%s15265_s3 + $0x3c] sm:$0xf] }
 0x506   :  { %10134 = vmatprep.mubr.bf16.mxu0 %v11583_v8  ;;  %v11937_v8 = vpop.permute.xlu0 %5377 }
 0x507   :  { %15718 = vst [vmem:[#allocation142_spill] sm:$0xff] %v11937_v8  ;;  %v15851_v8 = vld [vmem:[#allocation93_spill] sm:$0xff] }
 0x509   :  { %5063 = vperm.xlu0 %10226, %v4979_v19  }
 0x50a   :  { %v11942_v6 = vpop.permute.xlu0 %5401 }
 0x50b   :  { %15719 = vst [vmem:[#allocation143_spill] sm:$0xff] %v11942_v6 }
 0x50d   :  { %10135 = vmatmul.mubr.bf16.gmra.mrb[60].mxu0 %v11598_v34  ;;  %5087 = vperm.xlu0 %10226, %v4981_v20   ;;  %v5602_v20 = vld [vmem:[%s15265_s3] sm:$0xf] }
 0x50e   :  { %1484 = vmatprep.mubr.bf16.mxu0 %v15670_v31  ;;  %v11944_v51 = vpop.permute.xlu0 %5437 }
 0x50f   :  { %15720 = vst [vmem:[#allocation144_spill] sm:$0xff] %v11944_v51  ;;  %v15809_v51 = vld [vmem:[#allocation48_spill] sm:$0xff] }
 0x511   :  { %5123 = vperm.xlu0 %10226, %v4984_v18  }
 0x512   :  { %v11946_v34 = vpop.permute.xlu0 %5461 }
 0x513   :  { %15721 = vst [vmem:[#allocation145_spill] sm:$0xff] %v11946_v34  ;;  %v15812_v34 = vld [vmem:[#allocation49_spill] sm:$0xff] }
 0x515   :  { %5135 = vperm.xlu0 %10226, %v4985_v43   ;;  %v5605_v43 = vld [vmem:[%s15265_s3 + $0xc] sm:$0xf] }
 0x516   :  { %v11948_v40 = vpop.permute.xlu0 %5934 }
 0x517   :  { %15722 = vst [vmem:[#allocation146_spill] sm:$0xff] %v11948_v40 }
 0x519   :  { %5171 = vperm.xlu0 %10226, %v4988_v2   ;;  %v2592_v2 = vrot.slane %v11543_v46, %v10951_v28  ;;  %v2470_v46 = vld [vmem:[%s15265_s3 + $0x34] sm:$0xf] }
 0x51a   :  { %v11950_v47 = vpop.permute.xlu0 %5970  ;;  %2631 = vperm.xlu1 %10219, %v2470_v46   ;;  %v6235_v46 = vld [vmem:[%s15265_s3 + $0x10] sm:$0xf] }
 0x51b   :  { %15723 = vst [vmem:[#allocation147_spill] sm:$0xff] %v11950_v47  ;;  %v15816_v47 = vld [vmem:[#allocation52_spill] sm:$0xff] }
 0x51d   :  { %10228 = vset.pattern.permute.xlu0 %v15642_v14 }
 0x51e   :  { %v11952_v62 = vpop.permute.xlu0 %5994  ;;  %5620 = vperm.xlu0 %10228, %v5602_v20  }
 0x51f   :  { %15724 = vst [vmem:[#allocation148_spill] sm:$0xff] %v11952_v62  ;;  %v15802_v62 = vld [vmem:[#allocation38_spill] sm:$0xff] }
 0x522   :  { %v11954_v0 = vpop.permute.xlu0 %6018  ;;  %5656 = vperm.xlu0 %10228, %v5605_v43   ;;  %v2604_v43 = vrot.slane %v11562_v5, %v10951_v28  ;;  %v2471_v5 = vld [vmem:[%s15265_s3 + $0x38] sm:$0xf] }
 0x523   :  { %15725 = vst [vmem:[#allocation149_spill] sm:$0xff] %v11954_v0  ;;  %2643 = vperm.xlu1 %10219, %v2471_v5  }
 0x526   :  { %v11956_v37 = vpop.permute.xlu0 %6042  ;;  %5680 = vperm.xlu0 %10228, %v5607_v24  }
 0x527   :  { %15726 = vst [vmem:[#allocation150_spill] sm:$0xff] %v11956_v37  ;;  %10221 = vset.pattern.permute.xlu1 %v15625_v16 }
 0x52a   :  { %v11958_v3 = vpop.permute.xlu0 %6078 }
 0x52b   :  { %15727 = vst [vmem:[#allocation151_spill] sm:$0xff] %v11958_v3 }
 0x52e   :  { %v11966_v33 = vpop.permute.xlu0 %6114 }
 0x52f   :  { %15728 = vst [vmem:[#allocation152_spill] sm:$0xff] %v11966_v33 }
 0x532   :  { %v11974_v19 = vpop.permute.xlu0 %2487 }
 0x533   :  { %15729 = vst [vmem:[#allocation153_spill] sm:$0xff] %v11974_v19 }
 0x536   :  { %v11980_v18 = vpop.permute.xlu0 %2523 }
 0x537   :  { %15730 = vst [vmem:[#allocation154_spill] sm:$0xff] %v11980_v18  ;;  %v5609_v18 = vld [vmem:[%s15265_s3 + $0x1c] sm:$0xf] }
 0x538   :  { %5704 = vperm.xlu0 %10228, %v5609_v18  }
 0x53a   :  { %v11985_v57 = vpop.permute.xlu0 %2547 }
 0x53b   :  { %15731 = vst [vmem:[#allocation155_spill] sm:$0xff] %v11985_v57 }
 0x53e   :  { %v2572_v19 = vpop.permute.xlu0 %2571 }
 0x53f   :  { %v2580_v20 = vrot.slane %v2572_v19, %v10951_v28  ;;  %v5611_v19 = vld [vmem:[%s15265_s3 + $0x24] sm:$0xf] }
 0x540   :  { %5728 = vperm.xlu0 %10228, %v5611_v19   ;;  %v6237_v19 = vld [vmem:[%s15265_s3 + $0x18] sm:$0xf] }
 0x541   :  { %v11998_v33 = vcombine.low %v2580_v20, %v2592_v2 }
 0x542   :  { %v2608_v57 = vpop.permute.xlu0 %2607 }
 0x543   :  { %15732 = vst [vmem:[#allocation156_spill] sm:$0xff] %v11998_v33  ;;  %v2616_v3 = vrot.slane %v2608_v57, %v10951_v28  ;;  %v5615_v57 = vld [vmem:[%s15265_s3 + $0x34] sm:$0xf] }
 0x544   :  { %5776 = vperm.xlu0 %10228, %v5615_v57   ;;  %v3209_v57 = vrot.slane %v11569_v22, %v10951_v28  ;;  %v3100_v22 = vld [vmem:[%s15265_s3 + $0x38] sm:$0xf] }
 0x545   :  { %v12007_v24 = vcombine.low %v2604_v43, %v2616_v3  ;;  %v6232_v3 = vld [vmem:[%s15265_s3 + $0x4] sm:$0xf] }
 0x546   :  { %v12012_v18 = vpop.permute.xlu0 %2619 }
 0x547   :  { %15733 = vst [vmem:[#allocation157_spill] sm:$0xff] %v12007_v24 }
 0x548   :  { %10230 = vset.pattern.permute.xlu0 %v15646_v32 }
 0x549   :  { %6261 = vperm.xlu0 %10230, %v6232_v3  }
 0x54a   :  { %v12017_v2 = vpop.permute.xlu0 %2655 }
 0x54d   :  { %6297 = vperm.xlu0 %10230, %v6235_v46   ;;  %v3098_v46 = vld [vmem:[%s15265_s3 + $0x30] sm:$0xf] }
 0x54e   :  { %v12024_v20 = vpop.permute.xlu0 %3104  ;;  %3248 = vperm.xlu1 %10221, %v3098_v46   ;;  %v6242_v46 = vld [vmem:[%s15265_s3 + $0x2c] sm:$0xf] }
 0x54f   :  { %15734 = vst [vmem:[#allocation158_spill] sm:$0xff] %v12024_v20 }
 0x551   :  { %6321 = vperm.xlu0 %10230, %v6237_v19  }
 0x552   :  { %v12026_v43 = vpop.permute.xlu0 %3140  ;;  %3272 = vperm.xlu1 %10221, %v3100_v22  }
 0x553   :  { %15735 = vst [vmem:[#allocation159_spill] sm:$0xff] %v12026_v43 }
 0x556   :  { %v12034_v5 = vpop.permute.xlu0 %3164 }
 0x557   :  { %15736 = vst [vmem:[#allocation160_spill] sm:$0xff] %v12034_v5 }
 0x55a   :  { %v12036_v16 = vpop.permute.xlu0 %3188 }
 0x55b   :  { %15737 = vst [vmem:[#allocation161_spill] sm:$0xff] %v12036_v16  ;;  %v3729_v16 = vld [vmem:[%s15265_s3 + $0x38] sm:$0xf] }
 0x55e   :  { %v3213_v3 = vpop.permute.xlu0 %3212 }
 0x55f   :  { %v3221_v24 = vrot.slane %v3213_v3, %v10951_v28  ;;  %v6239_v3 = vld [vmem:[%s15265_s3 + $0x20] sm:$0xf] }
 0x560   :  { %6345 = vperm.xlu0 %10230, %v6239_v3   ;;  %v3862_v3 = vrot.slane %v11615_v27, %v10951_v28  ;;  %v4356_v27 = vld [vmem:[%s15265_s3 + $0x30] sm:$0xf] }
 0x561   :  { %v12041_v33 = vcombine.low %v3209_v57, %v3221_v24  ;;  %v3101_v24 = vld [vmem:[%s15265_s3 + $0x3c] sm:$0xf] }
 0x562   :  { %v12043_v43 = vpop.permute.xlu0 %3260  ;;  %3284 = vperm.xlu1 %10221, %v3101_v24   ;;  %v6243_v24 = vld [vmem:[%s15265_s3 + $0x30] sm:$0xf] }
 0x563   :  { %15738 = vst [vmem:[#allocation162_spill] sm:$0xff] %v12041_v33  ;;  %v3850_v33 = vrot.slane %v11606_v25, %v10951_v28 }
 0x564   :  { %6381 = vperm.xlu0 %10230, %v6242_v46  }
 0x566   :  { %v12048_v20 = vpop.permute.xlu0 %3745  ;;  %10223 = vset.pattern.permute.xlu1 %v15630_v60  ;;  %v6246_v60 = vld [vmem:[%s15265_s3 + $0x3c] sm:$0xf] }
 0x567   :  { %15739 = vst [vmem:[#allocation163_spill] sm:$0xff] %v12048_v20 }
 0x568   :  { %6393 = vperm.xlu0 %10230, %v6243_v24  }
 0x56a   :  { %v12050_v19 = vpop.permute.xlu0 %3781 }
 0x56b   :  { %15740 = vst [vmem:[#allocation164_spill] sm:$0xff] %v12050_v19  ;;  %v3728_v19 = vld [vmem:[%s15265_s3 + $0x34] sm:$0xf] }
 0x56c   :  { %3889 = vperm.xlu1 %10223, %v3728_v19   ;;  %6429 = vperm.xlu0 %10230, %v6246_v60   ;;  %v4358_v19 = vld [vmem:[%s15265_s3 + $0x38] sm:$0xf]  ;;  %v4467_v60 = vrot.slane %v11620_v13, %v10951_v28  ;;  %v5617_v13 = vld [vmem:[%s15265_s3 + $0x3c] sm:$0xf] }
 0x56e   :  { %v12058_v57 = vpop.permute.xlu0 %3805 }
 0x56f   :  { %15741 = vst [vmem:[#allocation165_spill] sm:$0xff] %v12058_v57 }
 0x570   :  { %3901 = vperm.xlu1 %10223, %v3729_v16   ;;  %v4359_v16 = vld [vmem:[%s15265_s3 + $0x3c] sm:$0xf] }
 0x572   :  { %v3830_v22 = vpop.permute.xlu0 %3829 }
 0x573   :  { %v3838_v57 = vrot.slane %v3830_v22, %v10951_v28 }
 0x574   :  { %10225 = vset.pattern.permute.xlu1 %v15633_v7  ;;  %v4986_v7 = vld [vmem:[%s15265_s3 + $0x34] sm:$0xf] }
 0x575   :  { %v12078_v20 = vcombine.low %v3838_v57, %v3850_v33  ;;  %4506 = vperm.xlu1 %10225, %v4356_v27   ;;  %v5614_v27 = vld [vmem:[%s15265_s3 + $0x30] sm:$0xf] }
 0x576   :  { %v3866_v25 = vpop.permute.xlu0 %3865 }
 0x577   :  { %15742 = vst [vmem:[#allocation166_spill] sm:$0xff] %v12078_v20  ;;  %v3874_v22 = vrot.slane %v3866_v25, %v10951_v28  ;;  %v4987_v25 = vld [vmem:[%s15265_s3 + $0x38] sm:$0xf]  ;;  %v5108_v20 = vrot.slane %v11639_v55, %v10951_v28 }
 0x579   :  { %v12087_v46 = vcombine.low %v3862_v3, %v3874_v22  ;;  %4530 = vperm.xlu1 %10225, %v4358_v19  }
 0x57a   :  { %v12089_v5 = vpop.permute.xlu0 %3877 }
 0x57b   :  { %15743 = vst [vmem:[#allocation167_spill] sm:$0xff] %v12087_v46 }
 0x57d   :  { %4542 = vperm.xlu1 %10225, %v4359_v16  }
 0x57e   :  { %v12095_v33 = vpop.permute.xlu0 %3913 }
 0x581   :  { %10227 = vset.pattern.permute.xlu1 %v15638_v12 }
 0x582   :  { %v12100_v57 = vpop.permute.xlu0 %4362  ;;  %5147 = vperm.xlu1 %10227, %v4986_v7   ;;  %v5616_v7 = vld [vmem:[%s15265_s3 + $0x38] sm:$0xf] }
 0x583   :  { %15744 = vst [vmem:[#allocation168_spill] sm:$0xff] %v12100_v57 }
 0x586   :  { %v12105_v24 = vpop.permute.xlu0 %4398  ;;  %5159 = vperm.xlu1 %10227, %v4987_v25  }
 0x587   :  { %15745 = vst [vmem:[#allocation169_spill] sm:$0xff] %v12105_v24  ;;  %v5677_v24 = vrot.slane %v11485_v17, %v10951_v28  ;;  %v2628_v17 = vrot.slane %v12012_v18, %v10951_v28 }
 0x58a   :  { %v12110_v3 = vpop.permute.xlu0 %4422  ;;  %10229 = vset.pattern.permute.xlu1 %v15642_v14  ;;  %v5060_v14 = vrot.slane %v11464_v42, %v10951_v28  ;;  %v6245_v42 = vld [vmem:[%s15265_s3 + $0x38] sm:$0xf] }
 0x58b   :  { %15746 = vst [vmem:[#allocation170_spill] sm:$0xff] %v12110_v3  ;;  %5764 = vperm.xlu1 %10229, %v5614_v27  }
 0x58e   :  { %v12116_v22 = vpop.permute.xlu0 %4446 }
 0x58f   :  { %15747 = vst [vmem:[#allocation171_spill] sm:$0xff] %v12116_v22  ;;  %5788 = vperm.xlu1 %10229, %v5616_v7  }
 0x592   :  { %v4471_v19 = vpop.permute.xlu0 %4470 }
 0x593   :  { %v4479_v16 = vrot.slane %v4471_v19, %v10951_v28  ;;  %5800 = vperm.xlu1 %10229, %v5617_v13  }
 0x595   :  { %v12125_v12 = vcombine.low %v4467_v60, %v4479_v16  ;;  %v6244_v60 = vld [vmem:[%s15265_s3 + $0x34] sm:$0xf]  ;;  %v5084_v16 = vrot.slane %v11469_v53, %v10951_v28  ;;  %v5120_v53 = vrot.slane %v11646_v23, %v10951_v28  ;;  %v5641_v23 = vrot.slane %v11474_v29, %v10951_v28 }
 0x596   :  { %v12130_v25 = vpop.permute.xlu0 %4518 }
 0x597   :  { %15748 = vst [vmem:[#allocation172_spill] sm:$0xff] %v12125_v12  ;;  %10231 = vset.pattern.permute.xlu1 %v15646_v32 }
 0x598   :  { %6405 = vperm.xlu1 %10231, %v6244_v60  }
 0x59a   :  { %v12135_v46 = vpop.permute.xlu0 %5003 }
 0x59b   :  { %15749 = vst [vmem:[#allocation173_spill] sm:$0xff] %v12135_v46 }
 0x59c   :  { %6417 = vperm.xlu1 %10231, %v6245_v42  }
 0x59e   :  { %v5040_v27 = vpop.permute.xlu0 %5039 }
 0x59f   :  { %v5048_v19 = vrot.slane %v5040_v27, %v10951_v28 }
 0x5a1   :  { %v12146_v7 = vcombine.low %v5048_v19, %v5060_v14 }
 0x5a2   :  { %v5064_v12 = vpop.permute.xlu0 %5063 }
 0x5a3   :  { %15750 = vst [vmem:[#allocation174_spill] sm:$0xff] %v12146_v7  ;;  %v5072_v13 = vrot.slane %v5064_v12, %v10951_v28 }
 0x5a5   :  { %v12154_v46 = vcombine.low %v5072_v13, %v5084_v16 }
 0x5a6   :  { %v5088_v32 = vpop.permute.xlu0 %5087 }
 0x5a7   :  { %15751 = vst [vmem:[#allocation175_spill] sm:$0xff] %v12154_v46  ;;  %v5096_v27 = vrot.slane %v5088_v32, %v10951_v28  ;;  %v12168_v32 = vpop.permute.xlu1 %6357 }
 0x5a9   :  { %v12159_v14 = vcombine.low %v5096_v27, %v5108_v20 }
 0x5aa   :  { %v5124_v60 = vpop.permute.xlu0 %5123 }
 0x5ab   :  { %15752 = vst [vmem:[#allocation176_spill] sm:$0xff] %v12159_v14  ;;  %v5132_v19 = vrot.slane %v5124_v60, %v10951_v28 }
 0x5ad   :  { %v12162_v22 = vcombine.low %v5120_v53, %v5132_v19 }
 0x5ae   :  { %v12164_v3 = vpop.permute.xlu0 %5135 }
 0x5af   :  { %15753 = vst [vmem:[#allocation177_spill] sm:$0xff] %v12162_v22 }
 0x5b2   :  { %v12166_v46 = vpop.permute.xlu0 %5171 }
 0x5b6   :  { %v5621_v53 = vpop.permute.xlu0 %5620 }
 0x5b7   :  { %v5629_v19 = vrot.slane %v5621_v53, %v10951_v28 }
 0x5ba   :  { %v5657_v14 = vpop.permute.xlu0 %5656 }
 0x5bb   :  { %v5665_v29 = vrot.slane %v5657_v14, %v10951_v28  ;;  %v5701_v14 = vrot.slane %v11492_v38, %v10951_v28 }
 0x5be   :  { %v5681_v57 = vpop.permute.xlu0 %5680 }
 0x5c8   :  { %v10124_v7 = vpop.f32.mrb[48].mxu0 }
 0x5c9   :  { %v1104_v12 = vpop.f32.mrb[49].mxu0 }
 0x5ca   :  { %v10125_v55 = vpop.f32.mrb[50].mxu0 }
 0x5cb   :  { %v1168_v16 = vpack.c.bf16 %v10125_v55, %v10124_v7  ;;  %v1107_v42 = vpop.f32.mrb[51].mxu0  ;;  %v12176_v55 = vpop.permute.xlu1 %6369 }
 0x5cc   :  { %v1167_v13 = vpack.c.bf16 %v1107_v42, %v1104_v12  ;;  %v5653_v12 = vrot.slane %v11480_v44, %v10951_v28 }
 0x5ce   :  { %1316 = vmatmul.mubr.bf16.vlgmr.msra.gmra.mrb[48].mxu1 %v1167_v13  ;;  %v12178_v13 = vcombine.low %v5629_v19, %v5641_v23  ;;  %v5689_v23 = vrot.slane %v5681_v57, %v10951_v28 }
 0x5cf   :  { %1325 = vmatprep.mubr.bf16.mxu1 %v15670_v31  ;;  %v12186_v44 = vpop.permute.xlu1 %2026 }
 0x5d0   :  { %v10128_v20 = vpop.f32.mrb[52].mxu0  ;;  %15754 = vst [vmem:[#allocation178_spill] sm:$0xff] %v12178_v13 }
 0x5d1   :  { %v1120_v27 = vpop.f32.mrb[53].mxu0 }
 0x5d2   :  { %v10129_v60 = vpop.f32.mrb[54].mxu0 }
 0x5d3   :  { %v1170_v22 = vpack.c.bf16 %v10129_v60, %v10128_v20  ;;  %v1123_v7 = vpop.f32.mrb[55].mxu0  ;;  %v12184_v20 = vcombine.low %v5653_v12, %v5665_v29  ;;  %v5705_v12 = vpop.permute.xlu0 %5704 }
 0x5d4   :  { %v1169_v42 = vpack.c.bf16 %v1123_v7, %v1120_v27  ;;  %v12191_v7 = vcombine.low %v5677_v24, %v5689_v23  ;;  %v5713_v29 = vrot.slane %v5705_v12, %v10951_v28  ;;  %v2664_v24 = vrot.slane %v12017_v2, %v10951_v28 }
 0x5d5   :  { %15755 = vst [vmem:[#allocation179_spill] sm:$0xff] %v12184_v20  ;;  %v2632_v20 = vpop.permute.xlu1 %2631  ;;  %v3269_v2 = vrot.slane %v12043_v43, %v10951_v28  ;;  %v3886_v43 = vrot.slane %v12089_v5, %v10951_v28 }
 0x5d6   :  { %1326 = vmatmul.mubr.bf16.gmra.mrb[52].mxu1 %v1168_v16  ;;  %15756 = vst [vmem:[#allocation180_spill] sm:$0xff] %v12191_v7  ;;  %v2640_v57 = vrot.slane %v2632_v20, %v10951_v28  ;;  %v12200_v38 = vcombine.low %v5701_v14, %v5713_v29 }
 0x5d7   :  { %1335 = vmatprep.mubr.bf16.mxu1 %v15670_v31 }
 0x5d8   :  { %v10132_v53 = vpop.f32.mrb[56].mxu0  ;;  %15757 = vst [vmem:[#allocation181_spill] sm:$0xff] %v12200_v38  ;;  %v12204_v18 = vcombine.low %v2628_v17, %v2640_v57  ;;  %v15813_v38 = vld [vmem:[#allocation64_spill] sm:$0xff] }
 0x5d9   :  { %v1136_v60 = vpop.f32.mrb[57].mxu0  ;;  %v2644_v12 = vpop.permute.xlu1 %2643 }
 0x5da   :  { %v10133_v37 = vpop.f32.mrb[58].mxu0  ;;  %15758 = vst [vmem:[#allocation182_spill] sm:$0xff] %v12204_v18  ;;  %v2652_v20 = vrot.slane %v2644_v12, %v10951_v28  ;;  %v9497_v18 = vcombine.low %v6747_v61, %v6751_v10 }
 0x5db   :  { %v1172_v27 = vpack.c.bf16 %v10133_v37, %v10132_v53  ;;  %v1139_v19 = vpop.f32.mrb[59].mxu0  ;;  %v5725_v37 = vrot.slane %v11650_v59, %v10951_v28 }
 0x5dc   :  { %v1171_v16 = vpack.c.bf16 %v1139_v19, %v1136_v60  ;;  %v12210_v14 = vcombine.low %v2652_v20, %v2664_v24 }
 0x5dd   :  { %v3249_v17 = vpop.permute.xlu1 %3248 }
 0x5de   :  { %1336 = vmatmul.mubr.bf16.gmra.mrb[56].mxu1 %v1169_v42  ;;  %v5729_v42 = vpop.permute.xlu0 %5728  ;;  %15760 = vst [vmem:[#allocation184_spill] sm:$0xff] %v12210_v14 }
 0x5df   :  { %1345 = vmatprep.mubr.bf16.mxu1 %v15670_v31  ;;  %v5737_v19 = vrot.slane %v5729_v42, %v10951_v28 }
 0x5e0   :  { %v10136_v53 = vpop.f32.mrb[60].mxu0 }
 0x5e1   :  { %v1152_v60 = vpop.f32.mrb[61].mxu0  ;;  %v12208_v59 = vcombine.low %v5725_v37, %v5737_v19 }
 0x5e2   :  { %v10137_v23 = vpop.f32.mrb[62].mxu0 }
 0x5e3   :  { %v1174_v7 = vpack.c.bf16 %v10137_v23, %v10136_v53  ;;  %v1155_v13 = vpop.f32.mrb[63].mxu0  ;;  %15759 = vst [vmem:[#allocation183_spill] sm:$0xff] %v12208_v59  ;;  %v4527_v23 = vrot.slane %v12130_v25, %v10951_v28  ;;  %v15781_v59 = vld [vmem:[#allocation14_spill] sm:$0xff] }
 0x5e4   :  { %v1173_v0 = vpack.c.bf16 %v1155_v13, %v1152_v60  ;;  %v3257_v13 = vrot.slane %v3249_v17, %v10951_v28 }
 0x5e6   :  { %1346 = vmatmul.mubr.bf16.gmra.mrb[60].mxu1 %v1170_v22  ;;  %v12219_v29 = vcombine.low %v3257_v13, %v3269_v2  ;;  %v3273_v22 = vpop.permute.xlu1 %3272 }
 0x5e7   :  { %1355 = vmatprep.mubr.bf16.mxu1 %v15670_v31 }
 0x5e8   :  { %15761 = vst [vmem:[#allocation185_spill] sm:$0xff] %v12219_v29  ;;  %v6731_v29 = vld [vmem:[%s15272_s14 + $0x1c0] sm:$0xff] }
 0x5ea   :  { %v3285_v57 = vpop.permute.xlu1 %3284 }
 0x5ee   :  { %1356 = vmatmul.mubr.bf16.gmra.mrb[64].mxu1 %v1171_v16  ;;  %v3281_v16 = vrot.slane %v3273_v22, %v10951_v28 }
 0x5ef   :  { %1365 = vmatprep.mubr.bf16.mxu1 %v15670_v31 }
 0x5f6   :  { %1366 = vmatmul.mubr.bf16.gmra.mrb[68].mxu1 %v1172_v27  ;;  %v3293_v27 = vrot.slane %v3285_v57, %v10951_v28 }
 0x5f7   :  { %1375 = vmatprep.mubr.bf16.mxu1 %v15670_v31 }
 0x5f8   :  { %v12223_v37 = vcombine.low %v3281_v16, %v3293_v27 }
 0x5fa   :  { %15762 = vst [vmem:[#allocation186_spill] sm:$0xff] %v12223_v37  ;;  %v15814_v37 = vld [vmem:[#allocation65_spill] sm:$0xff] }
 0x5fe   :  { %1376 = vmatmul.mubr.bf16.gmra.mrb[72].mxu1 %v1173_v0  ;;  %v3890_v0 = vpop.permute.xlu1 %3889 }
 0x5ff   :  { %1385 = vmatprep.mubr.bf16.mxu1 %v15670_v31  ;;  %v3898_v53 = vrot.slane %v3890_v0, %v10951_v28  ;;  %v3922_v31 = vrot.slane %v12095_v33, %v10951_v28  ;;  %v5144_v33 = vrot.slane %v12164_v3, %v10951_v28  ;;  %v5777_v0 = vpop.permute.xlu0 %5776  ;;  %v6679_v3 = vld [vmem:[%s15272_s14 + $0x20] sm:$0xff] }
 0x601   :  { %v12230_v24 = vcombine.low %v3886_v43, %v3898_v53  ;;  %v6675_v53 = vld [vmem:[%s15272_s14] sm:$0xff] }
 0x603   :  { %15763 = vst [vmem:[#allocation187_spill] sm:$0xff] %v12230_v24 }
 0x606   :  { %1386 = vmatmul.mubr.bf16.gmra.mrb[76].mxu1 %v1174_v7  ;;  %v3902_v7 = vpop.permute.xlu1 %3901 }
 0x607   :  { %v3910_v60 = vrot.slane %v3902_v7, %v10951_v28  ;;  %v5785_v7 = vrot.slane %v5777_v0, %v10951_v28  ;;  %v6691_v0 = vld [vmem:[%s15272_s14 + $0x80] sm:$0xff] }
 0x609   :  { %v12233_v42 = vcombine.low %v3910_v60, %v3922_v31  ;;  %v5180_v31 = vrot.slane %v12166_v46, %v10951_v28  ;;  %v9426_v60 = vcombine.high %v6675_v53, %v6679_v3 }
 0x60a   :  { %v4507_v19 = vpop.permute.xlu1 %4506 }
 0x60b   :  { %15764 = vst [vmem:[#allocation188_spill] sm:$0xff] %v12233_v42  ;;  %v4515_v12 = vrot.slane %v4507_v19, %v10951_v28  ;;  %7443 = vmatprep.subr.bf16.mxu1 %v9426_v60  ;;  %v6699_v60 = vld [vmem:[%s15272_s14 + $0xc0] sm:$0xff]  ;;  %v15799_v42 = vld [vmem:[#allocation34_spill] sm:$0xff] }
 0x60d   :  { %v12238_v5 = vcombine.low %v4515_v12, %v4527_v23  ;;  %v9425_v23 = vcombine.low %v6675_v53, %v6679_v3  ;;  %v6695_v53 = vld [vmem:[%s15272_s14 + $0xa0] sm:$0xff] }
 0x60e   :  { %v4531_v20 = vpop.permute.xlu1 %4530  ;;  %v9442_v3 = vcombine.high %v6691_v0, %v6695_v53 }
 0x60f   :  { %15765 = vst [vmem:[#allocation189_spill] sm:$0xff] %v12238_v5  ;;  %v4539_v17 = vrot.slane %v4531_v20, %v10951_v28  ;;  %7444 = vmatpush1.bf16.msra.mxu1 %v9425_v23  ;;  %v6703_v23 = vld [vmem:[%s15272_s14 + $0xe0] sm:$0xff] }
 0x612   :  { %v4543_v2 = vpop.permute.xlu1 %4542 }
 0x613   :  { %v4551_v13 = vrot.slane %v4543_v2, %v10951_v28  ;;  %v6683_v2 = vld [vmem:[%s15272_s14 + $0x40] sm:$0xff] }
 0x615   :  { %v12245_v57 = vcombine.low %v4539_v17, %v4551_v13  ;;  %v6687_v17 = vld [vmem:[%s15272_s14 + $0x60] sm:$0xff] }
 0x616   :  { %v5148_v22 = vpop.permute.xlu1 %5147  ;;  %v9434_v13 = vcombine.high %v6683_v2, %v6687_v17 }
 0x617   :  { %v5156_v16 = vrot.slane %v5148_v22, %v10951_v28  ;;  %15766 = vst [vmem:[#allocation190_spill] sm:$0xff] %v12245_v57  ;;  %v9433_v22 = vcombine.low %v6683_v2, %v6687_v17  ;;  %v9449_v2 = vcombine.low %v6699_v60, %v6703_v23  ;;  %v6707_v17 = vld [vmem:[%s15272_s14 + $0x100] sm:$0xff]  ;;  %v15811_v57 = vld [vmem:[#allocation60_spill] sm:$0xff] }
 0x618   :  { %7445 = vmatprep.subr.bf16.mxu1 %v9434_v13  ;;  %v6711_v13 = vld [vmem:[%s15272_s14 + $0x120] sm:$0xff]  ;;  %v5494_v6 = vrot.slane %v15811_v57, %v10951_v28  ;;  %v15815_v57 = vld [vmem:[#allocation50_spill] sm:$0xff] }
 0x619   :  { %v12247_v25 = vcombine.low %v5144_v33, %v5156_v16  ;;  %7446 = vmatpush1.bf16.msra.mxu1 %v9433_v22 }
 0x61a   :  { %v5160_v27 = vpop.permute.xlu1 %5159  ;;  %7447 = vmatprep.subr.bf16.mxu1 %v9442_v3  ;;  %v15775_v3 = vld [vmem:[#allocation6_spill] sm:$0xff] }
 0x61b   :  { %15767 = vst [vmem:[#allocation191_spill] sm:$0xff] %v12247_v25  ;;  %v5168_v19 = vrot.slane %v5160_v27, %v10951_v28 }
 0x61d   :  { %v12266_v46 = vcombine.low %v5168_v19, %v5180_v31  ;;  %v1540_v19 = vrot.slane %v10786_v4, %v10951_v28  ;;  %v15778_v4 = vld [vmem:[#allocation9_spill] sm:$0xff] }
 0x61e   :  { %v5765_v43 = vpop.permute.xlu1 %5764 }
 0x61f   :  { %v5773_v12 = vrot.slane %v5765_v43, %v10951_v28  ;;  %15768 = vst [vmem:[#allocation192_spill] sm:$0xff] %v12266_v46  ;;  %v15786_v46 = vld [vmem:[#allocation20_spill] sm:$0xff] }
 0x621   :  { %v12268_v33 = vcombine.low %v5773_v12, %v5785_v7  ;;  %v9441_v7 = vcombine.low %v6691_v0, %v6695_v53  ;;  %v1552_v12 = vrot.slane %v10791_v9, %v10951_v28  ;;  %v15777_v9 = vld [vmem:[#allocation8_spill] sm:$0xff]  ;;  %v2508_v53 = vrot.slane %v15813_v38, %v10951_v28 }
 0x622   :  { %v5789_v20 = vpop.permute.xlu1 %5788 }
 0x623   :  { %15769 = vst [vmem:[#allocation193_spill] sm:$0xff] %v12268_v33  ;;  %v5797_v16 = vrot.slane %v5789_v20, %v10951_v28  ;;  %7448 = vmatpush1.bf16.msra.mxu1 %v9441_v7  ;;  %v9450_v20 = vcombine.high %v6699_v60, %v6703_v23  ;;  %v12296_v22 = vcombine.low %v1540_v19, %v1552_v12  ;;  %v15774_v60 = vld [vmem:[#allocation5_spill] sm:$0xff] }
 0x624   :  { %v15780_v12 = vld [vmem:[#allocation13_spill] sm:$0xff] }
 0x625   :  { %7449 = vmatprep.subr.bf16.mxu1 %v9450_v20  ;;  %15771 = vst [vmem:[#allocation195_spill] sm:$0xff] %v12296_v22  ;;  %v6715_v20 = vld [vmem:[%s15272_s14 + $0x140] sm:$0xff] }
 0x626   :  { %v5801_v27 = vpop.permute.xlu1 %5800  ;;  %v6723_v19 = vld [vmem:[%s15272_s14 + $0x180] sm:$0xff] }
 0x627   :  { %v5809_v43 = vrot.slane %v5801_v27, %v10951_v28  ;;  %7450 = vmatpush1.bf16.msra.mxu1 %v9449_v2  ;;  %v6719_v2 = vld [vmem:[%s15272_s14 + $0x160] sm:$0xff]  ;;  %v15776_v27 = vld [vmem:[#allocation7_spill] sm:$0xff] }
 0x628   :  { %v9466_v23 = vcombine.high %v6715_v20, %v6719_v2  ;;  %v9465_v0 = vcombine.low %v6715_v20, %v6719_v2  ;;  %v15782_v20 = vld [vmem:[#allocation15_spill] sm:$0xff]  ;;  %v15784_v33 = vld [vmem:[#allocation17_spill] sm:$0xff] }
 0x629   :  { %v12278_v31 = vcombine.low %v5797_v16, %v5809_v43  ;;  %v9458_v16 = vcombine.high %v6707_v17, %v6711_v13  ;;  %v9457_v43 = vcombine.low %v6707_v17, %v6711_v13  ;;  %v15783_v17 = vld [vmem:[#allocation16_spill] sm:$0xff]  ;;  %v15785_v13 = vld [vmem:[#allocation18_spill] sm:$0xff]  ;;  %v6735_v22 = vld [vmem:[%s15272_s14 + $0x1e0] sm:$0xff] }
 0x62a   :  { %v9482_v7 = vcombine.high %v6731_v29, %v6735_v22  ;;  %v9481_v5 = vcombine.low %v6731_v29, %v6735_v22  ;;  %v15810_v29 = vld [vmem:[#allocation59_spill] sm:$0xff] }
 0x62b   :  { %15770 = vst [vmem:[#allocation194_spill] sm:$0xff] %v12278_v31  ;;  %7451 = vmatprep.subr.bf16.mxu1 %v9458_v16  ;;  %v15772_v16 = vld [vmem:[#allocation3_spill] sm:$0xff]  ;;  %v5482_v22 = vrot.slane %v15810_v29, %v10951_v28  ;;  %v2520_v29 = vrot.slane %v15814_v37, %v10951_v28 }
 0x62c   :  { %7452 = vmatpush1.bf16.msra.mxu1 %v9457_v43  ;;  %v15773_v43 = vld [vmem:[#allocation4_spill] sm:$0xff]  ;;  %v15779_v31 = vld [vmem:[#allocation11_spill] sm:$0xff] }
 0x62d   :  { %7453 = vmatprep.subr.bf16.mxu1 %v9466_v23 }
 0x630   :  { %7454 = vmatpush1.bf16.msra.mxu1 %v9465_v0  ;;  %v6727_v0 = vld [vmem:[%s15272_s14 + $0x1a0] sm:$0xff] }
 0x631   :  { %v9473_v23 = vcombine.low %v6723_v19, %v6727_v0  ;;  %v9474_v24 = vcombine.high %v6723_v19, %v6727_v0  ;;  %v15800_v0 = vld [vmem:[#allocation36_spill] sm:$0xff]  ;;  %v12448_v19 = vcombine.low %v5482_v22, %v5494_v6  ;;  %v15860_v22 = vld [vmem:[#allocation102_spill] sm:$0xff] }
 0x632   :  { %v1939_v2 = vrot.slane %v15860_v22, %v10951_v28  ;;  %v15866_v22 = vrot.slane %v10833_v30, %v10951_v28  ;;  %v6775_v30 = vld [vmem:[%s15272_s14 + $0x320] sm:$0xff] }
 0x633   :  { %7455 = vmatprep.subr.bf16.mxu1 %v9474_v24  ;;  %v15801_v24 = vld [vmem:[#allocation37_spill] sm:$0xff]  ;;  %15822 = vst [vmem:[#allocation3_spill] sm:$0xff] %v12448_v19  ;;  %v15848_v19 = vld [vmem:[#allocation88_spill] sm:$0xff] }
 0x634   :  { %7456 = vmatpush1.bf16.msra.mxu1 %v9473_v23  ;;  %v6739_v23 = vld [vmem:[%s15272_s14 + $0x200] sm:$0xff] }
 0x635   :  { %7457 = vmatprep.subr.bf16.mxu1 %v9482_v7  ;;  %v6743_v7 = vld [vmem:[%s15272_s14 + $0x220] sm:$0xff] }
 0x636   :  { %v9490_v40 = vcombine.high %v6739_v23, %v6743_v7  ;;  %v9489_v52 = vcombine.low %v6739_v23, %v6743_v7  ;;  %v15824_v23 = vld [vmem:[#allocation73_spill] sm:$0xff] }
 0x637   :  { %v3766_v7 = vrot.slane %v15824_v23, %v10951_v28  ;;  %v9498_v23 = vcombine.high %v6747_v61, %v6751_v10  ;;  %v1636_v61 = vrot.slane %v15851_v8, %v10951_v28  ;;  %v15856_v8 = vld [vmem:[#allocation96_spill] sm:$0xff] }
 0x638   :  { %7458 = vmatpush1.bf16.msra.mxu1 %v9481_v5  ;;  %v12466_v5 = vcombine.low %v2508_v53, %v2520_v29  ;;  %v15834_v53 = vld [vmem:[#allocation82_spill] sm:$0xff]  ;;  %v15835_v29 = vld [vmem:[#allocation83_spill] sm:$0xff] }
 0x639   :  { %7459 = vmatprep.subr.bf16.mxu1 %v9490_v40  ;;  %v12486_v10 = vcombine.low %v3766_v7, %v3778_v49  ;;  %v15842_v49 = vld [vmem:[#allocation87_spill] sm:$0xff]  ;;  %v1708_v40 = vrot.slane %v15856_v8, %v10951_v28  ;;  %v15862_v8 = vrot.slane %v10811_v21, %v10951_v28 }
 0x63a   :  { %15828 = vst [vmem:[#allocation4_spill] sm:$0xff] %v12466_v5  ;;  %v5036_v5 = vrot.slane %v15835_v29, %v10951_v28  ;;  %v1564_v7 = vrot.slane %v15842_v49, %v10951_v28  ;;  %v1588_v49 = vrot.slane %v15848_v19, %v10951_v28  ;;  %v6763_v19 = vld [vmem:[%s15272_s14 + $0x2c0] sm:$0xff]  ;;  %v15859_v29 = vld [vmem:[#allocation100_spill] sm:$0xff] }
 0x63b   :  { %15838 = vst [vmem:[#allocation5_spill] sm:$0xff] %v12486_v10  ;;  %v1915_v6 = vrot.slane %v15859_v29, %v10951_v28  ;;  %v12562_v29 = vcombine.low %v1636_v61, %v15866_v22  ;;  %v15878_v22 = vrot.slane %v10873_v48, %v10951_v28  ;;  %v15885_v48 = vld [vmem:[#allocation108_spill] sm:$0xff] }
 0x63c   :  { %7460 = vmatpush1.bf16.msra.mxu1 %v9489_v52  ;;  %v5024_v52 = vrot.slane %v15834_v53, %v10951_v28  ;;  %v6759_v53 = vld [vmem:[%s15272_s14 + $0x2a0] sm:$0xff] }
 0x63d   :  { %7461 = vmatprep.subr.bf16.mxu1 %v9498_v23  ;;  %v9506_v38 = vcombine.high %v6755_v11, %v6759_v53  ;;  %v9505_v37 = vcombine.low %v6755_v11, %v6759_v53  ;;  %v15852_v11 = vld [vmem:[#allocation94_spill] sm:$0xff]  ;;  %v15853_v23 = vld [vmem:[#allocation95_spill] sm:$0xff]  ;;  %15867 = vst [vmem:[#allocation9_spill] sm:$0xff] %v12562_v29 }
 0x63e   :  { %v12510_v36 = vcombine.low %v5024_v52, %v5036_v5  ;;  %v1660_v53 = vrot.slane %v15852_v11, %v10951_v28  ;;  %v1684_v5 = vrot.slane %v15853_v23, %v10951_v28  ;;  %v15854_v52 = vrot.slane %v10796_v15, %v10951_v28  ;;  %v15857_v11 = vld [vmem:[#allocation98_spill] sm:$0xff] }
 0x63f   :  { %v1855_v63 = vrot.slane %v15857_v11, %v10951_v28  ;;  %v15896_v11 = vld [vmem:[#allocation115_spill] sm:$0xff] }
 0x640   :  { %7462 = vmatpush1.bf16.msra.mxu1 %v9497_v18  ;;  %15847 = vst [vmem:[#allocation6_spill] sm:$0xff] %v12510_v36  ;;  %v15849_v18 = vld [vmem:[#allocation91_spill] sm:$0xff] }
 0x641   :  { %v1612_v14 = vrot.slane %v15849_v18, %v10951_v28  ;;  %7463 = vmatprep.subr.bf16.mxu1 %v9506_v38  ;;  %v6767_v38 = vld [vmem:[%s15272_s14 + $0x2e0] sm:$0xff]  ;;  %v12533_v18 = vcombine.low %v1564_v7, %v15854_v52  ;;  %v15858_v36 = vld [vmem:[#allocation99_spill] sm:$0xff]  ;;  %v15861_v7 = vld [vmem:[#allocation90_spill] sm:$0xff]  ;;  %v2846_v52 = vrot.slane %v15896_v11, %v10951_v28  ;;  %v15903_v11 = vrot.slane %v15776_v27, %v10951_v28 }
 0x642   :  { %v9514_v23 = vcombine.high %v6763_v19, %v6767_v38  ;;  %v1891_v10 = vrot.slane %v15858_v36, %v10951_v28  ;;  %v9513_v15 = vcombine.low %v6763_v19, %v6767_v38  ;;  %v15865_v36 = vrot.slane %v10822_v26, %v10951_v28  ;;  %v15872_v26 = vld [vmem:[#allocation103_spill] sm:$0xff] }
 0x643   :  { %15855 = vst [vmem:[#allocation7_spill] sm:$0xff] %v12533_v18  ;;  %v12550_v18 = vcombine.low %v1588_v49, %v15862_v8  ;;  %v15868_v19 = vrot.slane %v10842_v35, %v10951_v28  ;;  %v15870_v49 = vrot.slane %v10853_v39, %v10951_v28  ;;  %v15873_v35 = vrot.slane %v10859_v41, %v10951_v28 }
 0x644   :  { %7464 = vmatpush1.bf16.msra.mxu1 %v9505_v37  ;;  %v15864_v37 = vld [vmem:[#allocation92_spill] sm:$0xff]  ;;  %v12557_v25 = vcombine.low %v1612_v14, %v15865_v36  ;;  %v1963_v14 = vrot.slane %v15872_v26, %v10951_v28  ;;  %v15875_v39 = vrot.slane %v10865_v45, %v10951_v28  ;;  %v15879_v41 = vrot.slane %v10878_v50, %v10951_v28  ;;  %v15883_v26 = vld [vmem:[#allocation106_spill] sm:$0xff] }
 0x645   :  { %15863 = vst [vmem:[#allocation8_spill] sm:$0xff] %v12550_v18  ;;  %7465 = vmatprep.subr.bf16.mxu1 %v9514_v23  ;;  %v12567_v21 = vcombine.low %v1660_v53, %v15868_v19  ;;  %v12572_v38 = vcombine.low %v1684_v5, %v15870_v49  ;;  %v6771_v23 = vld [vmem:[%s15272_s14 + $0x300] sm:$0xff]  ;;  %v12585_v61 = vcombine.low %v1708_v40, %v15873_v35  ;;  %v15877_v5 = vld [vmem:[#allocation104_spill] sm:$0xff]  ;;  %v15884_v35 = vld [vmem:[#allocation107_spill] sm:$0xff] }
 0x646   :  { %v12590_v53 = vcombine.low %v1855_v63, %v15875_v39  ;;  %v1987_v8 = vrot.slane %v15877_v5, %v10951_v28  ;;  %v9522_v36 = vcombine.high %v6771_v23, %v6775_v30  ;;  %v12597_v19 = vcombine.low %v15878_v22, %v1891_v10  ;;  %v15886_v5 = vld [vmem:[#allocation109_spill] sm:$0xff] }
 0x647   :  { %15869 = vst [vmem:[#allocation11_spill] sm:$0xff] %v12567_v21  ;;  %15871 = vst [vmem:[#allocation13_spill] sm:$0xff] %v12572_v38  ;;  %v12602_v40 = vcombine.low %v15879_v41, %v1915_v6  ;;  %v15881_v45 = vrot.slane %v10887_v54, %v10951_v28  ;;  %v9521_v49 = vcombine.low %v6771_v23, %v6775_v30  ;;  %v15890_v30 = vld [vmem:[#allocation111_spill] sm:$0xff]  ;;  %v15891_v41 = vld [vmem:[#allocation112_spill] sm:$0xff] }
 0x648   :  { %15874 = vst [vmem:[#allocation14_spill] sm:$0xff] %v12585_v61  ;;  %15876 = vst [vmem:[#allocation15_spill] sm:$0xff] %v12590_v53  ;;  %7466 = vmatpush1.bf16.msra.mxu1 %v9513_v15  ;;  %v2011_v15 = vrot.slane %v15883_v26, %v10951_v28  ;;  %v2169_v39 = vrot.slane %v15884_v35, %v10951_v28  ;;  %v2205_v10 = vrot.slane %v15885_v48, %v10951_v28  ;;  %v6779_v26 = vld [vmem:[%s15272_s14 + $0x340] sm:$0xff] }
 0x649   :  { %15880 = vst [vmem:[#allocation16_spill] sm:$0xff] %v12602_v40  ;;  %v12607_v63 = vcombine.low %v15881_v45, %v1939_v2  ;;  %v2229_v50 = vrot.slane %v15886_v5, %v10951_v28  ;;  %7467 = vmatprep.subr.bf16.mxu1 %v9522_v36  ;;  %v15887_v6 = vrot.slane %v10892_v56, %v10951_v28  ;;  %v15889_v2 = vld [vmem:[#allocation110_spill] sm:$0xff]  ;;  %v6783_v36 = vld [vmem:[%s15272_s14 + $0x360] sm:$0xff] }
 0x64a   :  { %v2253_v23 = vrot.slane %v15889_v2, %v10951_v28  ;;  %v2277_v22 = vrot.slane %v15890_v30, %v10951_v28  ;;  %v2313_v45 = vrot.slane %v15891_v41, %v10951_v28  ;;  %v15892_v56 = vrot.slane %v10898_v58, %v10951_v28  ;;  %v15894_v48 = vld [vmem:[#allocation113_spill] sm:$0xff]  ;;  %v15895_v30 = vld [vmem:[#allocation114_spill] sm:$0xff]  ;;  %v15897_v58 = vld [vmem:[#allocation116_spill] sm:$0xff] }
 0x64b   :  { %15882 = vst [vmem:[#allocation17_spill] sm:$0xff] %v12607_v63  ;;  %v12620_v54 = vcombine.low %v15887_v6, %v1963_v14  ;;  %v2035_v35 = vrot.slane %v12186_v44, %v10951_v28  ;;  %v2349_v5 = vrot.slane %v15894_v48, %v10951_v28  ;;  %v12643_v6 = vpop.permute.xlu0 %6261  ;;  %v9530_v2 = vcombine.high %v6779_v26, %v6783_v36 }
 0x64c   :  { %v12637_v14 = vcombine.low %v15892_v56, %v1987_v8  ;;  %7468 = vmatpush1.bf16.msra.mxu1 %v9521_v49  ;;  %v2810_v41 = vrot.slane %v15895_v30, %v10951_v28  ;;  %v2870_v8 = vrot.slane %v15897_v58, %v10951_v28  ;;  %v9529_v56 = vcombine.low %v6779_v26, %v6783_v36 }
 0x64d   :  { %15888 = vst [vmem:[#allocation18_spill] sm:$0xff] %v12620_v54  ;;  %v15898_v44 = vrot.slane %v15772_v16, %v10951_v28  ;;  %v15900_v48 = vrot.slane %v15774_v60, %v10951_v28  ;;  %v15901_v30 = vrot.slane %v15775_v3, %v10951_v28  ;;  %v12669_v58 = vcombine.low %v15903_v11, %v2229_v50  ;;  %v6787_v50 = vld [vmem:[%s15272_s14 + $0x380] sm:$0xff]  ;;  %v15934_v60 = vld [vmem:[#allocation130_spill] sm:$0xff] }
 0x64e   :  { %15893 = vst [vmem:[#allocation20_spill] sm:$0xff] %v12637_v14  ;;  %7469 = vmatprep.subr.bf16.mxu1 %v9530_v2  ;;  %v15905_v16 = vrot.slane %v15777_v9, %v10951_v28  ;;  %v6791_v9 = vld [vmem:[%s15272_s14 + $0x3a0] sm:$0xff]  ;;  %v15915_v36 = vrot.slane %v15778_v4, %v10951_v28  ;;  %v15923_v4 = vld [vmem:[#allocation119_spill] sm:$0xff] }
 0x64f   :  { %v12654_v61 = vcombine.low %v15898_v44, %v2011_v15  ;;  %v12659_v49 = vcombine.low %v2169_v39, %v15900_v48  ;;  %v12664_v38 = vcombine.low %v15901_v30, %v2205_v10  ;;  %15904 = vst [vmem:[#allocation37_spill] sm:$0xff] %v12669_v58  ;;  %v15907_v39 = vrot.slane %v15799_v42, %v10951_v28  ;;  %v15922_v30 = vld [vmem:[#allocation118_spill] sm:$0xff] }
 0x650   :  { %v12674_v15 = vcombine.low %v15905_v16, %v2253_v23  ;;  %v15909_v10 = vrot.slane %v15809_v51, %v10951_v28  ;;  %v15911_v42 = vrot.slane %v15773_v43, %v10951_v28  ;;  %v15913_v51 = vrot.slane %v15812_v34, %v10951_v28  ;;  %7470 = vmatpush1.bf16.msra.mxu1 %v9529_v56  ;;  %v15924_v16 = vld [vmem:[#allocation120_spill] sm:$0xff] }
 0x651   :  { %15899 = vst [vmem:[#allocation34_spill] sm:$0xff] %v12654_v61  ;;  %15902 = vst [vmem:[#allocation36_spill] sm:$0xff] %v12664_v38  ;;  %v12681_v3 = vcombine.low %v15907_v39, %v2277_v22  ;;  %v9538_v26 = vcombine.high %v6787_v50, %v6791_v9  ;;  %v12709_v2 = vcombine.low %v15915_v36, %v2810_v41  ;;  %v15926_v39 = vld [vmem:[#allocation122_spill] sm:$0xff]  ;;  %v6795_v36 = vld [vmem:[%s15272_s14 + $0x3c0] sm:$0xff] }
 0x652   :  { %15906 = vst [vmem:[#allocation38_spill] sm:$0xff] %v12674_v15  ;;  %v12686_v27 = vcombine.low %v2313_v45, %v15909_v10  ;;  %v12699_v22 = vcombine.low %v15911_v42, %v2035_v35  ;;  %v12704_v45 = vcombine.low %v15913_v51, %v2349_v5  ;;  %v15917_v44 = vrot.slane %v15779_v31, %v10951_v28  ;;  %v15921_v5 = vld [vmem:[#allocation117_spill] sm:$0xff]  ;;  %v15928_v42 = vld [vmem:[#allocation124_spill] sm:$0xff] }
 0x653   :  { %15908 = vst [vmem:[#allocation48_spill] sm:$0xff] %v12681_v3  ;;  %15916 = vst [vmem:[#allocation64_spill] sm:$0xff] %v12709_v2  ;;  %v15919_v43 = vrot.slane %v15780_v12, %v10951_v28  ;;  %v9537_v34 = vcombine.low %v6787_v50, %v6791_v9  ;;  %v2894_v56 = vrot.slane %v15921_v5, %v10951_v28  ;;  %7471 = vmatprep.subr.bf16.mxu1 %v9538_v26  ;;  %v15925_v12 = vld [vmem:[#allocation121_spill] sm:$0xff]  ;;  %v15927_v50 = vld [vmem:[#allocation123_spill] sm:$0xff]  ;;  %v6406_v3 = vpop.permute.xlu1 %6405 }
 0x654   :  { %15910 = vst [vmem:[#allocation59_spill] sm:$0xff] %v12686_v27  ;;  %15912 = vst [vmem:[#allocation60_spill] sm:$0xff] %v12699_v22  ;;  %v12714_v48 = vcombine.low %v2846_v52, %v15917_v44  ;;  %v2930_v11 = vrot.slane %v15922_v30, %v10951_v28  ;;  %v2954_v41 = vrot.slane %v15923_v4, %v10951_v28  ;;  %v12729_v52 = vpop.permute.xlu0 %6297  ;;  %v6799_v26 = vld [vmem:[%s15272_s14 + $0x3e0] sm:$0xff]  ;;  %v15930_v5 = vld [vmem:[#allocation126_spill] sm:$0xff] }
 0x655   :  { %15914 = vst [vmem:[#allocation49_spill] sm:$0xff] %v12704_v45  ;;  %v12719_v35 = vcombine.low %v2870_v8, %v15919_v43  ;;  %v3427_v31 = vrot.slane %v15924_v16, %v10951_v28  ;;  %v3463_v8 = vrot.slane %v15925_v12, %v10951_v28  ;;  %v3487_v10 = vrot.slane %v15926_v39, %v10951_v28  ;;  %v15929_v44 = vld [vmem:[#allocation125_spill] sm:$0xff]  ;;  %v15931_v4 = vld [vmem:[#allocation127_spill] sm:$0xff]  ;;  %v15932_v39 = vld [vmem:[#allocation128_spill] sm:$0xff] }
 0x656   :  { %15918 = vst [vmem:[#allocation65_spill] sm:$0xff] %v12714_v48  ;;  %v3511_v9 = vrot.slane %v15927_v50, %v10951_v28  ;;  %v3535_v51 = vrot.slane %v15928_v42, %v10951_v28  ;;  %v3571_v43 = vrot.slane %v15929_v44, %v10951_v28  ;;  %v3607_v30 = vrot.slane %v15930_v5, %v10951_v28  ;;  %v15933_v42 = vld [vmem:[#allocation129_spill] sm:$0xff] }
 0x657   :  { %15920 = vst [vmem:[#allocation50_spill] sm:$0xff] %v12719_v35  ;;  %v4068_v16 = vrot.slane %v15931_v4, %v10951_v28  ;;  %7472 = vmatpush1.bf16.msra.mxu1 %v9537_v34  ;;  %v9546_v12 = vcombine.high %v6795_v36, %v6799_v26  ;;  %v4104_v50 = vrot.slane %v15932_v39, %v10951_v28  ;;  %v16048_v61 = vld [vmem:[#allocation33_spill] sm:$0xff] }
 0x658   :  { %v4128_v23 = vrot.slane %v15933_v42, %v10951_v28  ;;  %v4152_v45 = vrot.slane %v15934_v60, %v10951_v28  ;;  %v9545_v22 = vcombine.low %v6795_v36, %v6799_v26  ;;  %v15935_v44 = vrot.slane %v15800_v0, %v10951_v28 }
 0x659   :  { %v15937_v5 = vrot.slane %v15801_v24, %v10951_v28  ;;  %v15939_v4 = vrot.slane %v15815_v57, %v10951_v28  ;;  %v15941_v42 = vrot.slane %v15781_v59, %v10951_v28  ;;  %7473 = vmatprep.subr.bf16.mxu1 %v9546_v12  ;;  %v15943_v0 = vrot.slane %v15782_v20, %v10951_v28  ;;  %v15949_v59 = vld [vmem:[#allocation131_spill] sm:$0xff]  ;;  %v12811_v12 = vpop.permute.xlu0 %6321 }
 0x65a   :  { %v12760_v27 = vcombine.low %v2894_v56, %v15935_v44  ;;  %v15945_v24 = vrot.slane %v15783_v17, %v10951_v28  ;;  %v15947_v57 = vrot.slane %v15784_v33, %v10951_v28  ;;  %v15950_v36 = vrot.slane %v15802_v62, %v10951_v28  ;;  %v15956_v33 = vld [vmem:[#allocation132_spill] sm:$0xff]  ;;  %v15961_v44 = vld [vmem:[#allocation21_spill] sm:$0xff] }
 0x65b   :  { %v12765_v34 = vcombine.low %v15937_v5, %v2930_v11  ;;  %v12770_v39 = vcombine.low %v15939_v4, %v2954_v41  ;;  %v12775_v60 = vcombine.low %v3427_v31, %v15941_v42  ;;  %v12780_v56 = vcombine.low %v15943_v0, %v3463_v8  ;;  %7474 = vmatpush1.bf16.msra.mxu1 %v9545_v22  ;;  %v15964_v5 = vld [vmem:[#allocation40_spill] sm:$0xff]  ;;  %v15967_v22 = vld [vmem:[#allocation133_spill] sm:$0xff] }
 0x65c   :  { %15936 = vst [vmem:[#allocation52_spill] sm:$0xff] %v12760_v27  ;;  %v12785_v11 = vcombine.low %v15945_v24, %v3487_v10  ;;  %v12790_v41 = vcombine.low %v15947_v57, %v3511_v9  ;;  %v4188_v31 = vrot.slane %v15949_v59, %v10951_v28  ;;  %v12797_v26 = vcombine.low %v15950_v36, %v3535_v51  ;;  %v15970_v24 = vld [vmem:[#allocation136_spill] sm:$0xff]  ;;  %v15971_v59 = vld [vmem:[#allocation41_spill] sm:$0xff] }
 0x65d   :  { %15938 = vst [vmem:[#allocation53_spill] sm:$0xff] %v12765_v34  ;;  %15940 = vst [vmem:[#allocation73_spill] sm:$0xff] %v12770_v39  ;;  %v15952_v20 = vrot.slane %v15816_v47, %v10951_v28  ;;  %v15954_v17 = vrot.slane %v15817_v1, %v10951_v28  ;;  %v4212_v9 = vrot.slane %v15956_v33, %v10951_v28  ;;  %v16046_v39 = vld [vmem:[#allocation164_spill] sm:$0xff] }
 0x65e   :  { %15942 = vst [vmem:[#allocation74_spill] sm:$0xff] %v12775_v60  ;;  %15944 = vst [vmem:[#allocation82_spill] sm:$0xff] %v12780_v56  ;;  %v15957_v62 = vrot.slane %v15785_v13, %v10951_v28  ;;  %v15959_v47 = vrot.slane %v15786_v46, %v10951_v28  ;;  %v15962_v1 = vrot.slane %v15961_v44, %v10951_v28  ;;  %v15969_v46 = vld [vmem:[#allocation135_spill] sm:$0xff]  ;;  %v15977_v44 = vld [vmem:[#allocation54_spill] sm:$0xff] }
 0x65f   :  { %15946 = vst [vmem:[#allocation83_spill] sm:$0xff] %v12785_v11  ;;  %15948 = vst [vmem:[#allocation87_spill] sm:$0xff] %v12790_v41  ;;  %v12802_v8 = vcombine.low %v3571_v43, %v15952_v20  ;;  %v12807_v10 = vcombine.low %v15954_v17, %v3607_v30  ;;  %v15965_v4 = vrot.slane %v15964_v5, %v10951_v28  ;;  %v15975_v17 = vld [vmem:[#allocation138_spill] sm:$0xff]  ;;  %v16097_v41 = vld [vmem:[#allocation77_spill] sm:$0xff] }
 0x660   :  { %15951 = vst [vmem:[#allocation88_spill] sm:$0xff] %v12797_v26  ;;  %v12816_v51 = vcombine.low %v15957_v62, %v4068_v16  ;;  %v12821_v43 = vcombine.low %v4104_v50, %v15959_v47  ;;  %v12826_v30 = vcombine.low %v4128_v23, %v15962_v1  ;;  %v4685_v13 = vrot.slane %v15967_v22, %v10951_v28  ;;  %v15968_v16 = vld [vmem:[#allocation134_spill] sm:$0xff]  ;;  %v15976_v62 = vld [vmem:[#allocation139_spill] sm:$0xff] }
 0x661   :  { %15953 = vst [vmem:[#allocation91_spill] sm:$0xff] %v12802_v8  ;;  %15955 = vst [vmem:[#allocation93_spill] sm:$0xff] %v12807_v10  ;;  %v12831_v42 = vcombine.low %v4152_v45, %v15965_v4  ;;  %v4721_v0 = vrot.slane %v15968_v16, %v10951_v28  ;;  %v4745_v50 = vrot.slane %v15969_v46, %v10951_v28  ;;  %v15974_v45 = vld [vmem:[#allocation137_spill] sm:$0xff]  ;;  %v15980_v4 = vld [vmem:[#allocation140_spill] sm:$0xff] }
 0x662   :  { %15958 = vst [vmem:[#allocation94_spill] sm:$0xff] %v12816_v51  ;;  %15960 = vst [vmem:[#allocation95_spill] sm:$0xff] %v12821_v43  ;;  %v4769_v57 = vrot.slane %v15970_v24, %v10951_v28  ;;  %v15972_v23 = vrot.slane %v15971_v59, %v10951_v28  ;;  %v4793_v20 = vrot.slane %v15974_v45, %v10951_v28  ;;  %v15982_v46 = vld [vmem:[#allocation142_spill] sm:$0xff]  ;;  %v12863_v59 = vpop.permute.xlu0 %6345  ;;  %v15996_v10 = vld [vmem:[#allocation25_spill] sm:$0xff] }
 0x663   :  { %15963 = vst [vmem:[#allocation96_spill] sm:$0xff] %v12826_v30  ;;  %15966 = vst [vmem:[#allocation98_spill] sm:$0xff] %v12831_v42  ;;  %v4829_v33 = vrot.slane %v15975_v17, %v10951_v28  ;;  %v4865_v47 = vrot.slane %v15976_v62, %v10951_v28  ;;  %v15978_v1 = vrot.slane %v15977_v44, %v10951_v28  ;;  %v15984_v17 = vld [vmem:[#allocation144_spill] sm:$0xff]  ;;  %v16056_v26 = vld [vmem:[#allocation62_spill] sm:$0xff] }
 0x664   :  { %v12844_v36 = vcombine.low %v15972_v23, %v4188_v31  ;;  %v5326_v22 = vrot.slane %v15980_v4, %v10951_v28  ;;  %v15981_v31 = vld [vmem:[#allocation141_spill] sm:$0xff]  ;;  %v5386_v24 = vrot.slane %v15982_v46, %v10951_v28  ;;  %v15983_v23 = vld [vmem:[#allocation143_spill] sm:$0xff]  ;;  %v5446_v62 = vrot.slane %v15984_v17, %v10951_v28 }
 0x665   :  { %v12855_v5 = vcombine.low %v15978_v1, %v4212_v9  ;;  %v5362_v16 = vrot.slane %v15981_v31, %v10951_v28  ;;  %v5410_v45 = vrot.slane %v15983_v23, %v10951_v28  ;;  %v15985_v9 = vld [vmem:[#allocation145_spill] sm:$0xff]  ;;  %v15986_v1 = vld [vmem:[#allocation146_spill] sm:$0xff]  ;;  %v15990_v46 = vld [vmem:[#allocation23_spill] sm:$0xff] }
 0x666   :  { %15973 = vst [vmem:[#allocation99_spill] sm:$0xff] %v12844_v36  ;;  %v5470_v44 = vrot.slane %v15985_v9, %v10951_v28  ;;  %v5943_v4 = vrot.slane %v15986_v1, %v10951_v28  ;;  %v15991_v42 = vrot.slane %v15990_v46, %v10951_v28  ;;  %v15993_v23 = vld [vmem:[#allocation24_spill] sm:$0xff]  ;;  %v15997_v9 = vrot.slane %v15996_v10, %v10951_v28  ;;  %v15999_v1 = vld [vmem:[#allocation42_spill] sm:$0xff] }
 0x667   :  { %15979 = vst [vmem:[#allocation100_spill] sm:$0xff] %v12855_v5  ;;  %v15987_v5 = vld [vmem:[#allocation22_spill] sm:$0xff]  ;;  %v15994_v43 = vrot.slane %v15993_v23, %v10951_v28 }
 0x668   :  { %v15988_v31 = vrot.slane %v15987_v5, %v10951_v28  ;;  %v12881_v30 = vcombine.low %v15991_v42, %v4721_v0  ;;  %v12891_v8 = vcombine.low %v15997_v9, %v4769_v57  ;;  %v16000_v5 = vrot.slane %v15999_v1, %v10951_v28  ;;  %v16005_v0 = vld [vmem:[#allocation57_spill] sm:$0xff]  ;;  %v16009_v57 = vld [vmem:[#allocation26_spill] sm:$0xff] }
 0x669   :  { %v12886_v17 = vcombine.low %v15994_v43, %v4745_v50  ;;  %v16006_v23 = vrot.slane %v16005_v0, %v10951_v28  ;;  %v16008_v50 = vld [vmem:[#allocation147_spill] sm:$0xff]  ;;  %v16010_v9 = vrot.slane %v16009_v57, %v10951_v28 }
 0x66a   :  { %v12876_v36 = vcombine.low %v4685_v13, %v15988_v31  ;;  %15992 = vst [vmem:[#allocation90_spill] sm:$0xff] %v12881_v30  ;;  %15998 = vst [vmem:[#allocation103_spill] sm:$0xff] %v12891_v8  ;;  %v12896_v13 = vcombine.low %v16000_v5, %v4793_v20  ;;  %v16002_v31 = vld [vmem:[#allocation56_spill] sm:$0xff]  ;;  %v5979_v10 = vrot.slane %v16008_v50, %v10951_v28 }
 0x66b   :  { %15995 = vst [vmem:[#allocation92_spill] sm:$0xff] %v12886_v17  ;;  %v16003_v46 = vrot.slane %v16002_v31, %v10951_v28  ;;  %v12906_v43 = vcombine.low %v16006_v23, %v4865_v47  ;;  %v12913_v8 = vcombine.low %v16010_v9, %v5326_v22  ;;  %v16012_v20 = vld [vmem:[#allocation28_spill] sm:$0xff]  ;;  %v16022_v22 = vld [vmem:[#allocation45_spill] sm:$0xff]  ;;  %v16045_v17 = vld [vmem:[#allocation163_spill] sm:$0xff] }
 0x66c   :  { %15989 = vst [vmem:[#allocation102_spill] sm:$0xff] %v12876_v36  ;;  %16001 = vst [vmem:[#allocation104_spill] sm:$0xff] %v12896_v13  ;;  %v16013_v1 = vrot.slane %v16012_v20, %v10951_v28  ;;  %v16018_v47 = vld [vmem:[#allocation148_spill] sm:$0xff]  ;;  %v16023_v57 = vrot.slane %v16022_v22, %v10951_v28  ;;  %v16032_v22 = vld [vmem:[#allocation151_spill] sm:$0xff] }
 0x66d   :  { %v12901_v42 = vcombine.low %v4829_v33, %v16003_v46  ;;  %16007 = vst [vmem:[#allocation107_spill] sm:$0xff] %v12906_v43  ;;  %16011 = vst [vmem:[#allocation108_spill] sm:$0xff] %v12913_v8  ;;  %v16015_v33 = vld [vmem:[#allocation29_spill] sm:$0xff]  ;;  %v6003_v0 = vrot.slane %v16018_v47, %v10951_v28  ;;  %v16019_v23 = vld [vmem:[#allocation44_spill] sm:$0xff] }
 0x66e   :  { %v12918_v5 = vcombine.low %v5362_v16, %v16013_v1  ;;  %v16016_v31 = vrot.slane %v16015_v33, %v10951_v28  ;;  %v16020_v50 = vrot.slane %v16019_v23, %v10951_v28  ;;  %v12935_v9 = vcombine.low %v16023_v57, %v5446_v62  ;;  %v16025_v16 = vld [vmem:[#allocation58_spill] sm:$0xff]  ;;  %v16030_v47 = vld [vmem:[#allocation149_spill] sm:$0xff]  ;;  %v16033_v57 = vld [vmem:[#allocation152_spill] sm:$0xff] }
 0x66f   :  { %16004 = vst [vmem:[#allocation106_spill] sm:$0xff] %v12901_v42  ;;  %v16026_v20 = vrot.slane %v16025_v16, %v10951_v28  ;;  %v6027_v23 = vrot.slane %v16030_v47, %v10951_v28  ;;  %v6087_v62 = vrot.slane %v16032_v22, %v10951_v28  ;;  %v12955_v16 = vpop.permute.xlu0 %6381  ;;  %v16037_v47 = vld [vmem:[#allocation154_spill] sm:$0xff]  ;;  %v16039_v22 = vld [vmem:[#allocation32_spill] sm:$0xff]  ;;  %v16044_v13 = vld [vmem:[#allocation161_spill] sm:$0xff] }
 0x670   :  { %16014 = vst [vmem:[#allocation109_spill] sm:$0xff] %v12918_v5  ;;  %v12923_v46 = vcombine.low %v5386_v24, %v16016_v31  ;;  %v12930_v43 = vcombine.low %v5410_v45, %v16020_v50  ;;  %16024 = vst [vmem:[#allocation112_spill] sm:$0xff] %v12935_v9  ;;  %v16028_v24 = vld [vmem:[#allocation30_spill] sm:$0xff]  ;;  %v6123_v9 = vrot.slane %v16033_v57, %v10951_v28 }
 0x671   :  { %v12940_v1 = vcombine.low %v16026_v20, %v5470_v44  ;;  %v16029_v33 = vrot.slane %v16028_v24, %v10951_v28  ;;  %v16031_v45 = vld [vmem:[#allocation150_spill] sm:$0xff]  ;;  %v16034_v44 = vld [vmem:[#allocation31_spill] sm:$0xff] }
 0x672   :  { %16017 = vst [vmem:[#allocation110_spill] sm:$0xff] %v12923_v46  ;;  %16021 = vst [vmem:[#allocation111_spill] sm:$0xff] %v12930_v43  ;;  %v6051_v50 = vrot.slane %v16031_v45, %v10951_v28  ;;  %v16035_v20 = vrot.slane %v16034_v44, %v10951_v28  ;;  %v16038_v45 = vld [vmem:[#allocation155_spill] sm:$0xff]  ;;  %v16040_v46 = vrot.slane %v16039_v22, %v10951_v28  ;;  %v16041_v5 = vld [vmem:[#allocation158_spill] sm:$0xff] }
 0x673   :  { %16027 = vst [vmem:[#allocation113_spill] sm:$0xff] %v12940_v1  ;;  %v12945_v31 = vcombine.low %v5943_v4, %v16029_v33  ;;  %v16036_v4 = vld [vmem:[#allocation153_spill] sm:$0xff]  ;;  %v2532_v1 = vrot.slane %v16037_v47, %v10951_v28  ;;  %v2556_v43 = vrot.slane %v16038_v45, %v10951_v28  ;;  %v3113_v42 = vrot.slane %v16041_v5, %v10951_v28 }
 0x674   :  { %v12960_v24 = vcombine.low %v16035_v20, %v5979_v10  ;;  %v2496_v33 = vrot.slane %v16036_v4, %v10951_v28  ;;  %v12971_v57 = vcombine.low %v16040_v46, %v6003_v0  ;;  %v16042_v10 = vld [vmem:[#allocation159_spill] sm:$0xff]  ;;  %v16043_v20 = vld [vmem:[#allocation160_spill] sm:$0xff]  ;;  %v3197_v47 = vrot.slane %v16044_v13, %v10951_v28  ;;  %v16047_v46 = vld [vmem:[#allocation165_spill] sm:$0xff] }
 0x675   :  { %v3149_v44 = vrot.slane %v16042_v10, %v10951_v28  ;;  %v3173_v4 = vrot.slane %v16043_v20, %v10951_v28  ;;  %v3754_v45 = vrot.slane %v16045_v17, %v10951_v28  ;;  %v3790_v22 = vrot.slane %v16046_v39, %v10951_v28  ;;  %v16050_v10 = vld [vmem:[#allocation46_spill] sm:$0xff]  ;;  %v16053_v13 = vld [vmem:[#allocation61_spill] sm:$0xff] }
 0x676   :  { %v3814_v0 = vrot.slane %v16047_v46, %v10951_v28  ;;  %v16049_v5 = vrot.slane %v16048_v61, %v10951_v28  ;;  %v16051_v20 = vrot.slane %v16050_v10, %v10951_v28  ;;  %v16054_v21 = vrot.slane %v16053_v13, %v10951_v28  ;;  %v6394_v46 = vpop.permute.xlu0 %6393  ;;  %v16059_v61 = vld [vmem:[#allocation63_spill] sm:$0xff]  ;;  %v16062_v10 = vld [vmem:[#allocation66_spill] sm:$0xff] }
 0x677   :  { %v16057_v39 = vrot.slane %v16056_v26, %v10951_v28  ;;  %v16065_v13 = vld [vmem:[#allocation67_spill] sm:$0xff]  ;;  %v16068_v26 = vld [vmem:[#allocation10_spill] sm:$0xff] }
 0x678   :  { %v12990_v34 = vcombine.low %v16049_v5, %v6027_v23  ;;  %v12995_v14 = vcombine.low %v16051_v20, %v6051_v50  ;;  %v13000_v17 = vcombine.low %v6087_v62, %v16054_v21  ;;  %v16060_v23 = vrot.slane %v16059_v61, %v10951_v28  ;;  %v16072_v61 = vld [vmem:[#allocation69_spill] sm:$0xff] }
 0x679   :  { %v13005_v27 = vcombine.low %v16057_v39, %v6123_v9  ;;  %v16063_v50 = vrot.slane %v16062_v10, %v10951_v28  ;;  %v16066_v21 = vrot.slane %v16065_v13, %v10951_v28  ;;  %v16069_v39 = vld [vmem:[#allocation68_spill] sm:$0xff]  ;;  %v16075_v10 = vld [vmem:[#allocation70_spill] sm:$0xff] }
 0x67a   :  { %16052 = vst [vmem:[#allocation114_spill] sm:$0xff] %v12995_v14  ;;  %16055 = vst [vmem:[#allocation115_spill] sm:$0xff] %v13000_v17  ;;  %v13010_v5 = vcombine.low %v16060_v23, %v2496_v33  ;;  %v16073_v33 = vrot.slane %v16072_v61, %v10951_v28  ;;  %v16090_v13 = vld [vmem:[#allocation168_spill] sm:$0xff] }
 0x67b   :  { %16058 = vst [vmem:[#allocation116_spill] sm:$0xff] %v13005_v27  ;;  %v13015_v20 = vcombine.low %v2532_v1, %v16063_v50  ;;  %v13020_v62 = vcombine.low %v2556_v43, %v16066_v21  ;;  %v16070_v27 = vrot.slane %v16069_v39, %v10951_v28  ;;  %v16076_v1 = vrot.slane %v16075_v10, %v10951_v28  ;;  %v1191_v43 = vld [vmem:[%s15274_s12] sm:$0x3]  ;;  %v16078_v21 = vld [vmem:[#allocation71_spill] sm:$0xff]  ;;  %v16081_v39 = vld [vmem:[#allocation72_spill] sm:$0xff] }
 0x67c   :  { %16061 = vst [vmem:[#allocation117_spill] sm:$0xff] %v13010_v5  ;;  %v13031_v23 = vcombine.low %v16073_v33, %v3149_v44  ;;  %v16082_v44 = vrot.slane %v16081_v39, %v10951_v28  ;;  %v16084_v33 = vld [vmem:[#allocation75_spill] sm:$0xff]  ;;  %v16092_v39 = vld [vmem:[#allocation170_spill] sm:$0xff] }
 0x67d   :  { %16064 = vst [vmem:[#allocation118_spill] sm:$0xff] %v13015_v20  ;;  %16067 = vst [vmem:[#allocation119_spill] sm:$0xff] %v13020_v62  ;;  %v13026_v17 = vcombine.low %v3113_v42, %v16070_v27  ;;  %v13036_v50 = vcombine.low %v16076_v1, %v3173_v4  ;;  %v16079_v27 = vrot.slane %v16078_v21, %v10951_v28  ;;  %v16087_v1 = vld [vmem:[#allocation76_spill] sm:$0xff] }
 0x67e   :  { %16074 = vst [vmem:[#allocation121_spill] sm:$0xff] %v13031_v23  ;;  %v13050_v61 = vcombine.low %v16082_v44, %v3754_v45  ;;  %v16085_v4 = vrot.slane %v16084_v33, %v10951_v28  ;;  %v16088_v9 = vrot.slane %v16087_v1, %v10951_v28  ;;  %v4371_v21 = vrot.slane %v16090_v13, %v10951_v28  ;;  %v16093_v44 = vld [vmem:[#allocation171_spill] sm:$0xff]  ;;  %v6430_v33 = vpop.permute.xlu0 %6429 }
 0x67f   :  { %16071 = vst [vmem:[#allocation120_spill] sm:$0xff] %v13026_v17  ;;  %16077 = vst [vmem:[#allocation122_spill] sm:$0xff] %v13036_v50  ;;  %v13045_v42 = vcombine.low %v16079_v27, %v3197_v47  ;;  %v16091_v47 = vld [vmem:[#allocation169_spill] sm:$0xff]  ;;  %v4431_v45 = vrot.slane %v16092_v39, %v10951_v28  ;;  %v4455_v29 = vrot.slane %v16093_v44, %v10951_v28  ;;  %v16095_v13 = vsub.s32 0, %v16068_v26 }
 0x680   :  { %16083 = vst [vmem:[#allocation124_spill] sm:$0xff] %v13050_v61  ;;  %v13055_v10 = vcombine.low %v3790_v22, %v16085_v4  ;;  %v13060_v54 = vcombine.low %v3814_v0, %v16088_v9  ;;  %v4407_v27 = vrot.slane %v16091_v47, %v10951_v28  ;;  %v6418_v22 = vpop.permute.xlu1 %6417  ;;  %v16094_v4 = vld [vmem:[#allocation173_spill] sm:$0xff]  ;;  %v6270_v0 = vrot.slane %v12643_v6, %v10951_v28 }
 0x681   :  { %16080 = vst [vmem:[#allocation123_spill] sm:$0xff] %v13045_v42  ;;  %v6306_v9 = vrot.slane %v12729_v52, %v10951_v28  ;;  %v13078_v1 = vrot.slane %v1191_v43, %v16095_v13  ;;  %v6330_v47 = vrot.slane %v12811_v12, %v10951_v28  ;;  %v16096_v39 = vsub.s32 1, %v16068_v26  ;;  %v16103_v42 = vld [vmem:[#allocation79_spill] sm:$0xff] }
 0x682   :  { %16086 = vst [vmem:[#allocation125_spill] sm:$0xff] %v13055_v10  ;;  %16089 = vst [vmem:[#allocation126_spill] sm:$0xff] %v13060_v54  ;;  %v5012_v10 = vrot.slane %v16094_v4, %v10951_v28  ;;  %v6354_v4 = vrot.slane %v12863_v59, %v10951_v28  ;;  %v6390_v6 = vrot.slane %v12955_v16, %v10951_v28 }
 0x683   :  { %v13084_v44 = vrot.slane %v1191_v43, %v16096_v39  ;;  %v6402_v54 = vrot.slane %v6394_v46, %v10951_v28  ;;  %v6414_v52 = vrot.slane %v6406_v3, %v10951_v28  ;;  %v6438_v13 = vrot.slane %v6430_v33, %v10951_v28  ;;  %v16100_v43 = vld [vmem:[#allocation78_spill] sm:$0xff]  ;;  %v16106_v3 = vld [vmem:[#allocation80_spill] sm:$0xff] }
 0x684   :  { %v6426_v14 = vrot.slane %v6418_v22, %v10951_v28  ;;  %v16098_v12 = vrot.slane %v16097_v41, %v10951_v28  ;;  %v16101_v39 = vrot.slane %v16100_v43, %v10951_v28  ;;  %v16104_v16 = vrot.slane %v16103_v42, %v10951_v28  ;;  %v13117_v41 = vld [vmem:[%s15272_s14 + $0x8] sm:$0xff] }
 0x685   :  { %v16107_v33 = vrot.slane %v16106_v3, %v10951_v28  ;;  %16109 = vst [vmem:[#allocation131_spill] sm:$0xff] %v13117_v41 }
 0x686   :  { %v13097_v26 = vcombine.low %v4371_v21, %v16098_v12  ;;  %v13102_v59 = vcombine.low %v16101_v39, %v4407_v27  ;;  %v13107_v46 = vcombine.low %v16104_v16, %v4431_v45  ;;  %v13122_v21 = vld [vmem:[%s15272_s14 + $0x28] sm:$0xff]  ;;  %v16111_v27 = vld [vmem:[#allocation81_spill] sm:$0xff]  ;;  %v16116_v39 = vrot.slane %v15861_v7, %v10951_v28 }
 0x687   :  { %v13112_v35 = vcombine.low %v16107_v33, %v4455_v29  ;;  %16110 = vst [vmem:[#allocation132_spill] sm:$0xff] %v13122_v21  ;;  %v16112_v42 = vrot.slane %v16111_v27, %v10951_v28  ;;  %v16114_v12 = vld [vmem:[#allocation86_spill] sm:$0xff]  ;;  %v16135_v21 = vld [vmem:[#allocation195_spill] sm:$0xff] }
 0x688   :  { %16099 = vst [vmem:[#allocation127_spill] sm:$0xff] %v13097_v26  ;;  %16102 = vst [vmem:[#allocation128_spill] sm:$0xff] %v13102_v59  ;;  %v16115_v29 = vrot.slane %v16114_v12, %v10951_v28  ;;  %v13137_v16 = vcombine.low %v6306_v9, %v16116_v39  ;;  %v16121_v12 = vrot.slane %v12176_v55, %v10951_v28  ;;  %v13169_v39 = vld [vmem:[%s15272_s14 + $0x88] sm:$0xff]  ;;  %v16139_v26 = vld [vmem:[#allocation4_spill] sm:$0xff] }
 0x689   :  { %16105 = vst [vmem:[#allocation129_spill] sm:$0xff] %v13107_v46  ;;  %16108 = vst [vmem:[#allocation130_spill] sm:$0xff] %v13112_v35  ;;  %v13127_v45 = vcombine.low %v16112_v42, %v5012_v10  ;;  %v13143_v35 = vld [vmem:[%s15272_s14 + $0x48] sm:$0xff] }
 0x68a   :  { %v13132_v43 = vcombine.low %v16115_v29, %v6270_v0  ;;  %16117 = vst [vmem:[#allocation40_spill] sm:$0xff] %v13143_v35  ;;  %v13148_v10 = vld [vmem:[%s15272_s14 + $0x68] sm:$0xff]  ;;  %v16119_v0 = vrot.slane %v15864_v37, %v10951_v28  ;;  %v13164_v29 = vcombine.low %v16121_v12, %v6390_v6  ;;  %16122 = vst [vmem:[#allocation134_spill] sm:$0xff] %v13169_v39 }
 0x68b   :  { %16113 = vst [vmem:[#allocation21_spill] sm:$0xff] %v13127_v45  ;;  %16118 = vst [vmem:[#allocation133_spill] sm:$0xff] %v13148_v10  ;;  %v13174_v37 = vld [vmem:[%s15272_s14 + $0xa8] sm:$0xff] }
 0x68c   :  { %v13153_v27 = vcombine.low %v6330_v47, %v16119_v0  ;;  %16123 = vst [vmem:[#allocation135_spill] sm:$0xff] %v13174_v37  ;;  %v13186_v55 = vld [vmem:[%s15272_s14 + $0xc8] sm:$0xff] }
 0x68d   :  { %16124 = vst [vmem:[#allocation136_spill] sm:$0xff] %v13186_v55  ;;  %v13191_v6 = vld [vmem:[%s15272_s14 + $0xe8] sm:$0xff] }
 0x68e   :  { %16125 = vst [vmem:[#allocation41_spill] sm:$0xff] %v13191_v6  ;;  %v13218_v12 = vld [vmem:[%s15272_s14 + $0x168] sm:$0xff] }
 0x68f   :  { %v13232_v46 = vld [vmem:[%s15272_s14 + $0x1a8] sm:$0xff] }
 0x690   :  { %16127 = vst [vmem:[#allocation138_spill] sm:$0xff] %v13232_v46  ;;  %v13246_v39 = vld [vmem:[%s15272_s14 + $0x1e8] sm:$0xff] }
 0x691   :  { %16129 = vst [vmem:[#allocation54_spill] sm:$0xff] %v13246_v39  ;;  %v13251_v10 = vld [vmem:[%s15272_s14 + $0x208] sm:$0xff] }
 0x692   :  { %16130 = vst [vmem:[#allocation140_spill] sm:$0xff] %v13251_v10 }
 0x6a1   :  { %v1317_v22 = vpop.f32.mrb[48].mxu1 }
 0x6a2   :  { %v1318_v3 = vadd.f32 %v1317_v22, %v13078_v1  ;;  %v1319_v33 = vpop.f32.mrb[49].mxu1  ;;  %v16120_v22 = vrot.slane %v12168_v32, %v10951_v28  ;;  %v13227_v28 = vld [vmem:[%s15272_s14 + $0x188] sm:$0xff] }
 0x6a3   :  { %v1320_v7 = vadd.f32 %v1319_v33, %v13084_v44  ;;  %v1321_v9 = vpop.f32.mrb[50].mxu1  ;;  %v13179_v33 = vcombine.low %v6426_v14, %v6438_v13  ;;  %16126 = vst [vmem:[#allocation137_spill] sm:$0xff] %v13227_v28 }
 0x6a4   :  { %v13159_v42 = vcombine.low %v6354_v4, %v16120_v22  ;;  %v1322_v47 = vadd.f32 %v1321_v9, %v13078_v1  ;;  %v1323_v32 = vpop.f32.mrb[51].mxu1  ;;  %v13177_v4 = vcombine.low %v6402_v54, %v6414_v52  ;;  %v13196_v54 = vld [vmem:[%s15272_s14 + $0x108] sm:$0xff] }
 0x6a5   :  { %v1324_v14 = vadd.f32 %v1323_v32, %v13084_v44  ;;  %v13208_v9 = vld [vmem:[%s15272_s14 + $0x128] sm:$0xff]  ;;  %v1396_v32 = vmax.f32 %v1318_v3, 0.0 }
 0x6a6   :  { %v13213_v22 = vld [vmem:[%s15272_s14 + $0x148] sm:$0xff]  ;;  %v1398_v13 = vmax.f32 %v1322_v47, 0.0  ;;  %v1397_v47 = vmax.f32 %v1320_v7, 0.0 }
 0x6a7   :  { %v13237_v3 = vld [vmem:[%s15272_s14 + $0x1c8] sm:$0xff]  ;;  %v1399_v0 = vmax.f32 %v1324_v14, 0.0 }
 0x6a8   :  { %16128 = vst [vmem:[#allocation139_spill] sm:$0xff] %v13237_v3  ;;  %v13256_v7 = vld [vmem:[%s15272_s14 + $0x228] sm:$0xff]  ;;  %v13258_v14 = vpack.c.bf16 %v1398_v13, %v1396_v32 }
 0x6a9   :  { %16131 = vst [vmem:[#allocation141_spill] sm:$0xff] %v13256_v7  ;;  %v13266_v55 = vpack.c.bf16 %v1399_v0, %v1397_v47  ;;  %v1327_v35 = vpop.f32.mrb[52].mxu1  ;;  %v13277_v32 = vld [vmem:[%s15272_s14 + $0x248] sm:$0xff] }
 0x6aa   :  { %16132 = vst [vmem:[#allocation142_spill] sm:$0xff] %v13258_v14  ;;  %16133 = vst [vmem:[#allocation143_spill] sm:$0xff] %v13277_v32  ;;  %v13282_v0 = vld [vmem:[%s15272_s14 + $0x268] sm:$0xff]  ;;  %v1328_v47 = vadd.f32 %v1327_v35, %v13078_v1  ;;  %v1329_v6 = vpop.f32.mrb[53].mxu1 }
 0x6ab   :  { %16134 = vst [vmem:[#allocation144_spill] sm:$0xff] %v13282_v0  ;;  %v1330_v52 = vadd.f32 %v1329_v6, %v13084_v44  ;;  %v1331_v37 = vpop.f32.mrb[54].mxu1  ;;  %1452 = vmatprep.subr.bf16.mxu0 %v13266_v55 }
 0x6ac   :  { %v1332_v28 = vadd.f32 %v1331_v37, %v13078_v1  ;;  %v1333_v41 = vpop.f32.mrb[55].mxu1  ;;  %1453 = vmatpush1.bf16.msra.mxu0 %v13258_v14  ;;  %v1400_v10 = vmax.f32 %v1328_v47, 0.0 }
 0x6ad   :  { %v1334_v39 = vadd.f32 %v1333_v41, %v13084_v44  ;;  %v1401_v46 = vmax.f32 %v1330_v52, 0.0 }
 0x6ae   :  { %v1402_v3 = vmax.f32 %v1332_v28, 0.0 }
 0x6af   :  { %v1403_v0 = vmax.f32 %v1334_v39, 0.0 }
 0x6b0   :  { %v13322_v37 = vpack.c.bf16 %v1402_v3, %v1400_v10  ;;  %v16140_v10 = vld [vmem:[#allocation12_spill] sm:$0xff] }
 0x6b1   :  { %v13330_v13 = vpack.c.bf16 %v1403_v0, %v1401_v46  ;;  %v1337_v39 = vpop.f32.mrb[56].mxu1  ;;  %v16138_v0 = vld [vmem:[#allocation7_spill] sm:$0xff] }
 0x6b2   :  { %v1338_v3 = vadd.f32 %v1337_v39, %v13078_v1  ;;  %v1339_v47 = vpop.f32.mrb[57].mxu1  ;;  %v16137_v39 = vld [vmem:[#allocation89_spill] sm:$0xff] }
 0x6b3   :  { %v1340_v52 = vadd.f32 %v1339_v47, %v13084_v44  ;;  %v1341_v41 = vpop.f32.mrb[58].mxu1  ;;  %1454 = vmatprep.subr.bf16.mxu0 %v13330_v13 }
 0x6b4   :  { %v1342_v6 = vadd.f32 %v1341_v41, %v13078_v1  ;;  %v1343_v46 = vpop.f32.mrb[59].mxu1  ;;  %1455 = vmatpush1.bf16.msra.mxu0 %v13322_v37  ;;  %v1404_v8 = vmax.f32 %v1338_v3, 0.0 }
 0x6b5   :  { %v1344_v35 = vadd.f32 %v1343_v46, %v13084_v44  ;;  %v1405_v45 = vmax.f32 %v1340_v52, 0.0 }
 0x6b6   :  { %v1406_v36 = vmax.f32 %v1342_v6, 0.0 }
 0x6b7   :  { %v1407_v32 = vmax.f32 %v1344_v35, 0.0 }
 0x6b8   :  { %v13376_v51 = vpack.c.bf16 %v1406_v36, %v1404_v8 }
 0x6b9   :  { %v13384_v7 = vpack.c.bf16 %v1407_v32, %v1405_v45  ;;  %v1347_v3 = vpop.f32.mrb[60].mxu1 }
 0x6ba   :  { %16141 = vst [vmem:[#allocation145_spill] sm:$0xff] %v13376_v51  ;;  %v1348_v52 = vadd.f32 %v1347_v3, %v13078_v1  ;;  %v1349_v6 = vpop.f32.mrb[61].mxu1  ;;  %v6491_v41 = vmul.bf16 %v13137_v16, %v13376_v51  ;;  %v6176_v45 = vmul.bf16 %v12971_v57, %v13376_v51 }
 0x6bb   :  { %v1350_v46 = vadd.f32 %v1349_v6, %v13084_v44  ;;  %v1351_v30 = vpop.f32.mrb[62].mxu1  ;;  %1456 = vmatprep.subr.bf16.mxu0 %v13384_v7  ;;  %v6492_v36 = vmul.bf16 %v13137_v16, %v13384_v7  ;;  %v6177_v3 = vmul.bf16 %v12971_v57, %v13384_v7  ;;  %v1774_v28 = vmul.bf16 %v12550_v18, %v13384_v7 }
 0x6bc   :  { %v1408_v8 = vmax.f32 %v1348_v52, 0.0  ;;  %v1352_v61 = vadd.f32 %v1351_v30, %v13078_v1  ;;  %v1353_v59 = vpop.f32.mrb[63].mxu1  ;;  %1457 = vmatpush1.bf16.msra.mxu0 %v13376_v51  ;;  %v16147_v6 = vmul.bf16 %v13132_v43, %v13258_v14  ;;  %v16148_v16 = vmul.bf16 %v12945_v31, %v13258_v14 }
 0x6bd   :  { %v1409_v57 = vmax.f32 %v1350_v46, 0.0  ;;  %v1354_v47 = vadd.f32 %v1353_v59, %v13084_v44  ;;  %v16149_v52 = vmul.bf16 %v13132_v43, %v13266_v55  ;;  %v16150_v18 = vmul.bf16 %v12945_v31, %v13266_v55 }
 0x6be   :  { %v13412_v35 = vmax.bf16 %v6491_v41, %v16147_v6  ;;  %v13417_v32 = vmax.bf16 %v6176_v45, %v16148_v16  ;;  %v1410_v41 = vmax.f32 %v1352_v61, 0.0  ;;  %v16151_v6 = vmul.bf16 %v16135_v21, %v13266_v55 }
 0x6bf   :  { %v13423_v30 = vmax.bf16 %v6492_v36, %v16149_v52  ;;  %v13428_v51 = vmax.bf16 %v6177_v3, %v16150_v18  ;;  %v2089_v46 = vmul.bf16 %v12602_v40, %v13384_v7  ;;  %v2403_v59 = vmul.bf16 %v12669_v58, %v13384_v7 }
 0x6c0   :  { %v13433_v14 = vmax.bf16 %v1774_v28, %v16151_v6  ;;  %v1411_v43 = vmax.f32 %v1354_v47, 0.0  ;;  %v2718_v36 = vmul.bf16 %v13015_v20, %v13384_v7  ;;  %v3032_v18 = vmul.bf16 %v12714_v48, %v13384_v7 }
 0x6c1   :  { %v3347_v31 = vmul.bf16 %v13036_v50, %v13384_v7  ;;  %v13445_v61 = vpack.c.bf16 %v1410_v41, %v1408_v8  ;;  %v16152_v28 = vmul.bf16 %v12590_v53, %v13266_v55  ;;  %v16153_v3 = vmul.bf16 %v12659_v49, %v13266_v55  ;;  %v1357_v6 = vpop.f32.mrb[64].mxu1 }
 0x6c2   :  { %v3661_v16 = vmul.bf16 %v12785_v11, %v13384_v7  ;;  %v13459_v52 = vpack.c.bf16 %v1411_v43, %v1409_v57  ;;  %v16154_v8 = vmul.bf16 %v13010_v5, %v13266_v55  ;;  %v1358_v11 = vadd.f32 %v1357_v6, %v13078_v1  ;;  %v1359_v57 = vpop.f32.mrb[65].mxu1 }
 0x6c3   :  { %v13450_v45 = vmax.bf16 %v2089_v46, %v16152_v28  ;;  %v13455_v47 = vmax.bf16 %v2403_v59, %v16153_v3  ;;  %v16155_v46 = vmul.bf16 %v12709_v2, %v13266_v55  ;;  %v16156_v59 = vmul.bf16 %v13026_v17, %v13266_v55 }
 0x6c4   :  { %v13464_v41 = vmax.bf16 %v2718_v36, %v16154_v8  ;;  %v6178_v43 = vmul.bf16 %v12990_v34, %v13445_v61  ;;  %v6493_v36 = vmul.bf16 %v13153_v27, %v13445_v61  ;;  %v16157_v8 = vmul.bf16 %v12775_v60, %v13266_v55  ;;  %1458 = vmatprep.subr.bf16.mxu0 %v13459_v52 }
 0x6c5   :  { %v13469_v28 = vmax.bf16 %v3032_v18, %v16155_v46  ;;  %v13474_v3 = vmax.bf16 %v3347_v31, %v16156_v59  ;;  %v1360_v18 = vadd.f32 %v1359_v57, %v13084_v44  ;;  %v1361_v46 = vpop.f32.mrb[66].mxu1  ;;  %v6179_v31 = vmul.bf16 %v12990_v34, %v13459_v52  ;;  %1459 = vmatpush1.bf16.msra.mxu0 %v13445_v61 }
 0x6c6   :  { %v13484_v50 = vmax.bf16 %v3661_v16, %v16157_v8  ;;  %v6494_v6 = vmul.bf16 %v13153_v27, %v13459_v52  ;;  %v1776_v59 = vmul.bf16 %v12557_v25, %v13459_v52  ;;  %v1412_v17 = vmax.f32 %v1358_v11, 0.0  ;;  %v1363_v60 = vpop.f32.mrb[67].mxu1 }
 0x6c7   :  { %v1362_v48 = vadd.f32 %v1361_v46, %v13078_v1  ;;  %v16158_v16 = vmul.bf16 %v12960_v24, %v13322_v37  ;;  %v16159_v34 = vmul.bf16 %v16137_v39, %v13322_v37  ;;  %v1413_v27 = vmax.f32 %v1360_v18, 0.0 }
 0x6c8   :  { %v1364_v2 = vadd.f32 %v1363_v60, %v13084_v44  ;;  %v16160_v11 = vmul.bf16 %v12960_v24, %v13330_v13  ;;  %v16161_v20 = vmul.bf16 %v16137_v39, %v13330_v13  ;;  %v2405_v60 = vmul.bf16 %v12674_v15, %v13459_v52  ;;  %v16163_v39 = vld [vmem:[#allocation50_spill] sm:$0xff] }
 0x6c9   :  { %v13499_v57 = vmax.bf16 %v6178_v43, %v16158_v16  ;;  %v13504_v8 = vmax.bf16 %v6493_v36, %v16159_v34  ;;  %v1414_v43 = vmax.f32 %v1362_v48, 0.0  ;;  %v16162_v16 = vmul.bf16 %v16138_v0, %v13330_v13  ;;  %v16164_v48 = vld [vmem:[#allocation123_spill] sm:$0xff]  ;;  %v16183_v0 = vld [vmem:[#allocation20_spill] sm:$0xff] }
 0x6ca   :  { %v13510_v46 = vmax.bf16 %v6179_v31, %v16160_v11  ;;  %v13515_v5 = vmax.bf16 %v6494_v6, %v16161_v20  ;;  %v2091_v36 = vmul.bf16 %v12607_v63, %v13459_v52  ;;  %v1415_v24 = vmax.f32 %v1364_v2, 0.0  ;;  %v16175_v63 = vld [vmem:[#allocation48_spill] sm:$0xff] }
 0x6cb   :  { %v13520_v58 = vmax.bf16 %v1776_v59, %v16162_v16  ;;  %v2720_v18 = vmul.bf16 %v13020_v62, %v13459_v52  ;;  %v3034_v20 = vmul.bf16 %v16163_v39, %v13459_v52  ;;  %v3349_v31 = vmul.bf16 %v16164_v48, %v13459_v52  ;;  %v16167_v16 = vld [vmem:[#allocation87_spill] sm:$0xff]  ;;  %v1367_v39 = vpop.f32.mrb[68].mxu1  ;;  %v16171_v48 = vld [vmem:[#allocation114_spill] sm:$0xff] }
 0x6cc   :  { %v13532_v6 = vpack.c.bf16 %v1414_v43, %v1412_v17  ;;  %v16165_v59 = vmul.bf16 %v12597_v19, %v13330_v13  ;;  %v16166_v11 = vmul.bf16 %v12664_v38, %v13330_v13  ;;  %v3663_v62 = vmul.bf16 %v16167_v16, %v13459_v52  ;;  %v1369_v16 = vpop.f32.mrb[69].mxu1 }
 0x6cd   :  { %v13546_v15 = vpack.c.bf16 %v1415_v24, %v1413_v27  ;;  %v16168_v17 = vmul.bf16 %v16139_v26, %v13330_v13  ;;  %v1368_v24 = vadd.f32 %v1367_v39, %v13078_v1 }
 0x6ce   :  { %v13537_v34 = vmax.bf16 %v2091_v36, %v16165_v59  ;;  %v13542_v2 = vmax.bf16 %v2405_v60, %v16166_v11  ;;  %v16169_v36 = vmul.bf16 %v16140_v10, %v13330_v13  ;;  %v16170_v60 = vmul.bf16 %v13031_v23, %v13330_v13 }
 0x6cf   :  { %v13551_v43 = vmax.bf16 %v2720_v18, %v16168_v17  ;;  %v6495_v27 = vmul.bf16 %v13159_v42, %v13532_v6  ;;  %v6180_v18 = vmul.bf16 %v16171_v48, %v13532_v6  ;;  %v16172_v17 = vmul.bf16 %v12780_v56, %v13330_v13  ;;  %1460 = vmatprep.subr.bf16.mxu0 %v13546_v15 }
 0x6d0   :  { %v13556_v59 = vmax.bf16 %v3034_v20, %v16169_v36  ;;  %v13561_v11 = vmax.bf16 %v3349_v31, %v16170_v60  ;;  %v6496_v20 = vmul.bf16 %v13159_v42, %v13546_v15  ;;  %v1370_v31 = vadd.f32 %v1369_v16, %v13084_v44  ;;  %v1371_v36 = vpop.f32.mrb[70].mxu1  ;;  %v16173_v60 = vld [vmem:[#allocation9_spill] sm:$0xff]  ;;  %1461 = vmatpush1.bf16.msra.mxu0 %v13532_v6 }
 0x6d1   :  { %v13571_v10 = vmax.bf16 %v3663_v62, %v16172_v17  ;;  %v6181_v39 = vmul.bf16 %v16171_v48, %v13546_v15  ;;  %v1778_v23 = vmul.bf16 %v16173_v60, %v13546_v15  ;;  %v13582_v26 = vmax.bf16 %v13412_v35, %v6495_v27  ;;  %v1373_v17 = vpop.f32.mrb[71].mxu1 }
 0x6d2   :  { %v1416_v56 = vmax.f32 %v1368_v24, 0.0  ;;  %v1372_v62 = vadd.f32 %v1371_v36, %v13078_v1  ;;  %v13587_v42 = vmax.bf16 %v13417_v32, %v6180_v18  ;;  %v13590_v16 = vmax.bf16 %v13423_v30, %v6496_v20  ;;  %v16174_v24 = vld [vmem:[#allocation18_spill] sm:$0xff]  ;;  %v16176_v30 = vld [vmem:[#allocation156_spill] sm:$0xff] }
 0x6d3   :  { %v1417_v38 = vmax.f32 %v1370_v31, 0.0  ;;  %v1374_v48 = vadd.f32 %v1373_v17, %v13084_v44  ;;  %v13594_v53 = vmax.bf16 %v13428_v51, %v6181_v39  ;;  %v13597_v27 = vmax.bf16 %v13433_v14, %v1778_v23  ;;  %v16177_v31 = vld [vmem:[#allocation52_spill] sm:$0xff]  ;;  %v16178_v51 = vld [vmem:[#allocation162_spill] sm:$0xff] }
 0x6d4   :  { %v1418_v35 = vmax.f32 %v1372_v62, 0.0  ;;  %v2093_v36 = vmul.bf16 %v16174_v24, %v13546_v15  ;;  %v2407_v32 = vmul.bf16 %v16175_v63, %v13546_v15  ;;  %v2722_v20 = vmul.bf16 %v16176_v30, %v13546_v15  ;;  %v16180_v63 = vld [vmem:[#allocation88_spill] sm:$0xff]  ;;  %v1377_v30 = vpop.f32.mrb[72].mxu1 }
 0x6d5   :  { %v1419_v18 = vmax.f32 %v1374_v48, 0.0  ;;  %v3036_v17 = vmul.bf16 %v16177_v31, %v13546_v15  ;;  %v3351_v39 = vmul.bf16 %v16178_v51, %v13546_v15  ;;  %v3665_v48 = vmul.bf16 %v16180_v63, %v13546_v15 }
 0x6d6   :  { %v13609_v62 = vpack.c.bf16 %v1418_v35, %v1416_v56  ;;  %v13612_v23 = vmax.bf16 %v13450_v45, %v2093_v36  ;;  %v13615_v14 = vmax.bf16 %v13455_v47, %v2407_v32  ;;  %v13622_v40 = vmax.bf16 %v13464_v41, %v2722_v20  ;;  %v1379_v35 = vpop.f32.mrb[73].mxu1  ;;  %v16181_v47 = vld [vmem:[#allocation47_spill] sm:$0xff] }
 0x6d7   :  { %v13619_v24 = vpack.c.bf16 %v1419_v18, %v1417_v38  ;;  %v13625_v31 = vmax.bf16 %v13469_v28, %v3036_v17  ;;  %v13628_v56 = vmax.bf16 %v13474_v3, %v3351_v39  ;;  %v1378_v45 = vadd.f32 %v1377_v30, %v13078_v1  ;;  %v1381_v18 = vpop.f32.mrb[74].mxu1  ;;  %v16182_v30 = vld [vmem:[#allocation11_spill] sm:$0xff] }
 0x6d8   :  { %16179 = vst [vmem:[#allocation146_spill] sm:$0xff] %v13609_v62  ;;  %v6182_v36 = vmul.bf16 %v16181_v47, %v13609_v62  ;;  %v6497_v38 = vmul.bf16 %v13164_v29, %v13609_v62  ;;  %v13636_v32 = vmax.bf16 %v13484_v50, %v3665_v48  ;;  %v1380_v41 = vadd.f32 %v1379_v35, %v13084_v44  ;;  %v1383_v63 = vpop.f32.mrb[75].mxu1 }
 0x6d9   :  { %1462 = vmatprep.subr.bf16.mxu0 %v13619_v24  ;;  %v6183_v28 = vmul.bf16 %v16181_v47, %v13619_v24  ;;  %v6498_v3 = vmul.bf16 %v13164_v29, %v13619_v24  ;;  %v1780_v20 = vmul.bf16 %v16182_v30, %v13619_v24  ;;  %v1420_v17 = vmax.f32 %v1378_v45, 0.0 }
 0x6da   :  { %v1382_v39 = vadd.f32 %v1381_v18, %v13078_v1  ;;  %1463 = vmatpush1.bf16.msra.mxu0 %v13609_v62  ;;  %v13649_v50 = vmax.bf16 %v13499_v57, %v6182_v36  ;;  %v13652_v48 = vmax.bf16 %v13504_v8, %v6497_v38  ;;  %v1421_v35 = vmax.f32 %v1380_v41, 0.0  ;;  %v16184_v36 = vld [vmem:[#allocation35_spill] sm:$0xff]  ;;  %v16185_v41 = vld [vmem:[#allocation157_spill] sm:$0xff] }
 0x6db   :  { %v1384_v47 = vadd.f32 %v1383_v63, %v13084_v44  ;;  %v13656_v29 = vmax.bf16 %v13510_v46, %v6183_v28  ;;  %v13659_v51 = vmax.bf16 %v13515_v5, %v6498_v3  ;;  %v13662_v18 = vmax.bf16 %v13520_v58, %v1780_v20  ;;  %v16186_v46 = vld [vmem:[#allocation53_spill] sm:$0xff] }
 0x6dc   :  { %v1422_v45 = vmax.f32 %v1382_v39, 0.0  ;;  %v2095_v57 = vmul.bf16 %v16183_v0, %v13619_v24  ;;  %v2409_v8 = vmul.bf16 %v16184_v36, %v13619_v24  ;;  %v2724_v63 = vmul.bf16 %v16185_v41, %v13619_v24  ;;  %v16187_v5 = vld [vmem:[#allocation97_spill] sm:$0xff]  ;;  %v16189_v36 = vld [vmem:[#allocation39_spill] sm:$0xff]  ;;  %v1387_v41 = vpop.f32.mrb[76].mxu1 }
 0x6dd   :  { %v1423_v38 = vmax.f32 %v1384_v47, 0.0  ;;  %v3038_v28 = vmul.bf16 %v16186_v46, %v13619_v24  ;;  %v3353_v3 = vmul.bf16 %v16187_v5, %v13619_v24  ;;  %v3667_v47 = vmul.bf16 %v16189_v36, %v13619_v24 }
 0x6de   :  { %v13674_v39 = vpack.c.bf16 %v1422_v45, %v1420_v17  ;;  %v13677_v58 = vmax.bf16 %v13537_v34, %v2095_v57  ;;  %v13680_v20 = vmax.bf16 %v13542_v2, %v2409_v8  ;;  %v13687_v21 = vmax.bf16 %v13551_v43, %v2724_v63  ;;  %v1389_v45 = vpop.f32.mrb[77].mxu1  ;;  %v16190_v57 = vld [vmem:[#allocation115_spill] sm:$0xff] }
 0x6df   :  { %v13684_v0 = vpack.c.bf16 %v1423_v38, %v1421_v35  ;;  %v13690_v46 = vmax.bf16 %v13556_v59, %v3038_v28  ;;  %v13693_v17 = vmax.bf16 %v13561_v11, %v3353_v3  ;;  %v1388_v2 = vadd.f32 %v1387_v41, %v13078_v1  ;;  %v1391_v38 = vpop.f32.mrb[78].mxu1  ;;  %v16191_v41 = vld [vmem:[#allocation13_spill] sm:$0xff] }
 0x6e0   :  { %16188 = vst [vmem:[#allocation22_spill] sm:$0xff] %v13674_v39  ;;  %v6499_v34 = vmul.bf16 %v13177_v4, %v13674_v39  ;;  %v6184_v35 = vmul.bf16 %v16190_v57, %v13674_v39  ;;  %v13701_v8 = vmax.bf16 %v13571_v10, %v3667_v47  ;;  %v1390_v59 = vadd.f32 %v1389_v45, %v13084_v44  ;;  %v1393_v47 = vpop.f32.mrb[79].mxu1 }
 0x6e1   :  { %v6500_v43 = vmul.bf16 %v13177_v4, %v13684_v0  ;;  %1464 = vmatprep.subr.bf16.mxu0 %v13684_v0  ;;  %v6185_v11 = vmul.bf16 %v16190_v57, %v13684_v0  ;;  %v1782_v63 = vmul.bf16 %v16191_v41, %v13684_v0  ;;  %v1424_v3 = vmax.f32 %v1388_v2, 0.0 }
 0x6e2   :  { %v6507_v28 = vmax.bf16 %v13582_v26, %v6499_v34  ;;  %v1392_v10 = vadd.f32 %v1391_v38, %v13078_v1  ;;  %1465 = vmatpush1.bf16.msra.mxu0 %v13674_v39  ;;  %v6192_v4 = vmax.bf16 %v13587_v42, %v6184_v35  ;;  %v1425_v36 = vmax.f32 %v1390_v59, 0.0  ;;  %v16192_v26 = vld [vmem:[#allocation34_spill] sm:$0xff]  ;;  %v16193_v1 = vld [vmem:[#allocation59_spill] sm:$0xff] }
 0x6e3   :  { %v6524_v45 = vmax.bf16 %v13590_v16, %v6500_v43  ;;  %v1394_v5 = vadd.f32 %v1393_v47, %v13084_v44  ;;  %v6209_v57 = vmax.bf16 %v13594_v53, %v6185_v11  ;;  %v1806_v41 = vmax.bf16 %v13597_v27, %v1782_v63  ;;  %v16194_v39 = vld [vmem:[#allocation182_spill] sm:$0xff]  ;;  %v16195_v16 = vld [vmem:[#allocation73_spill] sm:$0xff]  ;;  %v16198_v11 = vld [vmem:[#allocation91_spill] sm:$0xff] }
 0x6e4   :  { %v1426_v30 = vmax.f32 %v1392_v10, 0.0  ;;  %v2097_v34 = vmul.bf16 %v16192_v26, %v13684_v0  ;;  %v2411_v2 = vmul.bf16 %v16193_v1, %v13684_v0  ;;  %v2726_v42 = vmul.bf16 %v16194_v39, %v13684_v0  ;;  %v16196_v44 = vld [vmem:[#allocation185_spill] sm:$0xff]  ;;  %v16205_v39 = vld [vmem:[#allocation131_spill] sm:$0xff]  ;;  %v16206_v1 = vld [vmem:[#allocation132_spill] sm:$0xff] }
 0x6e5   :  { %v1427_v38 = vmax.f32 %v1394_v5, 0.0  ;;  %v3040_v35 = vmul.bf16 %v16195_v16, %v13684_v0  ;;  %v3355_v43 = vmul.bf16 %v16196_v44, %v13684_v0  ;;  %v3669_v63 = vmul.bf16 %v16198_v11, %v13684_v0 }
 0x6e6   :  { %v13729_v53 = vpack.c.bf16 %v1426_v30, %v1424_v3  ;;  %v2121_v27 = vmax.bf16 %v13612_v23, %v2097_v34  ;;  %v2435_v59 = vmax.bf16 %v13615_v14, %v2411_v2  ;;  %v2750_v5 = vmax.bf16 %v13622_v40, %v2726_v42  ;;  %v16199_v30 = vld [vmem:[#allocation116_spill] sm:$0xff]  ;;  %v16201_v2 = vld [vmem:[#allocation14_spill] sm:$0xff] }
 0x6e7   :  { %v13735_v10 = vpack.c.bf16 %v1427_v38, %v1425_v36  ;;  %v13739_v47 = vmax.bf16 %v13625_v31, %v3040_v35  ;;  %v13742_v16 = vmax.bf16 %v13628_v56, %v3355_v43  ;;  %v13749_v14 = vmax.bf16 %v13636_v32, %v3669_v63  ;;  %v16200_v36 = vld [vmem:[#allocation125_spill] sm:$0xff]  ;;  %v16202_v32 = vld [vmem:[#allocation60_spill] sm:$0xff] }
 0x6e8   :  { %16197 = vst [vmem:[#allocation23_spill] sm:$0xff] %v13729_v53  ;;  %v6186_v3 = vmul.bf16 %v16199_v30, %v13729_v53  ;;  %v6501_v23 = vmul.bf16 %v13179_v33, %v13729_v53  ;;  %v10320_v56 = vld [vmem:[%s15273_s2] sm:$0xff]   ;;  %v16207_v26 = vcombine.high %v16205_v39, %v16206_v1 }
 0x6e9   :  { %v6187_v40 = vmul.bf16 %v16199_v30, %v13735_v10  ;;  %v6502_v31 = vmul.bf16 %v13179_v33, %v13735_v10  ;;  %1466 = vmatprep.subr.bf16.mxu0 %v13735_v10  ;;  %v1784_v38 = vmul.bf16 %v16201_v2, %v13735_v10  ;;  %v2099_v42 = vmul.bf16 %v16202_v32, %v13735_v10  ;;  %v16203_v33 = vld [vmem:[#allocation49_spill] sm:$0xff]  ;;  %v16204_v30 = vld [vmem:[#allocation184_spill] sm:$0xff] }
 0x6ea   :  { %v6193_v35 = vmax.bf16 %v13649_v50, %v6186_v3  ;;  %v6508_v43 = vmax.bf16 %v13652_v48, %v6501_v23  ;;  %1467 = vmatpush1.bf16.msra.mxu0 %v13729_v53  ;;  %v2413_v63 = vmul.bf16 %v16203_v33, %v13735_v10  ;;  %v2728_v34 = vmul.bf16 %v16204_v30, %v13735_v10 }
 0x6eb   :  { %v6210_v11 = vmax.bf16 %v13656_v29, %v6187_v40  ;;  %v6525_v44 = vmax.bf16 %v13659_v51, %v6502_v31  ;;  %7486 = vmatprep.subr.bf16.mxu0 %v16207_v26  ;;  %v1807_v50 = vmax.bf16 %v13662_v18, %v1784_v38  ;;  %v2122_v48 = vmax.bf16 %v13677_v58, %v2099_v42  ;;  %v16210_v38 = vld [vmem:[#allocation133_spill] sm:$0xff] }
 0x6ec   :  { %v6194_v3 = vmax.bf16 %v6193_v35, %v6192_v4  ;;  %v6509_v23 = vmax.bf16 %v6508_v43, %v6507_v28  ;;  %v2436_v32 = vmax.bf16 %v13680_v20, %v2413_v63  ;;  %v2751_v33 = vmax.bf16 %v13687_v21, %v2728_v34  ;;  %v16209_v20 = vld [vmem:[#allocation40_spill] sm:$0xff] }
 0x6ed   :  { %v6211_v2 = vmax.bf16 %v6210_v11, %v6209_v57  ;;  %v6526_v30 = vmax.bf16 %v6525_v44, %v6524_v45  ;;  %1485 = vmatmul.mubr.bf16.vlgmr.msra.gmra.mrb[64].mxu0 %v10320_v56  ;;  %v1808_v29 = vmax.bf16 %v1807_v50, %v1806_v41  ;;  %v2123_v40 = vmax.bf16 %v2122_v48, %v2121_v27 }
 0x6ee   :  { %v6195_v51 = vunpack.i.l.bf16 %v6194_v3  ;;  %v6196_v31 = vunpack.i.h.bf16 %v6194_v3  ;;  %v6510_v53 = vunpack.i.l.bf16 %v6509_v23  ;;  %v6511_v62 = vunpack.i.h.bf16 %v6509_v23 }
 0x6ef   :  { %v16208_v18 = vcombine.low %v16205_v39, %v16206_v1  ;;  %v6212_v58 = vunpack.i.l.bf16 %v6211_v2  ;;  %v6213_v4 = vunpack.i.h.bf16 %v6211_v2  ;;  %v6527_v28 = vunpack.i.l.bf16 %v6526_v30 }
 0x6f0   :  { %v6528_v26 = vunpack.i.h.bf16 %v6526_v30  ;;  %v16211_v21 = vcombine.high %v16209_v20, %v16210_v38  ;;  %v6197_v45 = vmax.f32 %v6195_v51, %v6196_v31  ;;  %v6512_v57 = vmax.f32 %v6510_v53, %v6511_v62  ;;  %v16213_v30 = vld [vmem:[#allocation134_spill] sm:$0xff]  ;;  %v16214_v62 = vld [vmem:[#allocation135_spill] sm:$0xff] }
 0x6f1   :  { %7487 = vmatpush1.bf16.msra.mxu0 %v16208_v18  ;;  %v1809_v41 = vunpack.i.l.bf16 %v1808_v29  ;;  %v1810_v44 = vunpack.i.h.bf16 %v1808_v29  ;;  %v6214_v27 = vmax.f32 %v6212_v58, %v6213_v4  ;;  %v2124_v34 = vunpack.i.l.bf16 %v2123_v40 }
 0x6f2   :  { %7488 = vmatprep.subr.bf16.mxu0 %v16211_v21  ;;  %v6529_v11 = vmax.f32 %v6527_v28, %v6528_v26  ;;  %v2125_v56 = vunpack.i.h.bf16 %v2123_v40  ;;  %v6198_v39 = vrot.slane %v6197_v45, 4  ;;  %v6513_v1 = vrot.slane %v6512_v57, 4 }
 0x6f3   :  { %v16212_v2 = vcombine.low %v16209_v20, %v16210_v38  ;;  %v1811_v42 = vmax.f32 %v1809_v41, %v1810_v44  ;;  %v2437_v35 = vmax.bf16 %v2436_v32, %v2435_v59  ;;  %v6215_v43 = vrot.slane %v6214_v27, 4  ;;  %v16218_v38 = vld [vmem:[#allocation41_spill] sm:$0xff] }
 0x6f4   :  { %v6530_v63 = vrot.slane %v6529_v11, 4  ;;  %v16215_v53 = vcombine.high %v16213_v30, %v16214_v62  ;;  %v2126_v50 = vmax.f32 %v2124_v34, %v2125_v56  ;;  %v2752_v48 = vmax.bf16 %v2751_v33, %v2750_v5  ;;  %v16217_v33 = vld [vmem:[#allocation136_spill] sm:$0xff] }
 0x6f5   :  { %7489 = vmatpush1.bf16.msra.mxu0 %v16212_v2  ;;  %v6199_v3 = vmax.f32 %v6197_v45, %v6198_v39  ;;  %v6514_v23 = vmax.f32 %v6512_v57, %v6513_v1  ;;  %v1812_v29 = vrot.slane %v1811_v42, 4  ;;  %v2438_v40 = vunpack.i.l.bf16 %v2437_v35 }
 0x6f6   :  { %7490 = vmatprep.subr.bf16.mxu0 %v16215_v53  ;;  %v6216_v51 = vmax.f32 %v6214_v27, %v6215_v43  ;;  %v6531_v31 = vmax.f32 %v6529_v11, %v6530_v63  ;;  %v2127_v18 = vrot.slane %v2126_v50, 4  ;;  %v2439_v58 = vunpack.i.h.bf16 %v2437_v35 }
 0x6f7   :  { %v6200_v4 = vrot.slane %v6199_v3, 2  ;;  %v6515_v59 = vrot.slane %v6514_v23, 2  ;;  %v16216_v32 = vcombine.low %v16213_v30, %v16214_v62  ;;  %v1813_v28 = vmax.f32 %v1811_v42, %v1812_v29 }
 0x6f8   :  { %v2753_v26 = vunpack.i.l.bf16 %v2752_v48  ;;  %v6217_v20 = vrot.slane %v6216_v51, 2  ;;  %v6532_v5 = vrot.slane %v6531_v31, 2  ;;  %v16219_v21 = vcombine.high %v16217_v33, %v16218_v38 }
 0x6f9   :  { %7491 = vmatpush1.bf16.msra.mxu0 %v16216_v32  ;;  %v2128_v45 = vmax.f32 %v2126_v50, %v2127_v18  ;;  %v2440_v57 = vmax.f32 %v2438_v40, %v2439_v58  ;;  %v6201_v41 = vmax.f32 %v6199_v3, %v6200_v4  ;;  %v6516_v44 = vmax.f32 %v6514_v23, %v6515_v59  ;;  %v6228_v32 = vld [vmem:[#allocation2 + $0x8] sm:$0x80] }
 0x6fa   :  { %7492 = vmatprep.subr.bf16.mxu0 %v16219_v21  ;;  %v1814_v27 = vrot.slane %v1813_v28, 2  ;;  %v2754_v11 = vunpack.i.h.bf16 %v2752_v48  ;;  %v6218_v34 = vmax.f32 %v6216_v51, %v6217_v20  ;;  %v6533_v56 = vmax.f32 %v6531_v31, %v6532_v5  ;;  %v6225_v31 = vld [vmem:[#allocation2] sm:$0x80]  ;;  %v16236_v51 = vld [vmem:[#allocation166_spill] sm:$0xff] }
 0x6fb   :  { %v2129_v39 = vrot.slane %v2128_v45, 2  ;;  %v2441_v1 = vrot.slane %v2440_v57, 4  ;;  %v6202_v2 = vrot.slane %v6201_v41, 1  ;;  %v6517_v42 = vrot.slane %v6516_v44, 1 }
 0x6fc   :  { %v16220_v35 = vcombine.low %v16217_v33, %v16218_v38  ;;  %v1815_v43 = vmax.f32 %v1813_v28, %v1814_v27  ;;  %v2755_v63 = vmax.f32 %v2753_v26, %v2754_v11  ;;  %v6219_v30 = vrot.slane %v6218_v34, 1 }
 0x6fd   :  { %v6534_v62 = vrot.slane %v6533_v56, 1  ;;  %v16221_v53 = vcombine.high %v13196_v54, %v13208_v9  ;;  %v2130_v50 = vmax.f32 %v2128_v45, %v2129_v39  ;;  %v2442_v48 = vmax.f32 %v2440_v57, %v2441_v1  ;;  %v16404_v57 = vld [vmem:[#allocation121_spill] sm:$0xff] }
 0x6fe   :  { %7493 = vmatpush1.bf16.msra.mxu0 %v16220_v35  ;;  %v6203_v3 = vmax.f32 %v6201_v41, %v6202_v2  ;;  %v13805_v23 = vmax.f32 %v6516_v44, %v6517_v42  ;;  %v1816_v29 = vrot.slane %v1815_v43, 1  ;;  %v2756_v40 = vrot.slane %v2755_v63, 4  ;;  %v1825_v41 = vld [vmem:[#allocation2 + $0x8] sm:$0x1] }
 0x6ff   :  { %7494 = vmatprep.subr.bf16.mxu0 %v16221_v53  ;;  %v6220_v18 = vmax.f32 %v6218_v34, %v6219_v30  ;;  %v13813_v58 = vmax.f32 %v6533_v56, %v6534_v62  ;;  %v2131_v4 = vrot.slane %v2130_v50, 1  ;;  %v2443_v59 = vrot.slane %v2442_v48, 2  ;;  %v16228_v34 = vld [vmem:[#allocation51_spill] sm:$0xff]  ;;  %v16229_v42 = vld [vmem:[#allocation186_spill] sm:$0xff]  ;;  %v16231_v53 = vld [vmem:[#allocation93_spill] sm:$0xff] }
 0x700   :  { %v6204_v28 = vpack.i.bf16 %v6203_v3, %v6203_v3  ;;  %v6519_v26 = vpack.i.bf16 %v13805_v23, %v13805_v23  ;;  %v16224_v20 = vcombine.low %v13196_v54, %v13208_v9  ;;  %v1817_v5 = vmax.f32 %v1815_v43, %v1816_v29  ;;  %v16233_v3 = vld [vmem:[#allocation138_spill] sm:$0xff] }
 0x701   :  { %v2757_v33 = vmax.f32 %v2755_v63, %v2756_v40  ;;  %v6221_v38 = vpack.i.bf16 %v6220_v18, %v6220_v18  ;;  %v6536_v21 = vpack.i.bf16 %v13813_v58, %v13813_v58  ;;  %v16225_v45 = vcombine.high %v13213_v22, %v13218_v12  ;;  %v2454_v18 = vld [vmem:[#allocation2 + $0x8] sm:$0x2] }
 0x702   :  { %7495 = vmatpush1.bf16.msra.mxu0 %v16224_v20  ;;  %v13831_v44 = vmax.f32 %v2130_v50, %v2131_v4  ;;  %v2444_v54 = vmax.f32 %v2442_v48, %v2443_v59  ;;  %v6226_v9 = vsel %vm13809_vm7, %v6204_v28, %v6225_v31  ;;  %v1818_v27 = vpack.i.bf16 %v1817_v5, %v1817_v5  ;;  %v16232_v48 = vld [vmem:[#allocation137_spill] sm:$0xff] }
 0x703   :  { %7496 = vmatprep.subr.bf16.mxu0 %v16225_v45  ;;  %v2758_v11 = vrot.slane %v2757_v33, 2  ;;  %v3042_v56 = vmul.bf16 %v16228_v34, %v13735_v10  ;;  %6227 = vst [vmem:[#allocation2] sm:$0x80] %v6226_v9  ;;  %v6229_v39 = vsel %vm13809_vm7, %v6221_v38, %v6228_v32  ;;  %v3357_v35 = vmul.bf16 %v16229_v42, %v13735_v10  ;;  %v16241_v45 = vld [vmem:[#allocation188_spill] sm:$0xff] }
 0x704   :  { %v2133_v1 = vpack.i.bf16 %v13831_v44, %v13831_v44  ;;  %v2445_v2 = vrot.slane %v2444_v54, 1  ;;  %6230 = vst [vmem:[#allocation2 + $0x8] sm:$0x80] %v6229_v39  ;;  %v16230_v43 = vcombine.low %v13213_v22, %v13218_v12  ;;  %v1826_v63 = vsel %vm13827_vm9, %v1818_v27, %v1825_v41  ;;  %v16235_v22 = vld [vmem:[#allocation126_spill] sm:$0xff]  ;;  %v16245_v27 = vld [vmem:[#allocation139_spill] sm:$0xff] }
 0x705   :  { %v2759_v30 = vmax.f32 %v2757_v33, %v2758_v11  ;;  %v3065_v62 = vmax.bf16 %v13690_v46, %v3042_v56  ;;  %v3671_v50 = vmul.bf16 %v16231_v53, %v13735_v10  ;;  %v16234_v23 = vcombine.high %v16232_v48, %v16233_v3  ;;  %1827 = vst [vmem:[#allocation2 + $0x8] sm:$0x1] %v1826_v63  ;;  %v16240_v33 = vld [vmem:[#allocation187_spill] sm:$0xff]  ;;  %v16246_v11 = vld [vmem:[#allocation54_spill] sm:$0xff] }
 0x706   :  { %7497 = vmatpush1.bf16.msra.mxu0 %v16230_v43  ;;  %v2446_v29 = vmax.f32 %v2444_v54, %v2445_v2  ;;  %v3380_v40 = vmax.bf16 %v13693_v17, %v3357_v35  ;;  %v3978_v12 = vmul.bf16 %v16235_v22, %v13459_v52  ;;  %v3980_v31 = vmul.bf16 %v16236_v51, %v13546_v15  ;;  %v16239_v17 = vld [vmem:[#allocation167_spill] sm:$0xff]  ;;  %v16248_v43 = vld [vmem:[#allocation124_spill] sm:$0xff] }
 0x707   :  { %7498 = vmatprep.subr.bf16.mxu0 %v16234_v23  ;;  %v2760_v4 = vrot.slane %v2759_v30, 1  ;;  %v3066_v59 = vmax.bf16 %v3065_v62, %v13739_v47  ;;  %v3694_v32 = vmax.bf16 %v13701_v8, %v3671_v50  ;;  %v3982_v28 = vmul.bf16 %v16239_v17, %v13619_v24 }
 0x708   :  { %v2447_v20 = vpack.i.bf16 %v2446_v29, %v2446_v29  ;;  %v3381_v5 = vmax.bf16 %v3380_v40, %v13742_v16  ;;  %v3984_v38 = vmul.bf16 %v16240_v33, %v13684_v0  ;;  %v3986_v41 = vmul.bf16 %v16241_v45, %v13735_v10 }
 0x709   :  { %v16244_v8 = vcombine.low %v16232_v48, %v16233_v3  ;;  %v2761_v47 = vmax.f32 %v2759_v30, %v2760_v4  ;;  %v3067_v54 = vunpack.i.l.bf16 %v3066_v59  ;;  %v3068_v9 = vunpack.i.h.bf16 %v3066_v59  ;;  %v16253_v59 = vld [vmem:[#allocation5_spill] sm:$0xff] }
 0x70a   :  { %v3695_v16 = vmax.bf16 %v3694_v32, %v13749_v14  ;;  %v16247_v56 = vcombine.high %v16245_v27, %v16246_v11  ;;  %v2455_v39 = vsel %vm13861_vm11, %v2447_v20, %v2454_v18  ;;  %v3382_v2 = vunpack.i.l.bf16 %v3381_v5  ;;  %v6539_v50 = vld [vmem:[#allocation2] sm:$0x80]  ;;  %v16414_v14 = vld [vmem:[#allocation39_spill] sm:$0xff] }
 0x70b   :  { %7499 = vmatpush1.bf16.msra.mxu0 %v16244_v8  ;;  %v3383_v35 = vunpack.i.h.bf16 %v3381_v5  ;;  %v16249_v63 = vmul.bf16 %v16248_v43, %v13266_v55  ;;  %v16250_v62 = vmul.bf16 %v16200_v36, %v13384_v7  ;;  %2456 = vst [vmem:[#allocation2 + $0x8] sm:$0x2] %v2455_v39  ;;  %v2762_v48 = vpack.i.bf16 %v2761_v47, %v2761_v47  ;;  %v6542_v18 = vld [vmem:[#allocation2 + $0x8] sm:$0x80] }
 0x70c   :  { %7500 = vmatprep.subr.bf16.mxu0 %v16247_v56  ;;  %v3069_v3 = vmax.f32 %v3067_v54, %v3068_v9  ;;  %v3696_v23 = vunpack.i.l.bf16 %v3695_v16  ;;  %v3697_v29 = vunpack.i.h.bf16 %v3695_v16  ;;  %v6540_v40 = vsel %vm13876_vm12, %v6519_v26, %v6539_v50  ;;  %v2139_v54 = vld [vmem:[#allocation2 + $0x8] sm:$0x1]  ;;  %v16256_v16 = vld [vmem:[#allocation95_spill] sm:$0xff]  ;;  %v16258_v56 = vld [vmem:[#allocation141_spill] sm:$0xff] }
 0x70d   :  { %v4004_v30 = vmax.bf16 %v16250_v62, %v16249_v63  ;;  %v3384_v4 = vmax.f32 %v3382_v2, %v3383_v35  ;;  %v16254_v32 = vmul.bf16 %v16253_v59, %v13330_v13  ;;  %6541 = vst [vmem:[#allocation2] sm:$0x80] %v6540_v40  ;;  %v6543_v8 = vsel %vm13876_vm12, %v6536_v21, %v6542_v18  ;;  %v16260_v35 = vld [vmem:[#allocation96_spill] sm:$0xff]  ;;  %v16261_v62 = vld [vmem:[#allocation98_spill] sm:$0xff]  ;;  %vm14022_vm12 = vmand %vm3706_vm0, %vm4021_vm5 }
 0x70e   :  { %v16255_v47 = vcombine.low %v16245_v27, %v16246_v11  ;;  %v3070_v26 = vrot.slane %v3069_v3, 4  ;;  %v3698_v9 = vmax.f32 %v3696_v23, %v3697_v29  ;;  %6544 = vst [vmem:[#allocation2 + $0x8] sm:$0x80] %v6543_v8  ;;  %v2140_v58 = vsel %vm13897_vm13, %v2133_v1, %v2139_v54  ;;  %v16265_v23 = vld [vmem:[#allocation100_spill] sm:$0xff]  ;;  %v16268_v8 = vld [vmem:[#allocation94_spill] sm:$0xff]  ;;  %v16419_v50 = vld [vmem:[#allocation99_spill] sm:$0xff] }
 0x70f   :  { %v4005_v20 = vmax.bf16 %v3978_v12, %v16254_v32  ;;  %v4006_v5 = vmax.bf16 %v4004_v30, %v3980_v31  ;;  %v4290_v12 = vmul.bf16 %v16256_v16, %v13384_v7  ;;  %v16257_v31 = vld [vmem:[#allocation140_spill] sm:$0xff]  ;;  %v3385_v21 = vrot.slane %v3384_v4, 4  ;;  %2141 = vst [vmem:[#allocation2 + $0x8] sm:$0x1] %v2140_v58 }
 0x710   :  { %7501 = vmatpush1.bf16.msra.mxu0 %v16255_v47  ;;  %v16259_v39 = vcombine.high %v16257_v31, %v16258_v56  ;;  %v3071_v11 = vmax.f32 %v3069_v3, %v3070_v26  ;;  %v3699_v2 = vrot.slane %v3698_v9, 4  ;;  %v4292_v63 = vmul.bf16 %v16260_v35, %v13459_v52  ;;  %v16271_v54 = vld [vmem:[#allocation144_spill] sm:$0xff] }
 0x711   :  { %v4007_v44 = vmax.bf16 %v4005_v20, %v3982_v28  ;;  %v4008_v27 = vmax.bf16 %v4006_v5, %v3984_v38  ;;  %v4294_v30 = vmul.bf16 %v16261_v62, %v13546_v15  ;;  %v3386_v1 = vmax.f32 %v3384_v4, %v3385_v21  ;;  %v16264_v38 = vld [vmem:[#allocation99_spill] sm:$0xff] }
 0x712   :  { %7502 = vmatprep.subr.bf16.mxu0 %v16259_v39  ;;  %v4296_v3 = vmul.bf16 %v16264_v38, %v13619_v24  ;;  %v4298_v29 = vmul.bf16 %v16265_v23, %v13684_v0  ;;  %v16266_v40 = vcombine.low %v16257_v31, %v16258_v56  ;;  %v3072_v18 = vrot.slane %v3071_v11, 2  ;;  %v16267_v20 = vld [vmem:[#allocation55_spill] sm:$0xff]  ;;  %v2768_v39 = vld [vmem:[#allocation2 + $0x8] sm:$0x2] }
 0x713   :  { %v4009_v28 = vmax.bf16 %v4007_v44, %v3986_v41  ;;  %v3700_v32 = vmax.f32 %v3698_v9, %v3699_v2  ;;  %v4300_v5 = vmul.bf16 %v16267_v20, %v13735_v10  ;;  %v16269_v47 = vmul.bf16 %v16268_v8, %v13266_v55  ;;  %v16270_v41 = vld [vmem:[#allocation143_spill] sm:$0xff]  ;;  %v16275_v9 = vld [vmem:[#allocation129_spill] sm:$0xff] }
 0x714   :  { %7503 = vmatpush1.bf16.msra.mxu0 %v16266_v40  ;;  %v16272_v26 = vcombine.high %v16270_v41, %v16271_v54  ;;  %v3387_v58 = vrot.slane %v3386_v1, 2  ;;  %v16273_v44 = vld [vmem:[#allocation19_spill] sm:$0xff]  ;;  %v4605_v2 = vmul.bf16 %v16275_v9, %v13384_v7  ;;  %v2769_v40 = vsel %vm13927_vm2, %v2762_v48, %v2768_v39  ;;  %v16277_v9 = vld [vmem:[#allocation130_spill] sm:$0xff] }
 0x715   :  { %v4318_v4 = vmax.bf16 %v4290_v12, %v16269_v47  ;;  %v4010_v21 = vmax.bf16 %v4009_v28, %v4008_v27  ;;  %v16274_v31 = vmul.bf16 %v16273_v44, %v13330_v13  ;;  %v3073_v20 = vmax.f32 %v3071_v11, %v3072_v18  ;;  %2770 = vst [vmem:[#allocation2 + $0x8] sm:$0x2] %v2769_v40 }
 0x716   :  { %7504 = vmatprep.subr.bf16.mxu0 %v16272_v26  ;;  %v3701_v23 = vrot.slane %v3700_v32, 2  ;;  %v3388_v47 = vmax.f32 %v3386_v1, %v3387_v58  ;;  %v16276_v27 = vcombine.low %v16270_v41, %v16271_v54  ;;  %v4607_v44 = vmul.bf16 %v16277_v9, %v13459_v52  ;;  %v16280_v41 = vld [vmem:[#allocation189_spill] sm:$0xff]  ;;  %v16293_v9 = vld [vmem:[#allocation104_spill] sm:$0xff] }
 0x717   :  { %v4319_v56 = vmax.bf16 %v4292_v63, %v16274_v31  ;;  %v4320_v12 = vmax.bf16 %v4318_v4, %v4294_v30  ;;  %v4011_v38 = vunpack.i.l.bf16 %v4010_v21  ;;  %v4012_v26 = vunpack.i.h.bf16 %v4010_v21  ;;  %v16278_v30 = vld [vmem:[#allocation172_spill] sm:$0xff] }
 0x718   :  { %7505 = vmatpush1.bf16.msra.mxu0 %v16276_v27  ;;  %v3074_v28 = vrot.slane %v3073_v20, 1  ;;  %v3702_v63 = vmax.f32 %v3700_v32, %v3701_v23  ;;  %v3389_v35 = vrot.slane %v3388_v47, 1  ;;  %v4609_v1 = vmul.bf16 %v16278_v30, %v13546_v15  ;;  %v16424_v23 = vld [vmem:[#allocation128_spill] sm:$0xff] }
 0x719   :  { %v4321_v62 = vmax.bf16 %v4319_v56, %v4296_v3  ;;  %v4322_v31 = vmax.bf16 %v4320_v12, %v4298_v29  ;;  %v4013_v48 = vmax.f32 %v4011_v38, %v4012_v26  ;;  %v16279_v3 = vld [vmem:[#allocation101_spill] sm:$0xff]  ;;  %v4613_v54 = vmul.bf16 %v16280_v41, %v13684_v0  ;;  %v3083_v29 = vld [vmem:[#allocation2 + $0x8] sm:$0x4]  ;;  %v16284_v56 = vld [vmem:[#allocation127_spill] sm:$0xff] }
 0x71a   :  { %v3075_v18 = vmax.f32 %v3073_v20, %v3074_v28  ;;  %v3703_v4 = vrot.slane %v3702_v63, 1  ;;  %v4611_v39 = vmul.bf16 %v16279_v3, %v13619_v24  ;;  %v3390_v38 = vmax.f32 %v3388_v47, %v3389_v35  ;;  %v16283_v20 = vld [vmem:[#allocation190_spill] sm:$0xff]  ;;  %v16286_v26 = vld [vmem:[#allocation128_spill] sm:$0xff]  ;;  %v16292_v3 = vld [vmem:[#allocation103_spill] sm:$0xff] }
 0x71b   :  { %v4323_v11 = vmax.bf16 %v4321_v62, %v4300_v5  ;;  %v4014_v62 = vrot.slane %v4013_v48, 4  ;;  %v4615_v5 = vmul.bf16 %v16283_v20, %v13735_v10  ;;  %v16285_v40 = vmul.bf16 %v16284_v56, %v13266_v55  ;;  %v3712_v47 = vld [vmem:[#allocation2 + $0x8] sm:$0x8]  ;;  %v16312_v56 = vld [vmem:[#allocation21_spill] sm:$0xff] }
 0x71c   :  { %v3076_v58 = vpack.i.bf16 %v3075_v18, %v3075_v18  ;;  %v3704_v21 = vmax.f32 %v3702_v63, %v3703_v4  ;;  %v16287_v27 = vmul.bf16 %v16286_v26, %v13330_v13  ;;  %v3391_v41 = vpack.i.bf16 %v3390_v38, %v3390_v38  ;;  %v16291_v38 = vld [vmem:[#allocation92_spill] sm:$0xff] }
 0x71d   :  { %v4324_v32 = vmax.bf16 %v4323_v11, %v4322_v31  ;;  %v4633_v12 = vmax.bf16 %v4605_v2, %v16285_v40  ;;  %v16288_v35 = vmov 0  ;;  %v4015_v31 = vmax.f32 %v4013_v48, %v4014_v62 }
 0x71e   :  { %v4634_v28 = vmax.bf16 %v4607_v44, %v16287_v27  ;;  %v16289_v35 = vsel %vm13980_vm6, 4294967295, %v16288_v35  ;;  %v3084_v63 = vsel %vm13966_vm4, %v3076_v58, %v3083_v29  ;;  %v3705_v4 = vpack.i.bf16 %v3704_v21, %v3704_v21  ;;  %v16294_v58 = vld [vmem:[#allocation43_spill] sm:$0xff] }
 0x71f   :  { %16290 = vst [vmem:[#allocation24_spill] sm:$0xff] %v16289_v35  ;;  %v4325_v11 = vunpack.i.l.bf16 %v4324_v32  ;;  %v4326_v18 = vunpack.i.h.bf16 %v4324_v32  ;;  %v4635_v2 = vmax.bf16 %v4633_v12, %v4609_v1  ;;  %3085 = vst [vmem:[#allocation2 + $0x8] sm:$0x4] %v3084_v63  ;;  %v4016_v20 = vrot.slane %v4015_v31, 2  ;;  %v16295_v12 = vld [vmem:[#allocation106_spill] sm:$0xff] }
 0x720   :  { %v4636_v40 = vmax.bf16 %v4634_v28, %v4611_v39  ;;  %v4919_v27 = vmul.bf16 %v16291_v38, %v13384_v7  ;;  %v4921_v30 = vmul.bf16 %v16292_v3, %v13459_v52  ;;  %v3713_v48 = vsel %vm13980_vm6, %v3705_v4, %v3712_v47  ;;  %v16299_v4 = vld [vmem:[#allocation90_spill] sm:$0xff] }
 0x721   :  { %v4327_v44 = vmax.f32 %v4325_v11, %v4326_v18  ;;  %v4637_v62 = vmax.bf16 %v4635_v2, %v4613_v54  ;;  %v4923_v29 = vmul.bf16 %v16293_v9, %v13546_v15  ;;  %3714 = vst [vmem:[#allocation2 + $0x8] sm:$0x8] %v3713_v48  ;;  %v4017_v1 = vmax.f32 %v4015_v31, %v4016_v20  ;;  %v16296_v18 = vld [vmem:[#allocation107_spill] sm:$0xff]  ;;  %v16297_v54 = vld [vmem:[#allocation102_spill] sm:$0xff] }
 0x722   :  { %v4638_v32 = vmax.bf16 %v4636_v40, %v4615_v5  ;;  %vm4335_vm7 = vcmask 1044484   ;;  %v4925_v21 = vmul.bf16 %v16294_v58, %v13619_v24  ;;  %v4927_v28 = vmul.bf16 %v16295_v12, %v13684_v0  ;;  %v16301_v48 = vld [vmem:[#allocation174_spill] sm:$0xff]  ;;  %v16302_v58 = vld [vmem:[#allocation175_spill] sm:$0xff] }
 0x723   :  { %v4328_v39 = vrot.slane %v4327_v44, 4  ;;  %v4929_v47 = vmul.bf16 %v16296_v18, %v13735_v10  ;;  %v16298_v5 = vmul.bf16 %v16297_v54, %v13266_v55  ;;  %v16300_v20 = vmul.bf16 %v16299_v4, %v13330_v13  ;;  %vm14050_vm15 = vmand %vm4335_vm7, %vm4336_vm8 }
 0x724   :  { %v4639_v11 = vmax.bf16 %v4638_v32, %v4637_v62  ;;  %v4018_v2 = vrot.slane %v4017_v1, 1  ;;  %v5234_v35 = vmul.bf16 %v16301_v48, %v13384_v7  ;;  %v5236_v12 = vmul.bf16 %v16302_v58, %v13459_v52  ;;  %vm14100_vm3 = vmand %vm4335_vm7, %vm4650_vm14  ;;  %v16435_v62 = vld [vmem:[#allocation43_spill] sm:$0xff] }
 0x725   :  { %v4947_v63 = vmax.bf16 %v4919_v27, %v16298_v5  ;;  %v4948_v31 = vmax.bf16 %v4921_v30, %v16300_v20  ;;  %v4329_v40 = vmax.f32 %v4327_v44, %v4328_v39  ;;  %v16305_v44 = vld [vmem:[#allocation176_spill] sm:$0xff]  ;;  %v16306_v20 = vld [vmem:[#allocation177_spill] sm:$0xff]  ;;  %v16307_v58 = vmov 0 }
 0x726   :  { %v4640_v32 = vunpack.i.l.bf16 %v4639_v11  ;;  %v4641_v27 = vunpack.i.h.bf16 %v4639_v11  ;;  %v4019_v9 = vmax.f32 %v4017_v1, %v4018_v2  ;;  %v5238_v39 = vmul.bf16 %v16305_v44, %v13546_v15  ;;  %v3397_v4 = vld [vmem:[#allocation2 + $0x8] sm:$0x4]  ;;  %v16311_v2 = vld [vmem:[#allocation192_spill] sm:$0xff] }
 0x727   :  { %v4949_v5 = vmax.bf16 %v4947_v63, %v4923_v29  ;;  %v4950_v18 = vmax.bf16 %v4948_v31, %v4925_v21  ;;  %v4330_v30 = vrot.slane %v4329_v40, 2  ;;  %v5240_v48 = vmul.bf16 %v16306_v20, %v13619_v24  ;;  %v16310_v29 = vld [vmem:[#allocation191_spill] sm:$0xff] }
 0x728   :  { %v16308_v58 = vsel %vm14022_vm12, 4294967295, %v16307_v58  ;;  %v4642_v3 = vmax.f32 %v4640_v32, %v4641_v27  ;;  %v5242_v1 = vmul.bf16 %v16310_v29, %v13684_v0  ;;  %v3398_v21 = vsel %vm14012_vm10, %v3391_v41, %v3397_v4  ;;  %v4026_v44 = vld [vmem:[#allocation2 + $0x8] sm:$0x8]  ;;  %v16316_v4 = vld [vmem:[#allocation109_spill] sm:$0xff]  ;;  %v16326_v29 = vld [vmem:[#allocation3_spill] sm:$0xff] }
 0x729   :  { %16309 = vst [vmem:[#allocation25_spill] sm:$0xff] %v16308_v58  ;;  %v4951_v38 = vmax.bf16 %v4949_v5, %v4927_v28  ;;  %v4952_v11 = vmax.bf16 %v4950_v18, %v4929_v47  ;;  %v4020_v63 = vpack.i.bf16 %v4019_v9, %v4019_v9  ;;  %v4331_v31 = vmax.f32 %v4329_v40, %v4330_v30  ;;  %v16314_v18 = vld [vmem:[#allocation6_spill] sm:$0xff] }
 0x72a   :  { %v5244_v20 = vmul.bf16 %v16311_v2, %v13735_v10  ;;  %3399 = vst [vmem:[#allocation2 + $0x8] sm:$0x4] %v3398_v21  ;;  %v4643_v54 = vrot.slane %v4642_v3, 4  ;;  %v16313_v32 = vmul.bf16 %v16312_v56, %v13266_v55  ;;  %v16315_v47 = vmul.bf16 %v16314_v18, %v13330_v13  ;;  %v16317_v5 = vld [vmem:[#allocation110_spill] sm:$0xff] }
 0x72b   :  { %v4953_v26 = vmax.bf16 %v4952_v11, %v4951_v38  ;;  %v4027_v41 = vsel %vm14022_vm12, %v4020_v63, %v4026_v44  ;;  %v4332_v9 = vrot.slane %v4331_v31, 1  ;;  %v5548_v40 = vmul.bf16 %v16316_v4, %v13384_v7 }
 0x72c   :  { %v5262_v28 = vmax.bf16 %v5234_v35, %v16313_v32  ;;  %v5263_v27 = vmax.bf16 %v5236_v12, %v16315_v47  ;;  %v5550_v30 = vmul.bf16 %v16317_v5, %v13459_v52  ;;  %4028 = vst [vmem:[#allocation2 + $0x8] sm:$0x8] %v4027_v41  ;;  %v4644_v38 = vmax.f32 %v4642_v3, %v4643_v54  ;;  %v16318_v12 = vld [vmem:[#allocation111_spill] sm:$0xff]  ;;  %v4341_v41 = vld [vmem:[#allocation2 + $0x8] sm:$0x10] }
 0x72d   :  { %v4954_v11 = vunpack.i.l.bf16 %v4953_v26  ;;  %v4955_v21 = vunpack.i.h.bf16 %v4953_v26  ;;  %v4333_v32 = vmax.f32 %v4331_v31, %v4332_v9  ;;  %v5552_v47 = vmul.bf16 %v16318_v12, %v13546_v15  ;;  %v16322_v26 = vld [vmem:[#allocation112_spill] sm:$0xff] }
 0x72e   :  { %v5264_v35 = vmax.bf16 %v5262_v28, %v5238_v39  ;;  %v5265_v2 = vmax.bf16 %v5263_v27, %v5240_v48  ;;  %v16319_v63 = vmov 0  ;;  %v4645_v3 = vrot.slane %v4644_v38, 2  ;;  %v16323_v28 = vld [vmem:[#allocation113_spill] sm:$0xff]  ;;  %v16324_v9 = vld [vmem:[#allocation108_spill] sm:$0xff] }
 0x72f   :  { %v16320_v63 = vsel %vm14050_vm15, 4294967295, %v16319_v63  ;;  %v4956_v54 = vmax.f32 %v4954_v11, %v4955_v21  ;;  %v5554_v39 = vmul.bf16 %v16322_v26, %v13619_v24  ;;  %v4334_v48 = vpack.i.bf16 %v4333_v32, %v4333_v32 }
 0x730   :  { %16321 = vst [vmem:[#allocation42_spill] sm:$0xff] %v16320_v63  ;;  %v5266_v5 = vmax.bf16 %v5264_v35, %v5242_v1  ;;  %v5267_v31 = vmax.bf16 %v5265_v2, %v5244_v20  ;;  %v5556_v27 = vmul.bf16 %v16323_v28, %v13684_v0  ;;  %v16325_v44 = vmul.bf16 %v16324_v9, %v13266_v55  ;;  %v16327_v1 = vld [vmem:[#allocation27_spill] sm:$0xff]  ;;  %v16329_v28 = vld [vmem:[#allocation180_spill] sm:$0xff] }
 0x731   :  { %v4646_v58 = vmax.f32 %v4644_v38, %v4645_v3  ;;  %v4957_v4 = vrot.slane %v4956_v54, 4  ;;  %vm4964_vm0 = vcmask 1045509   ;;  %v5558_v11 = vmul.bf16 %v16326_v29, %v13735_v10  ;;  %v16330_v3 = vld [vmem:[#allocation181_spill] sm:$0xff] }
 0x732   :  { %v5576_v12 = vmax.bf16 %v5548_v40, %v16325_v44  ;;  %v16328_v21 = vmul.bf16 %v16327_v1, %v13330_v13  ;;  %v4342_v20 = vsel %vm14050_vm15, %v4334_v48, %v4341_v41  ;;  %v5268_v2 = vmax.bf16 %v5267_v31, %v5266_v5  ;;  %v16338_v31 = vld [vmem:[#allocation142_spill] sm:$0xff]  ;;  %vm14114_vm7 = vmand %vm4964_vm0, %vm4965_vm1 }
 0x733   :  { %v5863_v26 = vmul.bf16 %v16329_v28, %v13384_v7  ;;  %4343 = vst [vmem:[#allocation2 + $0x8] sm:$0x10] %v4342_v20  ;;  %v4647_v40 = vrot.slane %v4646_v58, 1  ;;  %v4958_v38 = vmax.f32 %v4956_v54, %v4957_v4  ;;  %v5865_v9 = vmul.bf16 %v16330_v3, %v13459_v52  ;;  %v14079_v7 = vld [vmem:[%s15272_s14 + $0x10] sm:$0xff]  ;;  %v16335_v54 = vld [vmem:[#allocation193_spill] sm:$0xff] }
 0x734   :  { %v5577_v35 = vmax.bf16 %v5550_v30, %v16328_v21  ;;  %v5578_v32 = vmax.bf16 %v5576_v12, %v5552_v47  ;;  %v5269_v29 = vunpack.i.l.bf16 %v5268_v2  ;;  %v5270_v18 = vunpack.i.h.bf16 %v5268_v2  ;;  %v16331_v30 = vld [vmem:[#allocation183_spill] sm:$0xff]  ;;  %v16332_v12 = vld [vmem:[#allocation105_spill] sm:$0xff]  ;;  %16333 = vst [vmem:[#allocation56_spill] sm:$0xff] %v14079_v7 }
 0x735   :  { %v5867_v21 = vmul.bf16 %v16331_v30, %v13546_v15  ;;  %v4648_v63 = vmax.f32 %v4646_v58, %v4647_v40  ;;  %v4959_v41 = vrot.slane %v4958_v38, 2  ;;  %v5869_v47 = vmul.bf16 %v16332_v12, %v13619_v24  ;;  %v14084_v52 = vld [vmem:[%s15272_s14 + $0x30] sm:$0xff]  ;;  %v16336_v58 = vld [vmem:[#allocation178_spill] sm:$0xff] }
 0x736   :  { %v5579_v44 = vmax.bf16 %v5577_v35, %v5554_v39  ;;  %v5580_v56 = vmax.bf16 %v5578_v32, %v5556_v27  ;;  %16334 = vst [vmem:[#allocation57_spill] sm:$0xff] %v14084_v52  ;;  %v5271_v4 = vmax.f32 %v5269_v29, %v5270_v18  ;;  %v5871_v15 = vmul.bf16 %v16335_v54, %v13684_v0  ;;  %v16339_v35 = vld [vmem:[#allocation194_spill] sm:$0xff]  ;;  %v16340_v2 = vld [vmem:[#allocation179_spill] sm:$0xff] }
 0x737   :  { %v16337_v39 = vmul.bf16 %v16336_v58, %v13266_v55  ;;  %v4960_v27 = vmax.f32 %v4958_v38, %v4959_v41  ;;  %v5873_v20 = vmul.bf16 %v16339_v35, %v13735_v10  ;;  %v16341_v32 = vmul.bf16 %v16340_v2, %v13330_v13 }
 0x738   :  { %v5581_v5 = vmax.bf16 %v5579_v44, %v5558_v11  ;;  %v4649_v29 = vpack.i.bf16 %v4648_v63, %v4648_v63  ;;  %v16342_v0 = vmov 0  ;;  %v5272_v55 = vrot.slane %v5271_v4, 4 }
 0x739   :  { %v5891_v48 = vmax.bf16 %v5863_v26, %v16337_v39  ;;  %v5892_v40 = vmax.bf16 %v5865_v9, %v16341_v32  ;;  %v16343_v0 = vsel %vm14100_vm3, 4294967295, %v16342_v0  ;;  %vm5279_vm5 = vsmask.f32 7958  ;;  %v16345_v9 = vld [vmem:[#allocation145_spill] sm:$0xff]  ;;  %v16346_v39 = vld [vmem:[#allocation8_spill] sm:$0xff] }
 0x73a   :  { %v5582_v11 = vmax.bf16 %v5581_v5, %v5580_v56  ;;  %16344 = vst [vmem:[#allocation147_spill] sm:$0xff] %v16343_v0  ;;  %v4961_v56 = vrot.slane %v4960_v27, 1  ;;  %v4655_v41 = vld [vmem:[#allocation2 + $0x8] sm:$0x10]  ;;  %v5273_v5 = vmax.f32 %v5271_v4, %v5272_v55  ;;  %v9430_v63 = vcombine.high %v14079_v7, %v14084_v52  ;;  %v4970_v4 = vld [vmem:[#allocation2 + $0x8] sm:$0x20]  ;;  %vm14156_vm1 = vmand %vm4964_vm0, %vm5279_vm5 }
 0x73b   :  { %v5893_v18 = vmax.bf16 %v5891_v48, %v5867_v21  ;;  %v5894_v10 = vmax.bf16 %v5892_v40, %v5869_v47  ;;  %v1773_v32 = vmul.bf16 %v16346_v39, %v16345_v9  ;;  %v4656_v21 = vsel %vm14100_vm3, %v4649_v29, %v4655_v41  ;;  %v16350_v29 = vld [vmem:[#allocation146_spill] sm:$0xff]  ;;  %v16354_v39 = vld [vmem:[#allocation23_spill] sm:$0xff] }
 0x73c   :  { %v5583_v38 = vunpack.i.l.bf16 %v5582_v11  ;;  %v5584_v44 = vunpack.i.h.bf16 %v5582_v11  ;;  %v4962_v48 = vmax.f32 %v4960_v27, %v4961_v56  ;;  %4657 = vst [vmem:[#allocation2 + $0x8] sm:$0x10] %v4656_v21  ;;  %v16347_v47 = vmov 0  ;;  %7529 = vmatprep.subr.bf16.mxu1 %v9430_v63  ;;  %v16351_v27 = vld [vmem:[#allocation11_spill] sm:$0xff]  ;;  %v16355_v21 = vld [vmem:[#allocation14_spill] sm:$0xff] }
 0x73d   :  { %v5895_v13 = vmax.bf16 %v5893_v18, %v5871_v15  ;;  %v5896_v26 = vmax.bf16 %v5894_v10, %v5873_v20  ;;  %v16348_v47 = vsel %vm14114_vm7, 4294967295, %v16347_v47  ;;  %v5274_v15 = vrot.slane %v5273_v5, 2  ;;  %v16356_v52 = vld [vmem:[#allocation195_spill] sm:$0xff] }
 0x73e   :  { %v5585_v24 = vmax.f32 %v5583_v38, %v5584_v44  ;;  %16349 = vst [vmem:[#allocation26_spill] sm:$0xff] %v16348_v47  ;;  %v1775_v11 = vmul.bf16 %v12557_v25, %v13445_v61  ;;  %v1777_v40 = vmul.bf16 %v16173_v60, %v13532_v6  ;;  %v1779_v55 = vmul.bf16 %v16351_v27, %v16350_v29  ;;  %v16352_v38 = vld [vmem:[#allocation22_spill] sm:$0xff]  ;;  %v16353_v44 = vld [vmem:[#allocation13_spill] sm:$0xff]  ;;  %v16358_v0 = vld [vmem:[#allocation7_spill] sm:$0xff] }
 0x73f   :  { %v4963_v20 = vpack.i.bf16 %v4962_v48, %v4962_v48  ;;  %v5897_v56 = vmax.bf16 %v5896_v26, %v5895_v13  ;;  %v1781_v10 = vmul.bf16 %v16353_v44, %v16352_v38  ;;  %v5275_v41 = vmax.f32 %v5273_v5, %v5274_v15 }
 0x740   :  { %v5586_v18 = vrot.slane %v5585_v24, 4  ;;  %v1783_v63 = vmul.bf16 %v16355_v21, %v16354_v39  ;;  %v16357_v25 = vmul.bf16 %v16356_v52, %v16338_v31  ;;  %v16359_v60 = vmul.bf16 %v16358_v0, %v13322_v37  ;;  %v16360_v21 = vld [vmem:[#allocation16_spill] sm:$0xff]  ;;  %v16362_v0 = vld [vmem:[#allocation18_spill] sm:$0xff] }
 0x741   :  { %v4971_v48 = vsel %vm14114_vm7, %v4963_v20, %v4970_v4  ;;  %v5898_v26 = vunpack.i.l.bf16 %v5897_v56  ;;  %v5899_v13 = vunpack.i.h.bf16 %v5897_v56  ;;  %v5276_v44 = vrot.slane %v5275_v41, 1  ;;  %v16363_v20 = vld [vmem:[#allocation20_spill] sm:$0xff] }
 0x742   :  { %v1785_v7 = vmax.bf16 %v1773_v32, %v16357_v25  ;;  %v1786_v35 = vmax.bf16 %v1775_v11, %v16359_v60  ;;  %v5587_v27 = vmax.f32 %v5585_v24, %v5586_v18  ;;  %4972 = vst [vmem:[#allocation2 + $0x8] sm:$0x20] %v4971_v48  ;;  %v2088_v54 = vmul.bf16 %v16360_v21, %v16345_v9  ;;  %v16361_v32 = vld [vmem:[#allocation17_spill] sm:$0xff]  ;;  %v16365_v48 = vld [vmem:[#allocation60_spill] sm:$0xff] }
 0x743   :  { %v5900_v52 = vmax.f32 %v5898_v26, %v5899_v13  ;;  %v2090_v25 = vmul.bf16 %v16361_v32, %v13445_v61  ;;  %v2092_v11 = vmul.bf16 %v16362_v0, %v13532_v6  ;;  %v5277_v60 = vmax.f32 %v5275_v41, %v5276_v44  ;;  %v16366_v13 = vld [vmem:[#allocation15_spill] sm:$0xff] }
 0x744   :  { %v1787_v5 = vmax.bf16 %v1785_v7, %v1777_v40  ;;  %v1788_v15 = vmax.bf16 %v1786_v35, %v1779_v55  ;;  %v5588_v12 = vrot.slane %v5587_v27, 2  ;;  %v2094_v18 = vmul.bf16 %v16363_v20, %v16350_v29  ;;  %v16364_v35 = vld [vmem:[#allocation34_spill] sm:$0xff] }
 0x745   :  { %vm5594_vm14 = vsmask.f32 6400  ;;  %v5901_v7 = vrot.slane %v5900_v52, 4  ;;  %v2096_v40 = vmul.bf16 %v16364_v35, %v16352_v38  ;;  %v2098_v26 = vmul.bf16 %v16365_v48, %v16354_v39  ;;  %v16374_v48 = vld [vmem:[#allocation38_spill] sm:$0xff] }
 0x746   :  { %v1789_v4 = vmax.bf16 %v1787_v5, %v1781_v10  ;;  %v1790_v24 = vmax.bf16 %v1788_v15, %v1783_v63  ;;  %v5589_v56 = vmax.f32 %v5587_v27, %v5588_v12  ;;  %v16367_v21 = vmul.bf16 %v16366_v13, %v16338_v31  ;;  %v16372_v5 = vld [vmem:[#allocation36_spill] sm:$0xff] }
 0x747   :  { %v16368_v10 = vmul.bf16 %v12597_v19, %v13322_v37  ;;  %v5278_v63 = vpack.i.bf16 %v5277_v60, %v5277_v60  ;;  %v16369_v12 = vmov 0  ;;  %v5902_v44 = vmax.f32 %v5900_v52, %v5901_v7  ;;  %v16373_v60 = vld [vmem:[#allocation37_spill] sm:$0xff] }
 0x748   :  { %v1791_v55 = vmax.bf16 %v1790_v24, %v1789_v4  ;;  %v2100_v32 = vmax.bf16 %v2088_v54, %v16367_v21  ;;  %v16370_v12 = vsel %vm14156_vm1, 4294967295, %v16369_v12  ;;  %v5590_v27 = vrot.slane %v5589_v56, 1 }
 0x749   :  { %v2101_v41 = vmax.bf16 %v2090_v25, %v16368_v10  ;;  %16371 = vst [vmem:[#allocation28_spill] sm:$0xff] %v16370_v12  ;;  %v2400_v15 = vmul.bf16 %v16372_v5, %v13322_v37  ;;  %vm5908_vm8 = vsmask.f32 7962  ;;  %v5284_v20 = vld [vmem:[#allocation2 + $0x8] sm:$0x20]  ;;  %v5903_v25 = vrot.slane %v5902_v44, 2 }
 0x74a   :  { %v1792_v0 = vunpack.i.l.bf16 %v1791_v55  ;;  %v1793_v4 = vunpack.i.h.bf16 %v1791_v55  ;;  %v2102_v54 = vmax.bf16 %v2100_v32, %v2092_v11  ;;  %v5591_v19 = vmax.f32 %v5589_v56, %v5590_v27  ;;  %v5599_v11 = vld [vmem:[#allocation2 + $0x8] sm:$0x40]  ;;  %v16379_v10 = vld [vmem:[#allocation48_spill] sm:$0xff]  ;;  %v16380_v27 = vld [vmem:[#allocation35_spill] sm:$0xff] }
 0x74b   :  { %v2103_v24 = vmax.bf16 %v2101_v41, %v2094_v18  ;;  %v2402_v35 = vmul.bf16 %v16373_v60, %v16345_v9  ;;  %v2404_v13 = vmul.bf16 %v16374_v48, %v13445_v61  ;;  %v5285_v52 = vsel %vm14156_vm1, %v5278_v63, %v5284_v20  ;;  %v16381_v60 = vld [vmem:[#allocation59_spill] sm:$0xff]  ;;  %v16382_v12 = vld [vmem:[#allocation49_spill] sm:$0xff] }
 0x74c   :  { %vm16375_vm0 = vcmask 1046534   ;;  %v16376_v7 = vmov 0  ;;  %v1794_v18 = vmax.f32 %v1792_v0, %v1793_v4  ;;  %v2104_v55 = vmax.bf16 %v2102_v54, %v2096_v40  ;;  %5286 = vst [vmem:[#allocation2 + $0x8] sm:$0x20] %v5285_v52 }
 0x74d   :  { %vm14170_vm5 = vmand %vm16375_vm0, %vm5594_vm14  ;;  %v2105_v56 = vmax.bf16 %v2103_v24, %v2098_v26  ;;  %v5592_v21 = vpack.i.bf16 %v5591_v19, %v5591_v19  ;;  %v5904_v32 = vmax.f32 %v5902_v44, %v5903_v25  ;;  %v2406_v41 = vmul.bf16 %v16379_v10, %v13532_v6  ;;  %v16384_v25 = vld [vmem:[#allocation117_spill] sm:$0xff] }
 0x74e   :  { %v16377_v7 = vsel %vm14170_vm5, 4294967295, %v16376_v7  ;;  %v2408_v5 = vmul.bf16 %v16380_v27, %v16350_v29  ;;  %v1795_v63 = vrot.slane %v1794_v18, 4  ;;  %v2410_v48 = vmul.bf16 %v16381_v60, %v16352_v38  ;;  %v16386_v60 = vld [vmem:[#allocation4_spill] sm:$0xff]  ;;  %vm16391_vm14 = vmmov %vm16375_vm0 }
 0x74f   :  { %16378 = vst [vmem:[#allocation29_spill] sm:$0xff] %v16377_v7  ;;  %v2106_v20 = vmax.bf16 %v2105_v56, %v2104_v55  ;;  %v2412_v47 = vmul.bf16 %v16382_v12, %v16354_v39  ;;  %v5600_v40 = vsel %vm14170_vm5, %v5592_v21, %v5599_v11  ;;  %v5905_v26 = vrot.slane %v5904_v32, 1  ;;  %v16385_v12 = vld [vmem:[#allocation118_spill] sm:$0xff]  ;;  %vm14203_vm0 = vmand %vm16391_vm14, %vm5908_vm8 }
 0x750   :  { %v16383_v44 = vmul.bf16 %v12659_v49, %v16338_v31  ;;  %v2415_v4 = vmax.bf16 %v2404_v13, %v2400_v15  ;;  %5601 = vst [vmem:[#allocation2 + $0x8] sm:$0x40] %v5600_v40  ;;  %v1796_v54 = vmax.f32 %v1794_v18, %v1795_v63  ;;  %v2713_v52 = vmul.bf16 %v16384_v25, %v16338_v31  ;;  %v16387_v15 = vld [vmem:[#allocation119_spill] sm:$0xff]  ;;  %v16388_v63 = vld [vmem:[#allocation156_spill] sm:$0xff] }
 0x751   :  { %v2107_v24 = vunpack.i.l.bf16 %v2106_v20  ;;  %v2108_v19 = vunpack.i.h.bf16 %v2106_v20  ;;  %v5906_v55 = vmax.f32 %v5904_v32, %v5905_v26  ;;  %v2717_v27 = vmul.bf16 %v16385_v12, %v16345_v9  ;;  %v16389_v32 = vld [vmem:[#allocation157_spill] sm:$0xff] }
 0x752   :  { %v2414_v0 = vmax.bf16 %v2402_v35, %v16383_v44  ;;  %v2417_v10 = vmax.bf16 %v2415_v4, %v2408_v5  ;;  %v1797_v11 = vrot.slane %v1796_v54, 2  ;;  %v2715_v49 = vmul.bf16 %v16386_v60, %v13322_v37  ;;  %v16390_v44 = vld [vmem:[#allocation182_spill] sm:$0xff]  ;;  %v16396_v12 = vld [vmem:[#allocation65_spill] sm:$0xff] }
 0x753   :  { %v2109_v21 = vmax.f32 %v2107_v24, %v2108_v19  ;;  %v2719_v35 = vmul.bf16 %v16387_v15, %v13445_v61  ;;  %v2721_v20 = vmul.bf16 %v16388_v63, %v13532_v6  ;;  %v5907_v5 = vpack.i.bf16 %v5906_v55, %v5906_v55 }
 0x754   :  { %v2416_v56 = vmax.bf16 %v2414_v0, %v2406_v41  ;;  %v2419_v18 = vmax.bf16 %v2417_v10, %v2412_v47  ;;  %v2723_v41 = vmul.bf16 %v16389_v32, %v16350_v29  ;;  %v1798_v40 = vmax.f32 %v1796_v54, %v1797_v11  ;;  %v16394_v47 = vld [vmem:[#allocation184_spill] sm:$0xff] }
 0x755   :  { %v2110_v26 = vrot.slane %v2109_v21, 4  ;;  %v2725_v0 = vmul.bf16 %v16390_v44, %v16352_v38  ;;  %v2727_v24 = vmul.bf16 %v16394_v47, %v16354_v39  ;;  %v2729_v19 = vmax.bf16 %v2717_v27, %v2713_v52  ;;  %v16395_v54 = vld [vmem:[#allocation64_spill] sm:$0xff]  ;;  %v16397_v52 = vld [vmem:[#allocation50_spill] sm:$0xff] }
 0x756   :  { %v2418_v13 = vmax.bf16 %v2416_v56, %v2410_v48  ;;  %v2730_v25 = vmax.bf16 %v2719_v35, %v2715_v49  ;;  %v1799_v56 = vrot.slane %v1798_v40, 1  ;;  %v3027_v55 = vmul.bf16 %v16395_v54, %v16338_v31  ;;  %v16398_v54 = vld [vmem:[#allocation12_spill] sm:$0xff] }
 0x757   :  { %v2111_v10 = vmax.f32 %v2109_v21, %v2110_v26  ;;  %v3031_v11 = vmul.bf16 %v16396_v12, %v16345_v9  ;;  %v5913_v60 = vld [vmem:[#allocation2 + $0x8] sm:$0x40]  ;;  %v2731_v32 = vmax.bf16 %v2729_v19, %v2721_v20  ;;  %v3033_v27 = vmul.bf16 %v16397_v52, %v13445_v61  ;;  %v1822_v21 = vld [vmem:[#allocation2] sm:$0x1]  ;;  %v16399_v20 = vld [vmem:[#allocation52_spill] sm:$0xff] }
 0x758   :  { %v2420_v48 = vmax.bf16 %v2419_v18, %v2418_v13  ;;  %v2732_v44 = vmax.bf16 %v2730_v25, %v2723_v41  ;;  %v5914_v13 = vsel %vm14203_vm0, %v5907_v5, %v5913_v60  ;;  %v1800_v18 = vmax.f32 %v1798_v40, %v1799_v56  ;;  %v16400_v5 = vld [vmem:[#allocation53_spill] sm:$0xff] }
 0x759   :  { %v2112_v47 = vrot.slane %v2111_v10, 2  ;;  %5915 = vst [vmem:[#allocation2 + $0x8] sm:$0x40] %v5914_v13  ;;  %v2733_v35 = vmax.bf16 %v2731_v32, %v2725_v0  ;;  %v3029_v12 = vmul.bf16 %v16398_v54, %v13322_v37  ;;  %v3035_v41 = vmul.bf16 %v16399_v20, %v13532_v6  ;;  %v16401_v56 = vld [vmem:[#allocation73_spill] sm:$0xff]  ;;  %v16403_v54 = vld [vmem:[#allocation122_spill] sm:$0xff] }
 0x75a   :  { %v2421_v15 = vunpack.i.l.bf16 %v2420_v48  ;;  %v2422_v63 = vunpack.i.h.bf16 %v2420_v48  ;;  %v2734_v26 = vmax.bf16 %v2732_v44, %v2727_v24  ;;  %v1801_v7 = vpack.i.bf16 %v1800_v18, %v1800_v18  ;;  %v16402_v18 = vld [vmem:[#allocation120_spill] sm:$0xff] }
 0x75b   :  { %v2113_v48 = vmax.f32 %v2111_v10, %v2112_v47  ;;  %v3037_v40 = vmul.bf16 %v16400_v5, %v16350_v29  ;;  %v3039_v60 = vmul.bf16 %v16401_v56, %v16352_v38  ;;  %v3041_v0 = vmul.bf16 %v16228_v34, %v16354_v39 }
 0x75c   :  { %v2423_v49 = vmax.f32 %v2421_v15, %v2422_v63  ;;  %v2735_v25 = vmax.bf16 %v2734_v26, %v2733_v35  ;;  %v1823_v24 = vsel %vm13827_vm9, %v1801_v7, %v1822_v21  ;;  %v3043_v63 = vmax.bf16 %v3031_v11, %v3027_v55  ;;  %v16405_v55 = vld [vmem:[#allocation123_spill] sm:$0xff] }
 0x75d   :  { %v2114_v15 = vrot.slane %v2113_v48, 1  ;;  %v3044_v10 = vmax.bf16 %v3033_v27, %v3029_v12  ;;  %1824 = vst [vmem:[#allocation2] sm:$0x1] %v1823_v24  ;;  %v3342_v47 = vmul.bf16 %v16402_v18, %v16338_v31  ;;  %v3346_v20 = vmul.bf16 %v16403_v54, %v16345_v9  ;;  %v16406_v12 = vld [vmem:[#allocation162_spill] sm:$0xff]  ;;  %v16408_v24 = vld [vmem:[#allocation185_spill] sm:$0xff] }
 0x75e   :  { %v2424_v19 = vrot.slane %v2423_v49, 4  ;;  %v2736_v44 = vunpack.i.l.bf16 %v2735_v25  ;;  %v2737_v13 = vunpack.i.h.bf16 %v2735_v25  ;;  %v3045_v35 = vmax.bf16 %v3043_v63, %v3035_v41  ;;  %v16407_v41 = vld [vmem:[#allocation97_spill] sm:$0xff]  ;;  %v16409_v18 = vld [vmem:[#allocation74_spill] sm:$0xff] }
 0x75f   :  { %v2115_v52 = vmax.f32 %v2113_v48, %v2114_v15  ;;  %v3046_v26 = vmax.bf16 %v3044_v10, %v3037_v40  ;;  %v3344_v7 = vmul.bf16 %v16404_v57, %v13322_v37  ;;  %v3348_v11 = vmul.bf16 %v16405_v55, %v13445_v61 }
 0x760   :  { %v2425_v32 = vmax.f32 %v2423_v49, %v2424_v19  ;;  %v2738_v5 = vmax.f32 %v2736_v44, %v2737_v13  ;;  %v14237_v27 = vld [vmem:[#allocation2 + $0x8] sm:$0xff]  ;;  %v3047_v21 = vmax.bf16 %v3045_v35, %v3039_v60  ;;  %v3350_v48 = vmul.bf16 %v16406_v12, %v13532_v6 }
 0x761   :  { %v3048_v49 = vmax.bf16 %v3046_v26, %v3041_v0  ;;  %v3352_v40 = vmul.bf16 %v16407_v41, %v16350_v29  ;;  %7475 = vmatprep.mubr.bf16.mxu1 %v14237_v27  ;;  %7518 = vmatprep.mubr.bf16.mxu0 %v14237_v27  ;;  %v2116_v19 = vpack.i.bf16 %v2115_v52, %v2115_v52  ;;  %v16410_v26 = vld [vmem:[#allocation83_spill] sm:$0xff]  ;;  %v16412_v41 = vld [vmem:[#allocation82_spill] sm:$0xff] }
 0x762   :  { %v2426_v34 = vrot.slane %v2425_v32, 2  ;;  %v2739_v56 = vrot.slane %v2738_v5, 4  ;;  %v3354_v15 = vmul.bf16 %v16408_v24, %v16352_v38  ;;  %v3356_v60 = vmul.bf16 %v16229_v42, %v16354_v39 }
 0x763   :  { %v3049_v63 = vmax.bf16 %v3048_v49, %v3047_v21  ;;  %v3358_v0 = vmax.bf16 %v3346_v20, %v3342_v47  ;;  %v3359_v10 = vmax.bf16 %v3348_v11, %v3344_v7  ;;  %v3656_v35 = vmul.bf16 %v16409_v18, %v16338_v31  ;;  %v16411_v47 = vld [vmem:[#allocation87_spill] sm:$0xff] }
 0x764   :  { %v2427_v25 = vmax.f32 %v2425_v32, %v2426_v34  ;;  %v2740_v13 = vmax.f32 %v2738_v5, %v2739_v56  ;;  %v3660_v54 = vmul.bf16 %v16410_v26, %v16345_v9  ;;  %v2136_v52 = vld [vmem:[#allocation2] sm:$0x1]  ;;  %v3662_v20 = vmul.bf16 %v16411_v47, %v13445_v61  ;;  %v2451_v5 = vld [vmem:[#allocation2] sm:$0x2] }
 0x765   :  { %v3050_v32 = vunpack.i.l.bf16 %v3049_v63  ;;  %v3051_v34 = vunpack.i.h.bf16 %v3049_v63  ;;  %v3360_v57 = vmax.bf16 %v3358_v0, %v3350_v48  ;;  %v3361_v55 = vmax.bf16 %v3359_v10, %v3352_v40  ;;  %v16413_v48 = vld [vmem:[#allocation88_spill] sm:$0xff]  ;;  %v16415_v10 = vld [vmem:[#allocation91_spill] sm:$0xff] }
 0x766   :  { %v2428_v44 = vrot.slane %v2427_v25, 1  ;;  %v2137_v21 = vsel %vm13897_vm13, %v2116_v19, %v2136_v52  ;;  %v2741_v42 = vrot.slane %v2740_v13, 2  ;;  %v3658_v56 = vmul.bf16 %v16412_v41, %v13322_v37 }
 0x767   :  { %2138 = vst [vmem:[#allocation2] sm:$0x1] %v2137_v21  ;;  %v3052_v7 = vmax.f32 %v3050_v32, %v3051_v34  ;;  %v3362_v11 = vmax.bf16 %v3360_v57, %v3354_v15  ;;  %v3363_v12 = vmax.bf16 %v3361_v55, %v3356_v60  ;;  %v3664_v40 = vmul.bf16 %v16413_v48, %v13532_v6 }
 0x768   :  { %v2429_v49 = vmax.f32 %v2427_v25, %v2428_v44  ;;  %v2742_v63 = vmax.f32 %v2740_v13, %v2741_v42  ;;  %v3666_v19 = vmul.bf16 %v16414_v14, %v16350_v29  ;;  %v3668_v44 = vmul.bf16 %v16415_v10, %v16352_v38  ;;  %v16416_v10 = vld [vmem:[#allocation96_spill] sm:$0xff] }
 0x769   :  { %v3053_v25 = vrot.slane %v3052_v7, 4  ;;  %v3364_v0 = vmax.bf16 %v3363_v12, %v3362_v11  ;;  %v3670_v15 = vmul.bf16 %v16231_v53, %v16354_v39  ;;  %v3672_v26 = vmax.bf16 %v3660_v54, %v3656_v35 }
 0x76a   :  { %v2430_v24 = vpack.i.bf16 %v2429_v49, %v2429_v49  ;;  %v2743_v18 = vrot.slane %v2742_v63, 1  ;;  %v3673_v13 = vmax.bf16 %v3662_v20, %v3658_v56  ;;  %v3971_v57 = vmul.bf16 %v16248_v43, %v16338_v31 }
 0x76b   :  { %v3054_v52 = vmax.f32 %v3052_v7, %v3053_v25  ;;  %v3365_v32 = vunpack.i.l.bf16 %v3364_v0  ;;  %v3366_v34 = vunpack.i.h.bf16 %v3364_v0  ;;  %v3674_v21 = vmax.bf16 %v3672_v26, %v3664_v40 }
 0x76c   :  { %v2452_v60 = vsel %vm13861_vm11, %v2430_v24, %v2451_v5  ;;  %v2744_v55 = vmax.f32 %v2742_v63, %v2743_v18  ;;  %v3675_v49 = vmax.bf16 %v3673_v13, %v3666_v19  ;;  %v3975_v42 = vmul.bf16 %v16200_v36, %v16345_v9 }
 0x76d   :  { %2453 = vst [vmem:[#allocation2] sm:$0x2] %v2452_v60  ;;  %v3055_v53 = vrot.slane %v3054_v52, 2  ;;  %v3367_v47 = vmax.f32 %v3365_v32, %v3366_v34  ;;  %v3973_v46 = vmul.bf16 %v16253_v59, %v13322_v37  ;;  %v3977_v35 = vmul.bf16 %v16235_v22, %v13445_v61  ;;  %v16418_v32 = vld [vmem:[#allocation98_spill] sm:$0xff] }
 0x76e   :  { %v3676_v54 = vmax.bf16 %v3674_v21, %v3668_v44  ;;  %v3677_v20 = vmax.bf16 %v3675_v49, %v3670_v15  ;;  %v3979_v5 = vmul.bf16 %v16236_v51, %v13532_v6  ;;  %v3981_v43 = vmul.bf16 %v16239_v17, %v16350_v29  ;;  %v3080_v15 = vld [vmem:[#allocation2] sm:$0x4]  ;;  %v16420_v49 = vld [vmem:[#allocation100_spill] sm:$0xff] }
 0x76f   :  { %v2745_v7 = vpack.i.bf16 %v2744_v55, %v2744_v55  ;;  %v3056_v11 = vmax.f32 %v3054_v52, %v3055_v53  ;;  %v3368_v12 = vrot.slane %v3367_v47, 4  ;;  %v3983_v36 = vmul.bf16 %v16240_v33, %v16352_v38  ;;  %v16421_v53 = vld [vmem:[#allocation55_spill] sm:$0xff] }
 0x770   :  { %v3678_v41 = vmax.bf16 %v3677_v20, %v3676_v54  ;;  %v3985_v59 = vmul.bf16 %v16241_v45, %v16354_v39  ;;  %v3987_v56 = vmax.bf16 %v3975_v42, %v3971_v57  ;;  %v3988_v22 = vmax.bf16 %v3977_v35, %v3973_v46 }
 0x771   :  { %v3057_v24 = vrot.slane %v3056_v11, 1  ;;  %v3369_v63 = vmax.f32 %v3367_v47, %v3368_v12  ;;  %v4285_v51 = vmul.bf16 %v16268_v8, %v16338_v31  ;;  %v4289_v17 = vmul.bf16 %v16256_v16, %v16345_v9  ;;  %v16417_v16 = vld [vmem:[#allocation19_spill] sm:$0xff] }
 0x772   :  { %v3679_v40 = vunpack.i.l.bf16 %v3678_v41  ;;  %v3680_v14 = vunpack.i.h.bf16 %v3678_v41  ;;  %v3989_v19 = vmax.bf16 %v3987_v56, %v3979_v5  ;;  %v3990_v25 = vmax.bf16 %v3988_v22, %v3981_v43  ;;  %v16423_v56 = vld [vmem:[#allocation129_spill] sm:$0xff] }
 0x773   :  { %v3058_v0 = vmax.f32 %v3056_v11, %v3057_v24  ;;  %v3370_v45 = vrot.slane %v3369_v63, 2  ;;  %v4291_v44 = vmul.bf16 %v16416_v10, %v13445_v61  ;;  %v4287_v26 = vmul.bf16 %v16417_v16, %v13322_v37  ;;  %v16422_v11 = vld [vmem:[#allocation127_spill] sm:$0xff] }
 0x774   :  { %v2765_v48 = vld [vmem:[#allocation2] sm:$0x2]  ;;  %v3681_v60 = vmax.f32 %v3679_v40, %v3680_v14  ;;  %v3991_v8 = vmax.bf16 %v3989_v19, %v3983_v36  ;;  %v3992_v18 = vmax.bf16 %v3990_v25, %v3985_v59  ;;  %v4293_v34 = vmul.bf16 %v16418_v32, %v13532_v6  ;;  %v16426_v19 = vld [vmem:[#allocation172_spill] sm:$0xff] }
 0x775   :  { %v2766_v33 = vsel %vm13927_vm2, %v2745_v7, %v2765_v48  ;;  %v3059_v13 = vpack.i.bf16 %v3058_v0, %v3058_v0  ;;  %v3371_v52 = vmax.f32 %v3369_v63, %v3370_v45  ;;  %v4295_v57 = vmul.bf16 %v16419_v50, %v16350_v29 }
 0x776   :  { %2767 = vst [vmem:[#allocation2] sm:$0x2] %v2766_v33  ;;  %v3682_v55 = vrot.slane %v3681_v60, 4  ;;  %v3993_v21 = vmax.bf16 %v3992_v18, %v3991_v8  ;;  %v4297_v42 = vmul.bf16 %v16420_v49, %v16352_v38  ;;  %v4299_v47 = vmul.bf16 %v16421_v53, %v16354_v39  ;;  %v16427_v33 = vld [vmem:[#allocation101_spill] sm:$0xff]  ;;  %v16429_v18 = vld [vmem:[#allocation190_spill] sm:$0xff] }
 0x777   :  { %v3081_v46 = vsel %vm13966_vm4, %v3059_v13, %v3080_v15  ;;  %v3372_v35 = vrot.slane %v3371_v52, 1  ;;  %v4301_v54 = vmax.bf16 %v4289_v17, %v4285_v51  ;;  %v4302_v20 = vmax.bf16 %v4291_v44, %v4287_v26  ;;  %v16425_v51 = vld [vmem:[#allocation130_spill] sm:$0xff]  ;;  %v16428_v15 = vld [vmem:[#allocation189_spill] sm:$0xff] }
 0x778   :  { %3082 = vst [vmem:[#allocation2] sm:$0x4] %v3081_v46  ;;  %v3683_v5 = vmax.f32 %v3681_v60, %v3682_v55  ;;  %v3994_v43 = vunpack.i.l.bf16 %v3993_v21  ;;  %v3995_v7 = vunpack.i.h.bf16 %v3993_v21  ;;  %v4600_v12 = vmul.bf16 %v16422_v11, %v16338_v31 }
 0x779   :  { %v3373_v36 = vmax.f32 %v3371_v52, %v3372_v35  ;;  %v4303_v41 = vmax.bf16 %v4301_v54, %v4293_v34  ;;  %v4304_v59 = vmax.bf16 %v4302_v20, %v4295_v57  ;;  %v4604_v22 = vmul.bf16 %v16423_v56, %v16345_v9  ;;  %v16430_v34 = vld [vmem:[#allocation102_spill] sm:$0xff]  ;;  %v16431_v57 = vld [vmem:[#allocation92_spill] sm:$0xff]  ;;  %v16432_v20 = vld [vmem:[#allocation103_spill] sm:$0xff] }
 0x77a   :  { %v3684_v24 = vrot.slane %v3683_v5, 2  ;;  %v3996_v63 = vmax.f32 %v3994_v43, %v3995_v7  ;;  %v4602_v48 = vmul.bf16 %v16424_v23, %v13322_v37  ;;  %v4606_v17 = vmul.bf16 %v16425_v51, %v13445_v61  ;;  %v3709_v43 = vld [vmem:[#allocation2] sm:$0x8]  ;;  %v16436_v51 = vld [vmem:[#allocation106_spill] sm:$0xff] }
 0x77b   :  { %v4305_v40 = vmax.bf16 %v4303_v41, %v4297_v42  ;;  %v4306_v14 = vmax.bf16 %v4304_v59, %v4299_v47  ;;  %v4608_v25 = vmul.bf16 %v16426_v19, %v13532_v6  ;;  %v4610_v0 = vmul.bf16 %v16427_v33, %v16350_v29 }
 0x77c   :  { %v3374_v45 = vpack.i.bf16 %v3373_v36, %v3373_v36  ;;  %v3685_v10 = vmax.f32 %v3683_v5, %v3684_v24  ;;  %v3997_v44 = vrot.slane %v3996_v63, 4  ;;  %v4612_v60 = vmul.bf16 %v16428_v15, %v16352_v38  ;;  %v16433_v36 = vld [vmem:[#allocation90_spill] sm:$0xff] }
 0x77d   :  { %v4307_v8 = vmax.bf16 %v4306_v14, %v4305_v40  ;;  %v4614_v16 = vmul.bf16 %v16429_v18, %v16354_v39  ;;  %v4616_v26 = vmax.bf16 %v4604_v22, %v4600_v12  ;;  %v4617_v13 = vmax.bf16 %v4606_v17, %v4602_v48  ;;  %v16434_v22 = vld [vmem:[#allocation104_spill] sm:$0xff]  ;;  %v16437_v40 = vld [vmem:[#allocation107_spill] sm:$0xff] }
 0x77e   :  { %v3686_v52 = vrot.slane %v3685_v10, 1  ;;  %v3998_v32 = vmax.f32 %v3996_v63, %v3997_v44  ;;  %v4914_v50 = vmul.bf16 %v16430_v34, %v16338_v31  ;;  %v4918_v55 = vmul.bf16 %v16431_v57, %v16345_v9  ;;  %v16441_v57 = vld [vmem:[#allocation6_spill] sm:$0xff] }
 0x77f   :  { %v3394_v21 = vld [vmem:[#allocation2] sm:$0x4]  ;;  %v4308_v49 = vunpack.i.l.bf16 %v4307_v8  ;;  %v4309_v42 = vunpack.i.h.bf16 %v4307_v8  ;;  %v4618_v53 = vmax.bf16 %v4616_v26, %v4608_v25  ;;  %v4619_v47 = vmax.bf16 %v4617_v13, %v4610_v0  ;;  %v16440_v13 = vld [vmem:[#allocation174_spill] sm:$0xff] }
 0x780   :  { %v3395_v46 = vsel %vm14012_vm10, %v3374_v45, %v3394_v21  ;;  %v3687_v35 = vmax.f32 %v3685_v10, %v3686_v52  ;;  %v3999_v54 = vrot.slane %v3998_v32, 2  ;;  %v4920_v5 = vmul.bf16 %v16432_v20, %v13445_v61 }
 0x781   :  { %3396 = vst [vmem:[#allocation2] sm:$0x4] %v3395_v46  ;;  %v4310_v7 = vmax.f32 %v4308_v49, %v4309_v42  ;;  %v4620_v11 = vmax.bf16 %v4618_v53, %v4612_v60  ;;  %v4621_v12 = vmax.bf16 %v4619_v47, %v4614_v16  ;;  %v4916_v41 = vmul.bf16 %v16433_v36, %v13322_v37  ;;  %v16439_v60 = vld [vmem:[#allocation21_spill] sm:$0xff]  ;;  %v16443_v53 = vld [vmem:[#allocation176_spill] sm:$0xff] }
 0x782   :  { %v3688_v59 = vpack.i.bf16 %v3687_v35, %v3687_v35  ;;  %v4000_v56 = vmax.f32 %v3998_v32, %v3999_v54  ;;  %v4922_v24 = vmul.bf16 %v16434_v22, %v13532_v6  ;;  %v4924_v63 = vmul.bf16 %v16435_v62, %v16350_v29  ;;  %v16444_v46 = vld [vmem:[#allocation177_spill] sm:$0xff] }
 0x783   :  { %v4311_v23 = vrot.slane %v4310_v7, 4  ;;  %v4622_v48 = vmax.bf16 %v4621_v12, %v4620_v11  ;;  %v4926_v17 = vmul.bf16 %v16436_v51, %v16352_v38  ;;  %v4928_v14 = vmul.bf16 %v16437_v40, %v16354_v39  ;;  %v16446_v12 = vld [vmem:[#allocation192_spill] sm:$0xff] }
 0x784   :  { %v3710_v25 = vsel %vm13980_vm6, %v3688_v59, %v3709_v43  ;;  %v4001_v33 = vrot.slane %v4000_v56, 1  ;;  %v4930_v0 = vmax.bf16 %v4918_v55, %v4914_v50  ;;  %v4931_v45 = vmax.bf16 %v4920_v5, %v4916_v41  ;;  %v16442_v50 = vld [vmem:[#allocation175_spill] sm:$0xff] }
 0x785   :  { %3711 = vst [vmem:[#allocation2] sm:$0x8] %v3710_v25  ;;  %v4312_v10 = vmax.f32 %v4310_v7, %v4311_v23  ;;  %v4623_v44 = vunpack.i.l.bf16 %v4622_v48  ;;  %v4624_v15 = vunpack.i.h.bf16 %v4622_v48  ;;  %v5229_v8 = vmul.bf16 %v16439_v60, %v16338_v31  ;;  %v16445_v43 = vld [vmem:[#allocation191_spill] sm:$0xff] }
 0x786   :  { %v4002_v18 = vmax.f32 %v4000_v56, %v4001_v33  ;;  %v4932_v16 = vmax.bf16 %v4930_v0, %v4922_v24  ;;  %v4933_v26 = vmax.bf16 %v4931_v45, %v4924_v63  ;;  %v5233_v52 = vmul.bf16 %v16440_v13, %v16345_v9  ;;  %v16447_v24 = vld [vmem:[#allocation108_spill] sm:$0xff]  ;;  %v16448_v63 = vld [vmem:[#allocation109_spill] sm:$0xff]  ;;  %v16450_v45 = vld [vmem:[#allocation110_spill] sm:$0xff] }
 0x787   :  { %v4313_v32 = vrot.slane %v4312_v10, 2  ;;  %v4625_v34 = vmax.f32 %v4623_v44, %v4624_v15  ;;  %v5231_v21 = vmul.bf16 %v16441_v57, %v13322_v37  ;;  %v5235_v55 = vmul.bf16 %v16442_v50, %v13445_v61  ;;  %v4338_v44 = vld [vmem:[#allocation2] sm:$0x10]  ;;  %v16451_v13 = vld [vmem:[#allocation111_spill] sm:$0xff] }
 0x788   :  { %v4934_v49 = vmax.bf16 %v4932_v16, %v4926_v17  ;;  %v4935_v42 = vmax.bf16 %v4933_v26, %v4928_v14  ;;  %v5237_v47 = vmul.bf16 %v16443_v53, %v13532_v6  ;;  %v5239_v35 = vmul.bf16 %v16444_v46, %v16350_v29  ;;  %v16453_v50 = vld [vmem:[#allocation113_spill] sm:$0xff]  ;;  %v6784_v53 = vld [vmem:[%s15272_s14 + $0x368] sm:$0xff] }
 0x789   :  { %v4003_v54 = vpack.i.bf16 %v4002_v18, %v4002_v18  ;;  %v4314_v20 = vmax.f32 %v4312_v10, %v4313_v32  ;;  %v4626_v5 = vrot.slane %v4625_v34, 4  ;;  %v5241_v7 = vmul.bf16 %v16445_v43, %v16352_v38  ;;  %v16452_v32 = vld [vmem:[#allocation112_spill] sm:$0xff] }
 0x78a   :  { %v4936_v11 = vmax.bf16 %v4935_v42, %v4934_v49  ;;  %v5243_v36 = vmul.bf16 %v16446_v12, %v16354_v39  ;;  %v5245_v41 = vmax.bf16 %v5233_v52, %v5229_v8  ;;  %v5246_v59 = vmax.bf16 %v5235_v55, %v5231_v21  ;;  %v16454_v49 = vld [vmem:[#allocation3_spill] sm:$0xff] }
 0x78b   :  { %v4315_v56 = vrot.slane %v4314_v20, 1  ;;  %v4627_v22 = vmax.f32 %v4625_v34, %v4626_v5  ;;  %v5543_v62 = vmul.bf16 %v16447_v24, %v16338_v31  ;;  %v5547_v23 = vmul.bf16 %v16448_v63, %v16345_v9  ;;  %v6756_v24 = vld [vmem:[%s15272_s14 + $0x288] sm:$0xff] }
 0x78c   :  { %v4023_v48 = vld [vmem:[#allocation2] sm:$0x8]  ;;  %v4937_v51 = vunpack.i.l.bf16 %v4936_v11  ;;  %v4938_v17 = vunpack.i.h.bf16 %v4936_v11  ;;  %v5247_v40 = vmax.bf16 %v5245_v41, %v5237_v47  ;;  %v5248_v14 = vmax.bf16 %v5246_v59, %v5239_v35 }
 0x78d   :  { %v4024_v25 = vsel %vm14022_vm12, %v4003_v54, %v4023_v48  ;;  %v4316_v33 = vmax.f32 %v4314_v20, %v4315_v56  ;;  %v4628_v0 = vrot.slane %v4627_v22, 2  ;;  %v5549_v10 = vmul.bf16 %v16450_v45, %v13445_v61 }
 0x78e   :  { %4025 = vst [vmem:[#allocation2] sm:$0x8] %v4024_v25  ;;  %v4939_v15 = vmax.f32 %v4937_v51, %v4938_v17  ;;  %v5249_v60 = vmax.bf16 %v5247_v40, %v5241_v7  ;;  %v5250_v8 = vmax.bf16 %v5248_v14, %v5243_v36  ;;  %v5545_v18 = vmul.bf16 %v16327_v1, %v13322_v37 }
 0x78f   :  { %v4317_v16 = vpack.i.bf16 %v4316_v33, %v4316_v33  ;;  %v4629_v26 = vmax.f32 %v4627_v22, %v4628_v0  ;;  %v5551_v52 = vmul.bf16 %v16451_v13, %v13532_v6  ;;  %v5553_v34 = vmul.bf16 %v16452_v32, %v16350_v29  ;;  %v6772_v32 = vld [vmem:[%s15272_s14 + $0x308] sm:$0xff] }
 0x790   :  { %v4940_v57 = vrot.slane %v4939_v15, 4  ;;  %v5251_v21 = vmax.bf16 %v5250_v8, %v5249_v60  ;;  %v5555_v55 = vmul.bf16 %v16453_v50, %v16352_v38  ;;  %v5557_v42 = vmul.bf16 %v16454_v49, %v16354_v39 }
 0x791   :  { %v4339_v47 = vsel %vm14050_vm15, %v4317_v16, %v4338_v44  ;;  %v4630_v1 = vrot.slane %v4629_v26, 1  ;;  %v5559_v46 = vmax.bf16 %v5547_v23, %v5543_v62  ;;  %v5560_v35 = vmax.bf16 %v5549_v10, %v5545_v18  ;;  %v16458_v23 = vld [vmem:[#allocation194_spill] sm:$0xff]  ;;  %v4967_v18 = vld [vmem:[#allocation2] sm:$0x20]  ;;  %v6685_v44 = vld [vmem:[%s15272_s14 + $0x50] sm:$0xff] }
 0x792   :  { %4340 = vst [vmem:[#allocation2] sm:$0x10] %v4339_v47  ;;  %v4941_v54 = vmax.f32 %v4939_v15, %v4940_v57  ;;  %v5252_v20 = vunpack.i.l.bf16 %v5251_v21  ;;  %v5253_v5 = vunpack.i.h.bf16 %v5251_v21  ;;  %v5858_v43 = vmul.bf16 %v16336_v58, %v16338_v31  ;;  %v6760_v58 = vld [vmem:[%s15272_s14 + $0x2a8] sm:$0xff]  ;;  %v6705_v47 = vld [vmem:[%s15272_s14 + $0xf0] sm:$0xff] }
 0x793   :  { %v4631_v7 = vmax.f32 %v4629_v26, %v4630_v1  ;;  %v5561_v11 = vmax.bf16 %v5559_v46, %v5551_v52  ;;  %v5562_v12 = vmax.bf16 %v5560_v35, %v5553_v34  ;;  %v5862_v36 = vmul.bf16 %v16329_v28, %v16345_v9  ;;  %v16456_v9 = vld [vmem:[#allocation105_spill] sm:$0xff]  ;;  %v6776_v34 = vld [vmem:[%s15272_s14 + $0x328] sm:$0xff] }
 0x794   :  { %v4942_v41 = vrot.slane %v4941_v54, 2  ;;  %v5254_v59 = vmax.f32 %v5252_v20, %v5253_v5  ;;  %v5860_v56 = vmul.bf16 %v16340_v2, %v13322_v37  ;;  %v5864_v22 = vmul.bf16 %v16330_v3, %v13445_v61  ;;  %v16457_v61 = vld [vmem:[#allocation193_spill] sm:$0xff] }
 0x795   :  { %v5563_v31 = vmax.bf16 %v5561_v11, %v5555_v55  ;;  %v5564_v62 = vmax.bf16 %v5562_v12, %v5557_v42  ;;  %v5866_v28 = vmul.bf16 %v16331_v30, %v13532_v6  ;;  %v5868_v63 = vmul.bf16 %v16456_v9, %v16350_v29  ;;  %v6764_v6 = vld [vmem:[%s15272_s14 + $0x2c8] sm:$0xff] }
 0x796   :  { %v4943_v37 = vmax.f32 %v4941_v54, %v4942_v41  ;;  %v5255_v2 = vrot.slane %v5254_v59, 4  ;;  %v5870_v3 = vmul.bf16 %v16457_v61, %v16352_v38  ;;  %v5872_v48 = vmul.bf16 %v16458_v23, %v16354_v39  ;;  %v6768_v30 = vld [vmem:[%s15272_s14 + $0x2e8] sm:$0xff] }
 0x797   :  { %v5565_v51 = vmax.bf16 %v5564_v62, %v5563_v31  ;;  %v5874_v17 = vmax.bf16 %v5862_v36, %v5858_v43  ;;  %v5875_v40 = vmax.bf16 %v5864_v22, %v5860_v56  ;;  %v9507_v14 = vcombine.low %v6756_v24, %v6760_v58  ;;  %v6780_v42 = vld [vmem:[%s15272_s14 + $0x348] sm:$0xff] }
 0x798   :  { %v4632_v19 = vpack.i.bf16 %v4631_v7, %v4631_v7  ;;  %v4944_v25 = vrot.slane %v4943_v37, 1  ;;  %v5256_v33 = vmax.f32 %v5254_v59, %v5255_v2  ;;  %v9508_v0 = vcombine.high %v6756_v24, %v6760_v58  ;;  %v6788_v41 = vld [vmem:[%s15272_s14 + $0x388] sm:$0xff] }
 0x799   :  { %v4652_v29 = vld [vmem:[#allocation2] sm:$0x10]  ;;  %v5566_v38 = vunpack.i.l.bf16 %v5565_v51  ;;  %v5567_v45 = vunpack.i.h.bf16 %v5565_v51  ;;  %v5876_v39 = vmax.bf16 %v5874_v17, %v5866_v28  ;;  %v5877_v10 = vmax.bf16 %v5875_v40, %v5868_v63  ;;  %v6792_v59 = vld [vmem:[%s15272_s14 + $0x3a8] sm:$0xff]  ;;  %v5596_v51 = vld [vmem:[#allocation2] sm:$0x40] }
 0x79a   :  { %v4653_v15 = vsel %vm14100_vm3, %v4632_v19, %v4652_v29  ;;  %v4945_v60 = vmax.f32 %v4943_v37, %v4944_v25  ;;  %v5257_v8 = vrot.slane %v5256_v33, 2  ;;  %7506 = vmatprep.subr.bf16.mxu0 %v9508_v0  ;;  %v9515_v52 = vcombine.low %v6764_v6, %v6768_v30  ;;  %v6796_v9 = vld [vmem:[%s15272_s14 + $0x3c8] sm:$0xff]  ;;  %v6678_v19 = vld [vmem:[%s15272_s14 + $0x18] sm:$0xff] }
 0x79b   :  { %4654 = vst [vmem:[#allocation2] sm:$0x10] %v4653_v15  ;;  %v5568_v16 = vmax.f32 %v5566_v38, %v5567_v45  ;;  %v5878_v26 = vmax.bf16 %v5876_v39, %v5870_v3  ;;  %v5879_v13 = vmax.bf16 %v5877_v10, %v5872_v48  ;;  %7507 = vmatpush1.bf16.msra.mxu0 %v9507_v14  ;;  %v6800_v63 = vld [vmem:[%s15272_s14 + $0x3e8] sm:$0xff]  ;;  %v6682_v25 = vld [vmem:[%s15272_s14 + $0x38] sm:$0xff]  ;;  %v6689_v15 = vld [vmem:[%s15272_s14 + $0x70] sm:$0xff] }
 0x79c   :  { %v4946_v57 = vpack.i.bf16 %v4945_v60, %v4945_v60  ;;  %v5258_v21 = vmax.f32 %v5256_v33, %v5257_v8  ;;  %v9516_v50 = vcombine.high %v6764_v6, %v6768_v30  ;;  %v9524_v35 = vcombine.high %v6772_v32, %v6776_v34  ;;  %v6686_v60 = vld [vmem:[%s15272_s14 + $0x58] sm:$0xff] }
 0x79d   :  { %v5569_v55 = vrot.slane %v5568_v16, 4  ;;  %v5880_v49 = vmax.bf16 %v5879_v13, %v5878_v26  ;;  %v9523_v43 = vcombine.low %v6772_v32, %v6776_v34  ;;  %v9532_v7 = vcombine.high %v6780_v42, %v6784_v53  ;;  %v6690_v8 = vld [vmem:[%s15272_s14 + $0x78] sm:$0xff]  ;;  %v6693_v26 = vld [vmem:[%s15272_s14 + $0x90] sm:$0xff] }
 0x79e   :  { %v4968_v1 = vsel %vm14114_vm7, %v4946_v57, %v4967_v18  ;;  %v5259_v46 = vrot.slane %v5258_v21, 1  ;;  %7508 = vmatprep.subr.bf16.mxu0 %v9516_v50  ;;  %v9531_v24 = vcombine.low %v6780_v42, %v6784_v53  ;;  %v9540_v58 = vcombine.high %v6788_v41, %v6792_v59  ;;  %v6697_v13 = vld [vmem:[%s15272_s14 + $0xb0] sm:$0xff]  ;;  %v6694_v32 = vld [vmem:[%s15272_s14 + $0x98] sm:$0xff] }
 0x79f   :  { %4969 = vst [vmem:[#allocation2] sm:$0x20] %v4968_v1  ;;  %v5570_v54 = vmax.f32 %v5568_v16, %v5569_v55  ;;  %v5881_v20 = vunpack.i.l.bf16 %v5880_v49  ;;  %v5882_v5 = vunpack.i.h.bf16 %v5880_v49  ;;  %7509 = vmatpush1.bf16.msra.mxu0 %v9515_v52  ;;  %v9539_v48 = vcombine.low %v6788_v41, %v6792_v59  ;;  %v6698_v34 = vld [vmem:[%s15272_s14 + $0xb8] sm:$0xff]  ;;  %v6701_v53 = vld [vmem:[%s15272_s14 + $0xd0] sm:$0xff] }
 0x7a0   :  { %7510 = vmatprep.subr.bf16.mxu0 %v9524_v35  ;;  %v5260_v11 = vmax.f32 %v5258_v21, %v5259_v46  ;;  %v9548_v17 = vcombine.high %v6796_v9, %v6800_v63  ;;  %v9547_v30 = vcombine.low %v6796_v9, %v6800_v63  ;;  %v9432_v29 = vcombine.high %v6678_v19, %v6682_v25  ;;  %v16463_v57 = vld [vmem:[#allocation56_spill] sm:$0xff]  ;;  %v16464_v21 = vld [vmem:[#allocation57_spill] sm:$0xff]  ;;  %v6725_v63 = vld [vmem:[%s15272_s14 + $0x190] sm:$0xff] }
 0x7a1   :  { %v5571_v12 = vrot.slane %v5570_v54, 2  ;;  %v5883_v36 = vmax.f32 %v5881_v20, %v5882_v5  ;;  %v9438_v18 = vcombine.high %v6685_v44, %v6689_v15  ;;  %v9431_v4 = vcombine.low %v6678_v19, %v6682_v25  ;;  %v6702_v46 = vld [vmem:[%s15272_s14 + $0xd8] sm:$0xff]  ;;  %v6737_v19 = vld [vmem:[%s15272_s14 + $0x1f0] sm:$0xff] }
 0x7a2   :  { %v5261_v31 = vpack.i.bf16 %v5260_v11, %v5260_v11  ;;  %v9440_v52 = vcombine.high %v6686_v60, %v6690_v8  ;;  %v16465_v50 = vcombine.low %v16463_v57, %v16464_v21  ;;  %v9437_v55 = vcombine.low %v6685_v44, %v6689_v15  ;;  %v6706_v35 = vld [vmem:[%s15272_s14 + $0xf8] sm:$0xff] }
 0x7a3   :  { %v5572_v56 = vmax.f32 %v5570_v54, %v5571_v12  ;;  %v5884_v22 = vrot.slane %v5883_v36, 4  ;;  %7511 = vmatpush1.bf16.msra.mxu0 %v9523_v43  ;;  %v9446_v49 = vcombine.high %v6693_v26, %v6697_v13  ;;  %v9439_v42 = vcombine.low %v6686_v60, %v6690_v8  ;;  %v6713_v43 = vld [vmem:[%s15272_s14 + $0x130] sm:$0xff]  ;;  %v6710_v11 = vld [vmem:[%s15272_s14 + $0x118] sm:$0xff] }
 0x7a4   :  { %7512 = vmatprep.subr.bf16.mxu0 %v9532_v7  ;;  %v9448_v1 = vcombine.high %v6694_v32, %v6698_v34  ;;  %v9445_v54 = vcombine.low %v6693_v26, %v6697_v13  ;;  %v9454_v20 = vcombine.high %v6701_v53, %v6705_v47  ;;  %v9447_v5 = vcombine.low %v6694_v32, %v6698_v34  ;;  %v6714_v12 = vld [vmem:[%s15272_s14 + $0x138] sm:$0xff]  ;;  %v6745_v26 = vld [vmem:[%s15272_s14 + $0x230] sm:$0xff] }
 0x7a5   :  { %v5573_v62 = vrot.slane %v5572_v56, 1  ;;  %v5885_v28 = vmax.f32 %v5883_v36, %v5884_v22  ;;  %v9456_v7 = vcombine.high %v6702_v46, %v6706_v35  ;;  %v9453_v36 = vcombine.low %v6701_v53, %v6705_v47  ;;  %v6721_v22 = vld [vmem:[%s15272_s14 + $0x170] sm:$0xff]  ;;  %v6742_v32 = vld [vmem:[%s15272_s14 + $0x218] sm:$0xff] }
 0x7a6   :  { %v5281_v37 = vld [vmem:[#allocation2] sm:$0x20]  ;;  %v9455_v59 = vcombine.low %v6702_v46, %v6706_v35  ;;  %v9463_v9 = vcombine.low %v6710_v11, %v6714_v12  ;;  %v6746_v34 = vld [vmem:[%s15272_s14 + $0x238] sm:$0xff] }
 0x7a7   :  { %v5282_v61 = vsel %vm14156_vm1, %v5261_v31, %v5281_v37  ;;  %v5574_v3 = vmax.f32 %v5572_v56, %v5573_v62  ;;  %v5886_v23 = vrot.slane %v5885_v28, 2  ;;  %7513 = vmatpush1.bf16.msra.mxu0 %v9531_v24  ;;  %v6717_v56 = vld [vmem:[%s15272_s14 + $0x150] sm:$0xff]  ;;  %v9464_v24 = vcombine.high %v6710_v11, %v6714_v12  ;;  %v6722_v31 = vld [vmem:[%s15272_s14 + $0x178] sm:$0xff] }
 0x7a8   :  { %5283 = vst [vmem:[#allocation2] sm:$0x20] %v5282_v61  ;;  %7514 = vmatprep.subr.bf16.mxu0 %v9540_v58  ;;  %v6718_v58 = vld [vmem:[%s15272_s14 + $0x158] sm:$0xff]  ;;  %v6729_v37 = vld [vmem:[%s15272_s14 + $0x1b0] sm:$0xff]  ;;  %v9495_v35 = vcombine.low %v6742_v32, %v6746_v34 }
 0x7a9   :  { %v5575_v40 = vpack.i.bf16 %v5574_v3, %v5574_v3  ;;  %v5887_v14 = vmax.f32 %v5885_v28, %v5886_v23  ;;  %v9470_v28 = vcombine.high %v6717_v56, %v6721_v22  ;;  %v9472_v2 = vcombine.high %v6718_v58, %v6722_v31  ;;  %v6726_v61 = vld [vmem:[%s15272_s14 + $0x198] sm:$0xff] }
 0x7aa   :  { %v6730_v3 = vld [vmem:[%s15272_s14 + $0x1b8] sm:$0xff]  ;;  %v9469_v23 = vcombine.low %v6717_v56, %v6721_v22 }
 0x7ab   :  { %v5597_v0 = vsel %vm14170_vm5, %v5575_v40, %v5596_v51  ;;  %v5888_v6 = vrot.slane %v5887_v14, 1  ;;  %7515 = vmatpush1.bf16.msra.mxu0 %v9539_v48  ;;  %v9478_v51 = vcombine.high %v6725_v63, %v6729_v37  ;;  %v9480_v25 = vcombine.high %v6726_v61, %v6730_v3  ;;  %v6750_v53 = vld [vmem:[%s15272_s14 + $0x258] sm:$0xff] }
 0x7ac   :  { %5598 = vst [vmem:[#allocation2] sm:$0x40] %v5597_v0  ;;  %7516 = vmatprep.subr.bf16.mxu0 %v9548_v17  ;;  %v9471_v17 = vcombine.low %v6718_v58, %v6722_v31  ;;  %v6734_v0 = vld [vmem:[%s15272_s14 + $0x1d8] sm:$0xff]  ;;  %v9479_v8 = vcombine.low %v6726_v61, %v6730_v3 }
 0x7ad   :  { %v5889_v38 = vmax.f32 %v5887_v14, %v5888_v6  ;;  %v6733_v14 = vld [vmem:[%s15272_s14 + $0x1d0] sm:$0xff]  ;;  %v6738_v6 = vld [vmem:[%s15272_s14 + $0x1f8] sm:$0xff] }
 0x7ae   :  { %v9486_v60 = vcombine.high %v6733_v14, %v6737_v19  ;;  %v9488_v13 = vcombine.high %v6734_v0, %v6738_v6  ;;  %v9485_v57 = vcombine.low %v6733_v14, %v6737_v19  ;;  %v6754_v47 = vld [vmem:[%s15272_s14 + $0x278] sm:$0xff] }
 0x7af   :  { %7517 = vmatpush1.bf16.msra.mxu0 %v9547_v30  ;;  %v5890_v45 = vpack.i.bf16 %v5889_v38, %v5889_v38  ;;  %v16466_v30 = vld [vmem:[#allocation84_spill] sm:$0xff]  ;;  %v16467_v38 = vld [vmem:[#allocation85_spill] sm:$0xff]  ;;  %v9503_v12 = vcombine.low %v6750_v53, %v6754_v47 }
 0x7b0   :  { %7572 = vmatprep.subr.bf16.mxu0 %v9432_v29  ;;  %v6766_v56 = vld [vmem:[%s15272_s14 + $0x2d8] sm:$0xff] }
 0x7b1   :  { %v6770_v22 = vld [vmem:[%s15272_s14 + $0x2f8] sm:$0xff] }
 0x7b2   :  { %v9519_v3 = vcombine.low %v6766_v56, %v6770_v22 }
 0x7b3   :  { %v5910_v39 = vld [vmem:[#allocation2] sm:$0x40] }
 0x7b4   :  { %v5911_v10 = vsel %vm14203_vm0, %v5890_v45, %v5910_v39 }
 0x7b5   :  { %5912 = vst [vmem:[#allocation2] sm:$0x40] %v5911_v10  ;;  %v9477_v10 = vcombine.low %v6725_v63, %v6729_v37  ;;  %v6774_v63 = vld [vmem:[%s15272_s14 + $0x318] sm:$0xff] }
 0x7b6   :  { %v6778_v37 = vld [vmem:[%s15272_s14 + $0x338] sm:$0xff] }
 0x7bc   :  { %v14457_v16 = vld [vmem:[#allocation2] sm:$0xff] }
 0x7bd   :  { %7476 = vmatmul.mubr.bf16.vlgmr.msra.gmra.mrb[80].mxu1 %v14457_v16  ;;  %7519 = vmatmul.mubr.bf16.vlgmr.msra.gmra.mrb[68].mxu0 %v14457_v16 }
 0x7be   :  { %7530 = vmatpush1.bf16.msra.mxu1 %v16465_v50  ;;  %7561 = vmatprep.mubr.bf16.mxu1 %v14237_v27  ;;  %v9487_v50 = vcombine.low %v6734_v0, %v6738_v6  ;;  %v6793_v0 = vld [vmem:[%s15272_s14 + $0x3b0] sm:$0xff] }
 0x7bf   :  { %7531 = vmatprep.subr.bf16.mxu1 %v9438_v18  ;;  %7573 = vmatpush1.bf16.msra.mxu0 %v9431_v4  ;;  %v6741_v4 = vld [vmem:[%s15272_s14 + $0x210] sm:$0xff] }
 0x7c0   :  { %7604 = vmatprep.mubr.bf16.mxu0 %v14237_v27  ;;  %7574 = vmatprep.subr.bf16.mxu0 %v9440_v52  ;;  %v6709_v27 = vld [vmem:[%s15272_s14 + $0x110] sm:$0xff]  ;;  %v1486_v48 = vpop.f32.mrb[64].mxu0  ;;  %v9494_v21 = vcombine.high %v6741_v4, %v6745_v26 }
 0x7c1   :  { %v9462_v41 = vcombine.high %v6709_v27, %v6713_v43  ;;  %v9461_v62 = vcombine.low %v6709_v27, %v6713_v43  ;;  %v1488_v40 = vpop.f32.mrb[65].mxu0  ;;  %v1507_v29 = vmul.f32 %v16466_v30, %v1486_v48  ;;  %v6758_v27 = vld [vmem:[%s15272_s14 + $0x298] sm:$0xff]  ;;  %v6785_v48 = vld [vmem:[%s15272_s14 + $0x370] sm:$0xff] }
 0x7c2   :  { %7532 = vmatpush1.bf16.msra.mxu1 %v9437_v55  ;;  %v1490_v33 = vpop.f32.mrb[66].mxu0  ;;  %v1508_v44 = vmul.f32 %v16466_v30, %v1488_v40  ;;  %v6749_v55 = vld [vmem:[%s15272_s14 + $0x250] sm:$0xff]  ;;  %v6762_v43 = vld [vmem:[%s15272_s14 + $0x2b8] sm:$0xff] }
 0x7c3   :  { %7533 = vmatprep.subr.bf16.mxu1 %v9446_v49  ;;  %7575 = vmatpush1.bf16.msra.mxu0 %v9439_v42  ;;  %v1509_v45 = vmul.f32 %v16467_v38, %v1490_v33  ;;  %v1492_v39 = vpop.f32.mrb[67].mxu0  ;;  %v6753_v49 = vld [vmem:[%s15272_s14 + $0x270] sm:$0xff]  ;;  %v9496_v42 = vcombine.high %v6742_v32, %v6746_v34  ;;  %v9511_v31 = vcombine.low %v6758_v27, %v6762_v43  ;;  %v6786_v40 = vld [vmem:[%s15272_s14 + $0x378] sm:$0xff]  ;;  %v6545_v34 = vld [vmem:[%s15275_s13] sm:$0xff] }
 0x7c4   :  { %7576 = vmatprep.subr.bf16.mxu0 %v9448_v1  ;;  %v1510_v15 = vmul.f32 %v16467_v38, %v1492_v39  ;;  %v9493_v1 = vcombine.low %v6741_v4, %v6745_v26  ;;  %v9502_v46 = vcombine.high %v6749_v55, %v6753_v49  ;;  %v6789_v33 = vld [vmem:[%s15272_s14 + $0x390] sm:$0xff]  ;;  %v6790_v30 = vld [vmem:[%s15272_s14 + $0x398] sm:$0xff] }
 0x7c5   :  { %v14542_v18 = vpack.c.bf16 %v1509_v45, %v1507_v29  ;;  %v6794_v29 = vld [vmem:[%s15272_s14 + $0x3b8] sm:$0xff]  ;;  %v9542_v45 = vcombine.high %v6789_v33, %v6793_v0  ;;  %v9541_v4 = vcombine.low %v6789_v33, %v6793_v0  ;;  %v6593_v33 = vld [vmem:[%s15275_s13 + $0x180] sm:$0xff] }
 0x7c6   :  { %7534 = vmatpush1.bf16.msra.mxu1 %v9445_v54  ;;  %v14550_v52 = vpack.c.bf16 %v1510_v15, %v1508_v44  ;;  %v6757_v54 = vld [vmem:[%s15272_s14 + $0x290] sm:$0xff]  ;;  %v9544_v15 = vcombine.high %v6790_v30, %v6794_v29 }
 0x7c7   :  { %7535 = vmatprep.subr.bf16.mxu1 %v9454_v20  ;;  %7577 = vmatpush1.bf16.msra.mxu0 %v9447_v5  ;;  %v6761_v20 = vld [vmem:[%s15272_s14 + $0x2b0] sm:$0xff]  ;;  %v9504_v5 = vcombine.high %v6750_v53, %v6754_v47  ;;  %v6553_v47 = vld [vmem:[%s15275_s13 + $0x40] sm:$0xff] }
 0x7c8   :  { %7578 = vmatprep.subr.bf16.mxu0 %v9456_v7  ;;  %v9501_v7 = vcombine.low %v6749_v55, %v6753_v49  ;;  %v9510_v11 = vcombine.high %v6757_v54, %v6761_v20  ;;  %v6801_v44 = vld [vmem:[%s15272_s14 + $0x3f0] sm:$0xff] }
 0x7ca   :  { %7536 = vmatpush1.bf16.msra.mxu1 %v9453_v36  ;;  %v6765_v36 = vld [vmem:[%s15272_s14 + $0x2d0] sm:$0xff] }
 0x7cb   :  { %7537 = vmatprep.subr.bf16.mxu1 %v9462_v41  ;;  %7579 = vmatpush1.bf16.msra.mxu0 %v9455_v59  ;;  %v6769_v41 = vld [vmem:[%s15272_s14 + $0x2f0] sm:$0xff]  ;;  %v9512_v59 = vcombine.high %v6758_v27, %v6762_v43  ;;  %v6561_v43 = vld [vmem:[%s15275_s13 + $0x80] sm:$0xff] }
 0x7cc   :  { %7580 = vmatprep.subr.bf16.mxu0 %v9464_v24  ;;  %v9509_v24 = vcombine.low %v6757_v54, %v6761_v20  ;;  %v9518_v58 = vcombine.high %v6765_v36, %v6769_v41 }
 0x7ce   :  { %7538 = vmatpush1.bf16.msra.mxu1 %v9461_v62  ;;  %v6773_v62 = vld [vmem:[%s15272_s14 + $0x310] sm:$0xff] }
 0x7cf   :  { %7539 = vmatprep.subr.bf16.mxu1 %v9470_v28  ;;  %7581 = vmatpush1.bf16.msra.mxu0 %v9463_v9  ;;  %v6777_v28 = vld [vmem:[%s15272_s14 + $0x330] sm:$0xff]  ;;  %v9520_v9 = vcombine.high %v6766_v56, %v6770_v22  ;;  %v6573_v22 = vld [vmem:[%s15275_s13 + $0xe0] sm:$0xff] }
 0x7d0   :  { %7582 = vmatprep.subr.bf16.mxu0 %v9472_v2  ;;  %v9517_v2 = vcombine.low %v6765_v36, %v6769_v41  ;;  %v9526_v61 = vcombine.high %v6773_v62, %v6777_v28  ;;  %v9525_v14 = vcombine.low %v6773_v62, %v6777_v28  ;;  %v6569_v41 = vld [vmem:[%s15275_s13 + $0xc0] sm:$0xff] }
 0x7d1   :  { %v6577_v62 = vld [vmem:[%s15275_s13 + $0x100] sm:$0xff] }
 0x7d2   :  { %7540 = vmatpush1.bf16.msra.mxu1 %v9469_v23  ;;  %v6781_v23 = vld [vmem:[%s15272_s14 + $0x350] sm:$0xff] }
 0x7d3   :  { %7541 = vmatprep.subr.bf16.mxu1 %v9478_v51  ;;  %7583 = vmatpush1.bf16.msra.mxu0 %v9471_v17  ;;  %v9528_v51 = vcombine.high %v6774_v63, %v6778_v37  ;;  %v6782_v17 = vld [vmem:[%s15272_s14 + $0x358] sm:$0xff]  ;;  %v9534_v19 = vcombine.high %v6781_v23, %v6785_v48  ;;  %v9533_v38 = vcombine.low %v6781_v23, %v6785_v48  ;;  %v6585_v23 = vld [vmem:[%s15275_s13 + $0x140] sm:$0xff] }
 0x7d4   :  { %7584 = vmatprep.subr.bf16.mxu0 %v9480_v25  ;;  %v9527_v25 = vcombine.low %v6774_v63, %v6778_v37  ;;  %v9536_v6 = vcombine.high %v6782_v17, %v6786_v40  ;;  %v9535_v39 = vcombine.low %v6782_v17, %v6786_v40  ;;  %v6581_v63 = vld [vmem:[%s15275_s13 + $0x120] sm:$0xff] }
 0x7d5   :  { %v6589_v17 = vld [vmem:[%s15275_s13 + $0x160] sm:$0xff] }
 0x7d6   :  { %7542 = vmatpush1.bf16.msra.mxu1 %v9477_v10  ;;  %v6797_v10 = vld [vmem:[%s15272_s14 + $0x3d0] sm:$0xff] }
 0x7d7   :  { %7543 = vmatprep.subr.bf16.mxu1 %v9486_v60  ;;  %7585 = vmatpush1.bf16.msra.mxu0 %v9479_v8  ;;  %v6798_v60 = vld [vmem:[%s15272_s14 + $0x3d8] sm:$0xff]  ;;  %v9550_v26 = vcombine.high %v6797_v10, %v6801_v44  ;;  %v9549_v55 = vcombine.low %v6797_v10, %v6801_v44  ;;  %v6601_v10 = vld [vmem:[%s15275_s13 + $0x1c0] sm:$0xff] }
 0x7d8   :  { %7586 = vmatprep.subr.bf16.mxu0 %v9488_v13  ;;  %v6802_v8 = vld [vmem:[%s15272_s14 + $0x3f8] sm:$0xff]  ;;  %v9543_v13 = vcombine.low %v6790_v30, %v6794_v29  ;;  %v6597_v30 = vld [vmem:[%s15275_s13 + $0x1a0] sm:$0xff] }
 0x7d9   :  { %v9552_v32 = vcombine.high %v6798_v60, %v6802_v8  ;;  %v9551_v49 = vcombine.low %v6798_v60, %v6802_v8  ;;  %v6605_v60 = vld [vmem:[%s15275_s13 + $0x1e0] sm:$0xff] }
 0x7da   :  { %7544 = vmatpush1.bf16.msra.mxu1 %v9485_v57  ;;  %v6549_v57 = vld [vmem:[%s15275_s13 + $0x20] sm:$0xff] }
 0x7db   :  { %7545 = vmatprep.subr.bf16.mxu1 %v9494_v21  ;;  %7587 = vmatpush1.bf16.msra.mxu0 %v9487_v50  ;;  %v6546_v21 = vld [vmem:[%s15275_s13 + $0x8] sm:$0xff]  ;;  %v9553_v54 = vcombine.low %v6545_v34, %v6549_v57 }
 0x7dc   :  { %7588 = vmatprep.subr.bf16.mxu0 %v9496_v42  ;;  %v6550_v50 = vld [vmem:[%s15275_s13 + $0x28] sm:$0xff]  ;;  %v9554_v42 = vcombine.high %v6545_v34, %v6549_v57  ;;  %v6613_v34 = vld [vmem:[%s15275_s13 + $0x220] sm:$0xff] }
 0x7dd   :  { %v9556_v53 = vcombine.high %v6546_v21, %v6550_v50  ;;  %v9555_v20 = vcombine.low %v6546_v21, %v6550_v50  ;;  %v9610_v21 = vcombine.high %v6601_v10, %v6605_v60  ;;  %v6610_v50 = vld [vmem:[%s15275_s13 + $0x208] sm:$0xff] }
 0x7de   :  { %7546 = vmatpush1.bf16.msra.mxu1 %v9493_v1  ;;  %v6557_v1 = vld [vmem:[%s15275_s13 + $0x60] sm:$0xff] }
 0x7df   :  { %7547 = vmatprep.subr.bf16.mxu1 %v9502_v46  ;;  %7589 = vmatpush1.bf16.msra.mxu0 %v9495_v35  ;;  %v6554_v46 = vld [vmem:[%s15275_s13 + $0x48] sm:$0xff]  ;;  %v9561_v36 = vcombine.low %v6553_v47, %v6557_v1 }
 0x7e0   :  { %7590 = vmatprep.subr.bf16.mxu0 %v9504_v5  ;;  %v6558_v35 = vld [vmem:[%s15275_s13 + $0x68] sm:$0xff]  ;;  %v9562_v5 = vcombine.high %v6553_v47, %v6557_v1  ;;  %v6621_v47 = vld [vmem:[%s15275_s13 + $0x260] sm:$0xff] }
 0x7e1   :  { %v9564_v27 = vcombine.high %v6554_v46, %v6558_v35 }
 0x7e2   :  { %7548 = vmatpush1.bf16.msra.mxu1 %v9501_v7  ;;  %v6565_v7 = vld [vmem:[%s15275_s13 + $0xa0] sm:$0xff] }
 0x7e3   :  { %7549 = vmatprep.subr.bf16.mxu1 %v9510_v11  ;;  %7591 = vmatpush1.bf16.msra.mxu0 %v9503_v12  ;;  %v6562_v11 = vld [vmem:[%s15275_s13 + $0x88] sm:$0xff]  ;;  %v9570_v56 = vcombine.high %v6561_v43, %v6565_v7 }
 0x7e4   :  { %7592 = vmatprep.subr.bf16.mxu0 %v9512_v59  ;;  %v6566_v12 = vld [vmem:[%s15275_s13 + $0xa8] sm:$0xff]  ;;  %v9563_v59 = vcombine.low %v6554_v46, %v6558_v35 }
 0x7e5   :  { %v9571_v28 = vcombine.low %v6562_v11, %v6566_v12  ;;  %v6618_v35 = vld [vmem:[%s15275_s13 + $0x248] sm:$0xff] }
 0x7e6   :  { %7550 = vmatpush1.bf16.msra.mxu1 %v9509_v24  ;;  %v9572_v24 = vcombine.high %v6562_v11, %v6566_v12  ;;  %v6626_v12 = vld [vmem:[%s15275_s13 + $0x288] sm:$0xff] }
 0x7e7   :  { %7551 = vmatprep.subr.bf16.mxu1 %v9518_v58  ;;  %7593 = vmatpush1.bf16.msra.mxu0 %v9511_v31  ;;  %v6574_v58 = vld [vmem:[%s15275_s13 + $0xe8] sm:$0xff]  ;;  %v9569_v31 = vcombine.low %v6561_v43, %v6565_v7  ;;  %v6629_v43 = vld [vmem:[%s15275_s13 + $0x2a0] sm:$0xff] }
 0x7e8   :  { %7594 = vmatprep.subr.bf16.mxu0 %v9520_v9  ;;  %v9578_v9 = vcombine.high %v6569_v41, %v6573_v22 }
 0x7ea   :  { %7552 = vmatpush1.bf16.msra.mxu1 %v9517_v2  ;;  %v6578_v2 = vld [vmem:[%s15275_s13 + $0x108] sm:$0xff] }
 0x7eb   :  { %7553 = vmatprep.subr.bf16.mxu1 %v9526_v61  ;;  %7595 = vmatpush1.bf16.msra.mxu0 %v9519_v3  ;;  %v6582_v61 = vld [vmem:[%s15275_s13 + $0x128] sm:$0xff]  ;;  %v9577_v3 = vcombine.low %v6569_v41, %v6573_v22  ;;  %v6637_v22 = vld [vmem:[%s15275_s13 + $0x2e0] sm:$0xff] }
 0x7ec   :  { %7596 = vmatprep.subr.bf16.mxu0 %v9528_v51  ;;  %v9586_v51 = vcombine.high %v6577_v62, %v6581_v63  ;;  %v9588_v40 = vcombine.high %v6578_v2, %v6582_v61  ;;  %v9587_v0 = vcombine.low %v6578_v2, %v6582_v61  ;;  %v6642_v61 = vld [vmem:[%s15275_s13 + $0x308] sm:$0xff] }
 0x7ee   :  { %7554 = vmatpush1.bf16.msra.mxu1 %v9525_v14  ;;  %v6586_v14 = vld [vmem:[%s15275_s13 + $0x148] sm:$0xff] }
 0x7ef   :  { %7555 = vmatprep.subr.bf16.mxu1 %v9534_v19  ;;  %7597 = vmatpush1.bf16.msra.mxu0 %v9527_v25  ;;  %v6590_v19 = vld [vmem:[%s15275_s13 + $0x168] sm:$0xff]  ;;  %v9585_v25 = vcombine.low %v6577_v62, %v6581_v63  ;;  %v6645_v63 = vld [vmem:[%s15275_s13 + $0x320] sm:$0xff] }
 0x7f0   :  { %7598 = vmatprep.subr.bf16.mxu0 %v9536_v6  ;;  %v9594_v6 = vcombine.high %v6585_v23, %v6589_v17  ;;  %v9596_v29 = vcombine.high %v6586_v14, %v6590_v19  ;;  %v9595_v44 = vcombine.low %v6586_v14, %v6590_v19  ;;  %v6650_v19 = vld [vmem:[%s15275_s13 + $0x348] sm:$0xff] }
 0x7f2   :  { %7556 = vmatpush1.bf16.msra.mxu1 %v9533_v38  ;;  %v6594_v38 = vld [vmem:[%s15275_s13 + $0x188] sm:$0xff] }
 0x7f3   :  { %7557 = vmatprep.subr.bf16.mxu1 %v9542_v45  ;;  %7599 = vmatpush1.bf16.msra.mxu0 %v9535_v39  ;;  %v6598_v45 = vld [vmem:[%s15275_s13 + $0x1a8] sm:$0xff]  ;;  %v9593_v39 = vcombine.low %v6585_v23, %v6589_v17  ;;  %v6653_v17 = vld [vmem:[%s15275_s13 + $0x360] sm:$0xff] }
 0x7f4   :  { %7600 = vmatprep.subr.bf16.mxu0 %v9544_v15  ;;  %v9602_v15 = vcombine.high %v6593_v33, %v6597_v30  ;;  %v9604_v8 = vcombine.high %v6594_v38, %v6598_v45  ;;  %v9603_v57 = vcombine.low %v6594_v38, %v6598_v45  ;;  %v6658_v45 = vld [vmem:[%s15275_s13 + $0x388] sm:$0xff] }
 0x7f6   :  { %7558 = vmatpush1.bf16.msra.mxu1 %v9541_v4  ;;  %v6602_v4 = vld [vmem:[%s15275_s13 + $0x1c8] sm:$0xff] }
 0x7f7   :  { %7559 = vmatprep.subr.bf16.mxu1 %v9550_v26  ;;  %7601 = vmatpush1.bf16.msra.mxu0 %v9543_v13  ;;  %v6606_v26 = vld [vmem:[%s15275_s13 + $0x1e8] sm:$0xff]  ;;  %v9601_v13 = vcombine.low %v6593_v33, %v6597_v30  ;;  %v6661_v30 = vld [vmem:[%s15275_s13 + $0x3a0] sm:$0xff] }
 0x7f8   :  { %7602 = vmatprep.subr.bf16.mxu0 %v9552_v32  ;;  %v6609_v32 = vld [vmem:[%s15275_s13 + $0x200] sm:$0xff]  ;;  %v9611_v1 = vcombine.low %v6602_v4, %v6606_v26 }
 0x7f9   :  { %v9618_v46 = vcombine.high %v6609_v32, %v6613_v34 }
 0x7fa   :  { %7560 = vmatpush1.bf16.msra.mxu1 %v9549_v55  ;;  %v9612_v55 = vcombine.high %v6602_v4, %v6606_v26 }
 0x7fb   :  { %7603 = vmatpush1.bf16.msra.mxu0 %v9551_v49  ;;  %8255 = vmatprep.subr.bf16.mxu1 %v9554_v42  ;;  %v6614_v49 = vld [vmem:[%s15275_s13 + $0x228] sm:$0xff]  ;;  %v9609_v42 = vcombine.low %v6601_v10, %v6605_v60  ;;  %v6669_v60 = vld [vmem:[%s15275_s13 + $0x3e0] sm:$0xff] }
 0x7fc   :  { %8298 = vmatprep.subr.bf16.mxu0 %v9556_v53  ;;  %v6617_v53 = vld [vmem:[%s15275_s13 + $0x240] sm:$0xff]  ;;  %v9619_v7 = vcombine.low %v6610_v50, %v6614_v49 }
 0x7fd   :  { %7562 = vmatmul.mubr.bf16.vlgmr.msra.gmra.mrb[84].mxu1 %v14457_v16  ;;  %v9626_v11 = vcombine.high %v6617_v53, %v6621_v47 }
 0x7fe   :  { %7605 = vmatmul.mubr.bf16.vlgmr.msra.gmra.mrb[72].mxu0 %v14457_v16  ;;  %8256 = vmatpush1.bf16.msra.mxu1 %v9553_v54  ;;  %v6570_v16 = vld [vmem:[%s15275_s13 + $0xc8] sm:$0xff] }
 0x7ff   :  { %8299 = vmatpush1.bf16.msra.mxu0 %v9555_v20  ;;  %8257 = vmatprep.subr.bf16.mxu1 %v9562_v5  ;;  %v9580_v37 = vcombine.high %v6570_v16, %v6574_v58  ;;  %v9579_v48 = vcombine.low %v6570_v16, %v6574_v58  ;;  %v6622_v54 = vld [vmem:[%s15275_s13 + $0x268] sm:$0xff]  ;;  %v9620_v20 = vcombine.high %v6610_v50, %v6614_v49  ;;  %v6551_v49 = vld [vmem:[%s15275_s13 + $0x30] sm:$0xff] }
 0x800   :  { %8300 = vmatprep.subr.bf16.mxu0 %v9564_v27  ;;  %8287 = vmatprep.mubr.bf16.mxu1 %v14550_v52  ;;  %v9617_v5 = vcombine.low %v6609_v32, %v6613_v34  ;;  %v6625_v27 = vld [vmem:[%s15275_s13 + $0x280] sm:$0xff]  ;;  %v9628_v41 = vcombine.high %v6618_v35, %v6622_v54  ;;  %v6634_v58 = vld [vmem:[%s15275_s13 + $0x2c8] sm:$0xff] }
 0x801   :  { %8330 = vmatprep.mubr.bf16.mxu0 %v14550_v52  ;;  %v9634_v16 = vcombine.high %v6625_v27, %v6629_v43  ;;  %v6670_v32 = vld [vmem:[%s15275_s13 + $0x3e8] sm:$0xff] }
 0x802   :  { %8258 = vmatpush1.bf16.msra.mxu1 %v9561_v36  ;;  %v6630_v36 = vld [vmem:[%s15275_s13 + $0x2a8] sm:$0xff] }
 0x803   :  { %8301 = vmatpush1.bf16.msra.mxu0 %v9563_v59  ;;  %8259 = vmatprep.subr.bf16.mxu1 %v9570_v56  ;;  %v9625_v59 = vcombine.low %v6617_v53, %v6621_v47  ;;  %v6633_v56 = vld [vmem:[%s15275_s13 + $0x2c0] sm:$0xff]  ;;  %v9636_v62 = vcombine.high %v6626_v12, %v6630_v36  ;;  %v6552_v53 = vld [vmem:[%s15275_s13 + $0x38] sm:$0xff] }
 0x804   :  { %8302 = vmatprep.subr.bf16.mxu0 %v9572_v24  ;;  %v9627_v24 = vcombine.low %v6618_v35, %v6622_v54  ;;  %v9642_v2 = vcombine.high %v6633_v56, %v6637_v22  ;;  %v6555_v54 = vld [vmem:[%s15275_s13 + $0x50] sm:$0xff] }
 0x806   :  { %8260 = vmatpush1.bf16.msra.mxu1 %v9569_v31  ;;  %v6638_v31 = vld [vmem:[%s15275_s13 + $0x2e8] sm:$0xff] }
 0x807   :  { %8303 = vmatpush1.bf16.msra.mxu0 %v9571_v28  ;;  %8261 = vmatprep.subr.bf16.mxu1 %v9578_v9  ;;  %v9633_v28 = vcombine.low %v6625_v27, %v6629_v43  ;;  %v6641_v9 = vld [vmem:[%s15275_s13 + $0x300] sm:$0xff]  ;;  %v9644_v23 = vcombine.high %v6634_v58, %v6638_v31  ;;  %v6556_v27 = vld [vmem:[%s15275_s13 + $0x58] sm:$0xff] }
 0x808   :  { %8304 = vmatprep.subr.bf16.mxu0 %v9580_v37  ;;  %v9635_v37 = vcombine.low %v6626_v12, %v6630_v36  ;;  %v9650_v14 = vcombine.high %v6641_v9, %v6645_v63  ;;  %v6560_v43 = vld [vmem:[%s15275_s13 + $0x78] sm:$0xff]  ;;  %v6563_v12 = vld [vmem:[%s15275_s13 + $0x90] sm:$0xff] }
 0x809   :  { %v6567_v36 = vld [vmem:[%s15275_s13 + $0xb0] sm:$0xff] }
 0x80a   :  { %8262 = vmatpush1.bf16.msra.mxu1 %v9577_v3  ;;  %v6646_v3 = vld [vmem:[%s15275_s13 + $0x328] sm:$0xff] }
 0x80b   :  { %8305 = vmatpush1.bf16.msra.mxu0 %v9579_v48  ;;  %8263 = vmatprep.subr.bf16.mxu1 %v9586_v51  ;;  %v9641_v48 = vcombine.low %v6633_v56, %v6637_v22  ;;  %v6649_v51 = vld [vmem:[%s15275_s13 + $0x340] sm:$0xff]  ;;  %v9652_v33 = vcombine.high %v6642_v61, %v6646_v3  ;;  %v6568_v56 = vld [vmem:[%s15275_s13 + $0xb8] sm:$0xff] }
 0x80c   :  { %8306 = vmatprep.subr.bf16.mxu0 %v9588_v40  ;;  %v9643_v40 = vcombine.low %v6634_v58, %v6638_v31  ;;  %v9658_v38 = vcombine.high %v6649_v51, %v6653_v17  ;;  %v6571_v31 = vld [vmem:[%s15275_s13 + $0xd0] sm:$0xff] }
 0x80e   :  { %8264 = vmatpush1.bf16.msra.mxu1 %v9585_v25  ;;  %v6654_v25 = vld [vmem:[%s15275_s13 + $0x368] sm:$0xff] }
 0x80f   :  { %8307 = vmatpush1.bf16.msra.mxu0 %v9587_v0  ;;  %8265 = vmatprep.subr.bf16.mxu1 %v9594_v6  ;;  %v9649_v0 = vcombine.low %v6641_v9, %v6645_v63  ;;  %v6657_v6 = vld [vmem:[%s15275_s13 + $0x380] sm:$0xff]  ;;  %v9660_v10 = vcombine.high %v6650_v19, %v6654_v25  ;;  %v6576_v9 = vld [vmem:[%s15275_s13 + $0xf8] sm:$0xff] }
 0x810   :  { %8308 = vmatprep.subr.bf16.mxu0 %v9596_v29  ;;  %v9651_v29 = vcombine.low %v6642_v61, %v6646_v3  ;;  %v9666_v4 = vcombine.high %v6657_v6, %v6661_v30  ;;  %v9665_v34 = vcombine.low %v6657_v6, %v6661_v30  ;;  %v6579_v61 = vld [vmem:[%s15275_s13 + $0x110] sm:$0xff] }
 0x811   :  { %v6583_v3 = vld [vmem:[%s15275_s13 + $0x130] sm:$0xff] }
 0x812   :  { %8266 = vmatpush1.bf16.msra.mxu1 %v9593_v39  ;;  %v6662_v39 = vld [vmem:[%s15275_s13 + $0x3a8] sm:$0xff]  ;;  %v9589_v6 = vcombine.low %v6579_v61, %v6583_v3 }
 0x813   :  { %8309 = vmatpush1.bf16.msra.mxu0 %v9595_v44  ;;  %8267 = vmatprep.subr.bf16.mxu1 %v9602_v15  ;;  %v9657_v44 = vcombine.low %v6649_v51, %v6653_v17  ;;  %v6665_v15 = vld [vmem:[%s15275_s13 + $0x3c0] sm:$0xff]  ;;  %v9668_v26 = vcombine.high %v6658_v45, %v6662_v39 }
 0x814   :  { %8310 = vmatprep.subr.bf16.mxu0 %v9604_v8  ;;  %v9659_v8 = vcombine.low %v6650_v19, %v6654_v25  ;;  %v9673_v47 = vcombine.low %v6665_v15, %v6669_v60  ;;  %v6587_v19 = vld [vmem:[%s15275_s13 + $0x150] sm:$0xff] }
 0x815   :  { %v6591_v25 = vld [vmem:[%s15275_s13 + $0x170] sm:$0xff] }
 0x816   :  { %8268 = vmatpush1.bf16.msra.mxu1 %v9601_v13  ;;  %v6666_v13 = vld [vmem:[%s15275_s13 + $0x3c8] sm:$0xff] }
 0x817   :  { %8311 = vmatpush1.bf16.msra.mxu0 %v9603_v57  ;;  %8269 = vmatprep.subr.bf16.mxu1 %v9610_v21  ;;  %v9667_v57 = vcombine.low %v6658_v45, %v6662_v39  ;;  %v9674_v21 = vcombine.high %v6665_v15, %v6669_v60  ;;  %v9676_v50 = vcombine.high %v6666_v13, %v6670_v32  ;;  %v6595_v45 = vld [vmem:[%s15275_s13 + $0x190] sm:$0xff] }
 0x818   :  { %8312 = vmatprep.subr.bf16.mxu0 %v9612_v55  ;;  %v6547_v55 = vld [vmem:[%s15275_s13 + $0x10] sm:$0xff]  ;;  %v9597_v15 = vcombine.low %v6587_v19, %v6591_v25 }
 0x819   :  { %v6599_v39 = vld [vmem:[%s15275_s13 + $0x1b0] sm:$0xff] }
 0x81a   :  { %8270 = vmatpush1.bf16.msra.mxu1 %v9609_v42  ;;  %v6548_v42 = vld [vmem:[%s15275_s13 + $0x18] sm:$0xff] }
 0x81b   :  { %8313 = vmatpush1.bf16.msra.mxu0 %v9611_v1  ;;  %8271 = vmatprep.subr.bf16.mxu1 %v9618_v46  ;;  %v9675_v1 = vcombine.low %v6666_v13, %v6670_v32  ;;  %v9558_v46 = vcombine.high %v6547_v55, %v6551_v49  ;;  %v9560_v35 = vcombine.high %v6548_v42, %v6552_v53  ;;  %v6607_v13 = vld [vmem:[%s15275_s13 + $0x1f0] sm:$0xff]  ;;  %v6604_v32 = vld [vmem:[%s15275_s13 + $0x1d8] sm:$0xff] }
 0x81c   :  { %8314 = vmatprep.subr.bf16.mxu0 %v9620_v20  ;;  %v6559_v20 = vld [vmem:[%s15275_s13 + $0x70] sm:$0xff] }
 0x81d   :  { %v9565_v22 = vcombine.low %v6555_v54, %v6559_v20 }
 0x81e   :  { %8272 = vmatpush1.bf16.msra.mxu1 %v9617_v5  ;;  %v9557_v5 = vcombine.low %v6547_v55, %v6551_v49  ;;  %v6611_v49 = vld [vmem:[%s15275_s13 + $0x210] sm:$0xff] }
 0x81f   :  { %8315 = vmatpush1.bf16.msra.mxu0 %v9619_v7  ;;  %8273 = vmatprep.subr.bf16.mxu1 %v9626_v11  ;;  %v9559_v7 = vcombine.low %v6548_v42, %v6552_v53  ;;  %v9566_v11 = vcombine.high %v6555_v54, %v6559_v20  ;;  %v6615_v42 = vld [vmem:[%s15275_s13 + $0x230] sm:$0xff]  ;;  %v6612_v53 = vld [vmem:[%s15275_s13 + $0x218] sm:$0xff] }
 0x820   :  { %8316 = vmatprep.subr.bf16.mxu0 %v9628_v41  ;;  %v9568_v41 = vcombine.high %v6556_v27, %v6560_v43  ;;  %v6619_v20 = vld [vmem:[%s15275_s13 + $0x250] sm:$0xff] }
 0x822   :  { %8274 = vmatpush1.bf16.msra.mxu1 %v9625_v59  ;;  %v6564_v59 = vld [vmem:[%s15275_s13 + $0x98] sm:$0xff] }
 0x823   :  { %8317 = vmatpush1.bf16.msra.mxu0 %v9627_v24  ;;  %8275 = vmatprep.subr.bf16.mxu1 %v9634_v16  ;;  %v9567_v24 = vcombine.low %v6556_v27, %v6560_v43  ;;  %v9574_v16 = vcombine.high %v6563_v12, %v6567_v36  ;;  %v9576_v58 = vcombine.high %v6564_v59, %v6568_v56  ;;  %v6620_v27 = vld [vmem:[%s15275_s13 + $0x258] sm:$0xff] }
 0x824   :  { %8318 = vmatprep.subr.bf16.mxu0 %v9636_v62  ;;  %v6575_v62 = vld [vmem:[%s15275_s13 + $0xf0] sm:$0xff]  ;;  %v9575_v63 = vcombine.low %v6564_v59, %v6568_v56  ;;  %v6624_v43 = vld [vmem:[%s15275_s13 + $0x278] sm:$0xff] }
 0x825   :  { %v9581_v51 = vcombine.low %v6571_v31, %v6575_v62  ;;  %v6631_v59 = vld [vmem:[%s15275_s13 + $0x2b0] sm:$0xff]  ;;  %v6628_v56 = vld [vmem:[%s15275_s13 + $0x298] sm:$0xff] }
 0x826   :  { %8276 = vmatpush1.bf16.msra.mxu1 %v9633_v28  ;;  %v6572_v28 = vld [vmem:[%s15275_s13 + $0xd8] sm:$0xff] }
 0x827   :  { %8319 = vmatpush1.bf16.msra.mxu0 %v9635_v37  ;;  %8277 = vmatprep.subr.bf16.mxu1 %v9642_v2  ;;  %v9582_v37 = vcombine.high %v6571_v31, %v6575_v62  ;;  %v9584_v2 = vcombine.high %v6572_v28, %v6576_v9  ;;  %v9583_v17 = vcombine.low %v6572_v28, %v6576_v9  ;;  %v6635_v62 = vld [vmem:[%s15275_s13 + $0x2d0] sm:$0xff]  ;;  %v6636_v9 = vld [vmem:[%s15275_s13 + $0x2d8] sm:$0xff] }
 0x828   :  { %8320 = vmatprep.subr.bf16.mxu0 %v9644_v23  ;;  %v6580_v23 = vld [vmem:[%s15275_s13 + $0x118] sm:$0xff]  ;;  %v6639_v28 = vld [vmem:[%s15275_s13 + $0x2f0] sm:$0xff] }
 0x82a   :  { %8278 = vmatpush1.bf16.msra.mxu1 %v9641_v48  ;;  %v6584_v48 = vld [vmem:[%s15275_s13 + $0x138] sm:$0xff] }
 0x82b   :  { %8321 = vmatpush1.bf16.msra.mxu0 %v9643_v40  ;;  %8279 = vmatprep.subr.bf16.mxu1 %v9650_v14  ;;  %v9590_v40 = vcombine.high %v6579_v61, %v6583_v3  ;;  %v9592_v14 = vcombine.high %v6580_v23, %v6584_v48  ;;  %v9591_v30 = vcombine.low %v6580_v23, %v6584_v48  ;;  %v6643_v3 = vld [vmem:[%s15275_s13 + $0x310] sm:$0xff]  ;;  %v6644_v48 = vld [vmem:[%s15275_s13 + $0x318] sm:$0xff] }
 0x82c   :  { %8322 = vmatprep.subr.bf16.mxu0 %v9652_v33  ;;  %v6588_v33 = vld [vmem:[%s15275_s13 + $0x158] sm:$0xff]  ;;  %v6647_v23 = vld [vmem:[%s15275_s13 + $0x330] sm:$0xff] }
 0x82e   :  { %8280 = vmatpush1.bf16.msra.mxu1 %v9649_v0  ;;  %v6592_v0 = vld [vmem:[%s15275_s13 + $0x178] sm:$0xff] }
 0x82f   :  { %8323 = vmatpush1.bf16.msra.mxu0 %v9651_v29  ;;  %8281 = vmatprep.subr.bf16.mxu1 %v9658_v38  ;;  %v9598_v29 = vcombine.high %v6587_v19, %v6591_v25  ;;  %v9600_v38 = vcombine.high %v6588_v33, %v6592_v0  ;;  %v9599_v60 = vcombine.low %v6588_v33, %v6592_v0  ;;  %v6651_v25 = vld [vmem:[%s15275_s13 + $0x350] sm:$0xff]  ;;  %v6652_v0 = vld [vmem:[%s15275_s13 + $0x358] sm:$0xff] }
 0x830   :  { %8324 = vmatprep.subr.bf16.mxu0 %v9660_v10  ;;  %v6596_v10 = vld [vmem:[%s15275_s13 + $0x198] sm:$0xff]  ;;  %v6655_v33 = vld [vmem:[%s15275_s13 + $0x370] sm:$0xff] }
 0x832   :  { %8282 = vmatpush1.bf16.msra.mxu1 %v9657_v44  ;;  %v6600_v44 = vld [vmem:[%s15275_s13 + $0x1b8] sm:$0xff] }
 0x833   :  { %8325 = vmatpush1.bf16.msra.mxu0 %v9659_v8  ;;  %8283 = vmatprep.subr.bf16.mxu1 %v9666_v4  ;;  %v9606_v8 = vcombine.high %v6595_v45, %v6599_v39  ;;  %v9608_v4 = vcombine.high %v6596_v10, %v6600_v44 }
 0x834   :  { %8326 = vmatprep.subr.bf16.mxu0 %v9668_v26  ;;  %v6603_v26 = vld [vmem:[%s15275_s13 + $0x1d0] sm:$0xff] }
 0x836   :  { %8284 = vmatpush1.bf16.msra.mxu1 %v9665_v34  ;;  %v6608_v34 = vld [vmem:[%s15275_s13 + $0x1f8] sm:$0xff] }
 0x837   :  { %8327 = vmatpush1.bf16.msra.mxu0 %v9667_v57  ;;  %8285 = vmatprep.subr.bf16.mxu1 %v9674_v21  ;;  %v9605_v57 = vcombine.low %v6595_v45, %v6599_v39  ;;  %v9607_v21 = vcombine.low %v6596_v10, %v6600_v44  ;;  %v9616_v55 = vcombine.high %v6604_v32, %v6608_v34  ;;  %v6659_v39 = vld [vmem:[%s15275_s13 + $0x390] sm:$0xff]  ;;  %v6660_v44 = vld [vmem:[%s15275_s13 + $0x398] sm:$0xff] }
 0x838   :  { %8328 = vmatprep.subr.bf16.mxu0 %v9676_v50  ;;  %v9614_v50 = vcombine.high %v6603_v26, %v6607_v13  ;;  %v6663_v10 = vld [vmem:[%s15275_s13 + $0x3b0] sm:$0xff] }
 0x83a   :  { %8286 = vmatpush1.bf16.msra.mxu1 %v9673_v47  ;;  %v6616_v47 = vld [vmem:[%s15275_s13 + $0x238] sm:$0xff] }
 0x83b   :  { %8329 = vmatpush1.bf16.msra.mxu0 %v9675_v1  ;;  %8341 = vmatprep.subr.bf16.mxu1 %v9558_v46  ;;  %v9613_v1 = vcombine.low %v6603_v26, %v6607_v13  ;;  %v9615_v46 = vcombine.low %v6604_v32, %v6608_v34  ;;  %v9624_v54 = vcombine.high %v6612_v53, %v6616_v47  ;;  %v6667_v13 = vld [vmem:[%s15275_s13 + $0x3d0] sm:$0xff]  ;;  %v6668_v34 = vld [vmem:[%s15275_s13 + $0x3d8] sm:$0xff] }
 0x83c   :  { %8384 = vmatprep.subr.bf16.mxu0 %v9560_v35  ;;  %v9622_v35 = vcombine.high %v6611_v49, %v6615_v42  ;;  %v6671_v32 = vld [vmem:[%s15275_s13 + $0x3f0] sm:$0xff] }
 0x83d   :  { %8288 = vmatmul.mubr.bf16.vlgmr.msra.gmra.mrb[80].mxu1 %v14542_v18 }
 0x83e   :  { %8331 = vmatmul.mubr.bf16.vlgmr.msra.gmra.mrb[68].mxu0 %v14542_v18  ;;  %8342 = vmatpush1.bf16.msra.mxu1 %v9557_v5  ;;  %v6623_v5 = vld [vmem:[%s15275_s13 + $0x270] sm:$0xff] }
 0x83f   :  { %8385 = vmatpush1.bf16.msra.mxu0 %v9559_v7  ;;  %8373 = vmatprep.mubr.bf16.mxu1 %v14550_v52  ;;  %v9621_v7 = vcombine.low %v6611_v49, %v6615_v42  ;;  %v9677_v42 = vcombine.low %v6667_v13, %v6671_v32 }
 0x840   :  { %8416 = vmatprep.mubr.bf16.mxu0 %v14550_v52  ;;  %8343 = vmatprep.subr.bf16.mxu1 %v9566_v11  ;;  %v9573_v52 = vcombine.low %v6563_v12, %v6567_v36  ;;  %v9623_v11 = vcombine.low %v6612_v53, %v6616_v47  ;;  %v9630_v12 = vcombine.high %v6619_v20, %v6623_v5  ;;  %v10321_v47 = vld [vmem:[%s15276_s16 + $0x40] sm:$0xff]  }
 0x841   :  { %8386 = vmatprep.subr.bf16.mxu0 %v9568_v41  ;;  %v9632_v36 = vcombine.high %v6620_v27, %v6624_v43  ;;  %v6627_v41 = vld [vmem:[%s15275_s13 + $0x290] sm:$0xff] }
 0x842   :  { %8344 = vmatpush1.bf16.msra.mxu1 %v9565_v22  ;;  %v6632_v22 = vld [vmem:[%s15275_s13 + $0x2b8] sm:$0xff] }
 0x843   :  { %8387 = vmatpush1.bf16.msra.mxu0 %v9567_v24  ;;  %8345 = vmatprep.subr.bf16.mxu1 %v9574_v16  ;;  %v9629_v24 = vcombine.low %v6619_v20, %v6623_v5  ;;  %v9631_v16 = vcombine.low %v6620_v27, %v6624_v43  ;;  %v9640_v31 = vcombine.high %v6628_v56, %v6632_v22  ;;  %v10326_v20 = vld [vmem:[%s15276_s16 + $0xc8] sm:$0xff]   ;;  %v10329_v43 = vld [vmem:[%s15276_s16 + $0x50] sm:$0xff]  }
 0x844   :  { %8388 = vmatprep.subr.bf16.mxu0 %v9576_v58  ;;  %v9638_v58 = vcombine.high %v6627_v41, %v6631_v59  ;;  %v10327_v5 = vld [vmem:[%s15276_s16 + $0x8] sm:$0xff]  }
 0x845   :  { %v10328_v27 = vld [vmem:[%s15276_s16 + $0x88] sm:$0xff]  }
 0x846   :  { %8346 = vmatpush1.bf16.msra.mxu1 %v9573_v52  ;;  %v6640_v52 = vld [vmem:[%s15275_s13 + $0x2f8] sm:$0xff] }
 0x847   :  { %8389 = vmatpush1.bf16.msra.mxu0 %v9575_v63  ;;  %8347 = vmatprep.subr.bf16.mxu1 %v9582_v37  ;;  %v9637_v63 = vcombine.low %v6627_v41, %v6631_v59  ;;  %v9639_v37 = vcombine.low %v6628_v56, %v6632_v22  ;;  %v9648_v61 = vcombine.high %v6636_v9, %v6640_v52  ;;  %v10335_v41 = vld [vmem:[%s15276_s16 + $0x18] sm:$0xff]   ;;  %v10337_v56 = vld [vmem:[%s15276_s16 + $0x60] sm:$0xff]  }
 0x848   :  { %8390 = vmatprep.subr.bf16.mxu0 %v9584_v2  ;;  %v9646_v2 = vcombine.high %v6635_v62, %v6639_v28  ;;  %v10336_v59 = vld [vmem:[%s15276_s16 + $0x98] sm:$0xff]   ;;  %v10338_v22 = vld [vmem:[%s15276_s16 + $0xe0] sm:$0xff]  }
 0x84a   :  { %8348 = vmatpush1.bf16.msra.mxu1 %v9581_v51  ;;  %v6648_v51 = vld [vmem:[%s15275_s13 + $0x338] sm:$0xff] }
 0x84b   :  { %8391 = vmatpush1.bf16.msra.mxu0 %v9583_v17  ;;  %8349 = vmatprep.subr.bf16.mxu1 %v9590_v40  ;;  %v9645_v17 = vcombine.low %v6635_v62, %v6639_v28  ;;  %v9647_v40 = vcombine.low %v6636_v9, %v6640_v52  ;;  %v9656_v19 = vcombine.high %v6644_v48, %v6648_v51  ;;  %v10343_v62 = vld [vmem:[%s15276_s16 + $0x28] sm:$0xff]   ;;  %v10345_v9 = vld [vmem:[%s15276_s16 + $0x70] sm:$0xff]  }
 0x84c   :  { %8392 = vmatprep.subr.bf16.mxu0 %v9592_v14  ;;  %v9654_v14 = vcombine.high %v6643_v3, %v6647_v23  ;;  %v10344_v28 = vld [vmem:[%s15276_s16 + $0xa8] sm:$0xff]   ;;  %v10346_v52 = vld [vmem:[%s15276_s16 + $0xf0] sm:$0xff]  }
 0x84e   :  { %8350 = vmatpush1.bf16.msra.mxu1 %v9589_v6  ;;  %v6656_v6 = vld [vmem:[%s15275_s13 + $0x378] sm:$0xff] }
 0x84f   :  { %8393 = vmatpush1.bf16.msra.mxu0 %v9591_v30  ;;  %8351 = vmatprep.subr.bf16.mxu1 %v9598_v29  ;;  %v9653_v30 = vcombine.low %v6643_v3, %v6647_v23  ;;  %v9655_v29 = vcombine.low %v6644_v48, %v6648_v51  ;;  %v9664_v45 = vcombine.high %v6652_v0, %v6656_v6  ;;  %v10351_v3 = vld [vmem:[%s15276_s16 + $0x38] sm:$0xff]   ;;  %v10353_v48 = vld [vmem:[%s15276_s16 + $0x140] sm:$0xff]  }
 0x850   :  { %8394 = vmatprep.subr.bf16.mxu0 %v9600_v38  ;;  %v9662_v38 = vcombine.high %v6651_v25, %v6655_v33  ;;  %v10352_v23 = vld [vmem:[%s15276_s16 + $0xb8] sm:$0xff]   ;;  %v10354_v51 = vld [vmem:[%s15276_s16 + $0x1c0] sm:$0xff]  }
 0x852   :  { %8352 = vmatpush1.bf16.msra.mxu1 %v9597_v15  ;;  %v6664_v15 = vld [vmem:[%s15275_s13 + $0x3b8] sm:$0xff] }
 0x853   :  { %8395 = vmatpush1.bf16.msra.mxu0 %v9599_v60  ;;  %8353 = vmatprep.subr.bf16.mxu1 %v9606_v8  ;;  %v9661_v60 = vcombine.low %v6651_v25, %v6655_v33  ;;  %v9663_v8 = vcombine.low %v6652_v0, %v6656_v6  ;;  %v9672_v26 = vcombine.high %v6660_v44, %v6664_v15 }
 0x854   :  { %8396 = vmatprep.subr.bf16.mxu0 %v9608_v4  ;;  %v9670_v4 = vcombine.high %v6659_v39, %v6663_v10 }
 0x856   :  { %8354 = vmatpush1.bf16.msra.mxu1 %v9605_v57  ;;  %v6672_v57 = vld [vmem:[%s15275_s13 + $0x3f8] sm:$0xff] }
 0x857   :  { %8397 = vmatpush1.bf16.msra.mxu0 %v9607_v21  ;;  %8355 = vmatprep.subr.bf16.mxu1 %v9614_v50  ;;  %v9669_v21 = vcombine.low %v6659_v39, %v6663_v10  ;;  %v9671_v50 = vcombine.low %v6660_v44, %v6664_v15  ;;  %v9680_v49 = vcombine.high %v6668_v34, %v6672_v57 }
 0x858   :  { %8398 = vmatprep.subr.bf16.mxu0 %v9616_v55  ;;  %v9678_v55 = vcombine.high %v6667_v13, %v6671_v32  ;;  %v9679_v53 = vcombine.low %v6668_v34, %v6672_v57 }
 0x85a   :  { %8356 = vmatpush1.bf16.msra.mxu1 %v9613_v1  ;;  %v10322_v1 = vld [vmem:[%s15276_s16 + $0xc0] sm:$0xff]  }
 0x85b   :  { %8399 = vmatpush1.bf16.msra.mxu0 %v9615_v46  ;;  %8357 = vmatprep.subr.bf16.mxu1 %v9622_v35  ;;  %v10323_v46 = vld [vmem:[%s15276_s16] sm:$0xff]  }
 0x85c   :  { %8400 = vmatprep.subr.bf16.mxu0 %v9624_v54  ;;  %v10324_v35 = vld [vmem:[%s15276_s16 + $0x80] sm:$0xff]   ;;  %v10325_v54 = vld [vmem:[%s15276_s16 + $0x48] sm:$0xff]  }
 0x85e   :  { %8358 = vmatpush1.bf16.msra.mxu1 %v9621_v7  ;;  %v10331_v7 = vld [vmem:[%s15276_s16 + $0x10] sm:$0xff]  }
 0x85f   :  { %8401 = vmatpush1.bf16.msra.mxu0 %v9623_v11  ;;  %8359 = vmatprep.subr.bf16.mxu1 %v9630_v12  ;;  %v10332_v11 = vld [vmem:[%s15276_s16 + $0x90] sm:$0xff]   ;;  %v10333_v12 = vld [vmem:[%s15276_s16 + $0x58] sm:$0xff]  }
 0x860   :  { %8402 = vmatprep.subr.bf16.mxu0 %v9632_v36  ;;  %v10334_v36 = vld [vmem:[%s15276_s16 + $0xd8] sm:$0xff]  }
 0x862   :  { %8360 = vmatpush1.bf16.msra.mxu1 %v9629_v24  ;;  %v10339_v24 = vld [vmem:[%s15276_s16 + $0x20] sm:$0xff]  }
 0x863   :  { %8403 = vmatpush1.bf16.msra.mxu0 %v9631_v16  ;;  %8361 = vmatprep.subr.bf16.mxu1 %v9638_v58  ;;  %v10340_v16 = vld [vmem:[%s15276_s16 + $0xa0] sm:$0xff]   ;;  %v10341_v58 = vld [vmem:[%s15276_s16 + $0x68] sm:$0xff]  }
 0x864   :  { %8404 = vmatprep.subr.bf16.mxu0 %v9640_v31  ;;  %v10342_v31 = vld [vmem:[%s15276_s16 + $0xe8] sm:$0xff]  }
 0x866   :  { %8362 = vmatpush1.bf16.msra.mxu1 %v9637_v63  ;;  %v10347_v63 = vld [vmem:[%s15276_s16 + $0x30] sm:$0xff]  }
 0x867   :  { %8405 = vmatpush1.bf16.msra.mxu0 %v9639_v37  ;;  %8363 = vmatprep.subr.bf16.mxu1 %v9646_v2  ;;  %v10348_v37 = vld [vmem:[%s15276_s16 + $0xb0] sm:$0xff]   ;;  %v10349_v2 = vld [vmem:[%s15276_s16 + $0x78] sm:$0xff]  }
 0x868   :  { %8406 = vmatprep.subr.bf16.mxu0 %v9648_v61  ;;  %v10350_v61 = vld [vmem:[%s15276_s16 + $0xf8] sm:$0xff]  }
 0x86a   :  { %8364 = vmatpush1.bf16.msra.mxu1 %v9645_v17  ;;  %v15141_v17 = vld [vmem:[%s15277_s15] sm:$0xff] }
 0x86b   :  { %8407 = vmatpush1.bf16.msra.mxu0 %v9647_v40  ;;  %8365 = vmatprep.subr.bf16.mxu1 %v9654_v14  ;;  %v16468_v40 = vld [vmem:[#allocation10_spill] sm:$0xff] }
 0x86c   :  { %8408 = vmatprep.subr.bf16.mxu0 %v9656_v19  ;;  %v8439_v14 = vsub.s32 2, %v16468_v40  ;;  %v8443_v19 = vsub.s32 3, %v16468_v40  ;;  %v16469_v25 = vsub.s32 0, %v16468_v40  ;;  %v16470_v6 = vsub.s32 1, %v16468_v40 }
 0x86e   :  { %8366 = vmatpush1.bf16.msra.mxu1 %v9653_v30  ;;  %v8432_v33 = vrot.slane %v15141_v17, %v16469_v25  ;;  %v8440_v0 = vrot.slane %v15141_v17, %v8439_v14  ;;  %v8436_v30 = vrot.slane %v15141_v17, %v16470_v6  ;;  %v10381_v14 = vld [vmem:[%s15276_s16 + $0x178] sm:$0xff]   ;;  %v8455_v6 = vsub.s32 6, %v16468_v40 }
 0x86f   :  { %8409 = vmatpush1.bf16.msra.mxu0 %v9655_v29  ;;  %8367 = vmatprep.subr.bf16.mxu1 %v9662_v38  ;;  %v8444_v29 = vrot.slane %v15141_v17, %v8443_v19  ;;  %v10382_v19 = vld [vmem:[%s15276_s16 + $0x1f8] sm:$0xff]  }
 0x870   :  { %8410 = vmatprep.subr.bf16.mxu0 %v9664_v45  ;;  %v10383_v25 = vld [vmem:[%s15276_s16 + $0x138] sm:$0xff]  }
 0x872   :  { %8368 = vmatpush1.bf16.msra.mxu1 %v9661_v60 }
 0x873   :  { %8411 = vmatpush1.bf16.msra.mxu0 %v9663_v8  ;;  %8369 = vmatprep.subr.bf16.mxu1 %v9670_v4 }
 0x874   :  { %8412 = vmatprep.subr.bf16.mxu0 %v9672_v26 }
 0x876   :  { %8370 = vmatpush1.bf16.msra.mxu1 %v9669_v21 }
 0x877   :  { %8413 = vmatpush1.bf16.msra.mxu0 %v9671_v50  ;;  %8371 = vmatprep.subr.bf16.mxu1 %v9678_v55 }
 0x878   :  { %8414 = vmatprep.subr.bf16.mxu0 %v9680_v49 }
 0x87a   :  { %8372 = vmatpush1.bf16.msra.mxu1 %v9677_v42 }
 0x87b   :  { %8415 = vmatpush1.bf16.msra.mxu0 %v9679_v53  ;;  %9890 = vmatprep.subr.bf16.mxu1 %v10321_v47 }
 0x87c   :  { %9912 = vmatprep.subr.bf16.mxu0 %v10322_v1 }
 0x87d   :  { %8374 = vmatmul.mubr.bf16.vlgmr.msra.gmra.mrb[84].mxu1 %v14542_v18 }
 0x87e   :  { %8417 = vmatmul.mubr.bf16.vlgmr.msra.gmra.mrb[72].mxu0 %v14542_v18  ;;  %9891 = vmatpush3.bf16.msra.mxu1 %v10323_v46  ;;  %v10330_v18 = vld [vmem:[%s15276_s16 + $0xd0] sm:$0xff]  }
 0x87f   :  { %9913 = vmatpush3.bf16.msra.mxu0 %v10324_v35  ;;  %9892 = vmatprep.subr.bf16.mxu1 %v10325_v54 }
 0x880   :  { %9914 = vmatprep.subr.bf16.mxu0 %v10326_v20 }
 0x882   :  { %9893 = vmatpush3.bf16.msra.mxu1 %v10327_v5 }
 0x883   :  { %9915 = vmatpush3.bf16.msra.mxu0 %v10328_v27  ;;  %9894 = vmatprep.subr.bf16.mxu1 %v10329_v43  ;;  %v10355_v27 = vld [vmem:[%s15276_s16 + $0x100] sm:$0xff]  }
 0x884   :  { %9916 = vmatprep.subr.bf16.mxu0 %v10330_v18  ;;  %v10356_v18 = vld [vmem:[%s15276_s16 + $0x180] sm:$0xff]  }
 0x886   :  { %9895 = vmatpush3.bf16.msra.mxu1 %v10331_v7  ;;  %v10357_v7 = vld [vmem:[%s15276_s16 + $0x148] sm:$0xff]  }
 0x887   :  { %9917 = vmatpush3.bf16.msra.mxu0 %v10332_v11  ;;  %9896 = vmatprep.subr.bf16.mxu1 %v10333_v12  ;;  %v10358_v11 = vld [vmem:[%s15276_s16 + $0x1c8] sm:$0xff]  }
 0x888   :  { %9918 = vmatprep.subr.bf16.mxu0 %v10334_v36  ;;  %v10359_v12 = vld [vmem:[%s15276_s16 + $0x108] sm:$0xff]  }
 0x889   :  { %v10360_v36 = vld [vmem:[%s15276_s16 + $0x188] sm:$0xff]  }
 0x88a   :  { %9897 = vmatpush3.bf16.msra.mxu1 %v10335_v41  ;;  %v10361_v41 = vld [vmem:[%s15276_s16 + $0x150] sm:$0xff]  }
 0x88b   :  { %9919 = vmatpush3.bf16.msra.mxu0 %v10336_v59  ;;  %9898 = vmatprep.subr.bf16.mxu1 %v10337_v56  ;;  %v10362_v59 = vld [vmem:[%s15276_s16 + $0x1d0] sm:$0xff]  }
 0x88c   :  { %9920 = vmatprep.subr.bf16.mxu0 %v10338_v22  ;;  %v10363_v56 = vld [vmem:[%s15276_s16 + $0x110] sm:$0xff]  }
 0x88d   :  { %v10364_v22 = vld [vmem:[%s15276_s16 + $0x190] sm:$0xff]  }
 0x88e   :  { %9899 = vmatpush3.bf16.msra.mxu1 %v10339_v24  ;;  %v10365_v24 = vld [vmem:[%s15276_s16 + $0x158] sm:$0xff]  }
 0x88f   :  { %9921 = vmatpush3.bf16.msra.mxu0 %v10340_v16  ;;  %9900 = vmatprep.subr.bf16.mxu1 %v10341_v58  ;;  %v10366_v16 = vld [vmem:[%s15276_s16 + $0x1d8] sm:$0xff]  }
 0x890   :  { %9922 = vmatprep.subr.bf16.mxu0 %v10342_v31  ;;  %v10367_v58 = vld [vmem:[%s15276_s16 + $0x118] sm:$0xff]  }
 0x891   :  { %v10368_v31 = vld [vmem:[%s15276_s16 + $0x198] sm:$0xff]  }
 0x892   :  { %9901 = vmatpush3.bf16.msra.mxu1 %v10343_v62  ;;  %v10369_v62 = vld [vmem:[%s15276_s16 + $0x160] sm:$0xff]  }
 0x893   :  { %9923 = vmatpush3.bf16.msra.mxu0 %v10344_v28  ;;  %9902 = vmatprep.subr.bf16.mxu1 %v10345_v9  ;;  %v10370_v28 = vld [vmem:[%s15276_s16 + $0x1e0] sm:$0xff]  }
 0x894   :  { %9924 = vmatprep.subr.bf16.mxu0 %v10346_v52  ;;  %v10371_v9 = vld [vmem:[%s15276_s16 + $0x120] sm:$0xff]  }
 0x895   :  { %v10372_v52 = vld [vmem:[%s15276_s16 + $0x1a0] sm:$0xff]  }
 0x896   :  { %9903 = vmatpush3.bf16.msra.mxu1 %v10347_v63  ;;  %v10373_v63 = vld [vmem:[%s15276_s16 + $0x168] sm:$0xff]  }
 0x897   :  { %9925 = vmatpush3.bf16.msra.mxu0 %v10348_v37  ;;  %9904 = vmatprep.subr.bf16.mxu1 %v10349_v2  ;;  %v10374_v37 = vld [vmem:[%s15276_s16 + $0x1e8] sm:$0xff]  }
 0x898   :  { %9926 = vmatprep.subr.bf16.mxu0 %v10350_v61  ;;  %v10375_v2 = vld [vmem:[%s15276_s16 + $0x128] sm:$0xff]  }
 0x899   :  { %v10376_v61 = vld [vmem:[%s15276_s16 + $0x1a8] sm:$0xff]  }
 0x89a   :  { %9905 = vmatpush3.bf16.msra.mxu1 %v10351_v3  ;;  %v10377_v3 = vld [vmem:[%s15276_s16 + $0x170] sm:$0xff]  }
 0x89b   :  { %9927 = vmatpush3.bf16.msra.mxu0 %v10352_v23  ;;  %9934 = vmatprep.subr.bf16.mxu1 %v10353_v48  ;;  %v10378_v23 = vld [vmem:[%s15276_s16 + $0x1f0] sm:$0xff]  }
 0x89c   :  { %9956 = vmatprep.subr.bf16.mxu0 %v10354_v51  ;;  %v10379_v48 = vld [vmem:[%s15276_s16 + $0x130] sm:$0xff]  }
 0x89d   :  { %v10380_v51 = vld [vmem:[%s15276_s16 + $0x1b0] sm:$0xff]  }
 0x910   :  { %v8289_v38 = vpop.f32.mrb[80].mxu1 }
 0x911   :  { %v8469_v45 = vadd.f32 %v8432_v33, %v8289_v38  ;;  %v8332_v39 = vpop.f32.mrb[68].mxu0  ;;  %v8291_v10 = vpop.f32.mrb[81].mxu1 }
 0x912   :  { %v8471_v44 = vadd.f32 %v8440_v0, %v8332_v39  ;;  %v8470_v15 = vadd.f32 %v8436_v30, %v8291_v10  ;;  %v8334_v60 = vpop.f32.mrb[69].mxu0  ;;  %v8293_v8 = vpop.f32.mrb[82].mxu1 }
 0x913   :  { %v8472_v4 = vadd.f32 %v8444_v29, %v8334_v60  ;;  %v8477_v26 = vadd.f32 %v8432_v33, %v8293_v8  ;;  %v8336_v13 = vpop.f32.mrb[70].mxu0  ;;  %v8295_v32 = vpop.f32.mrb[83].mxu1  ;;  %v8485_v50 = vmax.f32 %v8469_v45, 0.0  ;;  %v10384_v33 = vld [vmem:[%s15276_s16 + $0x1b8] sm:$0xff]   ;;  %v8456_v45 = vrot.slane %v15141_v17, %v8455_v6 }
 0x914   :  { %v8479_v34 = vadd.f32 %v8440_v0, %v8336_v13  ;;  %v8478_v57 = vadd.f32 %v8436_v30, %v8295_v32  ;;  %v8338_v21 = vpop.f32.mrb[71].mxu0  ;;  %v8487_v42 = vmax.f32 %v8471_v44, 0.0  ;;  %v8486_v53 = vmax.f32 %v8470_v15, 0.0 }
 0x915   :  { %v8493_v55 = vmax.f32 %v8477_v26, 0.0  ;;  %v8480_v49 = vadd.f32 %v8444_v29, %v8338_v21  ;;  %v8488_v46 = vmax.f32 %v8472_v4, 0.0  ;;  %v8447_v0 = vsub.s32 4, %v16468_v40 }
 0x916   :  { %v8495_v47 = vmax.f32 %v8479_v34, 0.0  ;;  %v8494_v1 = vmax.f32 %v8478_v57, 0.0  ;;  %v8451_v30 = vsub.s32 5, %v16468_v40  ;;  %v8459_v29 = vsub.s32 7, %v16468_v40 }
 0x917   :  { %v8501_v35 = vpack.c.bf16 %v8493_v55, %v8485_v50  ;;  %v8496_v54 = vmax.f32 %v8480_v49, 0.0  ;;  %v8448_v38 = vrot.slane %v15141_v17, %v8447_v0 }
 0x918   :  { %v8503_v20 = vpack.c.bf16 %v8495_v47, %v8487_v42  ;;  %v8502_v5 = vpack.c.bf16 %v8494_v1, %v8486_v53  ;;  %v8452_v39 = vrot.slane %v15141_v17, %v8451_v30  ;;  %v8460_v10 = vrot.slane %v15141_v17, %v8459_v29 }
 0x919   :  { %v8504_v43 = vpack.c.bf16 %v8496_v54, %v8488_v46 }
 0x91a   :  { %9060 = vmatprep.mubr.bf16.mxu1 %v8502_v5 }
 0x91b   :  { %9101 = vmatprep.mubr.bf16.mxu0 %v8504_v43  ;;  %9061 = vmatmul.mubr.bf16.vlgmr.msra.gmra.mrb[88].mxu1 %v8501_v35 }
 0x91c   :  { %9102 = vmatmul.mubr.bf16.vlgmr.msra.gmra.mrb[76].mxu0 %v8503_v20  ;;  %9935 = vmatpush3.bf16.msra.mxu1 %v10355_v27 }
 0x91d   :  { %9957 = vmatpush3.bf16.msra.mxu0 %v10356_v18  ;;  %9936 = vmatprep.subr.bf16.mxu1 %v10357_v7 }
 0x91e   :  { %9958 = vmatprep.subr.bf16.mxu0 %v10358_v11 }
 0x920   :  { %9937 = vmatpush3.bf16.msra.mxu1 %v10359_v12  ;;  %v9681_v12 = vld [vmem:[%s15278_s17] ss:$0 sm:$0xff] }
 0x921   :  { %9959 = vmatpush3.bf16.msra.mxu0 %v10360_v36  ;;  %9938 = vmatprep.subr.bf16.mxu1 %v10361_v41 }
 0x922   :  { %9960 = vmatprep.subr.bf16.mxu0 %v10362_v59 }
 0x924   :  { %9939 = vmatpush3.bf16.msra.mxu1 %v10363_v56 }
 0x925   :  { %9961 = vmatpush3.bf16.msra.mxu0 %v10364_v22  ;;  %9940 = vmatprep.subr.bf16.mxu1 %v10365_v24 }
 0x926   :  { %9962 = vmatprep.subr.bf16.mxu0 %v10366_v16 }
 0x928   :  { %9941 = vmatpush3.bf16.msra.mxu1 %v10367_v58 }
 0x929   :  { %9963 = vmatpush3.bf16.msra.mxu0 %v10368_v31  ;;  %9942 = vmatprep.subr.bf16.mxu1 %v10369_v62 }
 0x92a   :  { %9964 = vmatprep.subr.bf16.mxu0 %v10370_v28 }
 0x92c   :  { %9943 = vmatpush3.bf16.msra.mxu1 %v10371_v9 }
 0x92d   :  { %9965 = vmatpush3.bf16.msra.mxu0 %v10372_v52  ;;  %9944 = vmatprep.subr.bf16.mxu1 %v10373_v63 }
 0x92e   :  { %9966 = vmatprep.subr.bf16.mxu0 %v10374_v37 }
 0x930   :  { %9945 = vmatpush3.bf16.msra.mxu1 %v10375_v2 }
 0x931   :  { %9967 = vmatpush3.bf16.msra.mxu0 %v10376_v61  ;;  %9946 = vmatprep.subr.bf16.mxu1 %v10377_v3  ;;  %v16471_v3 = vlaneseq }
 0x932   :  { %9968 = vmatprep.subr.bf16.mxu0 %v10378_v23 }
 0x933   :  { %v9193_v23 = vand.u32 127, %v16471_v3 }
 0x934   :  { %9947 = vmatpush3.bf16.msra.mxu1 %v10379_v48 }
 0x935   :  { %9969 = vmatpush3.bf16.msra.mxu0 %v10380_v51  ;;  %9948 = vmatprep.subr.bf16.mxu1 %v10381_v14  ;;  %vm9194_vm9 = vcmp.lt.s32.totalorder %v9193_v23, 2 }
 0x936   :  { %9970 = vmatprep.subr.bf16.mxu0 %v10382_v19 }
 0x938   :  { %9949 = vmatpush3.bf16.msra.mxu1 %v10383_v25 }
 0x939   :  { %9971 = vmatpush3.bf16.msra.mxu0 %v10384_v33 }
 0x950   :  { %v8375_v44 = vpop.f32.mrb[84].mxu1 }
 0x951   :  { %v8473_v15 = vadd.f32 %v8448_v38, %v8375_v44  ;;  %v8418_v60 = vpop.f32.mrb[72].mxu0  ;;  %v8377_v8 = vpop.f32.mrb[85].mxu1 }
 0x952   :  { %v8475_v4 = vadd.f32 %v8456_v45, %v8418_v60  ;;  %v8474_v26 = vadd.f32 %v8452_v39, %v8377_v8  ;;  %v8420_v13 = vpop.f32.mrb[73].mxu0  ;;  %v8379_v32 = vpop.f32.mrb[86].mxu1 }
 0x953   :  { %v8476_v34 = vadd.f32 %v8460_v10, %v8420_v13  ;;  %v8481_v57 = vadd.f32 %v8448_v38, %v8379_v32  ;;  %v8422_v21 = vpop.f32.mrb[74].mxu0  ;;  %v8381_v40 = vpop.f32.mrb[87].mxu1  ;;  %v8489_v42 = vmax.f32 %v8473_v15, 0.0 }
 0x954   :  { %v8483_v50 = vadd.f32 %v8456_v45, %v8422_v21  ;;  %v8482_v55 = vadd.f32 %v8452_v39, %v8381_v40  ;;  %v8424_v49 = vpop.f32.mrb[75].mxu0  ;;  %v8491_v1 = vmax.f32 %v8475_v4, 0.0  ;;  %v8490_v17 = vmax.f32 %v8474_v26, 0.0 }
 0x955   :  { %v8497_v53 = vmax.f32 %v8481_v57, 0.0  ;;  %v8484_v47 = vadd.f32 %v8460_v10, %v8424_v49  ;;  %v8492_v54 = vmax.f32 %v8476_v34, 0.0 }
 0x956   :  { %v8499_v46 = vmax.f32 %v8483_v50, 0.0  ;;  %v8498_v35 = vmax.f32 %v8482_v55, 0.0 }
 0x957   :  { %v8505_v20 = vpack.c.bf16 %v8497_v53, %v8489_v42  ;;  %v8500_v5 = vmax.f32 %v8484_v47, 0.0 }
 0x958   :  { %v8507_v27 = vpack.c.bf16 %v8499_v46, %v8491_v1  ;;  %v8506_v43 = vpack.c.bf16 %v8498_v35, %v8490_v17 }
 0x959   :  { %v8508_v18 = vpack.c.bf16 %v8500_v5, %v8492_v54 }
 0x95a   :  { %9142 = vmatprep.mubr.bf16.mxu1 %v8506_v43 }
 0x95b   :  { %9183 = vmatprep.mubr.bf16.mxu0 %v8508_v18  ;;  %9143 = vmatmul.mubr.bf16.vlgmr.msra.gmra.mrb[92].mxu1 %v8505_v20 }
 0x95c   :  { %9184 = vmatmul.mubr.bf16.vlgmr.msra.gmra.mrb[80].mxu0 %v8507_v27 }
 0x9ee   :  { %v9906_v7 = vpop.f32.mrb[88].mxu1 }
 0x9ef   :  { %v9928_v11 = vpop.f32.mrb[76].mxu0  ;;  %v9907_v36 = vpop.f32.mrb[89].mxu1 }
 0x9f0   :  { %v9908_v41 = vadd.f32 %v9907_v36, %v9906_v7  ;;  %v9929_v59 = vpop.f32.mrb[77].mxu0  ;;  %v9909_v56 = vpop.f32.mrb[90].mxu1 }
 0x9f1   :  { %v9930_v22 = vadd.f32 %v9929_v59, %v9928_v11  ;;  %v9931_v24 = vpop.f32.mrb[78].mxu0  ;;  %v9910_v16 = vpop.f32.mrb[91].mxu1 }
 0x9f2   :  { %v9063_v58 = vadd.f32 %v9908_v41, %v9681_v12  ;;  %v9911_v31 = vadd.f32 %v9910_v16, %v9909_v56  ;;  %v9932_v62 = vpop.f32.mrb[79].mxu0 }
 0x9f3   :  { %v9933_v28 = vadd.f32 %v9932_v62, %v9931_v24 }
 0x9f4   :  { %v9104_v9 = vadd.f32 %v9930_v22, %v9063_v58  ;;  %v9066_v52 = vadd.f32 %v9911_v31, %v9681_v12 }
 0x9f6   :  { %v9107_v63 = vadd.f32 %v9933_v28, %v9066_v52 }
 0xa2e   :  { %v9950_v37 = vpop.f32.mrb[92].mxu1 }
 0xa2f   :  { %v9972_v2 = vpop.f32.mrb[80].mxu0  ;;  %v9951_v61 = vpop.f32.mrb[93].mxu1 }
 0xa30   :  { %v9952_v48 = vadd.f32 %v9951_v61, %v9950_v37  ;;  %v9973_v51 = vpop.f32.mrb[81].mxu0  ;;  %v9953_v14 = vpop.f32.mrb[94].mxu1 }
 0xa31   :  { %v9974_v19 = vadd.f32 %v9973_v51, %v9972_v2  ;;  %v9975_v25 = vpop.f32.mrb[82].mxu0  ;;  %v9954_v33 = vpop.f32.mrb[95].mxu1 }
 0xa32   :  { %v9145_v0 = vadd.f32 %v9952_v48, %v9104_v9  ;;  %v9955_v6 = vadd.f32 %v9954_v33, %v9953_v14  ;;  %v9976_v30 = vpop.f32.mrb[83].mxu0 }
 0xa33   :  { %v9977_v29 = vadd.f32 %v9976_v30, %v9975_v25 }
 0xa34   :  { %v9186_v38 = vadd.f32 %v9974_v19, %v9145_v0  ;;  %v9148_v45 = vadd.f32 %v9955_v6, %v9107_v63 }
 0xa36   :  { %v9189_v39 = vadd.f32 %v9977_v29, %v9148_v45  ;;  %v9195_v10 = vsel %vm9194_vm9, %v9186_v38, -1e+30 }
 0xa37   :  { %9197 = vmax.xlane.f32.xlu1 %v9195_v10 }
 0xa38   :  { %v9196_v44 = vsel %vm9194_vm9, %v9189_v39, -1e+30 }
 0xa39   :  { %9199 = vmax.xlane.f32.xlu0 %v9196_v44 }
 0xac4   :  { %v9198_v15 = vpop.xlane.xlu1 %9197 }
 0xac5   :  { %v9201_v60 = vsub.f32 %v9195_v10, %v9198_v15 }
 0xac6   :  { %v9200_v8 = vpop.xlane.xlu0 %9199 }
 0xac7   :  { %v9203_v4 = vmul.f32 1.442695, %v9201_v60  ;;  %v9202_v26 = vsub.f32 %v9196_v44, %v9200_v8 }
 0xac9   :  { %10385 = vpow2.f32 %v9203_v4  ;;  %v9205_v13 = vmul.f32 1.442695, %v9202_v26 }
 0xacb   :  { %10387 = vpow2.f32 %v9205_v13 }
 0xad3   :  { %v10386_v32 = vpop.eup %10385 }
 0xad4   :  { %9207 = vadd.xlane.f32.xlu0 %v10386_v32 }
 0xad5   :  { %v10388_v34 = vpop.eup %10387 }
 0xad6   :  { %9209 = vadd.xlane.f32.xlu1 %v10388_v34 }
 0xb61   :  { %v9208_v57 = vpop.xlane.xlu0 %9207 }
 0xb62   :  { %10389 = vrcp.f32 %v9208_v57 }
 0xb63   :  { %v9210_v21 = vpop.xlane.xlu1 %9209 }
 0xb64   :  { %10391 = vrcp.f32 %v9210_v21 }
 0xb6c   :  { %v10390_v40 = vpop.eup %10389 }
 0xb6d   :  { %v9212_v50 = vmul.f32 %v10390_v40, %v10386_v32 }
 0xb6e   :  { %v10392_v55 = vpop.eup %10391 }
 0xb6f   :  { %9215 = vst [vmem:[%s15279_s18] sm:$0xff] %v9212_v50  ;;  %v9214_v49 = vmul.f32 %v10392_v55, %v10388_v34 }
 0xb71   :  { %9216 = vst [vmem:[%s15279_s18 + $0x8] sm:$0xff] %v9214_v49 }

</bundles_post_ra>
